<compile_context>
chip_gen: v6e
topology: v6e:2x2x1
jax: 0.10.0
libtpu: 0.0.40
codegen_flags: <defaults>
</compile_context>

<pallas_src>
import jax
import jax.numpy as jnp
from jax.experimental import pallas as pl
from jax.experimental.pallas import tpu as pltpu

N_EMBED = 512
HIDDEN = 4 * N_EMBED          # 2048
CHUNK = 512                   # hidden-dim chunk (multiple of 128 lanes / MXU width)
N_CHUNKS = HIDDEN // CHUNK    # 4


def _ffwd_kernel(x_ref, w1_ref, b1_ref, w2_ref, b2_ref, o_ref):
    # x_ref: (tm, C) f32, w1_ref: (C, 4C) bf16, b1_ref: (1, 4C) f32,
    # w2_ref: (4C, C) bf16, b2_ref: (1, C) f32, o_ref: (tm, C).
    x = x_ref[...].astype(jnp.bfloat16)   # in-kernel cast: cheap VPU work, MXU-bound kernel

    acc = None
    for c in range(N_CHUNKS):             # static, unrolled: 4 chunks of 512
        lo = c * CHUNK
        hi = lo + CHUNK
        # matmul 1 chunk: (tm, C) x (C, CHUNK) -> f32
        h = jnp.dot(x, w1_ref[:, lo:hi], preferred_element_type=jnp.float32)
        h = jnp.maximum(h + b1_ref[:, lo:hi], 0.0)       # bias + ReLU in f32 (VPU)
        # matmul 2 chunk: (tm, CHUNK) x (CHUNK, C) -> f32, accumulated into the
        # same (tm, C) f32 tile so v7x's MRB can accumulate in place.
        y = jnp.dot(h.astype(jnp.bfloat16), w2_ref[lo:hi, :],
                    preferred_element_type=jnp.float32)
        acc = y if acc is None else acc + y

    acc = jnp.maximum(acc + b2_ref[...], 0.0)            # second bias + ReLU in f32
    # Dropout (p=0.2) in eval mode == identity.
    o_ref[...] = acc.astype(o_ref.dtype)


def _pick_tm(m):
    """Row-tile size: divide M exactly when possible (avoid jnp.pad), feed the
    MXU with big tiles, and give v7x's two TensorCores >=2 steps each at large M."""
    if m <= 512:
        # Small-batch / decode regime: one (or few) grid steps, no megacore split.
        for cand in (512, 256, 128, 64, 32, 16, 8):
            if cand <= m and m % cand == 0:
                return cand
        return max(8, min(512, pl.next_power_of_2(m)))   # ragged tiny M -> pad
    # Large M: require >=4 grid steps so each v7x TC gets >=2 pipelined iters.
    # (On single-TC v6e with 128 MiB VMEM, tm=512 already amortizes the ~0.35us
    #  per-step overhead to <1% with hidden chunking in place.)
    for cand in (512, 256, 128):
        if m % cand == 0 and m >= 4 * cand:
            return cand
    return 256  # ragged large M: pad up to a multiple of 256


def _vmem_limit_bytes():
    # Stay well under the smallest physical VMEM (v7x: 64 MiB / TensorCore).
    # Actual need with chunking + bf16 single-buffered weights is ~10-15 MiB.
    cap = 64 << 20
    try:
        cap = int(getattr(pltpu.get_tpu_info(), "vmem_capacity_bytes", cap))
    except Exception:
        pass
    return int(min(48 << 20, (cap * 3) // 4))


def fforward(x, w1, b1, w2, b2, *, tm=None, out_dtype=jnp.float32):
    """x: (B, T, C) float32.  w1/w2 ideally pre-cast to bf16.  Returns (B, T, C)."""
    B, T, C = x.shape
    assert C == N_EMBED
    M = B * T
    if tm is None:
        tm = _pick_tm(M)

    # Keep x in f32; the kernel casts to bf16 (saves one HLO pass over x).
    x2 = x.reshape(M, C)
    m_pad = pl.cdiv(M, tm) * tm
    if m_pad != M:                       # rare: tm is normally chosen to divide M
        x2 = jnp.pad(x2, ((0, m_pad - M), (0, 0)))

    # Params should already be stored in bf16 (see _init_params); cast only if not.
    w1_bf = w1 if w1.dtype == jnp.bfloat16 else w1.astype(jnp.bfloat16)
    w2_bf = w2 if w2.dtype == jnp.bfloat16 else w2.astype(jnp.bfloat16)
    b1_2d = b1.reshape(1, HIDDEN).astype(jnp.float32)
    b2_2d = b2.reshape(1, C).astype(jnp.float32)

    grid_m = m_pad // tm
    # Few grid steps => don't megacore-shard (v7x would duplicate the 4 MiB
    # weight fetch per TC over shared HBM in the DMA-bound small-M regime).
    row_sem = "parallel" if grid_m >= 4 else "arbitrary"

    cost = pl.CostEstimate(
        flops=4 * m_pad * C * HIDDEN,                      # two M x C x 4C matmuls
        transcendentals=0,
        bytes_accessed=(m_pad * C * (4 + jnp.dtype(out_dtype).itemsize)  # x + out
                        + 2 * C * HIDDEN * 2                             # W1 + W2 (bf16)
                        + (HIDDEN + C) * 4),                             # biases (f32)
    )

    resident = dict(pipeline_mode=pl.Buffered(1))  # loaded once, constant index_map
    out = pl.pallas_call(
        _ffwd_kernel,
        out_shape=jax.ShapeDtypeStruct((m_pad, C), out_dtype),
        grid_spec=pltpu.PrefetchScalarGridSpec(
            num_scalar_prefetch=0,
            grid=(grid_m,),
            in_specs=[
                pl.BlockSpec((tm, C), lambda i: (i, 0)),                  # x rows (f32)
                pl.BlockSpec((C, HIDDEN), lambda i: (0, 0), **resident),  # W1 (bf16)
                pl.BlockSpec((1, HIDDEN), lambda i: (0, 0), **resident),  # b1
                pl.BlockSpec((HIDDEN, C), lambda i: (0, 0), **resident),  # W2 (bf16)
                pl.BlockSpec((1, C), lambda i: (0, 0), **resident),       # b2
            ],
            out_specs=pl.BlockSpec((tm, C), lambda i: (i, 0)),
        ),
        compiler_params=pltpu.CompilerParams(
            dimension_semantics=(row_sem,),
            vmem_limit_bytes=_vmem_limit_bytes(),
        ),
        cost_estimate=cost,
    )(x2, w1_bf, b1_2d, w2_bf, b2_2d)

    if m_pad != M:
        out = out[:M]
    return out.reshape(B, T, C)


def _init_params(key):
    # Deterministic synthetic init (shapes match nn.Linear(512,2048)/(2048,512)).
    # Weights are stored in bf16 (pre-cast once), biases stay f32.
    k1, k2, k3, k4 = jax.random.split(key, 4)
    s1 = 1.0 / jnp.sqrt(N_EMBED)
    s2 = 1.0 / jnp.sqrt(HIDDEN)
    w1 = jax.random.uniform(k1, (N_EMBED, HIDDEN), jnp.float32, -s1, s1)
    b1 = jax.random.uniform(k2, (HIDDEN,), jnp.float32, -s1, s1)
    w2 = jax.random.uniform(k3, (HIDDEN, N_EMBED), jnp.float32, -s2, s2)
    b2 = jax.random.uniform(k4, (N_EMBED,), jnp.float32, -s2, s2)
    return w1.astype(jnp.bfloat16), b1, w2.astype(jnp.bfloat16), b2


def _reference_bf16(x, w1, b1, w2, b2):
    # Same precision path as the kernel: bf16 MXU operands, f32 accumulate,
    # f32 bias/ReLU, identity dropout (eval mode).
    h = jnp.dot(x.astype(jnp.bfloat16), w1.astype(jnp.bfloat16),
                preferred_element_type=jnp.float32) + b1
    h = jnp.maximum(h, 0.0)
    y = jnp.dot(h.astype(jnp.bfloat16), w2.astype(jnp.bfloat16),
                preferred_element_type=jnp.float32) + b2
    return jnp.maximum(y, 0.0)


def _reference_f32(x, w1, b1, w2, b2):
    h = jnp.maximum(x @ w1.astype(jnp.float32) + b1, 0.0)
    return jnp.maximum(h @ w2.astype(jnp.float32) + b2, 0.0)  # dropout identity (eval)


if __name__ == "__main__":
    key = jax.random.PRNGKey(0)
    kx, kp = jax.random.split(key)

    B, T = 2, 64  # M = 128 rows (small-M regime: single grid step, "arbitrary")
    x = jax.random.normal(kx, (B, T, N_EMBED), jnp.float32)
    w1, b1, w2, b2 = _init_params(kp)

    # Default tiling (single grid step).
    out = jax.block_until_ready(fforward(x, w1, b1, w2, b2))
    assert out.shape == (B, T, N_EMBED)
    # Multi-step tiling (4 grid steps -> exercises pipelining + weight residency).
    out_multi = jax.block_until_ready(fforward(x, w1, b1, w2, b2, tm=32))

    # Tight check against a reference following the kernel's bf16/f32 path.
    ref = _reference_bf16(x, w1, b1, w2, b2)
    assert jnp.allclose(out, ref, atol=2e-3, rtol=2e-3), \
        float(jnp.max(jnp.abs(out - ref)))
    assert jnp.allclose(out_multi, ref, atol=2e-3, rtol=2e-3), \
        float(jnp.max(jnp.abs(out_multi - ref)))
    # Loose sanity check against the original full-f32 module semantics.
    ref32 = _reference_f32(x, w1, b1, w2, b2)
    assert jnp.allclose(out, ref32, atol=5e-2, rtol=5e-2), \
        float(jnp.max(jnp.abs(out - ref32)))

    print("KERNEL_OK")
</pallas_src>

<mosaic_0001>
module attributes {stable_mosaic.version = 11 : i64} {
  func.func @_ffwd_kernel(%arg0: i32, %arg1: memref<128x512xf32, #tpu.memory_space<vmem>>, %arg2: memref<512x2048xbf16, #tpu.memory_space<vmem>>, %arg3: memref<1x2048xf32, #tpu.memory_space<vmem>>, %arg4: memref<2048x512xbf16, #tpu.memory_space<vmem>>, %arg5: memref<1x512xf32, #tpu.memory_space<vmem>>, %arg6: memref<128x512xf32, #tpu.memory_space<vmem>>) attributes {dimension_semantics = [#tpu.dimension_semantics<arbitrary>], iteration_bounds = array<i64: 1>, scalar_prefetch = 0 : i64, scratch_operands = 0 : i64, tpu.core_type = #tpu.core_type<tc>, window_params = [{transform_indices = @transform_0, window_bounds = array<i64: 128, 512>}, {pipeline_mode = #tpu.pipeline_mode<synchronous>, transform_indices = @transform_1, window_bounds = array<i64: 512, 2048>}, {pipeline_mode = #tpu.pipeline_mode<synchronous>, transform_indices = @transform_2, window_bounds = array<i64: 1, 2048>}, {pipeline_mode = #tpu.pipeline_mode<synchronous>, transform_indices = @transform_3, window_bounds = array<i64: 2048, 512>}, {pipeline_mode = #tpu.pipeline_mode<synchronous>, transform_indices = @transform_4, window_bounds = array<i64: 1, 512>}, {transform_indices = @transform_5, window_bounds = array<i64: 128, 512>}]} {
    %c0 = arith.constant 0 : index
    %c0_0 = arith.constant 0 : index
    %0 = vector.load %arg1[%c0, %c0_0] : memref<128x512xf32, #tpu.memory_space<vmem>>, vector<128x512xf32>
    %1 = arith.truncf %0 : vector<128x512xf32> to vector<128x512xbf16>
    %c0_1 = arith.constant 0 : index
    %c0_2 = arith.constant 0 : index
    %2 = vector.load %arg2[%c0_1, %c0_2] : memref<512x2048xbf16, #tpu.memory_space<vmem>>, vector<512x512xbf16>
    %cst = arith.constant dense<0.000000e+00> : vector<128x512xf32>
    %3 = tpu.matmul %1, %2, %cst {dimension_numbers = #tpu.dot_dimension_numbers<[1], [0], [0], [1], [0, 0, 1, 1], [], []>} : vector<128x512xbf16>, vector<512x512xbf16>, vector<128x512xf32> -> vector<128x512xf32>
    %c0_3 = arith.constant 0 : index
    %c0_4 = arith.constant 0 : index
    %4 = vector.load %arg3[%c0_3, %c0_4] : memref<1x2048xf32, #tpu.memory_space<vmem>>, vector<1x512xf32>
    %5 = vector.broadcast %4 : vector<1x512xf32> to vector<128x512xf32>
    %6 = arith.addf %3, %5 : vector<128x512xf32>
    %cst_5 = arith.constant 0.000000e+00 : f32
    %7 = vector.broadcast %cst_5 : f32 to vector<128x512xf32>
    %8 = arith.maximumf %6, %7 : vector<128x512xf32>
    %9 = arith.truncf %8 : vector<128x512xf32> to vector<128x512xbf16>
    %c0_6 = arith.constant 0 : index
    %c0_7 = arith.constant 0 : index
    %10 = vector.load %arg4[%c0_6, %c0_7] : memref<2048x512xbf16, #tpu.memory_space<vmem>>, vector<512x512xbf16>
    %cst_8 = arith.constant dense<0.000000e+00> : vector<128x512xf32>
    %11 = tpu.matmul %9, %10, %cst_8 {dimension_numbers = #tpu.dot_dimension_numbers<[1], [0], [0], [1], [0, 0, 1, 1], [], []>} : vector<128x512xbf16>, vector<512x512xbf16>, vector<128x512xf32> -> vector<128x512xf32>
    %c0_9 = arith.constant 0 : index
    %c512 = arith.constant 512 : index
    %12 = vector.load %arg2[%c0_9, %c512] : memref<512x2048xbf16, #tpu.memory_space<vmem>>, vector<512x512xbf16>
    %cst_10 = arith.constant dense<0.000000e+00> : vector<128x512xf32>
    %13 = tpu.matmul %1, %12, %cst_10 {dimension_numbers = #tpu.dot_dimension_numbers<[1], [0], [0], [1], [0, 0, 1, 1], [], []>} : vector<128x512xbf16>, vector<512x512xbf16>, vector<128x512xf32> -> vector<128x512xf32>
    %c0_11 = arith.constant 0 : index
    %c512_12 = arith.constant 512 : index
    %14 = vector.load %arg3[%c0_11, %c512_12] : memref<1x2048xf32, #tpu.memory_space<vmem>>, vector<1x512xf32>
    %15 = vector.broadcast %14 : vector<1x512xf32> to vector<128x512xf32>
    %16 = arith.addf %13, %15 : vector<128x512xf32>
    %cst_13 = arith.constant 0.000000e+00 : f32
    %17 = vector.broadcast %cst_13 : f32 to vector<128x512xf32>
    %18 = arith.maximumf %16, %17 : vector<128x512xf32>
    %19 = arith.truncf %18 : vector<128x512xf32> to vector<128x512xbf16>
    %c512_14 = arith.constant 512 : index
    %c0_15 = arith.constant 0 : index
    %20 = vector.load %arg4[%c512_14, %c0_15] : memref<2048x512xbf16, #tpu.memory_space<vmem>>, vector<512x512xbf16>
    %cst_16 = arith.constant dense<0.000000e+00> : vector<128x512xf32>
    %21 = tpu.matmul %19, %20, %cst_16 {dimension_numbers = #tpu.dot_dimension_numbers<[1], [0], [0], [1], [0, 0, 1, 1], [], []>} : vector<128x512xbf16>, vector<512x512xbf16>, vector<128x512xf32> -> vector<128x512xf32>
    %22 = arith.addf %11, %21 : vector<128x512xf32>
    %c0_17 = arith.constant 0 : index
    %c1024 = arith.constant 1024 : index
    %23 = vector.load %arg2[%c0_17, %c1024] : memref<512x2048xbf16, #tpu.memory_space<vmem>>, vector<512x512xbf16>
    %cst_18 = arith.constant dense<0.000000e+00> : vector<128x512xf32>
    %24 = tpu.matmul %1, %23, %cst_18 {dimension_numbers = #tpu.dot_dimension_numbers<[1], [0], [0], [1], [0, 0, 1, 1], [], []>} : vector<128x512xbf16>, vector<512x512xbf16>, vector<128x512xf32> -> vector<128x512xf32>
    %c0_19 = arith.constant 0 : index
    %c1024_20 = arith.constant 1024 : index
    %25 = vector.load %arg3[%c0_19, %c1024_20] : memref<1x2048xf32, #tpu.memory_space<vmem>>, vector<1x512xf32>
    %26 = vector.broadcast %25 : vector<1x512xf32> to vector<128x512xf32>
    %27 = arith.addf %24, %26 : vector<128x512xf32>
    %cst_21 = arith.constant 0.000000e+00 : f32
    %28 = vector.broadcast %cst_21 : f32 to vector<128x512xf32>
    %29 = arith.maximumf %27, %28 : vector<128x512xf32>
    %30 = arith.truncf %29 : vector<128x512xf32> to vector<128x512xbf16>
    %c1024_22 = arith.constant 1024 : index
    %c0_23 = arith.constant 0 : index
    %31 = vector.load %arg4[%c1024_22, %c0_23] : memref<2048x512xbf16, #tpu.memory_space<vmem>>, vector<512x512xbf16>
    %cst_24 = arith.constant dense<0.000000e+00> : vector<128x512xf32>
    %32 = tpu.matmul %30, %31, %cst_24 {dimension_numbers = #tpu.dot_dimension_numbers<[1], [0], [0], [1], [0, 0, 1, 1], [], []>} : vector<128x512xbf16>, vector<512x512xbf16>, vector<128x512xf32> -> vector<128x512xf32>
    %33 = arith.addf %22, %32 : vector<128x512xf32>
    %c0_25 = arith.constant 0 : index
    %c1536 = arith.constant 1536 : index
    %34 = vector.load %arg2[%c0_25, %c1536] : memref<512x2048xbf16, #tpu.memory_space<vmem>>, vector<512x512xbf16>
    %cst_26 = arith.constant dense<0.000000e+00> : vector<128x512xf32>
    %35 = tpu.matmul %1, %34, %cst_26 {dimension_numbers = #tpu.dot_dimension_numbers<[1], [0], [0], [1], [0, 0, 1, 1], [], []>} : vector<128x512xbf16>, vector<512x512xbf16>, vector<128x512xf32> -> vector<128x512xf32>
    %c0_27 = arith.constant 0 : index
    %c1536_28 = arith.constant 1536 : index
    %36 = vector.load %arg3[%c0_27, %c1536_28] : memref<1x2048xf32, #tpu.memory_space<vmem>>, vector<1x512xf32>
    %37 = vector.broadcast %36 : vector<1x512xf32> to vector<128x512xf32>
    %38 = arith.addf %35, %37 : vector<128x512xf32>
    %cst_29 = arith.constant 0.000000e+00 : f32
    %39 = vector.broadcast %cst_29 : f32 to vector<128x512xf32>
    %40 = arith.maximumf %38, %39 : vector<128x512xf32>
    %41 = arith.truncf %40 : vector<128x512xf32> to vector<128x512xbf16>
    %c1536_30 = arith.constant 1536 : index
    %c0_31 = arith.constant 0 : index
    %42 = vector.load %arg4[%c1536_30, %c0_31] : memref<2048x512xbf16, #tpu.memory_space<vmem>>, vector<512x512xbf16>
    %cst_32 = arith.constant dense<0.000000e+00> : vector<128x512xf32>
    %43 = tpu.matmul %41, %42, %cst_32 {dimension_numbers = #tpu.dot_dimension_numbers<[1], [0], [0], [1], [0, 0, 1, 1], [], []>} : vector<128x512xbf16>, vector<512x512xbf16>, vector<128x512xf32> -> vector<128x512xf32>
    %44 = arith.addf %33, %43 : vector<128x512xf32>
    %c0_33 = arith.constant 0 : index
    %c0_34 = arith.constant 0 : index
    %45 = vector.load %arg5[%c0_33, %c0_34] : memref<1x512xf32, #tpu.memory_space<vmem>>, vector<1x512xf32>
    %46 = vector.broadcast %45 : vector<1x512xf32> to vector<128x512xf32>
    %47 = arith.addf %44, %46 : vector<128x512xf32>
    %cst_35 = arith.constant 0.000000e+00 : f32
    %48 = vector.broadcast %cst_35 : f32 to vector<128x512xf32>
    %49 = arith.maximumf %47, %48 : vector<128x512xf32>
    %c0_36 = arith.constant 0 : index
    %c0_37 = arith.constant 0 : index
    %50 = vector.load %arg6[%c0_36, %c0_37] : memref<128x512xf32, #tpu.memory_space<vmem>>, vector<128x512xf32>
    tpu.vector_store %arg6[%c0_36, %c0_37], %49 {strides = array<i32>} : memref<128x512xf32, #tpu.memory_space<vmem>>, vector<128x512xf32>,
    return
  }
  func.func @transform_0(%arg0: i32) -> (i32, i32) {
    %c0_i32 = arith.constant 0 : i32
    %c0_i32_0 = arith.constant 0 : i32
    return %arg0, %c0_i32 : i32, i32
  }
  func.func @transform_1(%arg0: i32) -> (i32, i32) {
    %c0_i32 = arith.constant 0 : i32
    %c0_i32_0 = arith.constant 0 : i32
    %c0_i32_1 = arith.constant 0 : i32
    return %c0_i32, %c0_i32_0 : i32, i32
  }
  func.func @transform_2(%arg0: i32) -> (i32, i32) {
    %c0_i32 = arith.constant 0 : i32
    %c0_i32_0 = arith.constant 0 : i32
    %c0_i32_1 = arith.constant 0 : i32
    return %c0_i32, %c0_i32_0 : i32, i32
  }
  func.func @transform_3(%arg0: i32) -> (i32, i32) {
    %c0_i32 = arith.constant 0 : i32
    %c0_i32_0 = arith.constant 0 : i32
    %c0_i32_1 = arith.constant 0 : i32
    return %c0_i32, %c0_i32_0 : i32, i32
  }
  func.func @transform_4(%arg0: i32) -> (i32, i32) {
    %c0_i32 = arith.constant 0 : i32
    %c0_i32_0 = arith.constant 0 : i32
    %c0_i32_1 = arith.constant 0 : i32
    return %c0_i32, %c0_i32_0 : i32, i32
  }
  func.func @transform_5(%arg0: i32) -> (i32, i32) {
    %c0_i32 = arith.constant 0 : i32
    %c0_i32_0 = arith.constant 0 : i32
    return %arg0, %c0_i32 : i32, i32
  }
}

</mosaic_0001>

<bundles_post_ra>
// kernel: tpu_custom_call.1
= control target key start
LH: loop header
LB: loop body
LE: loop exit
PB: predicated region body
PF: predicated region fallthrough
CT: control target
= control target key end

     0   :  { %10 = vsyncpa [#allocation3], 0  ;;  %s15776_s0 = inlined_call_operand.hbm [shape: f32[128,512], index: 0, kind: input, shape index: {}]   ;;  %s15777_s1 = inlined_call_operand.hbm [shape: bf16[512,2048], index: 1, kind: input, shape index: {}]   ;;  %s15778_s2 = inlined_call_operand.hbm [shape: f32[1,2048], index: 2, kind: input, shape index: {}]   ;;  %s15779_s3 = inlined_call_operand.hbm [shape: bf16[2048,512], index: 3, kind: input, shape index: {}]   ;;  %s15780_s4 = inlined_call_operand.hbm [shape: f32[1,512], index: 4, kind: input, shape index: {}]   ;;  %s15781_s5 = inlined_call_operand.hbm [shape: f32[128,512], index: 5, kind: output, shape index: {}]  }
   0x1   :  { %11 = vsyncpa [#allocation6], 0 }
   0x2   :  { %12 = vsyncpa [#allocation9], 0 }
   0x3   :  { %13 = vsyncpa [#allocation4], 0  ;;  %s12706_s18 = smov [#allocation5]  }
   0x4   :  { %s31_s19 = sshll.u32 %s12706_s18, 4  ;;  %s32_s19 = int_to_ptr.vmem [resolvable:$true] %s31_s19 }
   0x5   :  { %s12586_s20 = scalar_lea.vmem %s32_s19, 65536  ;;  %p12591_p1 = scmp.lt.s32.totalorder %s32_s19, %s32_s19 }
   0x6   :  { %p12587_p0 = scmp.ne.s32.totalorder %s32_s19, %s12586_s20  ;;  %p12592_p2 = scmp.lt.s32.totalorder %s12586_s20, %s12586_s20 }
   0x8   :  { %p12593_p3 = por %p12592_p2, %p12591_p1 }
   0xa   :  { %p12594_p4 = pnand %p12593_p3, %p12587_p0 }
   0xc   :  { %12597 = shalt.err (!%p12594_p4)
}
   0xd   :  { %s12707_s21 = smov 1024   ;;  %s12708_s22 = smov 64  }
   0xe   :  { %37 = dma.hbm_to_vmem [thread:$0]  %s15777_s1, 65536, %s32_s19, [#allocation6], %s12707_s21, %s12707_s21, %s12708_s22  }
   0xf   :  { %s12709_s25 = smov [#allocation8]  }
  0x10   :  { %s53_s26 = sshll.u32 %s12709_s25, 4  ;;  %s54_s26 = int_to_ptr.vmem [resolvable:$true] %s53_s26 }
  0x11   :  { %s12606_s27 = scalar_lea.vmem %s54_s26, 65536  ;;  %p12611_p6 = scmp.lt.s32.totalorder %s54_s26, %s54_s26 }
  0x12   :  { %p12607_p5 = scmp.ne.s32.totalorder %s54_s26, %s12606_s27  ;;  %p12612_p7 = scmp.lt.s32.totalorder %s12606_s27, %s12606_s27 }
  0x14   :  { %p12613_p8 = por %p12612_p7, %p12611_p6 }
  0x16   :  { %p12614_p9 = pnand %p12613_p8, %p12607_p5 }
  0x18   :  { %12617 = shalt.err (!%p12614_p9)
}
  0x19   :  { %s12710_s28 = smov 256   ;;  %s12711_s29 = smov 16  }
  0x1a   :  { %59 = dma.hbm_to_vmem [thread:$0]  %s15779_s3, 65536, %s54_s26, [#allocation9], %s12710_s28, %s12710_s28, %s12711_s29  }
  0x1b   :  { %s12712_s7 = smov [#allocation2]  }
  0x1c   :  { %s19_s8 = sshll.u32 %s12712_s7, 4  ;;  %s20_s8 = int_to_ptr.vmem [resolvable:$true] %s19_s8 }
  0x1d   :  { %s12626_s1 = scalar_lea.vmem %s20_s8, 8192  ;;  %p12631_p11 = scmp.lt.s32.totalorder %s20_s8, %s20_s8 }
  0x1e   :  { %p12627_p10 = scmp.ne.s32.totalorder %s20_s8, %s12626_s1  ;;  %p12632_p12 = scmp.lt.s32.totalorder %s12626_s1, %s12626_s1 }
  0x20   :  { %p12633_p13 = por %p12632_p12, %p12631_p11 }
  0x22   :  { %p12634_p0 = pnand %p12633_p13, %p12627_p10 }
  0x24   :  { %12637 = shalt.err (!%p12634_p0)
}
  0x25   :  { %s12713_s9 = smov 512   ;;  %s12714_s10 = smov 32  }
  0x26   :  { %25 = dma.hbm_to_vmem [thread:$0]  %s15776_s0, 8192, %s20_s8, [#allocation3], %s12713_s9, %s12713_s9, %s12714_s10  }
  0x27   :  { %s12715_s3 = smov [#allocation7]   ;;  %s12716_s14 = smov [#allocation10]  }
  0x28   :  { %s44_s13 = sshll.u32 %s12715_s3, 4  ;;  %s66_s15 = sshll.u32 %s12716_s14, 4  ;;  %s45_s13 = int_to_ptr.vmem [resolvable:$true] %s44_s13  ;;  %s67_s15 = int_to_ptr.vmem [resolvable:$true] %s66_s15 }
  0x29   :  { %s12646_s16 = scalar_lea.vmem %s45_s13, 256  ;;  %p12651_p2 = scmp.lt.s32.totalorder %s45_s13, %s45_s13 }
  0x2a   :  { %p12647_p1 = scmp.ne.s32.totalorder %s45_s13, %s12646_s16  ;;  %p12652_p3 = scmp.lt.s32.totalorder %s12646_s16, %s12646_s16 }
  0x2c   :  { %p12653_p4 = por %p12652_p3, %p12651_p2 }
  0x2e   :  { %p12654_p5 = pnand %p12653_p4, %p12647_p1 }
  0x30   :  { %12657 = shalt.err (!%p12654_p5)
}
  0x31   :  { %47 = dma.hbm_to_vmem [thread:$0]  %s15778_s2, 256, %s45_s13, [#allocation6]  }
  0x32   :  { %s12666_s19 = scalar_lea.vmem %s67_s15, 64  ;;  %p12671_p7 = scmp.lt.s32.totalorder %s67_s15, %s67_s15 }
  0x33   :  { %p12667_p6 = scmp.ne.s32.totalorder %s67_s15, %s12666_s19  ;;  %p12672_p8 = scmp.lt.s32.totalorder %s12666_s19, %s12666_s19 }
  0x35   :  { %p12673_p9 = por %p12672_p8, %p12671_p7 }
  0x37   :  { %p12674_p10 = pnand %p12673_p9, %p12667_p6 }
  0x39   :  { %12677 = shalt.err (!%p12674_p10)
}
  0x3a   :  { %69 = dma.hbm_to_vmem [thread:$0]  %s15780_s4, 64, %s67_s15, [#allocation9]  }
  0x3b   :  { %12698 = dma.done.wait [#allocation3], 8192  }
  0x3c   :  { %12699 = vsyncadd [#allocation3], 4294959104 }
  0x3d   :  { %12700 = dma.done.wait [#allocation6], 65792  }
  0x3e   :  { %12701 = vsyncadd [#allocation6], 4294901504 }
  0x3f   :  { %12702 = dma.done.wait [#allocation9], 65600  }
  0x40   :  { %12703 = vsyncadd [#allocation9], 4294901696  ;;  %v209_v0 = vld [vmem:[#allocation5 + $0x380] sm:$0xff]  ;;  %v86_v54 = vld [vmem:[#allocation2 + $0x8] sm:$0xff]  ;;  %s12717_s2 = smov [#allocation11]  }
  0x41   :  { %v211_v1 = vld [vmem:[#allocation5 + $0x3c0] sm:$0xff]  ;;  %v90_v55 = vld [vmem:[#allocation2 + $0x28] sm:$0xff]  ;;  %v88_v59 = vld [vmem:[#allocation2 + $0x18] sm:$0xff]  ;;  %s10760_s4 = sshll.u32 %s12717_s2, 4  ;;  %s10761_s4 = int_to_ptr.vmem [resolvable:$true] %s10760_s4 }
  0x42   :  { %v273_v2 = vld [vmem:[#allocation5 + $0xb80] sm:$0xff]  ;;  %v10803_v3 = vcombine.high %v209_v0, %v211_v1  ;;  %v10802_v5 = vcombine.low %v209_v0, %v211_v1  ;;  %v12766_v58 = vpack.c.bf16 %v90_v55, %v86_v54  ;;  %v92_v60 = vld [vmem:[#allocation2 + $0x38] sm:$0xff]  ;;  %s12678_s21 = scalar_lea.vmem %s10761_s4, 8192  ;;  %p12683_p12 = scmp.lt.s32.totalorder %s10761_s4, %s10761_s4 }
  0x43   :  { %v275_v4 = vld [vmem:[#allocation5 + $0xbc0] sm:$0xff]  ;;  %v12768_v63 = vpack.c.bf16 %v92_v60, %v88_v59  ;;  %p12679_p11 = scmp.ne.s32.totalorder %s10761_s4, %s12678_s21  ;;  %p12684_p13 = scmp.lt.s32.totalorder %s12678_s21, %s12678_s21 }
  0x44   :  { %v205_v6 = vld [vmem:[#allocation5 + $0x300] sm:$0xff]  ;;  %v10867_v8 = vcombine.high %v273_v2, %v275_v4  ;;  %v10866_v9 = vcombine.low %v273_v2, %v275_v4  ;;  %971 = vmatprep.subr.bf16.mxu0 %v10803_v3  ;;  %15881 = vst [vmem:[#allocation16_spill] sm:$0xff] %v12766_v58  ;;  %1003 = vmatprep.mubr.bf16.mxu0 %v12766_v58 }
  0x45   :  { %v207_v7 = vld [vmem:[#allocation5 + $0x340] sm:$0xff]  ;;  %972 = vmatpush1.bf16.msra.mxu0 %v10802_v5  ;;  %15882 = vst [vmem:[#allocation17_spill] sm:$0xff] %v12768_v63  ;;  %1116 = vmatprep.mubr.bf16.mxu1 %v12768_v63  ;;  %p12685_p0 = por %p12684_p13, %p12683_p12 }
  0x46   :  { %v10799_v10 = vcombine.high %v205_v6, %v207_v7  ;;  %v269_v11 = vld [vmem:[#allocation5 + $0xb00] sm:$0xff]  ;;  %1084 = vmatprep.subr.bf16.mxu1 %v10867_v8  ;;  %v10798_v18 = vcombine.low %v205_v6, %v207_v7 }
  0x47   :  { %v271_v12 = vld [vmem:[#allocation5 + $0xb40] sm:$0xff]  ;;  %1085 = vmatpush1.bf16.msra.mxu1 %v10866_v9  ;;  %p12686_p1 = pnand %p12685_p0, %p12679_p11 }
  0x48   :  { %v201_v13 = vld [vmem:[#allocation5 + $0x280] sm:$0xff]  ;;  %v10863_v14 = vcombine.high %v269_v11, %v271_v12  ;;  %973 = vmatprep.subr.bf16.mxu0 %v10799_v10  ;;  %v10862_v19 = vcombine.low %v269_v11, %v271_v12 }
  0x49   :  { %v203_v15 = vld [vmem:[#allocation5 + $0x2c0] sm:$0xff]  ;;  %974 = vmatpush1.bf16.msra.mxu0 %v10798_v18 }
  0x4a   :  { %v265_v16 = vld [vmem:[#allocation5 + $0xa80] sm:$0xff]  ;;  %v10795_v20 = vcombine.high %v201_v13, %v203_v15  ;;  %1086 = vmatprep.subr.bf16.mxu1 %v10863_v14  ;;  %v10794_v26 = vcombine.low %v201_v13, %v203_v15 }
  0x4b   :  { %v267_v17 = vld [vmem:[#allocation5 + $0xac0] sm:$0xff]  ;;  %1087 = vmatpush1.bf16.msra.mxu1 %v10862_v19 }
  0x4c   :  { %v10859_v21 = vcombine.high %v265_v16, %v267_v17  ;;  %v197_v22 = vld [vmem:[#allocation5 + $0x200] sm:$0xff]  ;;  %975 = vmatprep.subr.bf16.mxu0 %v10795_v20  ;;  %v10858_v27 = vcombine.low %v265_v16, %v267_v17 }
  0x4d   :  { %v199_v23 = vld [vmem:[#allocation5 + $0x240] sm:$0xff]  ;;  %976 = vmatpush1.bf16.msra.mxu0 %v10794_v26 }
  0x4e   :  { %v261_v24 = vld [vmem:[#allocation5 + $0xa00] sm:$0xff]  ;;  %v10791_v28 = vcombine.high %v197_v22, %v199_v23  ;;  %1088 = vmatprep.subr.bf16.mxu1 %v10859_v21  ;;  %v10790_v34 = vcombine.low %v197_v22, %v199_v23 }
  0x4f   :  { %v263_v25 = vld [vmem:[#allocation5 + $0xa40] sm:$0xff]  ;;  %1089 = vmatpush1.bf16.msra.mxu1 %v10858_v27 }
  0x50   :  { %v10855_v29 = vcombine.high %v261_v24, %v263_v25  ;;  %v193_v30 = vld [vmem:[#allocation5 + $0x180] sm:$0xff]  ;;  %977 = vmatprep.subr.bf16.mxu0 %v10791_v28  ;;  %v10854_v35 = vcombine.low %v261_v24, %v263_v25 }
  0x51   :  { %v195_v31 = vld [vmem:[#allocation5 + $0x1c0] sm:$0xff]  ;;  %978 = vmatpush1.bf16.msra.mxu0 %v10790_v34 }
  0x52   :  { %v257_v32 = vld [vmem:[#allocation5 + $0x980] sm:$0xff]  ;;  %v10787_v36 = vcombine.high %v193_v30, %v195_v31  ;;  %1090 = vmatprep.subr.bf16.mxu1 %v10855_v29  ;;  %v10786_v42 = vcombine.low %v193_v30, %v195_v31 }
  0x53   :  { %v259_v33 = vld [vmem:[#allocation5 + $0x9c0] sm:$0xff]  ;;  %1091 = vmatpush1.bf16.msra.mxu1 %v10854_v35 }
  0x54   :  { %v10851_v37 = vcombine.high %v257_v32, %v259_v33  ;;  %v189_v38 = vld [vmem:[#allocation5 + $0x100] sm:$0xff]  ;;  %979 = vmatprep.subr.bf16.mxu0 %v10787_v36  ;;  %v10850_v43 = vcombine.low %v257_v32, %v259_v33 }
  0x55   :  { %v191_v39 = vld [vmem:[#allocation5 + $0x140] sm:$0xff]  ;;  %980 = vmatpush1.bf16.msra.mxu0 %v10786_v42 }
  0x56   :  { %v253_v40 = vld [vmem:[#allocation5 + $0x900] sm:$0xff]  ;;  %v10783_v44 = vcombine.high %v189_v38, %v191_v39  ;;  %1092 = vmatprep.subr.bf16.mxu1 %v10851_v37  ;;  %v10782_v50 = vcombine.low %v189_v38, %v191_v39 }
  0x57   :  { %v255_v41 = vld [vmem:[#allocation5 + $0x940] sm:$0xff]  ;;  %1093 = vmatpush1.bf16.msra.mxu1 %v10850_v43 }
  0x58   :  { %v10847_v45 = vcombine.high %v253_v40, %v255_v41  ;;  %v185_v46 = vld [vmem:[#allocation5 + $0x80] sm:$0xff]  ;;  %981 = vmatprep.subr.bf16.mxu0 %v10783_v44  ;;  %v10846_v51 = vcombine.low %v253_v40, %v255_v41 }
  0x59   :  { %v187_v47 = vld [vmem:[#allocation5 + $0xc0] sm:$0xff]  ;;  %982 = vmatpush1.bf16.msra.mxu0 %v10782_v50 }
  0x5a   :  { %v249_v48 = vld [vmem:[#allocation5 + $0x880] sm:$0xff]  ;;  %v10779_v52 = vcombine.high %v185_v46, %v187_v47  ;;  %1094 = vmatprep.subr.bf16.mxu1 %v10847_v45  ;;  %v10778_v0 = vcombine.low %v185_v46, %v187_v47 }
  0x5b   :  { %v251_v49 = vld [vmem:[#allocation5 + $0x8c0] sm:$0xff]  ;;  %1095 = vmatpush1.bf16.msra.mxu1 %v10846_v51 }
  0x5c   :  { %v181_v53 = vld [vmem:[#allocation5] sm:$0xff]  ;;  %v10843_v56 = vcombine.high %v249_v48, %v251_v49  ;;  %983 = vmatprep.subr.bf16.mxu0 %v10779_v52  ;;  %v10842_v1 = vcombine.low %v249_v48, %v251_v49 }
  0x5d   :  { %v183_v57 = vld [vmem:[#allocation5 + $0x40] sm:$0xff]  ;;  %984 = vmatpush1.bf16.msra.mxu0 %v10778_v0 }
  0x5e   :  { %v245_v61 = vld [vmem:[#allocation5 + $0x800] sm:$0xff]  ;;  %v10775_v2 = vcombine.high %v181_v53, %v183_v57  ;;  %1096 = vmatprep.subr.bf16.mxu1 %v10843_v56  ;;  %v10774_v8 = vcombine.low %v181_v53, %v183_v57 }
  0x5f   :  { %v247_v62 = vld [vmem:[#allocation5 + $0x840] sm:$0xff]  ;;  %1097 = vmatpush1.bf16.msra.mxu1 %v10842_v1 }
  0x60   :  { %v10839_v3 = vcombine.high %v245_v61, %v247_v62  ;;  %v241_v4 = vld [vmem:[#allocation5 + $0x780] sm:$0xff]  ;;  %985 = vmatprep.subr.bf16.mxu0 %v10775_v2  ;;  %v10838_v9 = vcombine.low %v245_v61, %v247_v62 }
  0x61   :  { %v243_v5 = vld [vmem:[#allocation5 + $0x7c0] sm:$0xff]  ;;  %986 = vmatpush1.bf16.msra.mxu0 %v10774_v8  ;;  %v274_v8 = vld [vmem:[#allocation5 + $0xb88] sm:$0xff] }
  0x62   :  { %v305_v6 = vld [vmem:[#allocation5 + $0xf80] sm:$0xff]  ;;  %v10835_v10 = vcombine.high %v241_v4, %v243_v5  ;;  %1098 = vmatprep.subr.bf16.mxu1 %v10839_v3  ;;  %v10834_v16 = vcombine.low %v241_v4, %v243_v5 }
  0x63   :  { %v307_v7 = vld [vmem:[#allocation5 + $0xfc0] sm:$0xff]  ;;  %1099 = vmatpush1.bf16.msra.mxu1 %v10838_v9  ;;  %v276_v9 = vld [vmem:[#allocation5 + $0xbc8] sm:$0xff] }
  0x64   :  { %v10899_v11 = vcombine.high %v305_v6, %v307_v7  ;;  %v237_v12 = vld [vmem:[#allocation5 + $0x700] sm:$0xff]  ;;  %987 = vmatprep.subr.bf16.mxu0 %v10835_v10  ;;  %v10898_v17 = vcombine.low %v305_v6, %v307_v7  ;;  %v210_v6 = vld [vmem:[#allocation5 + $0x388] sm:$0xff] }
  0x65   :  { %v239_v13 = vld [vmem:[#allocation5 + $0x740] sm:$0xff]  ;;  %988 = vmatpush2.bf16.msra.mxu0 %v10834_v16  ;;  %v212_v7 = vld [vmem:[#allocation5 + $0x3c8] sm:$0xff] }
  0x66   :  { %v301_v14 = vld [vmem:[#allocation5 + $0xf00] sm:$0xff]  ;;  %v10831_v18 = vcombine.high %v237_v12, %v239_v13  ;;  %1100 = vmatprep.subr.bf16.mxu1 %v10899_v11  ;;  %v10830_v24 = vcombine.low %v237_v12, %v239_v13  ;;  %v10805_v16 = vcombine.high %v210_v6, %v212_v7 }
  0x67   :  { %v303_v15 = vld [vmem:[#allocation5 + $0xf40] sm:$0xff]  ;;  %1101 = vmatpush2.bf16.msra.mxu1 %v10898_v17  ;;  %v10869_v17 = vcombine.high %v274_v8, %v276_v9 }
  0x68   :  { %v10895_v19 = vcombine.high %v301_v14, %v303_v15  ;;  %v233_v20 = vld [vmem:[#allocation5 + $0x680] sm:$0xff]  ;;  %989 = vmatprep.subr.bf16.mxu0 %v10831_v18  ;;  %v10894_v25 = vcombine.low %v301_v14, %v303_v15  ;;  %v87_v14 = vld [vmem:[#allocation2 + $0x10] sm:$0xff]  ;;  %v206_v18 = vld [vmem:[#allocation5 + $0x308] sm:$0xff] }
  0x69   :  { %v235_v21 = vld [vmem:[#allocation5 + $0x6c0] sm:$0xff]  ;;  %990 = vmatpush2.bf16.msra.mxu0 %v10830_v24  ;;  %v91_v15 = vld [vmem:[#allocation2 + $0x30] sm:$0xff]  ;;  %v98_v24 = vld [vmem:[#allocation2 + $0x68] sm:$0xff] }
  0x6a   :  { %v297_v22 = vld [vmem:[#allocation5 + $0xe80] sm:$0xff]  ;;  %v10827_v26 = vcombine.high %v233_v20, %v235_v21  ;;  %1102 = vmatprep.subr.bf16.mxu1 %v10895_v19  ;;  %v10826_v32 = vcombine.low %v233_v20, %v235_v21  ;;  %v208_v19 = vld [vmem:[#allocation5 + $0x348] sm:$0xff] }
  0x6b   :  { %v299_v23 = vld [vmem:[#allocation5 + $0xec0] sm:$0xff]  ;;  %1103 = vmatpush2.bf16.msra.mxu1 %v10894_v25  ;;  %v270_v20 = vld [vmem:[#allocation5 + $0xb08] sm:$0xff]  ;;  %v12774_v25 = vpack.c.bf16 %v91_v15, %v87_v14 }
  0x6c   :  { %v10891_v27 = vcombine.high %v297_v22, %v299_v23  ;;  %v229_v28 = vld [vmem:[#allocation5 + $0x600] sm:$0xff]  ;;  %991 = vmatprep.subr.bf16.mxu0 %v10827_v26  ;;  %v10890_v33 = vcombine.low %v297_v22, %v299_v23  ;;  %v272_v22 = vld [vmem:[#allocation5 + $0xb48] sm:$0xff]  ;;  %v10804_v26 = vcombine.low %v210_v6, %v212_v7 }
  0x6d   :  { %v231_v29 = vld [vmem:[#allocation5 + $0x640] sm:$0xff]  ;;  %992 = vmatpush2.bf16.msra.mxu0 %v10826_v32  ;;  %v94_v23 = vld [vmem:[#allocation2 + $0x48] sm:$0xff]  ;;  %15884 = vst [vmem:[#allocation19_spill] sm:$0xff] %v12774_v25 }
  0x6e   :  { %v293_v30 = vld [vmem:[#allocation5 + $0xe00] sm:$0xff]  ;;  %v10823_v34 = vcombine.high %v229_v28, %v231_v29  ;;  %1104 = vmatprep.subr.bf16.mxu1 %v10891_v27  ;;  %v10822_v40 = vcombine.low %v229_v28, %v231_v29  ;;  %v96_v27 = vld [vmem:[#allocation2 + $0x58] sm:$0xff]  ;;  %v10868_v29 = vcombine.low %v274_v8, %v276_v9  ;;  %v12776_v32 = vpack.c.bf16 %v98_v24, %v94_v23  ;;  %v103_v8 = vld [vmem:[#allocation2 + $0x90] sm:$0xff] }
  0x6f   :  { %v295_v31 = vld [vmem:[#allocation5 + $0xe40] sm:$0xff]  ;;  %1105 = vmatpush2.bf16.msra.mxu1 %v10890_v33  ;;  %v100_v28 = vld [vmem:[#allocation2 + $0x78] sm:$0xff]  ;;  %v202_v33 = vld [vmem:[#allocation5 + $0x288] sm:$0xff] }
  0x70   :  { %v10887_v35 = vcombine.high %v293_v30, %v295_v31  ;;  %v225_v36 = vld [vmem:[#allocation5 + $0x580] sm:$0xff]  ;;  %993 = vmatprep.subr.bf16.mxu0 %v10823_v34  ;;  %v10886_v41 = vcombine.low %v293_v30, %v295_v31  ;;  %v10801_v30 = vcombine.high %v206_v18, %v208_v19  ;;  %v10865_v31 = vcombine.high %v270_v20, %v272_v22  ;;  %v204_v34 = vld [vmem:[#allocation5 + $0x2c8] sm:$0xff]  ;;  %v107_v9 = vld [vmem:[#allocation2 + $0xb0] sm:$0xff] }
  0x71   :  { %v227_v37 = vld [vmem:[#allocation5 + $0x5c0] sm:$0xff]  ;;  %994 = vmatpush2.bf16.msra.mxu0 %v10822_v40  ;;  %15885 = vst [vmem:[#allocation20_spill] sm:$0xff] %v12776_v32  ;;  %v254_v14 = vld [vmem:[#allocation5 + $0x908] sm:$0xff]  ;;  %v116_v23 = vld [vmem:[#allocation2 + $0xf8] sm:$0xff] }
  0x72   :  { %v289_v38 = vld [vmem:[#allocation5 + $0xd80] sm:$0xff]  ;;  %v10819_v42 = vcombine.high %v225_v36, %v227_v37  ;;  %1106 = vmatprep.subr.bf16.mxu1 %v10887_v35  ;;  %v10818_v48 = vcombine.low %v225_v36, %v227_v37  ;;  %v12779_v35 = vpack.c.bf16 %v100_v28, %v96_v27  ;;  %v266_v36 = vld [vmem:[#allocation5 + $0xa88] sm:$0xff] }
  0x73   :  { %v291_v39 = vld [vmem:[#allocation5 + $0xdc0] sm:$0xff]  ;;  %1107 = vmatpush2.bf16.msra.mxu1 %v10886_v41  ;;  %v268_v37 = vld [vmem:[#allocation5 + $0xac8] sm:$0xff]  ;;  %v10864_v41 = vcombine.low %v270_v20, %v272_v22  ;;  %v112_v22 = vld [vmem:[#allocation2 + $0xd8] sm:$0xff] }
  0x74   :  { %v10883_v43 = vcombine.high %v289_v38, %v291_v39  ;;  %v221_v44 = vld [vmem:[#allocation5 + $0x500] sm:$0xff]  ;;  %995 = vmatprep.subr.bf16.mxu0 %v10819_v42  ;;  %v10882_v49 = vcombine.low %v289_v38, %v291_v39  ;;  %15886 = vst [vmem:[#allocation21_spill] sm:$0xff] %v12779_v35  ;;  %v10800_v38 = vcombine.low %v206_v18, %v208_v19  ;;  %v95_v42 = vld [vmem:[#allocation2 + $0x50] sm:$0xff]  ;;  %v114_v18 = vld [vmem:[#allocation2 + $0xe8] sm:$0xff] }
  0x75   :  { %v223_v45 = vld [vmem:[#allocation5 + $0x540] sm:$0xff]  ;;  %996 = vmatpush2.bf16.msra.mxu0 %v10818_v48  ;;  %v262_v48 = vld [vmem:[#allocation5 + $0xa08] sm:$0xff]  ;;  %v12798_v19 = vpack.c.bf16 %v107_v9, %v103_v8  ;;  %v119_v9 = vld [vmem:[#allocation2 + $0x110] sm:$0xff] }
  0x76   :  { %v285_v46 = vld [vmem:[#allocation5 + $0xd00] sm:$0xff]  ;;  %v10815_v50 = vcombine.high %v221_v44, %v223_v45  ;;  %1108 = vmatprep.subr.bf16.mxu1 %v10883_v43  ;;  %v10814_v56 = vcombine.low %v221_v44, %v223_v45  ;;  %v99_v43 = vld [vmem:[#allocation2 + $0x70] sm:$0xff]  ;;  %v10797_v44 = vcombine.high %v202_v33, %v204_v34  ;;  %v10861_v45 = vcombine.high %v266_v36, %v268_v37 }
  0x77   :  { %v287_v47 = vld [vmem:[#allocation5 + $0xd40] sm:$0xff]  ;;  %1109 = vmatpush2.bf16.msra.mxu1 %v10882_v49  ;;  %15892 = vst [vmem:[#allocation27_spill] sm:$0xff] %v12798_v19 }
  0x78   :  { %v10879_v51 = vcombine.high %v285_v46, %v287_v47  ;;  %v217_v52 = vld [vmem:[#allocation5 + $0x480] sm:$0xff]  ;;  %997 = vmatprep.subr.bf16.mxu0 %v10815_v50  ;;  %v10878_v57 = vcombine.low %v285_v46, %v287_v47  ;;  %v198_v46 = vld [vmem:[#allocation5 + $0x208] sm:$0xff] }
  0x79   :  { %v219_v53 = vld [vmem:[#allocation5 + $0x4c0] sm:$0xff]  ;;  %998 = vmatpush2.bf16.msra.mxu0 %v10814_v56  ;;  %v200_v47 = vld [vmem:[#allocation5 + $0x248] sm:$0xff]  ;;  %v108_v56 = vld [vmem:[#allocation2 + $0xb8] sm:$0xff] }
  0x7a   :  { %v281_v54 = vld [vmem:[#allocation5 + $0xc80] sm:$0xff]  ;;  %v10811_v59 = vcombine.high %v217_v52, %v219_v53  ;;  %1110 = vmatprep.subr.bf16.mxu1 %v10879_v51  ;;  %v10810_v2 = vcombine.low %v217_v52, %v219_v53  ;;  %v264_v50 = vld [vmem:[#allocation5 + $0xa48] sm:$0xff]  ;;  %v12786_v53 = vpack.c.bf16 %v99_v43, %v95_v42 }
  0x7b   :  { %v283_v55 = vld [vmem:[#allocation5 + $0xcc0] sm:$0xff]  ;;  %1111 = vmatpush2.bf16.msra.mxu1 %v10878_v57  ;;  %v102_v51 = vld [vmem:[#allocation2 + $0x88] sm:$0xff]  ;;  %v10860_v57 = vcombine.low %v266_v36, %v268_v37  ;;  %v10856_v7 = vcombine.low %v262_v48, %v264_v50 }
  0x7c   :  { %v10875_v60 = vcombine.high %v281_v54, %v283_v55  ;;  %v213_v61 = vld [vmem:[#allocation5 + $0x400] sm:$0xff]  ;;  %999 = vmatprep.subr.bf16.mxu0 %v10811_v59  ;;  %v10874_v3 = vcombine.low %v281_v54, %v283_v55  ;;  %v106_v52 = vld [vmem:[#allocation2 + $0xa8] sm:$0xff]  ;;  %15888 = vst [vmem:[#allocation23_spill] sm:$0xff] %v12786_v53  ;;  %v10796_v54 = vcombine.low %v202_v33, %v204_v34  ;;  %v104_v55 = vld [vmem:[#allocation2 + $0x98] sm:$0xff] }
  0x7d   :  { %v215_v62 = vld [vmem:[#allocation5 + $0x440] sm:$0xff]  ;;  %1000 = vmatpush2.bf16.msra.mxu0 %v10810_v2  ;;  %v10793_v59 = vcombine.high %v198_v46, %v200_v47  ;;  %v258_v2 = vld [vmem:[#allocation5 + $0x988] sm:$0xff] }
  0x7e   :  { %v277_v0 = vld [vmem:[#allocation5 + $0xc00] sm:$0xff]  ;;  %v10807_v4 = vcombine.high %v213_v61, %v215_v62  ;;  %1112 = vmatprep.subr.bf16.mxu1 %v10875_v60  ;;  %v10806_v10 = vcombine.low %v213_v61, %v215_v62  ;;  %v10857_v60 = vcombine.high %v262_v48, %v264_v50  ;;  %v12788_v61 = vpack.c.bf16 %v106_v52, %v102_v51  ;;  %v194_v62 = vld [vmem:[#allocation5 + $0x188] sm:$0xff] }
  0x7f   :  { %v279_v1 = vld [vmem:[#allocation5 + $0xc40] sm:$0xff]  ;;  %1113 = vmatpush2.bf16.msra.mxu1 %v10874_v3  ;;  %v260_v3 = vld [vmem:[#allocation5 + $0x9c8] sm:$0xff] }
  0x80   :  { %v10871_v5 = vcombine.high %v277_v0, %v279_v1  ;;  %v85_v11 = vld [vmem:[#allocation2] sm:$0xff]  ;;  %1001 = vmatprep.subr.bf16.mxu0 %v10807_v4  ;;  %v10870_v13 = vcombine.low %v277_v0, %v279_v1  ;;  %15889 = vst [vmem:[#allocation24_spill] sm:$0xff] %v12788_v61  ;;  %v196_v0 = vld [vmem:[#allocation5 + $0x1c8] sm:$0xff]  ;;  %v12791_v1 = vpack.c.bf16 %v108_v56, %v104_v55  ;;  %v120_v55 = vld [vmem:[#allocation2 + $0x118] sm:$0xff] }
  0x81   :  { %v89_v12 = vld [vmem:[#allocation2 + $0x20] sm:$0xff]  ;;  %1002 = vmatpush2.bf16.msra.mxu0 %v10806_v10  ;;  %v10792_v4 = vcombine.low %v198_v46, %v200_v47  ;;  %v10789_v10 = vcombine.high %v194_v62, %v196_v0  ;;  %v10788_v20 = vcombine.low %v194_v62, %v196_v0  ;;  %v10852_v24 = vcombine.low %v258_v2, %v260_v3  ;;  %v250_v33 = vld [vmem:[#allocation5 + $0x888] sm:$0xff]  ;;  %v124_v56 = vld [vmem:[#allocation2 + $0x138] sm:$0xff] }
  0x82   :  { %1114 = vmatprep.subr.bf16.mxu1 %v10871_v5  ;;  %v12772_v21 = vpack.c.bf16 %v89_v12, %v85_v11  ;;  %1197 = vmatprep.subr.bf16.mxu0 %v10805_v16  ;;  %v93_v39 = vld [vmem:[#allocation2 + $0x40] sm:$0xff]  ;;  %15890 = vst [vmem:[#allocation25_spill] sm:$0xff] %v12791_v1  ;;  %v10853_v11 = vcombine.high %v258_v2, %v260_v3  ;;  %v190_v12 = vld [vmem:[#allocation5 + $0x108] sm:$0xff] }
  0x83   :  { %1115 = vmatpush2.bf16.msra.mxu1 %v10870_v13  ;;  %v97_v40 = vld [vmem:[#allocation2 + $0x60] sm:$0xff]  ;;  %v192_v13 = vld [vmem:[#allocation5 + $0x148] sm:$0xff]  ;;  %v12815_v3 = vpack.c.bf16 %v124_v56, %v120_v55 }
  0x84   :  { %15883 = vst [vmem:[#allocation18_spill] sm:$0xff] %v12772_v21  ;;  %1310 = vmatprep.subr.bf16.mxu1 %v10869_v17  ;;  %1004 = vmatmul.mubr.bf16.vlgmr.msra.gmra.mxu0 %v12772_v21  ;;  %v12784_v49 = vpack.c.bf16 %v97_v40, %v93_v39  ;;  %v101_v5 = vld [vmem:[#allocation2 + $0x80] sm:$0xff]  ;;  %v256_v16 = vld [vmem:[#allocation5 + $0x948] sm:$0xff]  ;;  %v10784_v36 = vcombine.low %v190_v12, %v192_v13  ;;  %v111_v40 = vld [vmem:[#allocation2 + $0xd0] sm:$0xff] }
  0x85   :  { %1198 = vmatpush1.bf16.msra.mxu0 %v10804_v26  ;;  %1013 = vmatprep.mubr.bf16.mxu0 %v12776_v32  ;;  %v105_v6 = vld [vmem:[#allocation2 + $0xa0] sm:$0xff]  ;;  %v110_v17 = vld [vmem:[#allocation2 + $0xc8] sm:$0xff]  ;;  %v10785_v26 = vcombine.high %v190_v12, %v192_v13  ;;  %v10849_v27 = vcombine.high %v254_v14, %v256_v16  ;;  %v10848_v39 = vcombine.low %v254_v14, %v256_v16 }
  0x86   :  { %1117 = vmatmul.mubr.bf16.vlgmr.msra.gmra.mxu1 %v12774_v25  ;;  %1199 = vmatprep.subr.bf16.mxu0 %v10801_v30  ;;  %15887 = vst [vmem:[#allocation22_spill] sm:$0xff] %v12784_v49  ;;  %v12796_v15 = vpack.c.bf16 %v105_v6, %v101_v5  ;;  %v12800_v28 = vpack.c.bf16 %v114_v18, %v110_v17  ;;  %v188_v30 = vld [vmem:[#allocation5 + $0xc8] sm:$0xff]  ;;  %v109_v37 = vld [vmem:[#allocation2 + $0xc0] sm:$0xff]  ;;  %15898 = vst [vmem:[#allocation33_spill] sm:$0xff] %v12815_v3 }
  0x87   :  { %1311 = vmatpush1.bf16.msra.mxu1 %v10868_v29  ;;  %1126 = vmatprep.mubr.bf16.mxu1 %v12779_v35  ;;  %v186_v29 = vld [vmem:[#allocation5 + $0x88] sm:$0xff]  ;;  %v121_v8 = vld [vmem:[#allocation2 + $0x120] sm:$0xff] }
  0x88   :  { %1312 = vmatprep.subr.bf16.mxu1 %v10865_v31  ;;  %15891 = vst [vmem:[#allocation26_spill] sm:$0xff] %v12796_v15  ;;  %15893 = vst [vmem:[#allocation28_spill] sm:$0xff] %v12800_v28  ;;  %v12803_v31 = vpack.c.bf16 %v116_v23, %v112_v22  ;;  %v252_v34 = vld [vmem:[#allocation5 + $0x8c8] sm:$0xff]  ;;  %v10781_v42 = vcombine.high %v186_v29, %v188_v30 }
  0x89   :  { %1200 = vmatpush1.bf16.msra.mxu0 %v10800_v38  ;;  %v113_v38 = vld [vmem:[#allocation2 + $0xe0] sm:$0xff]  ;;  %v10845_v43 = vcombine.high %v250_v33, %v252_v34  ;;  %v246_v46 = vld [vmem:[#allocation5 + $0x808] sm:$0xff] }
  0x8a   :  { %1201 = vmatprep.subr.bf16.mxu0 %v10797_v44  ;;  %15894 = vst [vmem:[#allocation29_spill] sm:$0xff] %v12803_v31  ;;  %v182_v44 = vld [vmem:[#allocation5 + $0x8] sm:$0xff]  ;;  %v12808_v47 = vpack.c.bf16 %v113_v38, %v109_v37 }
  0x8b   :  { %1313 = vmatpush1.bf16.msra.mxu1 %v10864_v41  ;;  %v115_v41 = vld [vmem:[#allocation2 + $0xf0] sm:$0xff]  ;;  %v248_v48 = vld [vmem:[#allocation5 + $0x848] sm:$0xff] }
  0x8c   :  { %1314 = vmatprep.subr.bf16.mxu1 %v10861_v45  ;;  %1014 = vmatmul.mubr.bf16.gmra.mxu0 %v12784_v49  ;;  %v184_v45 = vld [vmem:[#allocation5 + $0x48] sm:$0xff]  ;;  %15895 = vst [vmem:[#allocation30_spill] sm:$0xff] %v12808_v47  ;;  %v12810_v52 = vpack.c.bf16 %v115_v41, %v111_v40  ;;  %v125_v40 = vld [vmem:[#allocation2 + $0x140] sm:$0xff] }
  0x8d   :  { %1202 = vmatpush1.bf16.msra.mxu0 %v10796_v54  ;;  %1023 = vmatprep.mubr.bf16.mxu0 %v12788_v61  ;;  %v118_v50 = vld [vmem:[#allocation2 + $0x108] sm:$0xff]  ;;  %v10780_v54 = vcombine.low %v186_v29, %v188_v30  ;;  %v10776_v6 = vcombine.low %v182_v44, %v184_v45  ;;  %v129_v41 = vld [vmem:[#allocation2 + $0x160] sm:$0xff] }
  0x8e   :  { %1127 = vmatmul.mubr.bf16.gmra.mxu1 %v12786_v53  ;;  %1203 = vmatprep.subr.bf16.mxu0 %v10793_v59  ;;  %v122_v51 = vld [vmem:[#allocation2 + $0x128] sm:$0xff]  ;;  %15896 = vst [vmem:[#allocation31_spill] sm:$0xff] %v12810_v52  ;;  %v10777_v59 = vcombine.high %v182_v44, %v184_v45  ;;  %v127_v44 = vld [vmem:[#allocation2 + $0x150] sm:$0xff] }
  0x8f   :  { %1315 = vmatpush1.bf16.msra.mxu1 %v10860_v57  ;;  %1136 = vmatprep.mubr.bf16.mxu1 %v12791_v1  ;;  %v10844_v57 = vcombine.low %v250_v33, %v252_v34  ;;  %v12812_v62 = vpack.c.bf16 %v122_v51, %v118_v50  ;;  %v242_v0 = vld [vmem:[#allocation5 + $0x788] sm:$0xff]  ;;  %v131_v45 = vld [vmem:[#allocation2 + $0x170] sm:$0xff] }
  0x90   :  { %1316 = vmatprep.subr.bf16.mxu1 %v10857_v60  ;;  %v10841_v60 = vcombine.high %v246_v46, %v248_v48  ;;  %v244_v2 = vld [vmem:[#allocation5 + $0x7c8] sm:$0xff] }
  0x91   :  { %1204 = vmatpush1.bf16.msra.mxu0 %v10792_v4  ;;  %15897 = vst [vmem:[#allocation32_spill] sm:$0xff] %v12812_v62  ;;  %v306_v4 = vld [vmem:[#allocation5 + $0xf88] sm:$0xff]  ;;  %v10837_v12 = vcombine.high %v242_v0, %v244_v2  ;;  %v10836_v29 = vcombine.low %v242_v0, %v244_v2  ;;  %v136_v0 = vld [vmem:[#allocation2 + $0x198] sm:$0xff] }
  0x92   :  { %1205 = vmatprep.subr.bf16.mxu0 %v10789_v10  ;;  %v308_v5 = vld [vmem:[#allocation5 + $0xfc8] sm:$0xff]  ;;  %v10840_v10 = vcombine.low %v246_v46, %v248_v48  ;;  %v140_v2 = vld [vmem:[#allocation2 + $0x1b8] sm:$0xff] }
  0x93   :  { %1317 = vmatpush1.bf16.msra.mxu1 %v10856_v7  ;;  %v117_v7 = vld [vmem:[#allocation2 + $0x100] sm:$0xff]  ;;  %v238_v13 = vld [vmem:[#allocation5 + $0x708] sm:$0xff]  ;;  %v10901_v16 = vcombine.high %v306_v4, %v308_v5  ;;  %v10900_v30 = vcombine.low %v306_v4, %v308_v5  ;;  %v12832_v4 = vpack.c.bf16 %v129_v41, %v125_v40  ;;  %v12834_v5 = vpack.c.bf16 %v131_v45, %v127_v44  ;;  %v144_v41 = vld [vmem:[#allocation2 + $0x1d8] sm:$0xff] }
  0x94   :  { %1318 = vmatprep.subr.bf16.mxu1 %v10853_v11  ;;  %1024 = vmatmul.mubr.bf16.gmra.mxu0 %v12796_v15  ;;  %v123_v11 = vld [vmem:[#allocation2 + $0x130] sm:$0xff]  ;;  %v240_v14 = vld [vmem:[#allocation5 + $0x748] sm:$0xff]  ;;  %v12820_v22 = vpack.c.bf16 %v121_v8, %v117_v7 }
  0x95   :  { %1206 = vmatpush1.bf16.msra.mxu0 %v10788_v20  ;;  %1033 = vmatprep.mubr.bf16.mxu0 %v12800_v28  ;;  %v302_v17 = vld [vmem:[#allocation5 + $0xf08] sm:$0xff]  ;;  %v10833_v33 = vcombine.high %v238_v13, %v240_v14  ;;  %v10832_v46 = vcombine.low %v238_v13, %v240_v14  ;;  %15903 = vst [vmem:[#allocation38_spill] sm:$0xff] %v12832_v4  ;;  %15904 = vst [vmem:[#allocation39_spill] sm:$0xff] %v12834_v5  ;;  %v133_v14 = vld [vmem:[#allocation2 + $0x180] sm:$0xff] }
  0x96   :  { %1137 = vmatmul.mubr.bf16.gmra.mxu1 %v12798_v19  ;;  %1207 = vmatprep.subr.bf16.mxu0 %v10785_v26  ;;  %v304_v18 = vld [vmem:[#allocation5 + $0xf48] sm:$0xff]  ;;  %15899 = vst [vmem:[#allocation34_spill] sm:$0xff] %v12820_v22  ;;  %v132_v26 = vld [vmem:[#allocation2 + $0x178] sm:$0xff] }
  0x97   :  { %1319 = vmatpush1.bf16.msra.mxu1 %v10852_v24  ;;  %1146 = vmatprep.mubr.bf16.mxu1 %v12803_v31  ;;  %v126_v20 = vld [vmem:[#allocation2 + $0x148] sm:$0xff]  ;;  %v128_v24 = vld [vmem:[#allocation2 + $0x158] sm:$0xff]  ;;  %v10897_v38 = vcombine.high %v302_v17, %v304_v18  ;;  %v10896_v51 = vcombine.low %v302_v17, %v304_v18  ;;  %v12839_v18 = vpack.c.bf16 %v140_v2, %v136_v0 }
  0x98   :  { %1320 = vmatprep.subr.bf16.mxu1 %v10849_v27  ;;  %v130_v23 = vld [vmem:[#allocation2 + $0x168] sm:$0xff]  ;;  %v12822_v27 = vpack.c.bf16 %v123_v11, %v119_v9 }
  0x99   :  { %1208 = vmatpush1.bf16.msra.mxu0 %v10784_v36  ;;  %v234_v34 = vld [vmem:[#allocation5 + $0x688] sm:$0xff]  ;;  %15906 = vst [vmem:[#allocation41_spill] sm:$0xff] %v12839_v18 }
  0x9a   :  { %1209 = vmatprep.subr.bf16.mxu0 %v10781_v42  ;;  %15900 = vst [vmem:[#allocation35_spill] sm:$0xff] %v12822_v27  ;;  %v236_v36 = vld [vmem:[#allocation5 + $0x6c8] sm:$0xff] }
  0x9b   :  { %1321 = vmatpush1.bf16.msra.mxu1 %v10848_v39  ;;  %v298_v37 = vld [vmem:[#allocation5 + $0xe88] sm:$0xff]  ;;  %v12824_v39 = vpack.c.bf16 %v130_v23, %v126_v20  ;;  %v135_v20 = vld [vmem:[#allocation2 + $0x190] sm:$0xff] }
  0x9c   :  { %1322 = vmatprep.subr.bf16.mxu1 %v10845_v43  ;;  %1034 = vmatmul.mubr.bf16.gmra.mxu0 %v12808_v47  ;;  %v300_v42 = vld [vmem:[#allocation5 + $0xec8] sm:$0xff]  ;;  %v12827_v43 = vpack.c.bf16 %v132_v26, %v128_v24  ;;  %v139_v23 = vld [vmem:[#allocation2 + $0x1b0] sm:$0xff] }
  0x9d   :  { %1210 = vmatpush1.bf16.msra.mxu0 %v10780_v54  ;;  %1043 = vmatprep.mubr.bf16.mxu0 %v12812_v62  ;;  %15901 = vst [vmem:[#allocation36_spill] sm:$0xff] %v12824_v39  ;;  %v230_v48 = vld [vmem:[#allocation5 + $0x608] sm:$0xff]  ;;  %v10829_v54 = vcombine.high %v234_v34, %v236_v36  ;;  %v10892_v7 = vcombine.low %v298_v37, %v300_v42 }
  0x9e   :  { %1147 = vmatmul.mubr.bf16.gmra.mxu1 %v12810_v52  ;;  %1211 = vmatprep.subr.bf16.mxu0 %v10777_v59  ;;  %15902 = vst [vmem:[#allocation37_spill] sm:$0xff] %v12827_v43  ;;  %v232_v50 = vld [vmem:[#allocation5 + $0x648] sm:$0xff]  ;;  %v12846_v45 = vpack.c.bf16 %v139_v23, %v135_v20 }
  0x9f   :  { %1323 = vmatpush1.bf16.msra.mxu1 %v10844_v57  ;;  %1156 = vmatprep.mubr.bf16.mxu1 %v12815_v3  ;;  %v294_v55 = vld [vmem:[#allocation5 + $0xe08] sm:$0xff]  ;;  %v10825_v8 = vcombine.high %v230_v48, %v232_v50  ;;  %v10824_v24 = vcombine.low %v230_v48, %v232_v50 }
  0xa0   :  { %1324 = vmatprep.subr.bf16.mxu1 %v10841_v60  ;;  %v296_v56 = vld [vmem:[#allocation5 + $0xe48] sm:$0xff]  ;;  %v10893_v60 = vcombine.high %v298_v37, %v300_v42  ;;  %v148_v42 = vld [vmem:[#allocation2 + $0x1f8] sm:$0xff]  ;;  %15908 = vst [vmem:[#allocation43_spill] sm:$0xff] %v12846_v45 }
  0xa1   :  { %1212 = vmatpush1.bf16.msra.mxu0 %v10776_v6  ;;  %v134_v57 = vld [vmem:[#allocation2 + $0x188] sm:$0xff]  ;;  %v10828_v6 = vcombine.low %v234_v34, %v236_v36  ;;  %v12851_v2 = vpack.c.bf16 %v148_v42, %v144_v41  ;;  %v1671_v42 = vld [vmem:[#allocation5 + $0x310] sm:$0xff] }
  0xa2   :  { %1213 = vmatprep.subr.bf16.mxu0 %v10837_v12  ;;  %v138_v59 = vld [vmem:[#allocation2 + $0x1a8] sm:$0xff]  ;;  %v10889_v12 = vcombine.high %v294_v55, %v296_v56 }
  0xa3   :  { %1325 = vmatpush1.bf16.msra.mxu1 %v10840_v10  ;;  %v226_v9 = vld [vmem:[#allocation5 + $0x588] sm:$0xff]  ;;  %v12836_v13 = vpack.c.bf16 %v138_v59, %v134_v57  ;;  %v141_v59 = vld [vmem:[#allocation2 + $0x1c0] sm:$0xff]  ;;  %15910 = vst [vmem:[#allocation45_spill] sm:$0xff] %v12851_v2 }
  0xa4   :  { %1326 = vmatprep.subr.bf16.mxu1 %v10901_v16  ;;  %1044 = vmatmul.mubr.bf16.gmra.mxu0 %v12820_v22  ;;  %v228_v10 = vld [vmem:[#allocation5 + $0x5c8] sm:$0xff]  ;;  %v137_v16 = vld [vmem:[#allocation2 + $0x1a0] sm:$0xff] }
  0xa5   :  { %1214 = vmatpush2.bf16.msra.mxu0 %v10836_v29  ;;  %1053 = vmatprep.mubr.bf16.mxu0 %v12824_v39  ;;  %v290_v11 = vld [vmem:[#allocation5 + $0xd88] sm:$0xff]  ;;  %15905 = vst [vmem:[#allocation40_spill] sm:$0xff] %v12836_v13  ;;  %v12844_v44 = vpack.c.bf16 %v137_v16, %v133_v14 }
  0xa6   :  { %1157 = vmatmul.mubr.bf16.gmra.mxu1 %v12822_v27  ;;  %1215 = vmatprep.subr.bf16.mxu0 %v10833_v33  ;;  %v292_v17 = vld [vmem:[#allocation5 + $0xdc8] sm:$0xff]  ;;  %v10821_v33 = vcombine.high %v226_v9, %v228_v10 }
  0xa7   :  { %1327 = vmatpush2.bf16.msra.mxu1 %v10900_v30  ;;  %1166 = vmatprep.mubr.bf16.mxu1 %v12827_v43  ;;  %v222_v26 = vld [vmem:[#allocation5 + $0x508] sm:$0xff]  ;;  %v10888_v30 = vcombine.low %v294_v55, %v296_v56  ;;  %v10885_v40 = vcombine.high %v290_v11, %v292_v17  ;;  %15907 = vst [vmem:[#allocation42_spill] sm:$0xff] %v12844_v44 }
  0xa8   :  { %1328 = vmatprep.subr.bf16.mxu1 %v10897_v38  ;;  %v224_v29 = vld [vmem:[#allocation5 + $0x548] sm:$0xff]  ;;  %v10884_v48 = vcombine.low %v290_v11, %v292_v17 }
  0xa9   :  { %1216 = vmatpush2.bf16.msra.mxu0 %v10832_v46  ;;  %v286_v34 = vld [vmem:[#allocation5 + $0xd08] sm:$0xff]  ;;  %v10820_v46 = vcombine.low %v226_v9, %v228_v10  ;;  %v10817_v50 = vcombine.high %v222_v26, %v224_v29 }
  0xaa   :  { %1217 = vmatprep.subr.bf16.mxu0 %v10829_v54  ;;  %v288_v36 = vld [vmem:[#allocation5 + $0xd48] sm:$0xff] }
  0xab   :  { %1329 = vmatpush2.bf16.msra.mxu1 %v10896_v51  ;;  %v142_v37 = vld [vmem:[#allocation2 + $0x1c8] sm:$0xff]  ;;  %v10881_v56 = vcombine.high %v286_v34, %v288_v36  ;;  %v10880_v9 = vcombine.low %v286_v34, %v288_v36  ;;  %v1739_v34 = vld [vmem:[#allocation5 + $0xb90] sm:$0xff] }
  0xac   :  { %1330 = vmatprep.subr.bf16.mxu1 %v10893_v60  ;;  %1054 = vmatmul.mubr.bf16.gmra.mxu0 %v12832_v4  ;;  %v146_v38 = vld [vmem:[#allocation2 + $0x1e8] sm:$0xff]  ;;  %v145_v60 = vld [vmem:[#allocation2 + $0x1e0] sm:$0xff] }
  0xad   :  { %1218 = vmatpush2.bf16.msra.mxu0 %v10828_v6  ;;  %1063 = vmatprep.mubr.bf16.mxu0 %v12836_v13  ;;  %v218_v51 = vld [vmem:[#allocation5 + $0x488] sm:$0xff]  ;;  %v12848_v57 = vpack.c.bf16 %v146_v38, %v142_v37  ;;  %v143_v6 = vld [vmem:[#allocation2 + $0x1d0] sm:$0xff]  ;;  %v12856_v20 = vpack.c.bf16 %v145_v60, %v141_v59 }
  0xae   :  { %1167 = vmatmul.mubr.bf16.gmra.mxu1 %v12834_v5  ;;  %1219 = vmatprep.subr.bf16.mxu0 %v10825_v8  ;;  %v220_v54 = vld [vmem:[#allocation5 + $0x4c8] sm:$0xff]  ;;  %v10816_v8 = vcombine.low %v222_v26, %v224_v29  ;;  %v1741_v37 = vld [vmem:[#allocation5 + $0xbd0] sm:$0xff] }
  0xaf   :  { %1331 = vmatpush2.bf16.msra.mxu1 %v10892_v7  ;;  %1176 = vmatprep.mubr.bf16.mxu1 %v12839_v18  ;;  %v282_v55 = vld [vmem:[#allocation5 + $0xc88] sm:$0xff]  ;;  %15909 = vst [vmem:[#allocation44_spill] sm:$0xff] %v12848_v57  ;;  %v147_v7 = vld [vmem:[#allocation2 + $0x1f0] sm:$0xff]  ;;  %v10813_v10 = vcombine.high %v218_v51, %v220_v54  ;;  %15911 = vst [vmem:[#allocation46_spill] sm:$0xff] %v12856_v20  ;;  %v10994_v59 = vcombine.low %v1739_v34, %v1741_v37 }
  0xb0   :  { %1332 = vmatprep.subr.bf16.mxu1 %v10889_v12  ;;  %v284_v0 = vld [vmem:[#allocation5 + $0xcc8] sm:$0xff]  ;;  %v12858_v23 = vpack.c.bf16 %v147_v7, %v143_v6  ;;  %v1733_v6 = vld [vmem:[#allocation5 + $0xad0] sm:$0xff] }
  0xb1   :  { %1220 = vmatpush2.bf16.msra.mxu0 %v10824_v24  ;;  %v214_v11 = vld [vmem:[#allocation5 + $0x408] sm:$0xff]  ;;  %v10877_v16 = vcombine.high %v282_v55, %v284_v0  ;;  %v10812_v24 = vcombine.low %v218_v51, %v220_v54  ;;  %v10876_v26 = vcombine.low %v282_v55, %v284_v0  ;;  %v1737_v51 = vld [vmem:[#allocation5 + $0xb50] sm:$0xff] }
  0xb2   :  { %1221 = vmatprep.subr.bf16.mxu0 %v10821_v33  ;;  %v216_v12 = vld [vmem:[#allocation5 + $0x448] sm:$0xff]  ;;  %15912 = vst [vmem:[#allocation47_spill] sm:$0xff] %v12858_v23  ;;  %v1677_v33 = vld [vmem:[#allocation5 + $0x3d0] sm:$0xff] }
  0xb3   :  { %1333 = vmatpush2.bf16.msra.mxu1 %v10888_v30  ;;  %v278_v14 = vld [vmem:[#allocation5 + $0xc08] sm:$0xff]  ;;  %v10809_v29 = vcombine.high %v214_v11, %v216_v12  ;;  %v1675_v30 = vld [vmem:[#allocation5 + $0x390] sm:$0xff]  ;;  %v10808_v38 = vcombine.low %v214_v11, %v216_v12 }
  0xb4   :  { %1334 = vmatprep.subr.bf16.mxu1 %v10885_v40  ;;  %1064 = vmatmul.mubr.bf16.gmra.mxu0 %v12844_v44  ;;  %v280_v17 = vld [vmem:[#allocation5 + $0xc48] sm:$0xff]  ;;  %v10931_v41 = vcombine.high %v1675_v30, %v1677_v33  ;;  %v10930_v54 = vcombine.low %v1675_v30, %v1677_v33  ;;  %v1667_v55 = vld [vmem:[#allocation5 + $0x290] sm:$0xff] }
  0xb5   :  { %1222 = vmatpush2.bf16.msra.mxu0 %v10820_v46  ;;  %1073 = vmatprep.mubr.bf16.mxu0 %v12848_v57  ;;  %v10873_v36 = vcombine.high %v278_v14, %v280_v17  ;;  %v10872_v40 = vcombine.low %v278_v14, %v280_v17  ;;  %v1673_v46 = vld [vmem:[#allocation5 + $0x350] sm:$0xff] }
  0xb6   :  { %1177 = vmatmul.mubr.bf16.gmra.mxu1 %v12846_v45  ;;  %1223 = vmatprep.subr.bf16.mxu0 %v10817_v50  ;;  %v10995_v50 = vcombine.high %v1739_v34, %v1741_v37  ;;  %v10927_v60 = vcombine.high %v1671_v42, %v1673_v46  ;;  %v1731_v0 = vld [vmem:[#allocation5 + $0xa90] sm:$0xff] }
  0xb7   :  { %1335 = vmatpush2.bf16.msra.mxu1 %v10884_v48  ;;  %1186 = vmatprep.mubr.bf16.mxu1 %v12851_v2  ;;  %v1735_v48 = vld [vmem:[#allocation5 + $0xb10] sm:$0xff]  ;;  %v10987_v17 = vcombine.high %v1731_v0, %v1733_v6  ;;  %v10986_v30 = vcombine.low %v1731_v0, %v1733_v6 }
  0xb8   :  { %1336 = vmatprep.subr.bf16.mxu1 %v10881_v56  ;;  %v1669_v56 = vld [vmem:[#allocation5 + $0x2d0] sm:$0xff]  ;;  %v10991_v7 = vcombine.high %v1735_v48, %v1737_v51  ;;  %v10990_v11 = vcombine.low %v1735_v48, %v1737_v51 }
  0xb9   :  { %1224 = vmatpush2.bf16.msra.mxu0 %v10816_v8  ;;  %v10926_v8 = vcombine.low %v1671_v42, %v1673_v46  ;;  %v10923_v12 = vcombine.high %v1667_v55, %v1669_v56  ;;  %v1727_v14 = vld [vmem:[#allocation5 + $0xa10] sm:$0xff] }
  0xba   :  { %1225 = vmatprep.subr.bf16.mxu0 %v10813_v10  ;;  %v1665_v10 = vld [vmem:[#allocation5 + $0x250] sm:$0xff] }
  0xbb   :  { %1337 = vmatpush2.bf16.msra.mxu1 %v10880_v9  ;;  %v1663_v9 = vld [vmem:[#allocation5 + $0x210] sm:$0xff] }
  0xbc   :  { %1338 = vmatprep.subr.bf16.mxu1 %v10877_v16  ;;  %1074 = vmatmul.mubr.bf16.gmra.mxu0 %v12856_v20  ;;  %v1729_v16 = vld [vmem:[#allocation5 + $0xa50] sm:$0xff]  ;;  %v10919_v33 = vcombine.high %v1663_v9, %v1665_v10 }
  0xbd   :  { %1226 = vmatpush2.bf16.msra.mxu0 %v10812_v24  ;;  %1229 = vmatprep.mubr.bf16.mxu0 %v12766_v58  ;;  %v10922_v24 = vcombine.low %v1667_v55, %v1669_v56  ;;  %v1723_v34 = vld [vmem:[#allocation5 + $0x990] sm:$0xff]  ;;  %v10983_v37 = vcombine.high %v1727_v14, %v1729_v16  ;;  %v10982_v42 = vcombine.low %v1727_v14, %v1729_v16 }
  0xbe   :  { %1187 = vmatmul.mubr.bf16.gmra.mxu1 %v12858_v23  ;;  %1227 = vmatprep.subr.bf16.mxu0 %v10809_v29  ;;  %v1661_v29 = vld [vmem:[#allocation5 + $0x1d0] sm:$0xff] }
  0xbf   :  { %1339 = vmatpush2.bf16.msra.mxu1 %v10876_v26  ;;  %1342 = vmatprep.mubr.bf16.mxu1 %v12768_v63  ;;  %v1659_v26 = vld [vmem:[#allocation5 + $0x190] sm:$0xff] }
  0xc0   :  { %1340 = vmatprep.subr.bf16.mxu1 %v10873_v36  ;;  %v1725_v36 = vld [vmem:[#allocation5 + $0x9d0] sm:$0xff]  ;;  %v10915_v46 = vcombine.high %v1659_v26, %v1661_v29 }
  0xc1   :  { %1228 = vmatpush2.bf16.msra.mxu0 %v10808_v38  ;;  %v10918_v38 = vcombine.low %v1663_v9, %v1665_v10  ;;  %v1719_v48 = vld [vmem:[#allocation5 + $0x910] sm:$0xff]  ;;  %v10979_v51 = vcombine.high %v1723_v34, %v1725_v36 }
  0xc2   :  { %2437 = vmatprep.subr.bf16.mxu0 %v10931_v41  ;;  %v1657_v41 = vld [vmem:[#allocation5 + $0x150] sm:$0xff] }
  0xc3   :  { %1341 = vmatpush2.bf16.msra.mxu1 %v10872_v40  ;;  %v1655_v40 = vld [vmem:[#allocation5 + $0x110] sm:$0xff] }
  0xc4   :  { %2550 = vmatprep.subr.bf16.mxu1 %v10995_v50  ;;  %1230 = vmatmul.mubr.bf16.vlgmr.msra.gmra.mxu0 %v12772_v21  ;;  %v1721_v50 = vld [vmem:[#allocation5 + $0x950] sm:$0xff] }
  0xc5   :  { %2438 = vmatpush1.bf16.msra.mxu0 %v10930_v54  ;;  %1239 = vmatprep.mubr.bf16.mxu0 %v12776_v32  ;;  %v10914_v54 = vcombine.low %v1659_v26, %v1661_v29  ;;  %v1651_v55 = vld [vmem:[#allocation5 + $0x90] sm:$0xff] }
  0xc6   :  { %1343 = vmatmul.mubr.bf16.vlgmr.msra.gmra.mxu1 %v12774_v25  ;;  %2439 = vmatprep.subr.bf16.mxu0 %v10927_v60  ;;  %v1653_v56 = vld [vmem:[#allocation5 + $0xd0] sm:$0xff]  ;;  %v10911_v60 = vcombine.high %v1655_v40, %v1657_v41 }
  0xc7   :  { %2551 = vmatpush1.bf16.msra.mxu1 %v10994_v59  ;;  %1352 = vmatprep.mubr.bf16.mxu1 %v12779_v35  ;;  %v10978_v59 = vcombine.low %v1723_v34, %v1725_v36  ;;  %v1715_v0 = vld [vmem:[#allocation5 + $0x890] sm:$0xff] }
  0xc8   :  { %2552 = vmatprep.subr.bf16.mxu1 %v10991_v7  ;;  %v1717_v6 = vld [vmem:[#allocation5 + $0x8d0] sm:$0xff]  ;;  %v10975_v7 = vcombine.high %v1719_v48, %v1721_v50 }
  0xc9   :  { %2440 = vmatpush1.bf16.msra.mxu0 %v10926_v8  ;;  %v10910_v8 = vcombine.low %v1655_v40, %v1657_v41  ;;  %v1647_v9 = vld [vmem:[#allocation5 + $0x10] sm:$0xff] }
  0xca   :  { %2441 = vmatprep.subr.bf16.mxu0 %v10923_v12  ;;  %v1649_v10 = vld [vmem:[#allocation5 + $0x50] sm:$0xff]  ;;  %v10907_v12 = vcombine.high %v1651_v55, %v1653_v56 }
  0xcb   :  { %2553 = vmatpush1.bf16.msra.mxu1 %v10990_v11  ;;  %v10974_v11 = vcombine.low %v1719_v48, %v1721_v50  ;;  %v1711_v14 = vld [vmem:[#allocation5 + $0x810] sm:$0xff] }
  0xcc   :  { %2554 = vmatprep.subr.bf16.mxu1 %v10987_v17  ;;  %1240 = vmatmul.mubr.bf16.gmra.mxu0 %v12784_v49  ;;  %v1713_v16 = vld [vmem:[#allocation5 + $0x850] sm:$0xff]  ;;  %v10971_v17 = vcombine.high %v1715_v0, %v1717_v6 }
  0xcd   :  { %2442 = vmatpush1.bf16.msra.mxu0 %v10922_v24  ;;  %1249 = vmatprep.mubr.bf16.mxu0 %v12788_v61  ;;  %v10906_v24 = vcombine.low %v1651_v55, %v1653_v56  ;;  %v1707_v26 = vld [vmem:[#allocation5 + $0x790] sm:$0xff] }
  0xce   :  { %1353 = vmatmul.mubr.bf16.gmra.mxu1 %v12786_v53  ;;  %2443 = vmatprep.subr.bf16.mxu0 %v10919_v33  ;;  %v1709_v29 = vld [vmem:[#allocation5 + $0x7d0] sm:$0xff]  ;;  %v10903_v33 = vcombine.high %v1647_v9, %v1649_v10 }
  0xcf   :  { %2555 = vmatpush1.bf16.msra.mxu1 %v10986_v30  ;;  %1362 = vmatprep.mubr.bf16.mxu1 %v12791_v1  ;;  %v10970_v30 = vcombine.low %v1715_v0, %v1717_v6  ;;  %v1771_v34 = vld [vmem:[#allocation5 + $0xf90] sm:$0xff] }
  0xd0   :  { %2556 = vmatprep.subr.bf16.mxu1 %v10983_v37  ;;  %v1773_v36 = vld [vmem:[#allocation5 + $0xfd0] sm:$0xff]  ;;  %v10967_v37 = vcombine.high %v1711_v14, %v1713_v16 }
  0xd1   :  { %2444 = vmatpush1.bf16.msra.mxu0 %v10918_v38  ;;  %v10902_v38 = vcombine.low %v1647_v9, %v1649_v10  ;;  %v1703_v40 = vld [vmem:[#allocation5 + $0x710] sm:$0xff] }
  0xd2   :  { %2445 = vmatprep.subr.bf16.mxu0 %v10915_v46  ;;  %v1705_v41 = vld [vmem:[#allocation5 + $0x750] sm:$0xff]  ;;  %v10963_v46 = vcombine.high %v1707_v26, %v1709_v29 }
  0xd3   :  { %2557 = vmatpush1.bf16.msra.mxu1 %v10982_v42  ;;  %v10966_v42 = vcombine.low %v1711_v14, %v1713_v16  ;;  %v1767_v48 = vld [vmem:[#allocation5 + $0xf10] sm:$0xff] }
  0xd4   :  { %2558 = vmatprep.subr.bf16.mxu1 %v10979_v51  ;;  %1250 = vmatmul.mubr.bf16.gmra.mxu0 %v12796_v15  ;;  %v1769_v50 = vld [vmem:[#allocation5 + $0xf50] sm:$0xff]  ;;  %v11027_v51 = vcombine.high %v1771_v34, %v1773_v36 }
  0xd5   :  { %2446 = vmatpush1.bf16.msra.mxu0 %v10914_v54  ;;  %1259 = vmatprep.mubr.bf16.mxu0 %v12800_v28  ;;  %v10962_v54 = vcombine.low %v1707_v26, %v1709_v29  ;;  %v1699_v55 = vld [vmem:[#allocation5 + $0x690] sm:$0xff] }
  0xd6   :  { %1363 = vmatmul.mubr.bf16.gmra.mxu1 %v12798_v19  ;;  %2447 = vmatprep.subr.bf16.mxu0 %v10911_v60  ;;  %v1701_v56 = vld [vmem:[#allocation5 + $0x6d0] sm:$0xff]  ;;  %v10959_v60 = vcombine.high %v1703_v40, %v1705_v41 }
  0xd7   :  { %2559 = vmatpush1.bf16.msra.mxu1 %v10978_v59  ;;  %1372 = vmatprep.mubr.bf16.mxu1 %v12803_v31  ;;  %v11026_v59 = vcombine.low %v1771_v34, %v1773_v36  ;;  %v1763_v0 = vld [vmem:[#allocation5 + $0xe90] sm:$0xff] }
  0xd8   :  { %2560 = vmatprep.subr.bf16.mxu1 %v10975_v7  ;;  %v1765_v6 = vld [vmem:[#allocation5 + $0xed0] sm:$0xff]  ;;  %v11023_v7 = vcombine.high %v1767_v48, %v1769_v50 }
  0xd9   :  { %2448 = vmatpush1.bf16.msra.mxu0 %v10910_v8  ;;  %v10958_v8 = vcombine.low %v1703_v40, %v1705_v41  ;;  %v1695_v9 = vld [vmem:[#allocation5 + $0x610] sm:$0xff] }
  0xda   :  { %2449 = vmatprep.subr.bf16.mxu0 %v10907_v12  ;;  %v1697_v10 = vld [vmem:[#allocation5 + $0x650] sm:$0xff]  ;;  %v10955_v12 = vcombine.high %v1699_v55, %v1701_v56 }
  0xdb   :  { %2561 = vmatpush1.bf16.msra.mxu1 %v10974_v11  ;;  %v11022_v11 = vcombine.low %v1767_v48, %v1769_v50  ;;  %v1759_v14 = vld [vmem:[#allocation5 + $0xe10] sm:$0xff] }
  0xdc   :  { %2562 = vmatprep.subr.bf16.mxu1 %v10971_v17  ;;  %1260 = vmatmul.mubr.bf16.gmra.mxu0 %v12808_v47  ;;  %v1761_v16 = vld [vmem:[#allocation5 + $0xe50] sm:$0xff]  ;;  %v11019_v17 = vcombine.high %v1763_v0, %v1765_v6 }
  0xdd   :  { %2450 = vmatpush1.bf16.msra.mxu0 %v10906_v24  ;;  %1269 = vmatprep.mubr.bf16.mxu0 %v12812_v62  ;;  %v10954_v24 = vcombine.low %v1699_v55, %v1701_v56  ;;  %v1691_v26 = vld [vmem:[#allocation5 + $0x590] sm:$0xff] }
  0xde   :  { %1373 = vmatmul.mubr.bf16.gmra.mxu1 %v12810_v52  ;;  %2451 = vmatprep.subr.bf16.mxu0 %v10903_v33  ;;  %v1693_v29 = vld [vmem:[#allocation5 + $0x5d0] sm:$0xff]  ;;  %v10951_v33 = vcombine.high %v1695_v9, %v1697_v10 }
  0xdf   :  { %2563 = vmatpush1.bf16.msra.mxu1 %v10970_v30  ;;  %1382 = vmatprep.mubr.bf16.mxu1 %v12815_v3  ;;  %v11018_v30 = vcombine.low %v1763_v0, %v1765_v6  ;;  %v1755_v34 = vld [vmem:[#allocation5 + $0xd90] sm:$0xff] }
  0xe0   :  { %2564 = vmatprep.subr.bf16.mxu1 %v10967_v37  ;;  %v1757_v36 = vld [vmem:[#allocation5 + $0xdd0] sm:$0xff]  ;;  %v11015_v37 = vcombine.high %v1759_v14, %v1761_v16 }
  0xe1   :  { %2452 = vmatpush1.bf16.msra.mxu0 %v10902_v38  ;;  %v10950_v38 = vcombine.low %v1695_v9, %v1697_v10  ;;  %v1687_v40 = vld [vmem:[#allocation5 + $0x510] sm:$0xff] }
  0xe2   :  { %2453 = vmatprep.subr.bf16.mxu0 %v10963_v46  ;;  %v1689_v41 = vld [vmem:[#allocation5 + $0x550] sm:$0xff]  ;;  %v10947_v46 = vcombine.high %v1691_v26, %v1693_v29 }
  0xe3   :  { %2565 = vmatpush1.bf16.msra.mxu1 %v10966_v42  ;;  %v11014_v42 = vcombine.low %v1759_v14, %v1761_v16  ;;  %v1751_v48 = vld [vmem:[#allocation5 + $0xd10] sm:$0xff] }
  0xe4   :  { %2566 = vmatprep.subr.bf16.mxu1 %v11027_v51  ;;  %1270 = vmatmul.mubr.bf16.gmra.mxu0 %v12820_v22  ;;  %v1753_v50 = vld [vmem:[#allocation5 + $0xd50] sm:$0xff]  ;;  %v11011_v51 = vcombine.high %v1755_v34, %v1757_v36 }
  0xe5   :  { %2454 = vmatpush2.bf16.msra.mxu0 %v10962_v54  ;;  %1279 = vmatprep.mubr.bf16.mxu0 %v12824_v39  ;;  %v10946_v54 = vcombine.low %v1691_v26, %v1693_v29  ;;  %v1683_v55 = vld [vmem:[#allocation5 + $0x490] sm:$0xff]  ;;  %v1676_v26 = vld [vmem:[#allocation5 + $0x398] sm:$0xff] }
  0xe6   :  { %1383 = vmatmul.mubr.bf16.gmra.mxu1 %v12822_v27  ;;  %2455 = vmatprep.subr.bf16.mxu0 %v10959_v60  ;;  %v1685_v56 = vld [vmem:[#allocation5 + $0x4d0] sm:$0xff]  ;;  %v10943_v60 = vcombine.high %v1687_v40, %v1689_v41  ;;  %v1678_v29 = vld [vmem:[#allocation5 + $0x3d8] sm:$0xff] }
  0xe7   :  { %2567 = vmatpush2.bf16.msra.mxu1 %v11026_v59  ;;  %1392 = vmatprep.mubr.bf16.mxu1 %v12827_v43  ;;  %v11010_v59 = vcombine.low %v1755_v34, %v1757_v36  ;;  %v1747_v0 = vld [vmem:[#allocation5 + $0xc90] sm:$0xff]  ;;  %v1740_v34 = vld [vmem:[#allocation5 + $0xb98] sm:$0xff] }
  0xe8   :  { %2568 = vmatprep.subr.bf16.mxu1 %v11023_v7  ;;  %v1749_v6 = vld [vmem:[#allocation5 + $0xcd0] sm:$0xff]  ;;  %v11007_v7 = vcombine.high %v1751_v48, %v1753_v50  ;;  %v1742_v36 = vld [vmem:[#allocation5 + $0xbd8] sm:$0xff] }
  0xe9   :  { %2456 = vmatpush2.bf16.msra.mxu0 %v10958_v8  ;;  %v10942_v8 = vcombine.low %v1687_v40, %v1689_v41  ;;  %v1679_v9 = vld [vmem:[#allocation5 + $0x410] sm:$0xff]  ;;  %v1672_v40 = vld [vmem:[#allocation5 + $0x318] sm:$0xff] }
  0xea   :  { %2457 = vmatprep.subr.bf16.mxu0 %v10955_v12  ;;  %v1681_v10 = vld [vmem:[#allocation5 + $0x450] sm:$0xff]  ;;  %v10939_v12 = vcombine.high %v1683_v55, %v1685_v56  ;;  %v1674_v41 = vld [vmem:[#allocation5 + $0x358] sm:$0xff] }
  0xeb   :  { %2569 = vmatpush2.bf16.msra.mxu1 %v11022_v11  ;;  %v11006_v11 = vcombine.low %v1751_v48, %v1753_v50  ;;  %v1743_v14 = vld [vmem:[#allocation5 + $0xc10] sm:$0xff]  ;;  %v1736_v48 = vld [vmem:[#allocation5 + $0xb18] sm:$0xff] }
  0xec   :  { %2570 = vmatprep.subr.bf16.mxu1 %v11019_v17  ;;  %1280 = vmatmul.mubr.bf16.gmra.mxu0 %v12832_v4  ;;  %v1745_v16 = vld [vmem:[#allocation5 + $0xc50] sm:$0xff]  ;;  %v11003_v17 = vcombine.high %v1747_v0, %v1749_v6  ;;  %v1738_v50 = vld [vmem:[#allocation5 + $0xb58] sm:$0xff] }
  0xed   :  { %2458 = vmatpush2.bf16.msra.mxu0 %v10954_v24  ;;  %1289 = vmatprep.mubr.bf16.mxu0 %v12836_v13  ;;  %v10938_v24 = vcombine.low %v1683_v55, %v1685_v56  ;;  %v1668_v55 = vld [vmem:[#allocation5 + $0x298] sm:$0xff] }
  0xee   :  { %1393 = vmatmul.mubr.bf16.gmra.mxu1 %v12834_v5  ;;  %2459 = vmatprep.subr.bf16.mxu0 %v10951_v33  ;;  %v10935_v33 = vcombine.high %v1679_v9, %v1681_v10  ;;  %v1670_v56 = vld [vmem:[#allocation5 + $0x2d8] sm:$0xff] }
  0xef   :  { %2571 = vmatpush2.bf16.msra.mxu1 %v11018_v30  ;;  %1402 = vmatprep.mubr.bf16.mxu1 %v12839_v18  ;;  %v11002_v30 = vcombine.low %v1747_v0, %v1749_v6  ;;  %v1732_v0 = vld [vmem:[#allocation5 + $0xa98] sm:$0xff] }
  0xf0   :  { %2572 = vmatprep.subr.bf16.mxu1 %v11015_v37  ;;  %v10999_v37 = vcombine.high %v1743_v14, %v1745_v16  ;;  %v1734_v6 = vld [vmem:[#allocation5 + $0xad8] sm:$0xff] }
  0xf1   :  { %2460 = vmatpush2.bf16.msra.mxu0 %v10950_v38  ;;  %v10934_v38 = vcombine.low %v1679_v9, %v1681_v10  ;;  %v1664_v9 = vld [vmem:[#allocation5 + $0x218] sm:$0xff] }
  0xf2   :  { %2461 = vmatprep.subr.bf16.mxu0 %v10947_v46  ;;  %v10933_v46 = vcombine.high %v1676_v26, %v1678_v29  ;;  %v1666_v10 = vld [vmem:[#allocation5 + $0x258] sm:$0xff] }
  0xf3   :  { %2573 = vmatpush2.bf16.msra.mxu1 %v11014_v42  ;;  %v10998_v42 = vcombine.low %v1743_v14, %v1745_v16  ;;  %v1728_v14 = vld [vmem:[#allocation5 + $0xa18] sm:$0xff] }
  0xf4   :  { %2574 = vmatprep.subr.bf16.mxu1 %v11011_v51  ;;  %1290 = vmatmul.mubr.bf16.gmra.mxu0 %v12844_v44  ;;  %v10997_v51 = vcombine.high %v1740_v34, %v1742_v36  ;;  %v1730_v16 = vld [vmem:[#allocation5 + $0xa58] sm:$0xff] }
  0xf5   :  { %2462 = vmatpush2.bf16.msra.mxu0 %v10946_v54  ;;  %1299 = vmatprep.mubr.bf16.mxu0 %v12848_v57  ;;  %v10932_v54 = vcombine.low %v1676_v26, %v1678_v29  ;;  %v1660_v26 = vld [vmem:[#allocation5 + $0x198] sm:$0xff] }
  0xf6   :  { %1403 = vmatmul.mubr.bf16.gmra.mxu1 %v12846_v45  ;;  %2463 = vmatprep.subr.bf16.mxu0 %v10943_v60  ;;  %v10929_v60 = vcombine.high %v1672_v40, %v1674_v41  ;;  %v1662_v29 = vld [vmem:[#allocation5 + $0x1d8] sm:$0xff] }
  0xf7   :  { %2575 = vmatpush2.bf16.msra.mxu1 %v11010_v59  ;;  %1412 = vmatprep.mubr.bf16.mxu1 %v12851_v2  ;;  %v10996_v59 = vcombine.low %v1740_v34, %v1742_v36  ;;  %v1724_v34 = vld [vmem:[#allocation5 + $0x998] sm:$0xff] }
  0xf8   :  { %2576 = vmatprep.subr.bf16.mxu1 %v11007_v7  ;;  %v10993_v7 = vcombine.high %v1736_v48, %v1738_v50  ;;  %v1726_v36 = vld [vmem:[#allocation5 + $0x9d8] sm:$0xff] }
  0xf9   :  { %2464 = vmatpush2.bf16.msra.mxu0 %v10942_v8  ;;  %v10928_v8 = vcombine.low %v1672_v40, %v1674_v41  ;;  %v1656_v40 = vld [vmem:[#allocation5 + $0x118] sm:$0xff] }
  0xfa   :  { %2465 = vmatprep.subr.bf16.mxu0 %v10939_v12  ;;  %v10925_v12 = vcombine.high %v1668_v55, %v1670_v56  ;;  %v1658_v41 = vld [vmem:[#allocation5 + $0x158] sm:$0xff] }
  0xfb   :  { %2577 = vmatpush2.bf16.msra.mxu1 %v11006_v11  ;;  %v10992_v11 = vcombine.low %v1736_v48, %v1738_v50  ;;  %v1720_v48 = vld [vmem:[#allocation5 + $0x918] sm:$0xff] }
  0xfc   :  { %2578 = vmatprep.subr.bf16.mxu1 %v11003_v17  ;;  %1300 = vmatmul.mubr.bf16.gmra.mxu0 %v12856_v20  ;;  %v10989_v17 = vcombine.high %v1732_v0, %v1734_v6  ;;  %v1722_v50 = vld [vmem:[#allocation5 + $0x958] sm:$0xff] }
  0xfd   :  { %2466 = vmatpush2.bf16.msra.mxu0 %v10938_v24  ;;  %2469 = vmatprep.mubr.bf16.mxu0 %v12766_v58  ;;  %v10924_v24 = vcombine.low %v1668_v55, %v1670_v56  ;;  %v1652_v55 = vld [vmem:[#allocation5 + $0x98] sm:$0xff] }
  0xfe   :  { %1413 = vmatmul.mubr.bf16.gmra.mxu1 %v12858_v23  ;;  %2467 = vmatprep.subr.bf16.mxu0 %v10935_v33  ;;  %v10921_v33 = vcombine.high %v1664_v9, %v1666_v10  ;;  %v1654_v56 = vld [vmem:[#allocation5 + $0xd8] sm:$0xff] }
  0xff   :  { %2579 = vmatpush2.bf16.msra.mxu1 %v11002_v30  ;;  %2582 = vmatprep.mubr.bf16.mxu1 %v12768_v63  ;;  %v10988_v30 = vcombine.low %v1732_v0, %v1734_v6  ;;  %v10977_v0 = vcombine.high %v1720_v48, %v1722_v50  ;;  %v1716_v6 = vld [vmem:[#allocation5 + $0x898] sm:$0xff] }
 0x100   :  { %2580 = vmatprep.subr.bf16.mxu1 %v10999_v37  ;;  %v10985_v37 = vcombine.high %v1728_v14, %v1730_v16 }
 0x101   :  { %2468 = vmatpush2.bf16.msra.mxu0 %v10934_v38  ;;  %v10920_v38 = vcombine.low %v1664_v9, %v1666_v10  ;;  %v1648_v9 = vld [vmem:[#allocation5 + $0x18] sm:$0xff] }
 0x102   :  { %2663 = vmatprep.subr.bf16.mxu0 %v10933_v46  ;;  %v10917_v46 = vcombine.high %v1660_v26, %v1662_v29  ;;  %v1650_v10 = vld [vmem:[#allocation5 + $0x58] sm:$0xff] }
 0x103   :  { %2581 = vmatpush2.bf16.msra.mxu1 %v10998_v42  ;;  %v10984_v42 = vcombine.low %v1728_v14, %v1730_v16  ;;  %v1712_v16 = vld [vmem:[#allocation5 + $0x818] sm:$0xff] }
 0x104   :  { %2776 = vmatprep.subr.bf16.mxu1 %v10997_v51  ;;  %2470 = vmatmul.mubr.bf16.vlgmr.msra.gmra.mxu0 %v12772_v21  ;;  %v10981_v51 = vcombine.high %v1724_v34, %v1726_v36 }
 0x105   :  { %2664 = vmatpush1.bf16.msra.mxu0 %v10932_v54  ;;  %2479 = vmatprep.mubr.bf16.mxu0 %v12776_v32  ;;  %v10916_v54 = vcombine.low %v1660_v26, %v1662_v29  ;;  %v1708_v26 = vld [vmem:[#allocation5 + $0x798] sm:$0xff] }
 0x106   :  { %2583 = vmatmul.mubr.bf16.vlgmr.msra.gmra.mxu1 %v12774_v25  ;;  %2665 = vmatprep.subr.bf16.mxu0 %v10929_v60  ;;  %v10913_v60 = vcombine.high %v1656_v40, %v1658_v41  ;;  %v1710_v29 = vld [vmem:[#allocation5 + $0x7d8] sm:$0xff] }
 0x107   :  { %2777 = vmatpush1.bf16.msra.mxu1 %v10996_v59  ;;  %2592 = vmatprep.mubr.bf16.mxu1 %v12779_v35  ;;  %v10980_v59 = vcombine.low %v1724_v34, %v1726_v36  ;;  %v1772_v36 = vld [vmem:[#allocation5 + $0xf98] sm:$0xff] }
 0x108   :  { %2778 = vmatprep.subr.bf16.mxu1 %v10993_v7  ;;  %v1718_v7 = vld [vmem:[#allocation5 + $0x8d8] sm:$0xff] }
 0x109   :  { %2666 = vmatpush1.bf16.msra.mxu0 %v10928_v8  ;;  %v10912_v8 = vcombine.low %v1656_v40, %v1658_v41  ;;  %v10973_v14 = vcombine.high %v1716_v6, %v1718_v7  ;;  %v1704_v40 = vld [vmem:[#allocation5 + $0x718] sm:$0xff] }
 0x10a   :  { %2667 = vmatprep.subr.bf16.mxu0 %v10925_v12  ;;  %v10909_v12 = vcombine.high %v1652_v55, %v1654_v56  ;;  %v1706_v41 = vld [vmem:[#allocation5 + $0x758] sm:$0xff] }
 0x10b   :  { %2779 = vmatpush1.bf16.msra.mxu1 %v10992_v11  ;;  %v10976_v11 = vcombine.low %v1720_v48, %v1722_v50  ;;  %v1768_v50 = vld [vmem:[#allocation5 + $0xf18] sm:$0xff] }
 0x10c   :  { %2780 = vmatprep.subr.bf16.mxu1 %v10989_v17  ;;  %2480 = vmatmul.mubr.bf16.gmra.mxu0 %v12784_v49  ;;  %v1714_v17 = vld [vmem:[#allocation5 + $0x858] sm:$0xff] }
 0x10d   :  { %2668 = vmatpush1.bf16.msra.mxu0 %v10924_v24  ;;  %2489 = vmatprep.mubr.bf16.mxu0 %v12788_v61  ;;  %v10908_v24 = vcombine.low %v1652_v55, %v1654_v56  ;;  %v10969_v34 = vcombine.high %v1712_v16, %v1714_v17  ;;  %v1700_v55 = vld [vmem:[#allocation5 + $0x698] sm:$0xff] }
 0x10e   :  { %2593 = vmatmul.mubr.bf16.gmra.mxu1 %v12786_v53  ;;  %2669 = vmatprep.subr.bf16.mxu0 %v10921_v33  ;;  %v10905_v33 = vcombine.high %v1648_v9, %v1650_v10  ;;  %v1702_v56 = vld [vmem:[#allocation5 + $0x6d8] sm:$0xff] }
 0x10f   :  { %2781 = vmatpush1.bf16.msra.mxu1 %v10988_v30  ;;  %2602 = vmatprep.mubr.bf16.mxu1 %v12791_v1  ;;  %v10972_v30 = vcombine.low %v1716_v6, %v1718_v7  ;;  %v1764_v6 = vld [vmem:[#allocation5 + $0xe98] sm:$0xff] }
 0x110   :  { %2782 = vmatprep.subr.bf16.mxu1 %v10985_v37  ;;  %v1774_v37 = vld [vmem:[#allocation5 + $0xfd8] sm:$0xff] }
 0x111   :  { %2670 = vmatpush1.bf16.msra.mxu0 %v10920_v38  ;;  %v10904_v38 = vcombine.low %v1648_v9, %v1650_v10  ;;  %v11029_v48 = vcombine.high %v1772_v36, %v1774_v37  ;;  %v1766_v7 = vld [vmem:[#allocation5 + $0xed8] sm:$0xff] }
 0x112   :  { %2671 = vmatprep.subr.bf16.mxu0 %v10917_v46  ;;  %v10965_v46 = vcombine.high %v1708_v26, %v1710_v29  ;;  %v1696_v9 = vld [vmem:[#allocation5 + $0x618] sm:$0xff] }
 0x113   :  { %2783 = vmatpush1.bf16.msra.mxu1 %v10984_v42  ;;  %v10968_v42 = vcombine.low %v1712_v16, %v1714_v17  ;;  %v1698_v10 = vld [vmem:[#allocation5 + $0x658] sm:$0xff] }
 0x114   :  { %2784 = vmatprep.subr.bf16.mxu1 %v10981_v51  ;;  %2490 = vmatmul.mubr.bf16.gmra.mxu0 %v12796_v15  ;;  %v1770_v51 = vld [vmem:[#allocation5 + $0xf58] sm:$0xff] }
 0x115   :  { %2672 = vmatpush1.bf16.msra.mxu0 %v10916_v54  ;;  %2499 = vmatprep.mubr.bf16.mxu0 %v12800_v28  ;;  %v10964_v54 = vcombine.low %v1708_v26, %v1710_v29  ;;  %v1760_v16 = vld [vmem:[#allocation5 + $0xe18] sm:$0xff] }
 0x116   :  { %2603 = vmatmul.mubr.bf16.gmra.mxu1 %v12798_v19  ;;  %2673 = vmatprep.subr.bf16.mxu0 %v10913_v60  ;;  %v10961_v60 = vcombine.high %v1704_v40, %v1706_v41  ;;  %v1762_v17 = vld [vmem:[#allocation5 + $0xe58] sm:$0xff] }
 0x117   :  { %2785 = vmatpush1.bf16.msra.mxu1 %v10980_v59  ;;  %2612 = vmatprep.mubr.bf16.mxu1 %v12803_v31  ;;  %v11028_v59 = vcombine.low %v1772_v36, %v1774_v37  ;;  %v1692_v26 = vld [vmem:[#allocation5 + $0x598] sm:$0xff] }
 0x118   :  { %2786 = vmatprep.subr.bf16.mxu1 %v10977_v0  ;;  %v11025_v0 = vcombine.high %v1768_v50, %v1770_v51  ;;  %v1694_v29 = vld [vmem:[#allocation5 + $0x5d8] sm:$0xff] }
 0x119   :  { %2674 = vmatpush1.bf16.msra.mxu0 %v10912_v8  ;;  %v10960_v8 = vcombine.low %v1704_v40, %v1706_v41  ;;  %v1756_v36 = vld [vmem:[#allocation5 + $0xd98] sm:$0xff] }
 0x11a   :  { %2675 = vmatprep.subr.bf16.mxu0 %v10909_v12  ;;  %v10957_v12 = vcombine.high %v1700_v55, %v1702_v56  ;;  %v1758_v37 = vld [vmem:[#allocation5 + $0xdd8] sm:$0xff] }
 0x11b   :  { %2787 = vmatpush1.bf16.msra.mxu1 %v10976_v11  ;;  %v11024_v11 = vcombine.low %v1768_v50, %v1770_v51  ;;  %v1688_v40 = vld [vmem:[#allocation5 + $0x518] sm:$0xff] }
 0x11c   :  { %2788 = vmatprep.subr.bf16.mxu1 %v10973_v14  ;;  %2500 = vmatmul.mubr.bf16.gmra.mxu0 %v12808_v47  ;;  %v11021_v14 = vcombine.high %v1764_v6, %v1766_v7  ;;  %v1690_v41 = vld [vmem:[#allocation5 + $0x558] sm:$0xff] }
 0x11d   :  { %2676 = vmatpush1.bf16.msra.mxu0 %v10908_v24  ;;  %2509 = vmatprep.mubr.bf16.mxu0 %v12812_v62  ;;  %v10956_v24 = vcombine.low %v1700_v55, %v1702_v56  ;;  %v1752_v50 = vld [vmem:[#allocation5 + $0xd18] sm:$0xff] }
 0x11e   :  { %2613 = vmatmul.mubr.bf16.gmra.mxu1 %v12810_v52  ;;  %2677 = vmatprep.subr.bf16.mxu0 %v10905_v33  ;;  %v10953_v33 = vcombine.high %v1696_v9, %v1698_v10  ;;  %v1754_v51 = vld [vmem:[#allocation5 + $0xd58] sm:$0xff] }
 0x11f   :  { %2789 = vmatpush1.bf16.msra.mxu1 %v10972_v30  ;;  %2622 = vmatprep.mubr.bf16.mxu1 %v12815_v3  ;;  %v11020_v30 = vcombine.low %v1764_v6, %v1766_v7  ;;  %v1684_v55 = vld [vmem:[#allocation5 + $0x498] sm:$0xff] }
 0x120   :  { %2790 = vmatprep.subr.bf16.mxu1 %v10969_v34  ;;  %v11017_v34 = vcombine.high %v1760_v16, %v1762_v17  ;;  %v1686_v56 = vld [vmem:[#allocation5 + $0x4d8] sm:$0xff] }
 0x121   :  { %2678 = vmatpush1.bf16.msra.mxu0 %v10904_v38  ;;  %v10952_v38 = vcombine.low %v1696_v9, %v1698_v10  ;;  %v1748_v6 = vld [vmem:[#allocation5 + $0xc98] sm:$0xff] }
 0x122   :  { %2679 = vmatprep.subr.bf16.mxu0 %v10965_v46  ;;  %v10949_v46 = vcombine.high %v1692_v26, %v1694_v29  ;;  %v1750_v7 = vld [vmem:[#allocation5 + $0xcd8] sm:$0xff] }
 0x123   :  { %2791 = vmatpush1.bf16.msra.mxu1 %v10968_v42  ;;  %v11016_v42 = vcombine.low %v1760_v16, %v1762_v17  ;;  %v1680_v9 = vld [vmem:[#allocation5 + $0x418] sm:$0xff]  ;;  %v11005_v16 = vcombine.high %v1748_v6, %v1750_v7 }
 0x124   :  { %2792 = vmatprep.subr.bf16.mxu1 %v11029_v48  ;;  %2510 = vmatmul.mubr.bf16.gmra.mxu0 %v12820_v22  ;;  %v11013_v48 = vcombine.high %v1756_v36, %v1758_v37  ;;  %v1682_v10 = vld [vmem:[#allocation5 + $0x458] sm:$0xff] }
 0x125   :  { %2680 = vmatpush2.bf16.msra.mxu0 %v10964_v54  ;;  %2519 = vmatprep.mubr.bf16.mxu0 %v12824_v39  ;;  %v10948_v54 = vcombine.low %v1692_v26, %v1694_v29  ;;  %v1744_v17 = vld [vmem:[#allocation5 + $0xc18] sm:$0xff]  ;;  %v10940_v26 = vcombine.low %v1684_v55, %v1686_v56 }
 0x126   :  { %2623 = vmatmul.mubr.bf16.gmra.mxu1 %v12822_v27  ;;  %2681 = vmatprep.subr.bf16.mxu0 %v10961_v60  ;;  %v10945_v60 = vcombine.high %v1688_v40, %v1690_v41 }
 0x127   :  { %2793 = vmatpush2.bf16.msra.mxu1 %v11028_v59  ;;  %2632 = vmatprep.mubr.bf16.mxu1 %v12827_v43  ;;  %v11012_v59 = vcombine.low %v1756_v36, %v1758_v37  ;;  %v12927_v36 = vld [vmem:[#allocation7] sm:$0xf]  ;;  %v11812_v37 = vld [vmem:[#allocation8 + $0x4e4] ss:$16 sps:$4 sm:$0xff]  }
 0x128   :  { %2794 = vmatprep.subr.bf16.mxu1 %v11025_v0  ;;  %v11009_v0 = vcombine.high %v1752_v50, %v1754_v51 }
 0x129   :  { %2682 = vmatpush2.bf16.msra.mxu0 %v10960_v8  ;;  %v10944_v8 = vcombine.low %v1688_v40, %v1690_v41 }
 0x12a   :  { %2683 = vmatprep.subr.bf16.mxu0 %v10957_v12  ;;  %v11008_v12 = vcombine.low %v1752_v50, %v1754_v51  ;;  %v11815_v51 = vld [vmem:[#allocation8 + $0x4c4] ss:$16 sps:$4 sm:$0xff]  }
 0x12b   :  { %2795 = vmatpush2.bf16.msra.mxu1 %v11024_v11  ;;  %v311_v11 = vlaneseq }
 0x12c   :  { %2796 = vmatprep.subr.bf16.mxu1 %v11021_v14  ;;  %2520 = vmatmul.mubr.bf16.gmra.mxu0 %v12832_v4  ;;  %v10941_v14 = vcombine.high %v1684_v55, %v1686_v56  ;;  %v11813_v55 = vld [vmem:[#allocation8 + $0x4c0] ss:$16 sps:$4 sm:$0xff]  }
 0x12d   :  { %2684 = vmatpush2.bf16.msra.mxu0 %v10956_v24  ;;  %2529 = vmatprep.mubr.bf16.mxu0 %v12836_v13  ;;  %v1746_v24 = vld [vmem:[#allocation5 + $0xc58] sm:$0xff]  ;;  %v12924_v29 = vshrl.u32 %v311_v11, 7 }
 0x12e   :  { %2633 = vmatmul.mubr.bf16.gmra.mxu1 %v12834_v5  ;;  %2685 = vmatprep.subr.bf16.mxu0 %v10953_v33  ;;  %v10937_v33 = vcombine.high %v1680_v9, %v1682_v10  ;;  %v11000_v41 = vcombine.low %v1744_v17, %v1746_v24 }
 0x12f   :  { %2797 = vmatpush2.bf16.msra.mxu1 %v11020_v30  ;;  %2642 = vmatprep.mubr.bf16.mxu1 %v12839_v18  ;;  %v11004_v30 = vcombine.low %v1748_v6, %v1750_v7  ;;  %v12931_v40 = vsub.s32 0, %v12924_v29 }
 0x130   :  { %2798 = vmatprep.subr.bf16.mxu1 %v11017_v34  ;;  %v11001_v34 = vcombine.high %v1744_v17, %v1746_v24 }
 0x131   :  { %2686 = vmatpush2.bf16.msra.mxu0 %v10952_v38  ;;  %v10936_v38 = vcombine.low %v1680_v9, %v1682_v10  ;;  %15913 = vst [vmem:[#allocation48_spill] sm:$0xff] %v12931_v40  ;;  %v11816_v10 = vld [vmem:[#allocation8 + $0x4a0] ss:$16 sps:$4 sm:$0xff]  }
 0x132   :  { %2687 = vmatprep.subr.bf16.mxu0 %v10949_v46  ;;  %v11810_v46 = vld [vmem:[#allocation8 + $0x4e0] ss:$16 sps:$4 sm:$0xff]  }
 0x133   :  { %2799 = vmatpush2.bf16.msra.mxu1 %v11016_v42  ;;  %v12935_v42 = vsub.s32 1, %v12924_v29 }
 0x134   :  { %2800 = vmatprep.subr.bf16.mxu1 %v11013_v48  ;;  %2530 = vmatmul.mubr.bf16.gmra.mxu0 %v12844_v44  ;;  %v12940_v48 = vrot.slane %v12927_v36, %v12931_v40 }
 0x135   :  { %2688 = vmatpush2.bf16.msra.mxu0 %v10948_v54  ;;  %2539 = vmatprep.mubr.bf16.mxu0 %v12848_v57  ;;  %15914 = vst [vmem:[#allocation49_spill] sm:$0xff] %v12935_v42  ;;  %v12944_v50 = vrot.slane %v12927_v36, %v12935_v42 }
 0x136   :  { %2643 = vmatmul.mubr.bf16.gmra.mxu1 %v12846_v45  ;;  %2689 = vmatprep.subr.bf16.mxu0 %v10945_v60 }
 0x137   :  { %2801 = vmatpush2.bf16.msra.mxu1 %v11012_v59  ;;  %2652 = vmatprep.mubr.bf16.mxu1 %v12851_v2 }
 0x138   :  { %2802 = vmatprep.subr.bf16.mxu1 %v11009_v0 }
 0x139   :  { %2690 = vmatpush2.bf16.msra.mxu0 %v10944_v8  ;;  %v11818_v8 = vld [vmem:[#allocation8 + $0x4a4] ss:$16 sps:$4 sm:$0xff]  }
 0x13a   :  { %2691 = vmatprep.subr.bf16.mxu0 %v10941_v14 }
 0x13b   :  { %2803 = vmatpush2.bf16.msra.mxu1 %v11008_v12 }
 0x13c   :  { %2804 = vmatprep.subr.bf16.mxu1 %v11005_v16  ;;  %2540 = vmatmul.mubr.bf16.gmra.mxu0 %v12856_v20 }
 0x13d   :  { %2692 = vmatpush2.bf16.msra.mxu0 %v10940_v26  ;;  %2695 = vmatprep.mubr.bf16.mxu0 %v12766_v58 }
 0x13e   :  { %2653 = vmatmul.mubr.bf16.gmra.mxu1 %v12858_v23  ;;  %2693 = vmatprep.subr.bf16.mxu0 %v10937_v33 }
 0x13f   :  { %2805 = vmatpush2.bf16.msra.mxu1 %v11004_v30  ;;  %2808 = vmatprep.mubr.bf16.mxu1 %v12768_v63  ;;  %v11821_v30 = vld [vmem:[#allocation8 + $0x484] ss:$16 sps:$4 sm:$0xff]  }
 0x140   :  { %2806 = vmatprep.subr.bf16.mxu1 %v11001_v34  ;;  %v11819_v34 = vld [vmem:[#allocation8 + $0x480] ss:$16 sps:$4 sm:$0xff]  }
 0x141   :  { %2694 = vmatpush2.bf16.msra.mxu0 %v10936_v38 }
 0x142   :  { %3753 = vmatprep.subr.bf16.mxu0 %v11812_v37 }
 0x143   :  { %2807 = vmatpush2.bf16.msra.mxu1 %v11000_v41 }
 0x144   :  { %v1005_v54 = vpop.f32.mrf.mxu0  ;;  %2696 = vmatmul.mubr.bf16.vlgmr.msra.gmra.mxu0 %v12772_v21 }
 0x145   :  { %v1006_v56 = vadd.f32 %v1005_v54, %v12940_v48  ;;  %2705 = vmatprep.mubr.bf16.mxu0 %v12776_v32  ;;  %3754 = vmatpush1.bf16.msra.mxu0 %v11810_v46 }
 0x146   :  { %v1118_v59 = vpop.f32.mrf.mxu1  ;;  %2809 = vmatmul.mubr.bf16.vlgmr.msra.gmra.mxu1 %v12774_v25  ;;  %v1007_v60 = vpop.f32.mrf.mxu0  ;;  %3755 = vmatprep.subr.bf16.mxu0 %v11815_v51 }
 0x147   :  { %2818 = vmatprep.mubr.bf16.mxu1 %v12779_v35  ;;  %v1119_v0 = vadd.f32 %v1118_v59, %v1006_v56  ;;  %v1008_v6 = vadd.f32 %v1007_v60, %v12944_v50 }
 0x148   :  { %v1120_v7 = vpop.f32.mrf.mxu1  ;;  %v1009_v9 = vpop.f32.mrf.mxu0 }
 0x149   :  { %v1121_v11 = vadd.f32 %v1120_v7, %v1008_v6  ;;  %v1010_v12 = vadd.f32 %v1009_v9, %v12940_v48  ;;  %3756 = vmatpush1.bf16.msra.mxu0 %v11813_v55  ;;  %v1423_v37 = vmax.f32 %v1119_v0, 0.0  ;;  %v11824_v7 = vld [vmem:[#allocation8 + $0x464] ss:$16 sps:$4 sm:$0xff]   ;;  %v11822_v9 = vld [vmem:[#allocation8 + $0x460] ss:$16 sps:$4 sm:$0xff]  }
 0x14a   :  { %v1122_v14 = vpop.f32.mrf.mxu1  ;;  %v1011_v16 = vpop.f32.mrf.mxu0  ;;  %3757 = vmatprep.subr.bf16.mxu0 %v11818_v8 }
 0x14b   :  { %v1123_v17 = vadd.f32 %v1122_v14, %v1010_v12  ;;  %v1012_v24 = vadd.f32 %v1011_v16, %v12944_v50  ;;  %v1424_v54 = vmax.f32 %v1121_v11, 0.0 }
 0x14c   :  { %v1124_v26 = vpop.f32.mrf.mxu1  ;;  %v1015_v33 = vpop.f32.mrf.mxu0  ;;  %2706 = vmatmul.mubr.bf16.gmra.mxu0 %v12784_v49 }
 0x14d   :  { %v1427_v38 = vmax.f32 %v1123_v17, 0.0  ;;  %v1125_v41 = vadd.f32 %v1124_v26, %v1012_v24  ;;  %v1016_v46 = vadd.f32 %v1015_v33, %v12940_v48  ;;  %2715 = vmatprep.mubr.bf16.mxu0 %v12788_v61  ;;  %3758 = vmatpush1.bf16.msra.mxu0 %v11816_v10  ;;  %v11827_v33 = vld [vmem:[#allocation8 + $0x444] ss:$16 sps:$4 sm:$0xff]  }
 0x14e   :  { %v1128_v51 = vpop.f32.mrf.mxu1  ;;  %2819 = vmatmul.mubr.bf16.gmra.mxu1 %v12786_v53  ;;  %v1017_v55 = vpop.f32.mrf.mxu0  ;;  %3759 = vmatprep.subr.bf16.mxu0 %v11821_v30  ;;  %v11825_v30 = vld [vmem:[#allocation8 + $0x440] ss:$16 sps:$4 sm:$0xff]  }
 0x14f   :  { %2828 = vmatprep.mubr.bf16.mxu1 %v12791_v1  ;;  %v12959_v56 = vpack.c.bf16 %v1427_v38, %v1423_v37  ;;  %v1428_v59 = vmax.f32 %v1125_v41, 0.0  ;;  %v1129_v60 = vadd.f32 %v1128_v51, %v1016_v46  ;;  %v1018_v0 = vadd.f32 %v1017_v55, %v12944_v50  ;;  %v11860_v37 = vld [vmem:[#allocation8 + $0x6e4] ss:$16 sps:$4 sm:$0xff]   ;;  %v11858_v41 = vld [vmem:[#allocation8 + $0x6e0] ss:$16 sps:$4 sm:$0xff]  }
 0x150   :  { %v1130_v6 = vpop.f32.mrf.mxu1  ;;  %v1019_v8 = vpop.f32.mrf.mxu0  ;;  %3866 = vmatprep.subr.bf16.mxu1 %v11860_v37  ;;  %v11833_v37 = vld [vmem:[#allocation8 + $0x404] ss:$16 sps:$4 sm:$0xff]   ;;  %v11924_v53 = vld [vmem:[#allocation8 + $0x780] ss:$16 sps:$4 sm:$0xff]  }
 0x151   :  { %v1131_v12 = vadd.f32 %v1130_v6, %v1018_v0  ;;  %v1020_v14 = vadd.f32 %v1019_v8, %v12940_v48  ;;  %v12963_v11 = vpack.c.bf16 %v1428_v59, %v1424_v54  ;;  %3760 = vmatpush1.bf16.msra.mxu0 %v11819_v34  ;;  %v1431_v46 = vmax.f32 %v1129_v60, 0.0  ;;  %3867 = vmatpush1.bf16.msra.mxu1 %v11858_v41  ;;  %v11831_v41 = vld [vmem:[#allocation8 + $0x400] ss:$16 sps:$4 sm:$0xff]  }
 0x152   :  { %v1132_v16 = vpop.f32.mrf.mxu1  ;;  %v1021_v17 = vpop.f32.mrf.mxu0  ;;  %3761 = vmatprep.subr.bf16.mxu0 %v11824_v7 }
 0x153   :  { %v1133_v10 = vadd.f32 %v1132_v16, %v1020_v14  ;;  %v1022_v24 = vadd.f32 %v1021_v17, %v12944_v50  ;;  %v1432_v34 = vmax.f32 %v1131_v12, 0.0  ;;  %v11830_v16 = vld [vmem:[#allocation8 + $0x424] ss:$16 sps:$4 sm:$0xff]  }
 0x154   :  { %v1134_v26 = vpop.f32.mrf.mxu1  ;;  %v1025_v38 = vpop.f32.mrf.mxu0  ;;  %2716 = vmatmul.mubr.bf16.gmra.mxu0 %v12796_v15  ;;  %v11866_v17 = vld [vmem:[#allocation8 + $0x6c4] ss:$16 sps:$4 sm:$0xff]  }
 0x155   :  { %v1435_v51 = vmax.f32 %v1133_v10, 0.0  ;;  %v1135_v55 = vadd.f32 %v1134_v26, %v1022_v24  ;;  %v1026_v54 = vadd.f32 %v1025_v38, %v12940_v48  ;;  %2725 = vmatprep.mubr.bf16.mxu0 %v12800_v28  ;;  %3762 = vmatpush1.bf16.msra.mxu0 %v11822_v9  ;;  %v11828_v24 = vld [vmem:[#allocation8 + $0x420] ss:$16 sps:$4 sm:$0xff]  }
 0x156   :  { %v1138_v59 = vpop.f32.mrf.mxu1  ;;  %2829 = vmatmul.mubr.bf16.gmra.mxu1 %v12798_v19  ;;  %v1027_v0 = vpop.f32.mrf.mxu0  ;;  %3763 = vmatprep.subr.bf16.mxu0 %v11827_v33  ;;  %v11864_v26 = vld [vmem:[#allocation8 + $0x6c0] ss:$16 sps:$4 sm:$0xff]  }
 0x157   :  { %2838 = vmatprep.mubr.bf16.mxu1 %v12803_v31  ;;  %v12971_v6 = vpack.c.bf16 %v1435_v51, %v1431_v46  ;;  %v1436_v7 = vmax.f32 %v1135_v55, 0.0  ;;  %v1139_v8 = vadd.f32 %v1138_v59, %v1026_v54  ;;  %v1028_v60 = vadd.f32 %v1027_v0, %v12944_v50  ;;  %3868 = vmatprep.subr.bf16.mxu1 %v11866_v17  ;;  %v11872_v54 = vld [vmem:[#allocation8 + $0x6a4] ss:$16 sps:$4 sm:$0xff]   ;;  %v11870_v0 = vld [vmem:[#allocation8 + $0x6a0] ss:$16 sps:$4 sm:$0xff]  }
 0x158   :  { %v1140_v14 = vpop.f32.mrf.mxu1  ;;  %v1029_v10 = vpop.f32.mrf.mxu0  ;;  %3869 = vmatpush1.bf16.msra.mxu1 %v11864_v26 }
 0x159   :  { %v1141_v12 = vadd.f32 %v1140_v14, %v1028_v60  ;;  %v1030_v38 = vadd.f32 %v1029_v10, %v12940_v48  ;;  %v12975_v9 = vpack.c.bf16 %v1436_v7, %v1432_v34  ;;  %3764 = vmatpush1.bf16.msra.mxu0 %v11825_v30  ;;  %v1439_v60 = vmax.f32 %v1139_v8, 0.0  ;;  %3870 = vmatprep.subr.bf16.mxu1 %v11872_v54  ;;  %v11839_v54 = vld [vmem:[#allocation8 + $0x5c4] ss:$16 sps:$4 sm:$0xff]  }
 0x15a   :  { %v1142_v31 = vpop.f32.mrf.mxu1  ;;  %v1031_v46 = vpop.f32.mrf.mxu0  ;;  %3765 = vmatprep.subr.bf16.mxu0 %v11830_v16 }
 0x15b   :  { %v1143_v51 = vadd.f32 %v1142_v31, %v1030_v38  ;;  %v1032_v55 = vadd.f32 %v1031_v46, %v12944_v50  ;;  %v1440_v31 = vmax.f32 %v1141_v12, 0.0  ;;  %v11836_v46 = vld [vmem:[#allocation8 + $0x5e4] ss:$16 sps:$4 sm:$0xff]  }
 0x15c   :  { %v1144_v33 = vpop.f32.mrf.mxu1  ;;  %v1035_v59 = vpop.f32.mrf.mxu0  ;;  %2726 = vmatmul.mubr.bf16.gmra.mxu0 %v12808_v47  ;;  %3871 = vmatpush1.bf16.msra.mxu1 %v11870_v0  ;;  %v11837_v0 = vld [vmem:[#allocation8 + $0x5c0] ss:$16 sps:$4 sm:$0xff]  }
 0x15d   :  { %v1443_v14 = vmax.f32 %v1143_v51, 0.0  ;;  %v1145_v17 = vadd.f32 %v1144_v33, %v1032_v55  ;;  %v1036_v34 = vadd.f32 %v1035_v59, %v12940_v48  ;;  %2735 = vmatprep.mubr.bf16.mxu0 %v12812_v62  ;;  %3766 = vmatpush1.bf16.msra.mxu0 %v11828_v24  ;;  %v11878_v51 = vld [vmem:[#allocation8 + $0x684] ss:$16 sps:$4 sm:$0xff]   ;;  %v11834_v33 = vld [vmem:[#allocation8 + $0x5e0] ss:$16 sps:$4 sm:$0xff]  }
 0x15e   :  { %v1148_v7 = vpop.f32.mrf.mxu1  ;;  %2839 = vmatmul.mubr.bf16.gmra.mxu1 %v12810_v52  ;;  %v1037_v30 = vpop.f32.mrf.mxu0  ;;  %3767 = vmatprep.subr.bf16.mxu0 %v11833_v37  ;;  %v11876_v59 = vld [vmem:[#allocation8 + $0x680] ss:$16 sps:$4 sm:$0xff]  }
 0x15f   :  { %2848 = vmatprep.mubr.bf16.mxu1 %v12815_v3  ;;  %v12983_v16 = vpack.c.bf16 %v1443_v14, %v1439_v60  ;;  %v1444_v10 = vmax.f32 %v1145_v17, 0.0  ;;  %v1149_v26 = vadd.f32 %v1148_v7, %v1036_v34  ;;  %v1038_v8 = vadd.f32 %v1037_v30, %v12944_v50  ;;  %3872 = vmatprep.subr.bf16.mxu1 %v11878_v51  ;;  %v11884_v34 = vld [vmem:[#allocation8 + $0x664] ss:$16 sps:$4 sm:$0xff]   ;;  %v11882_v30 = vld [vmem:[#allocation8 + $0x660] ss:$16 sps:$4 sm:$0xff]  }
 0x160   :  { %v1150_v38 = vpop.f32.mrf.mxu1  ;;  %v1039_v55 = vpop.f32.mrf.mxu0  ;;  %3873 = vmatpush1.bf16.msra.mxu1 %v11876_v59 }
 0x161   :  { %v1151_v12 = vadd.f32 %v1150_v38, %v1038_v8  ;;  %v1040_v52 = vadd.f32 %v1039_v55, %v12940_v48  ;;  %v12987_v24 = vpack.c.bf16 %v1444_v10, %v1440_v31  ;;  %3768 = vmatpush1.bf16.msra.mxu0 %v11831_v41  ;;  %v1447_v8 = vmax.f32 %v1149_v26, 0.0  ;;  %3874 = vmatprep.subr.bf16.mxu1 %v11884_v34  ;;  %v11845_v34 = vld [vmem:[#allocation8 + $0x584] ss:$16 sps:$4 sm:$0xff]  }
 0x162   :  { %v1152_v3 = vpop.f32.mrf.mxu1  ;;  %v1041_v60 = vpop.f32.mrf.mxu0  ;;  %3769 = vmatprep.subr.bf16.mxu0 %v11836_v46 }
 0x163   :  { %v1153_v14 = vadd.f32 %v1152_v3, %v1040_v52  ;;  %v1042_v17 = vadd.f32 %v1041_v60, %v12944_v50  ;;  %v1448_v52 = vmax.f32 %v1151_v12, 0.0  ;;  %v11842_v60 = vld [vmem:[#allocation8 + $0x5a4] ss:$16 sps:$4 sm:$0xff]  }
 0x164   :  { %v1154_v37 = vpop.f32.mrf.mxu1  ;;  %v1045_v7 = vpop.f32.mrf.mxu0  ;;  %2736 = vmatmul.mubr.bf16.gmra.mxu0 %v12820_v22  ;;  %3875 = vmatpush1.bf16.msra.mxu1 %v11882_v30 }
 0x165   :  { %v1451_v38 = vmax.f32 %v1153_v14, 0.0  ;;  %v1155_v51 = vadd.f32 %v1154_v37, %v1042_v17  ;;  %v1046_v31 = vadd.f32 %v1045_v7, %v12940_v48  ;;  %2745 = vmatprep.mubr.bf16.mxu0 %v12824_v39  ;;  %3770 = vmatpush2.bf16.msra.mxu0 %v11834_v33  ;;  %v11890_v14 = vld [vmem:[#allocation8 + $0x644] ss:$16 sps:$4 sm:$0xff]   ;;  %v11888_v37 = vld [vmem:[#allocation8 + $0x640] ss:$16 sps:$4 sm:$0xff]  }
 0x166   :  { %v1158_v10 = vpop.f32.mrf.mxu1  ;;  %2849 = vmatmul.mubr.bf16.gmra.mxu1 %v12822_v27  ;;  %v1047_v3 = vpop.f32.mrf.mxu0  ;;  %3771 = vmatprep.subr.bf16.mxu0 %v11839_v54 }
 0x167   :  { %2858 = vmatprep.mubr.bf16.mxu1 %v12827_v43  ;;  %v12995_v41 = vpack.c.bf16 %v1451_v38, %v1447_v8  ;;  %v1452_v46 = vmax.f32 %v1155_v51, 0.0  ;;  %v1159_v55 = vadd.f32 %v1158_v10, %v1046_v31  ;;  %v1048_v26 = vadd.f32 %v1047_v3, %v12944_v50  ;;  %3876 = vmatprep.subr.bf16.mxu1 %v11890_v14  ;;  %v11840_v38 = vld [vmem:[#allocation8 + $0x5a0] ss:$16 sps:$4 sm:$0xff]   ;;  %v11896_v31 = vld [vmem:[#allocation8 + $0x624] ss:$16 sps:$4 sm:$0xff]  }
 0x168   :  { %v1160_v59 = vpop.f32.mrf.mxu1  ;;  %v1049_v17 = vpop.f32.mrf.mxu0  ;;  %3877 = vmatpush1.bf16.msra.mxu1 %v11888_v37  ;;  %v11894_v10 = vld [vmem:[#allocation8 + $0x620] ss:$16 sps:$4 sm:$0xff]   ;;  %v11902_v37 = vld [vmem:[#allocation8 + $0x604] ss:$16 sps:$4 sm:$0xff]  }
 0x169   :  { %v12998_v7 = vadd.f32 %v1160_v59, %v1048_v26  ;;  %v1050_v12 = vadd.f32 %v1049_v17, %v12940_v48  ;;  %v13001_v33 = vpack.c.bf16 %v1452_v46, %v1448_v52  ;;  %3772 = vmatpush2.bf16.msra.mxu0 %v11837_v0  ;;  %v1455_v3 = vmax.f32 %v1159_v55, 0.0  ;;  %v11843_v0 = vld [vmem:[#allocation8 + $0x580] ss:$16 sps:$4 sm:$0xff]   ;;  %v11848_v55 = vld [vmem:[#allocation8 + $0x564] ss:$16 sps:$4 sm:$0xff]   ;;  %3878 = vmatprep.subr.bf16.mxu1 %v11896_v31 }
 0x16a   :  { %v1162_v43 = vpop.f32.mrf.mxu1  ;;  %v13003_v8 = vpop.f32.mrf.mxu0  ;;  %3773 = vmatprep.subr.bf16.mxu0 %v11842_v60  ;;  %v11908_v31 = vld [vmem:[#allocation8 + $0x7e4] ss:$16 sps:$4 sm:$0xff]  }
 0x16b   :  { %v1163_v51 = vadd.f32 %v1162_v43, %v1050_v12 }
 0x16c   :  { %v13005_v54 = vpop.f32.mrf.mxu1  ;;  %v1055_v30 = vpop.f32.mrf.mxu0  ;;  %2746 = vmatmul.mubr.bf16.gmra.mxu0 %v12832_v4  ;;  %3879 = vmatpush1.bf16.msra.mxu1 %v11894_v10  ;;  %v11906_v10 = vld [vmem:[#allocation8 + $0x7e0] ss:$16 sps:$4 sm:$0xff]  }
 0x16d   :  { %v1459_v26 = vmax.f32 %v1163_v51, 0.0  ;;  %v1056_v52 = vadd.f32 %v1055_v30, %v12940_v48  ;;  %2755 = vmatprep.mubr.bf16.mxu0 %v12836_v13  ;;  %3774 = vmatpush2.bf16.msra.mxu0 %v11840_v38  ;;  %v11900_v51 = vld [vmem:[#allocation8 + $0x600] ss:$16 sps:$4 sm:$0xff]  }
 0x16e   :  { %v1168_v46 = vpop.f32.mrf.mxu1  ;;  %2859 = vmatmul.mubr.bf16.gmra.mxu1 %v12834_v5  ;;  %v1057_v43 = vpop.f32.mrf.mxu0  ;;  %3775 = vmatprep.subr.bf16.mxu0 %v11845_v34  ;;  %v11851_v34 = vld [vmem:[#allocation8 + $0x544] ss:$16 sps:$4 sm:$0xff]   ;;  %v11948_v13 = vld [vmem:[#allocation8 + $0x700] ss:$16 sps:$4 sm:$0xff]  }
 0x16f   :  { %2868 = vmatprep.mubr.bf16.mxu1 %v12839_v18  ;;  %v13012_v59 = vpack.c.bf16 %v1459_v26, %v1455_v3  ;;  %v1169_v60 = vadd.f32 %v1168_v46, %v1056_v52  ;;  %v1058_v14 = vadd.f32 %v1057_v43, %v12944_v50  ;;  %3880 = vmatprep.subr.bf16.mxu1 %v11902_v37  ;;  %v11846_v3 = vld [vmem:[#allocation8 + $0x560] ss:$16 sps:$4 sm:$0xff]  }
 0x170   :  { %v1170_v17 = vpop.f32.mrf.mxu1  ;;  %v1059_v12 = vpop.f32.mrf.mxu0  ;;  %3881 = vmatpush1.bf16.msra.mxu1 %v11900_v51 }
 0x171   :  { %v13015_v30 = vadd.f32 %v1170_v17, %v1058_v14  ;;  %v1060_v5 = vadd.f32 %v1059_v12, %v12940_v48  ;;  %3776 = vmatpush2.bf16.msra.mxu0 %v11843_v0  ;;  %v1463_v43 = vmax.f32 %v1169_v60, 0.0  ;;  %v11854_v60 = vld [vmem:[#allocation8 + $0x524] ss:$16 sps:$4 sm:$0xff]   ;;  %3882 = vmatprep.subr.bf16.mxu1 %v11908_v31 }
 0x172   :  { %v1172_v18 = vpop.f32.mrf.mxu1  ;;  %v13018_v38 = vpop.f32.mrf.mxu0  ;;  %3777 = vmatprep.subr.bf16.mxu0 %v11848_v55  ;;  %v11920_v31 = vld [vmem:[#allocation8 + $0x7a4] ss:$16 sps:$4 sm:$0xff]  }
 0x173   :  { %v1173_v26 = vadd.f32 %v1172_v18, %v1060_v5  ;;  %v11849_v18 = vld [vmem:[#allocation8 + $0x540] ss:$16 sps:$4 sm:$0xff]  }
 0x174   :  { %v13020_v52 = vpop.f32.mrf.mxu1  ;;  %v1065_v46 = vpop.f32.mrf.mxu0  ;;  %2756 = vmatmul.mubr.bf16.gmra.mxu0 %v12844_v44  ;;  %3883 = vmatpush2.bf16.msra.mxu1 %v11906_v10  ;;  %v11918_v10 = vld [vmem:[#allocation8 + $0x7a0] ss:$16 sps:$4 sm:$0xff]  }
 0x175   :  { %v1467_v14 = vmax.f32 %v1173_v26, 0.0  ;;  %v1066_v17 = vadd.f32 %v1065_v46, %v12940_v48  ;;  %2765 = vmatprep.mubr.bf16.mxu0 %v12848_v57  ;;  %3778 = vmatpush2.bf16.msra.mxu0 %v11846_v3  ;;  %v11914_v26 = vld [vmem:[#allocation8 + $0x7c4] ss:$16 sps:$4 sm:$0xff]  }
 0x176   :  { %v1178_v37 = vpop.f32.mrf.mxu1  ;;  %2869 = vmatmul.mubr.bf16.gmra.mxu1 %v12846_v45  ;;  %v1067_v5 = vpop.f32.mrf.mxu0  ;;  %3779 = vmatprep.subr.bf16.mxu0 %v11851_v34  ;;  %v11912_v45 = vld [vmem:[#allocation8 + $0x7c0] ss:$16 sps:$4 sm:$0xff]   ;;  %v11857_v34 = vld [vmem:[#allocation8 + $0x504] ss:$16 sps:$4 sm:$0xff]  }
 0x177   :  { %2878 = vmatprep.mubr.bf16.mxu1 %v12851_v2  ;;  %v13027_v0 = vpack.c.bf16 %v1467_v14, %v1463_v43  ;;  %v1179_v55 = vadd.f32 %v1178_v37, %v1066_v17  ;;  %v1068_v12 = vadd.f32 %v1067_v5, %v12944_v50  ;;  %3884 = vmatprep.subr.bf16.mxu1 %v11914_v26  ;;  %v11852_v43 = vld [vmem:[#allocation8 + $0x520] ss:$16 sps:$4 sm:$0xff]  }
 0x178   :  { %v1180_v51 = vpop.f32.mrf.mxu1  ;;  %v1069_v46 = vpop.f32.mrf.mxu0  ;;  %3885 = vmatpush2.bf16.msra.mxu1 %v11912_v45 }
 0x179   :  { %v13030_v27 = vadd.f32 %v1180_v51, %v1068_v12  ;;  %v1070_v19 = vadd.f32 %v1069_v46, %v12940_v48  ;;  %3780 = vmatpush2.bf16.msra.mxu0 %v11849_v18  ;;  %v1471_v5 = vmax.f32 %v1179_v55, 0.0  ;;  %v13041_v18 = vsub.s32 2, %v12924_v29  ;;  %3886 = vmatprep.subr.bf16.mxu1 %v11920_v31 }
 0x17a   :  { %v1182_v2 = vpop.f32.mrf.mxu1  ;;  %v13033_v3 = vpop.f32.mrf.mxu0  ;;  %3781 = vmatprep.subr.bf16.mxu0 %v11854_v60  ;;  %v13047_v55 = vsub.s32 3, %v12924_v29 }
 0x17b   :  { %v1183_v14 = vadd.f32 %v1182_v2, %v1070_v19  ;;  %15915 = vst [vmem:[#allocation50_spill] sm:$0xff] %v13041_v18  ;;  %v11855_v2 = vld [vmem:[#allocation8 + $0x500] ss:$16 sps:$4 sm:$0xff]  }
 0x17c   :  { %v13035_v17 = vpop.f32.mrf.mxu1  ;;  %v1075_v37 = vpop.f32.mrf.mxu0  ;;  %2766 = vmatmul.mubr.bf16.gmra.mxu0 %v12856_v20  ;;  %15917 = vst [vmem:[#allocation52_spill] sm:$0xff] %v13047_v55  ;;  %3887 = vmatpush2.bf16.msra.mxu1 %v11918_v10  ;;  %v13062_v10 = vrot.slane %v12927_v36, %v13047_v55 }
 0x17d   :  { %v1475_v12 = vmax.f32 %v1183_v14, 0.0  ;;  %v1076_v51 = vadd.f32 %v1075_v37, %v12940_v48  ;;  %3782 = vmatpush2.bf16.msra.mxu0 %v11852_v43  ;;  %v11863_v14 = vld [vmem:[#allocation8 + $0x4ec] ss:$16 sps:$4 sm:$0xff]   ;;  %v11926_v37 = vld [vmem:[#allocation8 + $0x784] ss:$16 sps:$4 sm:$0xff]  }
 0x17e   :  { %v1188_v26 = vpop.f32.mrf.mxu1  ;;  %2879 = vmatmul.mubr.bf16.gmra.mxu1 %v12858_v23  ;;  %v1077_v19 = vpop.f32.mrf.mxu0  ;;  %3783 = vmatprep.subr.bf16.mxu0 %v11857_v34  ;;  %15919 = vst [vmem:[#allocation54_spill] sm:$0xff] %v13062_v10 }
 0x17f   :  { %v13043_v60 = vpack.c.bf16 %v1475_v12, %v1471_v5  ;;  %v1189_v46 = vadd.f32 %v1188_v26, %v1076_v51  ;;  %v1078_v45 = vadd.f32 %v1077_v19, %v12944_v50  ;;  %v13054_v5 = vrot.slane %v12927_v36, %v13041_v18  ;;  %3888 = vmatprep.subr.bf16.mxu1 %v11926_v37  ;;  %v11938_v36 = vld [vmem:[#allocation8 + $0x744] ss:$16 sps:$4 sm:$0xff]  }
 0x180   :  { %v1190_v1 = vpop.f32.mrf.mxu1  ;;  %v1079_v23 = vpop.f32.mrf.mxu0  ;;  %3889 = vmatpush2.bf16.msra.mxu1 %v11924_v53 }
 0x181   :  { %15916 = vst [vmem:[#allocation51_spill] sm:$0xff] %v13043_v60  ;;  %v13049_v35 = vadd.f32 %v1190_v1, %v1078_v45  ;;  %v1080_v43 = vadd.f32 %v1079_v23, %v12940_v48  ;;  %3784 = vmatpush2.bf16.msra.mxu0 %v11855_v2  ;;  %v11932_v1 = vld [vmem:[#allocation8 + $0x764] ss:$16 sps:$4 sm:$0xff]   ;;  %v11930_v23 = vld [vmem:[#allocation8 + $0x760] ss:$16 sps:$4 sm:$0xff]   ;;  %v1479_v48 = vmax.f32 %v1189_v46, 0.0 }
 0x182   :  { %v1192_v31 = vpop.f32.mrf.mxu1  ;;  %v13056_v12 = vpop.f32.mrf.mxu0  ;;  %3979 = vmatprep.subr.bf16.mxu0 %v11863_v14  ;;  %3890 = vmatprep.subr.bf16.mxu1 %v11932_v1  ;;  %v11936_v14 = vld [vmem:[#allocation8 + $0x740] ss:$16 sps:$4 sm:$0xff]  }
 0x183   :  { %15918 = vst [vmem:[#allocation53_spill] sm:$0xff] %v13049_v35  ;;  %v1193_v29 = vadd.f32 %v1192_v31, %v1080_v43 }
 0x184   :  { %v13058_v34 = vpop.f32.mrf.mxu1  ;;  %v1231_v51 = vpop.f32.mrf.mxu0  ;;  %3891 = vmatpush2.bf16.msra.mxu1 %v11930_v23 }
 0x185   :  { %v1483_v26 = vmax.f32 %v1193_v29, 0.0  ;;  %v1232_v19 = vadd.f32 %v1231_v51, %v13054_v5  ;;  %3892 = vmatprep.subr.bf16.mxu1 %v11938_v36 }
 0x186   :  { %v1344_v45 = vpop.f32.mrf.mxu1  ;;  %v1233_v37 = vpop.f32.mrf.mxu0 }
 0x187   :  { %v13065_v2 = vpack.c.bf16 %v1483_v26, %v1479_v48  ;;  %v1345_v43 = vadd.f32 %v1344_v45, %v1232_v19  ;;  %v1234_v31 = vadd.f32 %v1233_v37, %v13062_v10  ;;  %v11944_v48 = vld [vmem:[#allocation8 + $0x724] ss:$16 sps:$4 sm:$0xff]   ;;  %v11942_v19 = vld [vmem:[#allocation8 + $0x720] ss:$16 sps:$4 sm:$0xff]  }
 0x188   :  { %v1346_v25 = vpop.f32.mrf.mxu1  ;;  %v1235_v20 = vpop.f32.mrf.mxu0  ;;  %3893 = vmatpush2.bf16.msra.mxu1 %v11936_v14 }
 0x189   :  { %15920 = vst [vmem:[#allocation55_spill] sm:$0xff] %v13065_v2  ;;  %v13068_v63 = vadd.f32 %v1346_v25, %v1234_v31  ;;  %v1236_v53 = vadd.f32 %v1235_v20, %v13054_v5  ;;  %v1425_v45 = vmax.f32 %v1345_v43, 0.0  ;;  %3894 = vmatprep.subr.bf16.mxu1 %v11944_v48 }
 0x18a   :  { %v1348_v46 = vpop.f32.mrf.mxu1  ;;  %v13071_v29 = vpop.f32.mrf.mxu0 }
 0x18b   :  { %15921 = vst [vmem:[#allocation56_spill] sm:$0xff] %v13068_v63  ;;  %15922 = vst [vmem:[#allocation57_spill] sm:$0xff] %v13071_v29  ;;  %v1349_v1 = vadd.f32 %v1348_v46, %v1236_v53  ;;  %v11950_v53 = vld [vmem:[#allocation8 + $0x704] ss:$16 sps:$4 sm:$0xff]  }
 0x18c   :  { %v13073_v51 = vpop.f32.mrf.mxu1  ;;  %v1241_v26 = vpop.f32.mrf.mxu0  ;;  %3895 = vmatpush2.bf16.msra.mxu1 %v11942_v19 }
 0x18d   :  { %15923 = vst [vmem:[#allocation58_spill] sm:$0xff] %v13073_v51  ;;  %v1429_v37 = vmax.f32 %v1349_v1, 0.0  ;;  %v1242_v23 = vadd.f32 %v1241_v26, %v13054_v5  ;;  %3896 = vmatprep.subr.bf16.mxu1 %v11950_v53 }
 0x18e   :  { %v1354_v57 = vpop.f32.mrf.mxu1  ;;  %v1243_v25 = vpop.f32.mrf.mxu0 }
 0x18f   :  { %v13076_v31 = vpack.c.bf16 %v1429_v37, %v1425_v45  ;;  %v1355_v20 = vadd.f32 %v1354_v57, %v1242_v23  ;;  %v1244_v36 = vadd.f32 %v1243_v25, %v13062_v10  ;;  %v11956_v45 = vld [vmem:[#allocation8 + $0x6ec] ss:$16 sps:$4 sm:$0xff]  }
 0x190   :  { %v1356_v44 = vpop.f32.mrf.mxu1  ;;  %v1245_v46 = vpop.f32.mrf.mxu0  ;;  %3897 = vmatpush2.bf16.msra.mxu1 %v11948_v13 }
 0x191   :  { %15924 = vst [vmem:[#allocation59_spill] sm:$0xff] %v13076_v31  ;;  %v13079_v4 = vadd.f32 %v1356_v44, %v1244_v36  ;;  %v1246_v43 = vadd.f32 %v1245_v46, %v13054_v5  ;;  %v1433_v37 = vmax.f32 %v1355_v20, 0.0  ;;  %4092 = vmatprep.subr.bf16.mxu1 %v11956_v45 }
 0x192   :  { %v1358_v14 = vpop.f32.mrf.mxu1  ;;  %v13082_v1 = vpop.f32.mrf.mxu0 }
 0x193   :  { %15925 = vst [vmem:[#allocation60_spill] sm:$0xff] %v13079_v4  ;;  %15926 = vst [vmem:[#allocation61_spill] sm:$0xff] %v13082_v1  ;;  %v1359_v48 = vadd.f32 %v1358_v14, %v1246_v43 }
 0x194   :  { %v13084_v26 = vpop.f32.mrf.mxu1  ;;  %v1251_v57 = vpop.f32.mrf.mxu0 }
 0x195   :  { %15927 = vst [vmem:[#allocation62_spill] sm:$0xff] %v13084_v26  ;;  %v1437_v23 = vmax.f32 %v1359_v48, 0.0  ;;  %v1252_v25 = vadd.f32 %v1251_v57, %v13054_v5 }
 0x196   :  { %v1364_v19 = vpop.f32.mrf.mxu1  ;;  %v1253_v44 = vpop.f32.mrf.mxu0 }
 0x197   :  { %v13087_v36 = vpack.c.bf16 %v1437_v23, %v1433_v37  ;;  %v1365_v46 = vadd.f32 %v1364_v19, %v1252_v25  ;;  %v1254_v53 = vadd.f32 %v1253_v44, %v13062_v10 }
 0x198   :  { %v1366_v39 = vpop.f32.mrf.mxu1  ;;  %v1255_v22 = vpop.f32.mrf.mxu0 }
 0x199   :  { %15928 = vst [vmem:[#allocation63_spill] sm:$0xff] %v13087_v36  ;;  %v13090_v43 = vadd.f32 %v1366_v39, %v1254_v53  ;;  %v1256_v14 = vadd.f32 %v1255_v22, %v13054_v5  ;;  %v1441_v45 = vmax.f32 %v1365_v46, 0.0 }
 0x19a   :  { %v1368_v62 = vpop.f32.mrf.mxu1  ;;  %v13093_v13 = vpop.f32.mrf.mxu0 }
 0x19b   :  { %15929 = vst [vmem:[#allocation64_spill] sm:$0xff] %v13090_v43  ;;  %15930 = vst [vmem:[#allocation65_spill] sm:$0xff] %v13093_v13  ;;  %v1369_v20 = vadd.f32 %v1368_v62, %v1256_v14 }
 0x19c   :  { %v13095_v48 = vpop.f32.mrf.mxu1  ;;  %v1261_v57 = vpop.f32.mrf.mxu0 }
 0x19d   :  { %15931 = vst [vmem:[#allocation66_spill] sm:$0xff] %v13095_v48  ;;  %v1445_v47 = vmax.f32 %v1369_v20, 0.0  ;;  %v1262_v37 = vadd.f32 %v1261_v57, %v13054_v5 }
 0x19e   :  { %v1374_v23 = vpop.f32.mrf.mxu1  ;;  %v1263_v25 = vpop.f32.mrf.mxu0 }
 0x19f   :  { %v13098_v19 = vpack.c.bf16 %v1445_v47, %v1441_v45  ;;  %v1375_v44 = vadd.f32 %v1374_v23, %v1262_v37  ;;  %v1264_v39 = vadd.f32 %v1263_v25, %v13062_v10 }
 0x1a0   :  { %v1376_v53 = vpop.f32.mrf.mxu1  ;;  %v1265_v22 = vpop.f32.mrf.mxu0 }
 0x1a1   :  { %15932 = vst [vmem:[#allocation67_spill] sm:$0xff] %v13098_v19  ;;  %v13101_v28 = vadd.f32 %v1376_v53, %v1264_v39  ;;  %v1266_v62 = vadd.f32 %v1265_v22, %v13054_v5  ;;  %v1449_v61 = vmax.f32 %v1375_v44, 0.0 }
 0x1a2   :  { %v1378_v14 = vpop.f32.mrf.mxu1  ;;  %v13104_v15 = vpop.f32.mrf.mxu0 }
 0x1a3   :  { %15933 = vst [vmem:[#allocation68_spill] sm:$0xff] %v13101_v28  ;;  %15934 = vst [vmem:[#allocation69_spill] sm:$0xff] %v13104_v15  ;;  %v1379_v46 = vadd.f32 %v1378_v14, %v1266_v62 }
 0x1a4   :  { %v13106_v20 = vpop.f32.mrf.mxu1  ;;  %v1271_v57 = vpop.f32.mrf.mxu0 }
 0x1a5   :  { %15935 = vst [vmem:[#allocation70_spill] sm:$0xff] %v13106_v20  ;;  %v1453_v49 = vmax.f32 %v1379_v46, 0.0  ;;  %v1272_v47 = vadd.f32 %v1271_v57, %v13054_v5 }
 0x1a6   :  { %v1384_v45 = vpop.f32.mrf.mxu1  ;;  %v1273_v37 = vpop.f32.mrf.mxu0 }
 0x1a7   :  { %v13109_v23 = vpack.c.bf16 %v1453_v49, %v1449_v61  ;;  %v1385_v25 = vadd.f32 %v1384_v45, %v1272_v47  ;;  %v1274_v39 = vadd.f32 %v1273_v37, %v13062_v10 }
 0x1a8   :  { %v1386_v53 = vpop.f32.mrf.mxu1  ;;  %v1275_v22 = vpop.f32.mrf.mxu0 }
 0x1a9   :  { %15936 = vst [vmem:[#allocation71_spill] sm:$0xff] %v13109_v23  ;;  %v13112_v32 = vadd.f32 %v1386_v53, %v1274_v39  ;;  %v1276_v62 = vadd.f32 %v1275_v22, %v13054_v5  ;;  %v1457_v58 = vmax.f32 %v1385_v25, 0.0 }
 0x1aa   :  { %v1388_v14 = vpop.f32.mrf.mxu1  ;;  %v13115_v21 = vpop.f32.mrf.mxu0 }
 0x1ab   :  { %15937 = vst [vmem:[#allocation72_spill] sm:$0xff] %v13112_v32  ;;  %15938 = vst [vmem:[#allocation73_spill] sm:$0xff] %v13115_v21  ;;  %v1389_v44 = vadd.f32 %v1388_v14, %v1276_v62 }
 0x1ac   :  { %v13117_v46 = vpop.f32.mrf.mxu1  ;;  %v1281_v57 = vpop.f32.mrf.mxu0 }
 0x1ad   :  { %15939 = vst [vmem:[#allocation74_spill] sm:$0xff] %v13117_v46  ;;  %v1461_v19 = vmax.f32 %v1389_v44, 0.0  ;;  %v1282_v49 = vadd.f32 %v1281_v57, %v13054_v5 }
 0x1ae   :  { %v1394_v61 = vpop.f32.mrf.mxu1  ;;  %v1283_v47 = vpop.f32.mrf.mxu0 }
 0x1af   :  { %v13120_v45 = vpack.c.bf16 %v1461_v19, %v1457_v58  ;;  %v1395_v37 = vadd.f32 %v1394_v61, %v1282_v49  ;;  %v1284_v39 = vadd.f32 %v1283_v47, %v13062_v10 }
 0x1b0   :  { %v1396_v53 = vpop.f32.mrf.mxu1  ;;  %v1285_v22 = vpop.f32.mrf.mxu0 }
 0x1b1   :  { %15940 = vst [vmem:[#allocation75_spill] sm:$0xff] %v13120_v45  ;;  %v13123_v23 = vadd.f32 %v1396_v53, %v1284_v39  ;;  %v1286_v62 = vadd.f32 %v1285_v22, %v13054_v5  ;;  %v1465_v46 = vmax.f32 %v1395_v37, 0.0 }
 0x1b2   :  { %v1398_v14 = vpop.f32.mrf.mxu1  ;;  %v13126_v32 = vpop.f32.mrf.mxu0 }
 0x1b3   :  { %15941 = vst [vmem:[#allocation76_spill] sm:$0xff] %v13123_v23  ;;  %15942 = vst [vmem:[#allocation77_spill] sm:$0xff] %v13126_v32  ;;  %v1399_v25 = vadd.f32 %v1398_v14, %v1286_v62 }
 0x1b4   :  { %v13128_v44 = vpop.f32.mrf.mxu1  ;;  %v1291_v57 = vpop.f32.mrf.mxu0 }
 0x1b5   :  { %15943 = vst [vmem:[#allocation78_spill] sm:$0xff] %v13128_v44  ;;  %v1469_v28 = vmax.f32 %v1399_v25, 0.0  ;;  %v1292_v58 = vadd.f32 %v1291_v57, %v13054_v5 }
 0x1b6   :  { %v1404_v19 = vpop.f32.mrf.mxu1  ;;  %v1293_v49 = vpop.f32.mrf.mxu0 }
 0x1b7   :  { %v13131_v61 = vpack.c.bf16 %v1469_v28, %v1465_v46  ;;  %v1405_v47 = vadd.f32 %v1404_v19, %v1292_v58  ;;  %v1294_v39 = vadd.f32 %v1293_v49, %v13062_v10 }
 0x1b8   :  { %v1406_v53 = vpop.f32.mrf.mxu1  ;;  %v1295_v22 = vpop.f32.mrf.mxu0 }
 0x1b9   :  { %15944 = vst [vmem:[#allocation79_spill] sm:$0xff] %v13131_v61  ;;  %v13134_v45 = vadd.f32 %v1406_v53, %v1294_v39  ;;  %v1296_v62 = vadd.f32 %v1295_v22, %v13054_v5  ;;  %v1473_v44 = vmax.f32 %v1405_v47, 0.0 }
 0x1ba   :  { %v1408_v14 = vpop.f32.mrf.mxu1  ;;  %v13137_v23 = vpop.f32.mrf.mxu0 }
 0x1bb   :  { %15945 = vst [vmem:[#allocation80_spill] sm:$0xff] %v13134_v45  ;;  %15946 = vst [vmem:[#allocation81_spill] sm:$0xff] %v13137_v23  ;;  %v1409_v37 = vadd.f32 %v1408_v14, %v1296_v62  ;;  %v13148_v45 = vld [vmem:[#allocation7 + $0x4] sm:$0xf] }
 0x1bc   :  { %v13139_v25 = vpop.f32.mrf.mxu1  ;;  %v1301_v57 = vpop.f32.mrf.mxu0 }
 0x1bd   :  { %15947 = vst [vmem:[#allocation82_spill] sm:$0xff] %v13139_v25  ;;  %v1477_v32 = vmax.f32 %v1409_v37, 0.0  ;;  %v1302_v28 = vadd.f32 %v1301_v57, %v13054_v5 }
 0x1be   :  { %v1414_v46 = vpop.f32.mrf.mxu1  ;;  %v1303_v58 = vpop.f32.mrf.mxu0 }
 0x1bf   :  { %v13142_v19 = vpack.c.bf16 %v1477_v32, %v1473_v44  ;;  %v1415_v49 = vadd.f32 %v1414_v46, %v1302_v28  ;;  %v1304_v39 = vadd.f32 %v1303_v58, %v13062_v10  ;;  %v13156_v32 = vrot.slane %v13148_v45, %v12935_v42 }
 0x1c0   :  { %v1416_v53 = vpop.f32.mrf.mxu1  ;;  %v1305_v22 = vpop.f32.mrf.mxu0  ;;  %v13160_v44 = vrot.slane %v13148_v45, %v12931_v40 }
 0x1c1   :  { %15948 = vst [vmem:[#allocation83_spill] sm:$0xff] %v13142_v19  ;;  %v13145_v61 = vadd.f32 %v1416_v53, %v1304_v39  ;;  %v1306_v62 = vadd.f32 %v1305_v22, %v13054_v5  ;;  %v1481_v46 = vmax.f32 %v1415_v49, 0.0 }
 0x1c2   :  { %v1418_v14 = vpop.f32.mrf.mxu1  ;;  %v13150_v47 = vpop.f32.mrf.mxu0 }
 0x1c3   :  { %15949 = vst [vmem:[#allocation84_spill] sm:$0xff] %v13145_v61  ;;  %15950 = vst [vmem:[#allocation85_spill] sm:$0xff] %v13150_v47  ;;  %v1419_v37 = vadd.f32 %v1418_v14, %v1306_v62 }
 0x1c4   :  { %v13152_v57 = vpop.f32.mrf.mxu1  ;;  %v2471_v28 = vpop.f32.mrf.mxu0 }
 0x1c5   :  { %15951 = vst [vmem:[#allocation86_spill] sm:$0xff] %v13152_v57  ;;  %v1485_v58 = vmax.f32 %v1419_v37, 0.0  ;;  %v2472_v14 = vadd.f32 %v2471_v28, %v13160_v44 }
 0x1c6   :  { %v2584_v5 = vpop.f32.mrf.mxu1  ;;  %v2473_v39 = vpop.f32.mrf.mxu0 }
 0x1c7   :  { %v13162_v53 = vpack.c.bf16 %v1485_v58, %v1481_v46  ;;  %v2474_v22 = vadd.f32 %v2473_v39, %v13156_v32  ;;  %v2585_v37 = vadd.f32 %v2584_v5, %v2472_v14  ;;  %v11861_v5 = vld [vmem:[#allocation8 + $0x4e8] ss:$16 sps:$4 sm:$0xff]  }
 0x1c8   :  { %v2586_v62 = vpop.f32.mrf.mxu1  ;;  %v2475_v19 = vpop.f32.mrf.mxu0 }
 0x1c9   :  { %15952 = vst [vmem:[#allocation87_spill] sm:$0xff] %v13162_v53  ;;  %v2476_v42 = vadd.f32 %v2475_v19, %v13160_v44  ;;  %v2587_v47 = vadd.f32 %v2586_v62, %v2474_v22  ;;  %v2889_v43 = vmax.f32 %v2585_v37, 0.0 }
 0x1ca   :  { %v2588_v61 = vpop.f32.mrf.mxu1  ;;  %v2477_v57 = vpop.f32.mrf.mxu0 }
 0x1cb   :  { %v2589_v40 = vadd.f32 %v2588_v61, %v2476_v42  ;;  %v2478_v25 = vadd.f32 %v2477_v57, %v13156_v32  ;;  %v2890_v39 = vmax.f32 %v2587_v47, 0.0 }
 0x1cc   :  { %v2590_v49 = vpop.f32.mrf.mxu1  ;;  %v2481_v23 = vpop.f32.mrf.mxu0 }
 0x1cd   :  { %v2591_v21 = vadd.f32 %v2590_v49, %v2478_v25  ;;  %v2893_v58 = vmax.f32 %v2589_v40, 0.0  ;;  %v2482_v19 = vadd.f32 %v2481_v23, %v13160_v44  ;;  %v11869_v40 = vld [vmem:[#allocation8 + $0x4cc] ss:$16 sps:$4 sm:$0xff]  }
 0x1ce   :  { %v2594_v46 = vpop.f32.mrf.mxu1  ;;  %v2483_v53 = vpop.f32.mrf.mxu0 }
 0x1cf   :  { %v2894_v36 = vmax.f32 %v2591_v21, 0.0  ;;  %v2484_v28 = vadd.f32 %v2483_v53, %v13156_v32  ;;  %v13173_v22 = vpack.c.bf16 %v2893_v58, %v2889_v43  ;;  %v2595_v14 = vadd.f32 %v2594_v46, %v2482_v19  ;;  %v11875_v58 = vld [vmem:[#allocation8 + $0x4ac] ss:$16 sps:$4 sm:$0xff]  }
 0x1d0   :  { %v2596_v20 = vpop.f32.mrf.mxu1  ;;  %v2485_v15 = vpop.f32.mrf.mxu0 }
 0x1d1   :  { %v2486_v42 = vadd.f32 %v2485_v15, %v13160_v44  ;;  %v13171_v57 = vpack.c.bf16 %v2894_v36, %v2890_v39  ;;  %v2597_v62 = vadd.f32 %v2596_v20, %v2484_v28  ;;  %v11867_v36 = vld [vmem:[#allocation8 + $0x4c8] ss:$16 sps:$4 sm:$0xff]  }
 0x1d2   :  { %v2598_v61 = vpop.f32.mrf.mxu1  ;;  %v2487_v25 = vpop.f32.mrf.mxu0 }
 0x1d3   :  { %v2599_v47 = vadd.f32 %v2598_v61, %v2486_v42  ;;  %v2488_v21 = vadd.f32 %v2487_v25, %v13156_v32  ;;  %3785 = vmatprep.mubr.bf16.mxu0 %v13171_v57  ;;  %v2898_v39 = vmax.f32 %v2597_v62, 0.0  ;;  %v2897_v61 = vmax.f32 %v2595_v14, 0.0  ;;  %v11881_v62 = vld [vmem:[#allocation8 + $0x48c] ss:$16 sps:$4 sm:$0xff]  }
 0x1d4   :  { %v2600_v53 = vpop.f32.mrf.mxu1  ;;  %v2491_v23 = vpop.f32.mrf.mxu0  ;;  %3786 = vmatmul.mubr.bf16.vlgmr.msra.gmra.mxu0 %v13173_v22 }
 0x1d5   :  { %v2601_v15 = vadd.f32 %v2600_v53, %v2488_v21  ;;  %3980 = vmatpush1.bf16.msra.mxu0 %v11861_v5  ;;  %v2901_v37 = vmax.f32 %v2599_v47, 0.0  ;;  %v2492_v25 = vadd.f32 %v2491_v23, %v13160_v44  ;;  %v11873_v5 = vld [vmem:[#allocation8 + $0x4a8] ss:$16 sps:$4 sm:$0xff]  }
 0x1d6   :  { %v2604_v49 = vpop.f32.mrf.mxu1  ;;  %v2493_v43 = vpop.f32.mrf.mxu0  ;;  %3981 = vmatprep.subr.bf16.mxu0 %v11869_v40 }
 0x1d7   :  { %v2902_v20 = vmax.f32 %v2601_v15, 0.0  ;;  %v2494_v28 = vadd.f32 %v2493_v43, %v13156_v32  ;;  %v13183_v47 = vpack.c.bf16 %v2901_v37, %v2897_v61  ;;  %v2605_v23 = vadd.f32 %v2604_v49, %v2492_v25 }
 0x1d8   :  { %v2606_v42 = vpop.f32.mrf.mxu1  ;;  %v2495_v46 = vpop.f32.mrf.mxu0 }
 0x1d9   :  { %v2496_v19 = vadd.f32 %v2495_v46, %v13160_v44  ;;  %3982 = vmatpush1.bf16.msra.mxu0 %v11867_v36  ;;  %v13181_v21 = vpack.c.bf16 %v2902_v20, %v2898_v39  ;;  %v2607_v53 = vadd.f32 %v2606_v42, %v2494_v28  ;;  %v11879_v20 = vld [vmem:[#allocation8 + $0x488] ss:$16 sps:$4 sm:$0xff]  }
 0x1da   :  { %v2608_v31 = vpop.f32.mrf.mxu1  ;;  %v2497_v40 = vpop.f32.mrf.mxu0  ;;  %3983 = vmatprep.subr.bf16.mxu0 %v11875_v58  ;;  %v11887_v58 = vld [vmem:[#allocation8 + $0x46c] ss:$16 sps:$4 sm:$0xff]  }
 0x1db   :  { %v2609_v15 = vadd.f32 %v2608_v31, %v2496_v19  ;;  %v2498_v43 = vadd.f32 %v2497_v40, %v13156_v32  ;;  %3795 = vmatprep.mubr.bf16.mxu0 %v13181_v21  ;;  %v2906_v46 = vmax.f32 %v2607_v53, 0.0  ;;  %v2905_v19 = vmax.f32 %v2605_v23, 0.0  ;;  %v11893_v53 = vld [vmem:[#allocation8 + $0x44c] ss:$16 sps:$4 sm:$0xff]  }
 0x1dc   :  { %v2610_v14 = vpop.f32.mrf.mxu1  ;;  %v2501_v48 = vpop.f32.mrf.mxu0  ;;  %3796 = vmatmul.mubr.bf16.gmra.mxu0 %v13183_v47 }
 0x1dd   :  { %v2611_v36 = vadd.f32 %v2610_v14, %v2498_v43  ;;  %3984 = vmatpush1.bf16.msra.mxu0 %v11873_v5  ;;  %v2909_v37 = vmax.f32 %v2609_v15, 0.0  ;;  %v2502_v40 = vadd.f32 %v2501_v48, %v13160_v44  ;;  %v11885_v5 = vld [vmem:[#allocation8 + $0x468] ss:$16 sps:$4 sm:$0xff]  }
 0x1de   :  { %v2614_v39 = vpop.f32.mrf.mxu1  ;;  %v2503_v61 = vpop.f32.mrf.mxu0  ;;  %3985 = vmatprep.subr.bf16.mxu0 %v11881_v62 }
 0x1df   :  { %v2910_v28 = vmax.f32 %v2611_v36, 0.0  ;;  %v2504_v31 = vadd.f32 %v2503_v61, %v13156_v32  ;;  %v13193_v15 = vpack.c.bf16 %v2909_v37, %v2905_v19  ;;  %v2615_v48 = vadd.f32 %v2614_v39, %v2502_v40 }
 0x1e0   :  { %v2616_v42 = vpop.f32.mrf.mxu1  ;;  %v2505_v49 = vpop.f32.mrf.mxu0 }
 0x1e1   :  { %v2506_v25 = vadd.f32 %v2505_v49, %v13160_v44  ;;  %3986 = vmatpush1.bf16.msra.mxu0 %v11879_v20  ;;  %v13191_v43 = vpack.c.bf16 %v2910_v28, %v2906_v46  ;;  %v2617_v14 = vadd.f32 %v2616_v42, %v2504_v31  ;;  %v11891_v28 = vld [vmem:[#allocation8 + $0x448] ss:$16 sps:$4 sm:$0xff]  }
 0x1e2   :  { %v2618_v4 = vpop.f32.mrf.mxu1  ;;  %v2507_v62 = vpop.f32.mrf.mxu0  ;;  %3987 = vmatprep.subr.bf16.mxu0 %v11887_v58  ;;  %v11899_v58 = vld [vmem:[#allocation8 + $0x42c] ss:$16 sps:$4 sm:$0xff]  }
 0x1e3   :  { %v2619_v36 = vadd.f32 %v2618_v4, %v2506_v25  ;;  %v2508_v61 = vadd.f32 %v2507_v62, %v13156_v32  ;;  %3805 = vmatprep.mubr.bf16.mxu0 %v13191_v43  ;;  %v2914_v49 = vmax.f32 %v2617_v14, 0.0  ;;  %v2913_v25 = vmax.f32 %v2615_v48, 0.0  ;;  %v11905_v14 = vld [vmem:[#allocation8 + $0x40c] ss:$16 sps:$4 sm:$0xff]  }
 0x1e4   :  { %v2620_v23 = vpop.f32.mrf.mxu1  ;;  %v2511_v13 = vpop.f32.mrf.mxu0  ;;  %3806 = vmatmul.mubr.bf16.gmra.mxu0 %v13193_v15 }
 0x1e5   :  { %v2621_v20 = vadd.f32 %v2620_v23, %v2508_v61  ;;  %3988 = vmatpush1.bf16.msra.mxu0 %v11885_v5  ;;  %v2917_v37 = vmax.f32 %v2619_v36, 0.0  ;;  %v2512_v62 = vadd.f32 %v2511_v13, %v13160_v44  ;;  %v11897_v5 = vld [vmem:[#allocation8 + $0x428] ss:$16 sps:$4 sm:$0xff]  }
 0x1e6   :  { %v2624_v46 = vpop.f32.mrf.mxu1  ;;  %v2513_v19 = vpop.f32.mrf.mxu0  ;;  %3989 = vmatprep.subr.bf16.mxu0 %v11893_v53 }
 0x1e7   :  { %v2918_v31 = vmax.f32 %v2621_v20, 0.0  ;;  %v2514_v4 = vadd.f32 %v2513_v19, %v13156_v32  ;;  %v13203_v36 = vpack.c.bf16 %v2917_v37, %v2913_v25  ;;  %v2625_v13 = vadd.f32 %v2624_v46, %v2512_v62 }
 0x1e8   :  { %v2626_v42 = vpop.f32.mrf.mxu1  ;;  %v2515_v39 = vpop.f32.mrf.mxu0 }
 0x1e9   :  { %v2516_v40 = vadd.f32 %v2515_v39, %v13160_v44  ;;  %3990 = vmatpush1.bf16.msra.mxu0 %v11891_v28  ;;  %v13201_v61 = vpack.c.bf16 %v2918_v31, %v2914_v49  ;;  %v2627_v23 = vadd.f32 %v2626_v42, %v2514_v4  ;;  %v11903_v31 = vld [vmem:[#allocation8 + $0x408] ss:$16 sps:$4 sm:$0xff]  }
 0x1ea   :  { %v2628_v2 = vpop.f32.mrf.mxu1  ;;  %v2517_v53 = vpop.f32.mrf.mxu0  ;;  %3991 = vmatprep.subr.bf16.mxu0 %v11899_v58  ;;  %v11911_v58 = vld [vmem:[#allocation8 + $0x5ec] ss:$16 sps:$4 sm:$0xff]  }
 0x1eb   :  { %v2629_v20 = vadd.f32 %v2628_v2, %v2516_v40  ;;  %v2518_v19 = vadd.f32 %v2517_v53, %v13156_v32  ;;  %3815 = vmatprep.mubr.bf16.mxu0 %v13201_v61  ;;  %v2922_v39 = vmax.f32 %v2627_v23, 0.0  ;;  %v2921_v40 = vmax.f32 %v2625_v13, 0.0  ;;  %v11917_v23 = vld [vmem:[#allocation8 + $0x5cc] ss:$16 sps:$4 sm:$0xff]  }
 0x1ec   :  { %v2630_v48 = vpop.f32.mrf.mxu1  ;;  %v2521_v26 = vpop.f32.mrf.mxu0  ;;  %3816 = vmatmul.mubr.bf16.gmra.mxu0 %v13203_v36 }
 0x1ed   :  { %v2631_v28 = vadd.f32 %v2630_v48, %v2518_v19  ;;  %3992 = vmatpush1.bf16.msra.mxu0 %v11897_v5  ;;  %v2925_v37 = vmax.f32 %v2629_v20, 0.0  ;;  %v2522_v53 = vadd.f32 %v2521_v26, %v13160_v44  ;;  %v11909_v5 = vld [vmem:[#allocation8 + $0x5e8] ss:$16 sps:$4 sm:$0xff]  }
 0x1ee   :  { %v2634_v49 = vpop.f32.mrf.mxu1  ;;  %v2523_v25 = vpop.f32.mrf.mxu0  ;;  %3993 = vmatprep.subr.bf16.mxu0 %v11905_v14 }
 0x1ef   :  { %v2926_v4 = vmax.f32 %v2631_v28, 0.0  ;;  %v2524_v2 = vadd.f32 %v2523_v25, %v13156_v32  ;;  %v13213_v20 = vpack.c.bf16 %v2925_v37, %v2921_v40  ;;  %v2635_v26 = vadd.f32 %v2634_v49, %v2522_v53 }
 0x1f0   :  { %v2636_v42 = vpop.f32.mrf.mxu1  ;;  %v2525_v46 = vpop.f32.mrf.mxu0 }
 0x1f1   :  { %v2526_v62 = vadd.f32 %v2525_v46, %v13160_v44  ;;  %3994 = vmatpush1.bf16.msra.mxu0 %v11903_v31  ;;  %v13211_v19 = vpack.c.bf16 %v2926_v4, %v2922_v39  ;;  %v2637_v48 = vadd.f32 %v2636_v42, %v2524_v2  ;;  %v11915_v4 = vld [vmem:[#allocation8 + $0x5c8] ss:$16 sps:$4 sm:$0xff]  }
 0x1f2   :  { %v2638_v63 = vpop.f32.mrf.mxu1  ;;  %v2527_v14 = vpop.f32.mrf.mxu0  ;;  %3995 = vmatprep.subr.bf16.mxu0 %v11911_v58  ;;  %v11923_v58 = vld [vmem:[#allocation8 + $0x5ac] ss:$16 sps:$4 sm:$0xff]  }
 0x1f3   :  { %v2639_v28 = vadd.f32 %v2638_v63, %v2526_v62  ;;  %v2528_v25 = vadd.f32 %v2527_v14, %v13156_v32  ;;  %3825 = vmatprep.mubr.bf16.mxu0 %v13211_v19  ;;  %v2930_v46 = vmax.f32 %v2637_v48, 0.0  ;;  %v2929_v62 = vmax.f32 %v2635_v26, 0.0  ;;  %v11929_v48 = vld [vmem:[#allocation8 + $0x58c] ss:$16 sps:$4 sm:$0xff]  }
 0x1f4   :  { %v2640_v13 = vpop.f32.mrf.mxu1  ;;  %v2531_v1 = vpop.f32.mrf.mxu0  ;;  %3826 = vmatmul.mubr.bf16.gmra.mxu0 %v13213_v20 }
 0x1f5   :  { %v2641_v31 = vadd.f32 %v2640_v13, %v2528_v25  ;;  %3996 = vmatpush2.bf16.msra.mxu0 %v11909_v5  ;;  %v2933_v37 = vmax.f32 %v2639_v28, 0.0  ;;  %v2532_v14 = vadd.f32 %v2531_v1, %v13160_v44  ;;  %v11921_v5 = vld [vmem:[#allocation8 + $0x5a8] ss:$16 sps:$4 sm:$0xff]  }
 0x1f6   :  { %v2644_v39 = vpop.f32.mrf.mxu1  ;;  %v2533_v40 = vpop.f32.mrf.mxu0  ;;  %3997 = vmatprep.subr.bf16.mxu0 %v11917_v23 }
 0x1f7   :  { %v2934_v2 = vmax.f32 %v2641_v31, 0.0  ;;  %v2534_v63 = vadd.f32 %v2533_v40, %v13156_v32  ;;  %v13223_v28 = vpack.c.bf16 %v2933_v37, %v2929_v62  ;;  %v2645_v1 = vadd.f32 %v2644_v39, %v2532_v14 }
 0x1f8   :  { %v2646_v42 = vpop.f32.mrf.mxu1  ;;  %v2535_v49 = vpop.f32.mrf.mxu0 }
 0x1f9   :  { %v2536_v53 = vadd.f32 %v2535_v49, %v13160_v44  ;;  %3998 = vmatpush2.bf16.msra.mxu0 %v11915_v4  ;;  %v13221_v25 = vpack.c.bf16 %v2934_v2, %v2930_v46  ;;  %v2647_v13 = vadd.f32 %v2646_v42, %v2534_v63  ;;  %v11927_v2 = vld [vmem:[#allocation8 + $0x588] ss:$16 sps:$4 sm:$0xff]  }
 0x1fa   :  { %v2648_v60 = vpop.f32.mrf.mxu1  ;;  %v2537_v23 = vpop.f32.mrf.mxu0  ;;  %3999 = vmatprep.subr.bf16.mxu0 %v11923_v58  ;;  %v11935_v58 = vld [vmem:[#allocation8 + $0x56c] ss:$16 sps:$4 sm:$0xff]  }
 0x1fb   :  { %v2649_v31 = vadd.f32 %v2648_v60, %v2536_v53  ;;  %v2538_v40 = vadd.f32 %v2537_v23, %v13156_v32  ;;  %3835 = vmatprep.mubr.bf16.mxu0 %v13221_v25  ;;  %v2938_v49 = vmax.f32 %v2647_v13, 0.0  ;;  %v2937_v53 = vmax.f32 %v2645_v1, 0.0  ;;  %v11941_v13 = vld [vmem:[#allocation8 + $0x54c] ss:$16 sps:$4 sm:$0xff]  }
 0x1fc   :  { %v2650_v26 = vpop.f32.mrf.mxu1  ;;  %v2541_v51 = vpop.f32.mrf.mxu0  ;;  %3836 = vmatmul.mubr.bf16.gmra.mxu0 %v13223_v28 }
 0x1fd   :  { %v2651_v4 = vadd.f32 %v2650_v26, %v2538_v40  ;;  %4000 = vmatpush2.bf16.msra.mxu0 %v11921_v5  ;;  %v2941_v37 = vmax.f32 %v2649_v31, 0.0  ;;  %v2542_v23 = vadd.f32 %v2541_v51, %v13160_v44  ;;  %v11933_v5 = vld [vmem:[#allocation8 + $0x568] ss:$16 sps:$4 sm:$0xff]   ;;  %v13239_v51 = vrot.slane %v13148_v45, %v13047_v55 }
 0x1fe   :  { %v2654_v46 = vpop.f32.mrf.mxu1  ;;  %v2543_v62 = vpop.f32.mrf.mxu0  ;;  %4001 = vmatprep.subr.bf16.mxu0 %v11929_v48 }
 0x1ff   :  { %v2942_v63 = vmax.f32 %v2651_v4, 0.0  ;;  %v2544_v60 = vadd.f32 %v2543_v62, %v13156_v32  ;;  %v13233_v31 = vpack.c.bf16 %v2941_v37, %v2937_v53 }
 0x200   :  { %v2656_v42 = vpop.f32.mrf.mxu1  ;;  %v2545_v39 = vpop.f32.mrf.mxu0 }
 0x201   :  { %v2546_v14 = vadd.f32 %v2545_v39, %v13160_v44  ;;  %4002 = vmatpush2.bf16.msra.mxu0 %v11927_v2  ;;  %v13231_v40 = vpack.c.bf16 %v2942_v63, %v2938_v49  ;;  %v2657_v26 = vadd.f32 %v2656_v42, %v2544_v60  ;;  %v2655_v44 = vadd.f32 %v2654_v46, %v2542_v23  ;;  %v11947_v60 = vld [vmem:[#allocation8 + $0x52c] ss:$16 sps:$4 sm:$0xff]  }
 0x202   :  { %v2658_v35 = vpop.f32.mrf.mxu1  ;;  %v2547_v48 = vpop.f32.mrf.mxu0  ;;  %4003 = vmatprep.subr.bf16.mxu0 %v11935_v58  ;;  %v13243_v2 = vrot.slane %v13148_v45, %v13041_v18 }
 0x203   :  { %v2659_v4 = vadd.f32 %v2658_v35, %v2546_v14  ;;  %v2548_v62 = vadd.f32 %v2547_v48, %v13156_v32  ;;  %3845 = vmatprep.mubr.bf16.mxu0 %v13231_v40  ;;  %v11939_v35 = vld [vmem:[#allocation8 + $0x548] ss:$16 sps:$4 sm:$0xff]   ;;  %v2946_v42 = vmax.f32 %v2657_v26, 0.0  ;;  %v2945_v23 = vmax.f32 %v2655_v44, 0.0  ;;  %v11953_v26 = vld [vmem:[#allocation8 + $0x50c] ss:$16 sps:$4 sm:$0xff]  }
 0x204   :  { %v2660_v1 = vpop.f32.mrf.mxu1  ;;  %v2697_v37 = vpop.f32.mrf.mxu0  ;;  %3846 = vmatmul.mubr.bf16.gmra.mxu0 %v13233_v31 }
 0x205   :  { %v2661_v58 = vadd.f32 %v2660_v1, %v2548_v62  ;;  %4004 = vmatpush2.bf16.msra.mxu0 %v11933_v5  ;;  %v2949_v32 = vmax.f32 %v2659_v4, 0.0  ;;  %v2698_v45 = vadd.f32 %v2697_v37, %v13243_v2  ;;  %v11945_v5 = vld [vmem:[#allocation8 + $0x528] ss:$16 sps:$4 sm:$0xff]  }
 0x206   :  { %v2810_v49 = vpop.f32.mrf.mxu1  ;;  %v2699_v63 = vpop.f32.mrf.mxu0  ;;  %4005 = vmatprep.subr.bf16.mxu0 %v11941_v13 }
 0x207   :  { %v2950_v53 = vmax.f32 %v2661_v58, 0.0  ;;  %v2700_v39 = vadd.f32 %v2699_v63, %v13239_v51  ;;  %v13251_v4 = vpack.c.bf16 %v2949_v32, %v2945_v23  ;;  %v2811_v37 = vadd.f32 %v2810_v49, %v2698_v45  ;;  %v11951_v32 = vld [vmem:[#allocation8 + $0x508] ss:$16 sps:$4 sm:$0xff]  }
 0x208   :  { %v2812_v46 = vpop.f32.mrf.mxu1  ;;  %v2701_v14 = vpop.f32.mrf.mxu0 }
 0x209   :  { %v2702_v48 = vadd.f32 %v2701_v14, %v13243_v2  ;;  %4006 = vmatpush2.bf16.msra.mxu0 %v11939_v35  ;;  %v13249_v62 = vpack.c.bf16 %v2950_v53, %v2946_v42  ;;  %v2813_v1 = vadd.f32 %v2812_v46, %v2700_v39  ;;  %v11959_v39 = vld [vmem:[#allocation8 + $0xe4] ss:$16 sps:$4 sm:$0xff]  }
 0x20a   :  { %v2814_v55 = vpop.f32.mrf.mxu1  ;;  %v2703_v13 = vpop.f32.mrf.mxu0  ;;  %4007 = vmatprep.subr.bf16.mxu0 %v11947_v60 }
 0x20b   :  { %v2815_v58 = vadd.f32 %v2814_v55, %v2702_v48  ;;  %v2704_v63 = vadd.f32 %v2703_v13, %v13239_v51  ;;  %3855 = vmatprep.mubr.bf16.mxu0 %v13249_v62  ;;  %v2892_v55 = vmax.f32 %v2813_v1, 0.0  ;;  %v2891_v48 = vmax.f32 %v2811_v37, 0.0  ;;  %v11962_v1 = vld [vmem:[#allocation8 + $0x6cc] ss:$16 sps:$4 sm:$0xff]  }
 0x20c   :  { %v2816_v44 = vpop.f32.mrf.mxu1  ;;  %v2707_v18 = vpop.f32.mrf.mxu0  ;;  %3856 = vmatmul.mubr.bf16.gmra.mxu0 %v13251_v4 }
 0x20d   :  { %v2817_v35 = vadd.f32 %v2816_v44, %v2704_v63  ;;  %4008 = vmatpush2.bf16.msra.mxu0 %v11945_v5  ;;  %4011 = vmatprep.mubr.bf16.mxu0 %v13171_v57  ;;  %v2895_v53 = vmax.f32 %v2815_v58, 0.0  ;;  %v2708_v49 = vadd.f32 %v2707_v18, %v13243_v2  ;;  %v11954_v57 = vld [vmem:[#allocation8 + $0x6e8] ss:$16 sps:$4 sm:$0xff]   ;;  %v11957_v44 = vld [vmem:[#allocation8 + $0xe0] ss:$16 sps:$4 sm:$0xff]  }
 0x20e   :  { %v2820_v42 = vpop.f32.mrf.mxu1  ;;  %v2709_v60 = vpop.f32.mrf.mxu0  ;;  %4009 = vmatprep.subr.bf16.mxu0 %v11953_v26  ;;  %v11965_v18 = vld [vmem:[#allocation8 + $0xc4] ss:$16 sps:$4 sm:$0xff]  }
 0x20f   :  { %v2896_v46 = vmax.f32 %v2817_v35, 0.0  ;;  %v2710_v23 = vadd.f32 %v2709_v60, %v13239_v51  ;;  %v13262_v58 = vpack.c.bf16 %v2895_v53, %v2891_v48 }
 0x210   :  { %v2822_v14 = vpop.f32.mrf.mxu1  ;;  %v2711_v45 = vpop.f32.mrf.mxu0 }
 0x211   :  { %v2712_v13 = vadd.f32 %v2711_v45, %v13243_v2  ;;  %4010 = vmatpush2.bf16.msra.mxu0 %v11951_v32  ;;  %v13260_v5 = vpack.c.bf16 %v2896_v46, %v2892_v55  ;;  %v2823_v35 = vadd.f32 %v2822_v14, %v2710_v23  ;;  %v2821_v45 = vadd.f32 %v2820_v42, %v2708_v49  ;;  %v11963_v23 = vld [vmem:[#allocation8 + $0xc0] ss:$16 sps:$4 sm:$0xff]   ;;  %v11968_v14 = vld [vmem:[#allocation8 + $0x6ac] ss:$16 sps:$4 sm:$0xff]  }
 0x212   :  { %v2824_v63 = vpop.f32.mrf.mxu1  ;;  %v2713_v26 = vpop.f32.mrf.mxu0  ;;  %4845 = vmatprep.subr.bf16.mxu0 %v11959_v39  ;;  %v11960_v39 = vld [vmem:[#allocation8 + $0x6c8] ss:$16 sps:$4 sm:$0xff]  }
 0x213   :  { %v2825_v60 = vadd.f32 %v2824_v63, %v2712_v13  ;;  %v2714_v37 = vadd.f32 %v2713_v26, %v13239_v51  ;;  %3898 = vmatprep.mubr.bf16.mxu1 %v13260_v5  ;;  %v2900_v48 = vmax.f32 %v2823_v35, 0.0  ;;  %v11971_v63 = vld [vmem:[#allocation8 + $0xa4] ss:$16 sps:$4 sm:$0xff]  }
 0x214   :  { %v2826_v29 = vpop.f32.mrf.mxu1  ;;  %v2717_v10 = vpop.f32.mrf.mxu0  ;;  %3899 = vmatmul.mubr.bf16.vlgmr.msra.gmra.mxu1 %v13262_v58  ;;  %4012 = vmatmul.mubr.bf16.vlgmr.msra.gmra.mxu0 %v13173_v22  ;;  %v2899_v22 = vmax.f32 %v2821_v45, 0.0 }
 0x215   :  { %v2827_v32 = vadd.f32 %v2826_v29, %v2714_v37  ;;  %4021 = vmatprep.mubr.bf16.mxu0 %v13181_v21  ;;  %4093 = vmatpush1.bf16.msra.mxu1 %v11954_v57  ;;  %v2903_v55 = vmax.f32 %v2825_v60, 0.0  ;;  %v2718_v29 = vadd.f32 %v2717_v10, %v13243_v2  ;;  %v11969_v37 = vld [vmem:[#allocation8 + $0xa0] ss:$16 sps:$4 sm:$0xff]  }
 0x216   :  { %v2830_v53 = vpop.f32.mrf.mxu1  ;;  %4846 = vmatpush1.bf16.msra.mxu0 %v11957_v44  ;;  %v2719_v46 = vpop.f32.mrf.mxu0  ;;  %4094 = vmatprep.subr.bf16.mxu1 %v11962_v1  ;;  %v11966_v1 = vld [vmem:[#allocation8 + $0x6a8] ss:$16 sps:$4 sm:$0xff]  }
 0x217   :  { %v2904_v13 = vmax.f32 %v2827_v32, 0.0  ;;  %v2720_v42 = vadd.f32 %v2719_v46, %v13239_v51  ;;  %4847 = vmatprep.subr.bf16.mxu0 %v11965_v18  ;;  %v13274_v60 = vpack.c.bf16 %v2903_v55, %v2899_v22  ;;  %v11974_v32 = vld [vmem:[#allocation8 + $0x68c] ss:$16 sps:$4 sm:$0xff]  }
 0x218   :  { %v2832_v49 = vpop.f32.mrf.mxu1  ;;  %v2721_v26 = vpop.f32.mrf.mxu0  ;;  %v11980_v22 = vld [vmem:[#allocation8 + $0x66c] ss:$16 sps:$4 sm:$0xff]  }
 0x219   :  { %v2722_v21 = vadd.f32 %v2721_v26, %v13243_v2  ;;  %4095 = vmatpush1.bf16.msra.mxu1 %v11960_v39  ;;  %v13272_v44 = vpack.c.bf16 %v2904_v13, %v2900_v48  ;;  %v2833_v18 = vadd.f32 %v2832_v49, %v2720_v42  ;;  %v11977_v26 = vld [vmem:[#allocation8 + $0x84] ss:$16 sps:$4 sm:$0xff]   ;;  %v2831_v39 = vadd.f32 %v2830_v53, %v2718_v29  ;;  %v11975_v49 = vld [vmem:[#allocation8 + $0x80] ss:$16 sps:$4 sm:$0xff]  }
 0x21a   :  { %v2834_v57 = vpop.f32.mrf.mxu1  ;;  %4848 = vmatpush1.bf16.msra.mxu0 %v11963_v23  ;;  %v2723_v35 = vpop.f32.mrf.mxu0  ;;  %4096 = vmatprep.subr.bf16.mxu1 %v11968_v14  ;;  %v11972_v14 = vld [vmem:[#allocation8 + $0x688] ss:$16 sps:$4 sm:$0xff]  }
 0x21b   :  { %v2835_v46 = vadd.f32 %v2834_v57, %v2722_v21  ;;  %v2724_v45 = vadd.f32 %v2723_v35, %v13239_v51  ;;  %3908 = vmatprep.mubr.bf16.mxu1 %v13272_v44  ;;  %4849 = vmatprep.subr.bf16.mxu0 %v11971_v63  ;;  %v2908_v63 = vmax.f32 %v2833_v18, 0.0  ;;  %v11983_v57 = vld [vmem:[#allocation8 + $0x64] ss:$16 sps:$4 sm:$0xff]  }
 0x21c   :  { %v2836_v10 = vpop.f32.mrf.mxu1  ;;  %v2727_v48 = vpop.f32.mrf.mxu0  ;;  %3909 = vmatmul.mubr.bf16.gmra.mxu1 %v13274_v60  ;;  %4022 = vmatmul.mubr.bf16.gmra.mxu0 %v13183_v47  ;;  %v2907_v47 = vmax.f32 %v2831_v39, 0.0 }
 0x21d   :  { %v2837_v55 = vadd.f32 %v2836_v10, %v2724_v45  ;;  %4031 = vmatprep.mubr.bf16.mxu0 %v13191_v43  ;;  %4097 = vmatpush1.bf16.msra.mxu1 %v11966_v1  ;;  %v2911_v13 = vmax.f32 %v2835_v46, 0.0  ;;  %v2728_v35 = vadd.f32 %v2727_v48, %v13243_v2  ;;  %v11981_v10 = vld [vmem:[#allocation8 + $0x60] ss:$16 sps:$4 sm:$0xff]  }
 0x21e   :  { %v2840_v23 = vpop.f32.mrf.mxu1  ;;  %4850 = vmatpush1.bf16.msra.mxu0 %v11969_v37  ;;  %v2729_v42 = vpop.f32.mrf.mxu0  ;;  %4098 = vmatprep.subr.bf16.mxu1 %v11974_v32  ;;  %v11978_v32 = vld [vmem:[#allocation8 + $0x668] ss:$16 sps:$4 sm:$0xff]  }
 0x21f   :  { %v2912_v21 = vmax.f32 %v2837_v55, 0.0  ;;  %v2730_v53 = vadd.f32 %v2729_v42, %v13239_v51  ;;  %4851 = vmatprep.subr.bf16.mxu0 %v11977_v26  ;;  %v13286_v46 = vpack.c.bf16 %v2911_v13, %v2907_v47  ;;  %v11986_v55 = vld [vmem:[#allocation8 + $0x64c] ss:$16 sps:$4 sm:$0xff]  }
 0x220   :  { %v2842_v29 = vpop.f32.mrf.mxu1  ;;  %v2731_v45 = vpop.f32.mrf.mxu0  ;;  %v11992_v47 = vld [vmem:[#allocation8 + $0x62c] ss:$16 sps:$4 sm:$0xff]  }
 0x221   :  { %v2732_v43 = vadd.f32 %v2731_v45, %v13243_v2  ;;  %4099 = vmatpush1.bf16.msra.mxu1 %v11972_v14  ;;  %v13284_v37 = vpack.c.bf16 %v2912_v21, %v2908_v63  ;;  %v2843_v26 = vadd.f32 %v2842_v29, %v2730_v53  ;;  %v11989_v45 = vld [vmem:[#allocation8 + $0x44] ss:$16 sps:$4 sm:$0xff]   ;;  %v2841_v14 = vadd.f32 %v2840_v23, %v2728_v35  ;;  %v11987_v29 = vld [vmem:[#allocation8 + $0x40] ss:$16 sps:$4 sm:$0xff]  }
 0x222   :  { %v2844_v1 = vpop.f32.mrf.mxu1  ;;  %4852 = vmatpush1.bf16.msra.mxu0 %v11975_v49  ;;  %v2733_v18 = vpop.f32.mrf.mxu0  ;;  %4100 = vmatprep.subr.bf16.mxu1 %v11980_v22  ;;  %v11984_v22 = vld [vmem:[#allocation8 + $0x648] ss:$16 sps:$4 sm:$0xff]  }
 0x223   :  { %v2845_v42 = vadd.f32 %v2844_v1, %v2732_v43  ;;  %v2734_v39 = vadd.f32 %v2733_v18, %v13239_v51  ;;  %3918 = vmatprep.mubr.bf16.mxu1 %v13284_v37  ;;  %4853 = vmatprep.subr.bf16.mxu0 %v11983_v57  ;;  %v2916_v57 = vmax.f32 %v2843_v26, 0.0  ;;  %v11995_v1 = vld [vmem:[#allocation8 + $0x24] ss:$16 sps:$4 sm:$0xff]  }
 0x224   :  { %v2846_v48 = vpop.f32.mrf.mxu1  ;;  %v2737_v63 = vpop.f32.mrf.mxu0  ;;  %3919 = vmatmul.mubr.bf16.gmra.mxu1 %v13286_v46  ;;  %4032 = vmatmul.mubr.bf16.gmra.mxu0 %v13193_v15  ;;  %v2915_v15 = vmax.f32 %v2841_v14, 0.0 }
 0x225   :  { %v2847_v13 = vadd.f32 %v2846_v48, %v2734_v39  ;;  %4041 = vmatprep.mubr.bf16.mxu0 %v13201_v61  ;;  %4101 = vmatpush1.bf16.msra.mxu1 %v11978_v32  ;;  %v2919_v21 = vmax.f32 %v2845_v42, 0.0  ;;  %v2738_v18 = vadd.f32 %v2737_v63, %v13243_v2  ;;  %v11993_v48 = vld [vmem:[#allocation8 + $0x20] ss:$16 sps:$4 sm:$0xff]  }
 0x226   :  { %v2850_v49 = vpop.f32.mrf.mxu1  ;;  %4854 = vmatpush1.bf16.msra.mxu0 %v11981_v10  ;;  %v2739_v53 = vpop.f32.mrf.mxu0  ;;  %4102 = vmatprep.subr.bf16.mxu1 %v11986_v55  ;;  %v11990_v55 = vld [vmem:[#allocation8 + $0x628] ss:$16 sps:$4 sm:$0xff]  }
 0x227   :  { %v2920_v43 = vmax.f32 %v2847_v13, 0.0  ;;  %v2740_v23 = vadd.f32 %v2739_v53, %v13239_v51  ;;  %4855 = vmatprep.subr.bf16.mxu0 %v11989_v45  ;;  %v13298_v42 = vpack.c.bf16 %v2919_v21, %v2915_v15  ;;  %v11998_v13 = vld [vmem:[#allocation8 + $0x60c] ss:$16 sps:$4 sm:$0xff]  }
 0x228   :  { %v2852_v35 = vpop.f32.mrf.mxu1  ;;  %v2741_v39 = vpop.f32.mrf.mxu0  ;;  %v12004_v15 = vld [vmem:[#allocation8 + $0x7ec] ss:$16 sps:$4 sm:$0xff]  }
 0x229   :  { %v2742_v61 = vadd.f32 %v2741_v39, %v13243_v2  ;;  %4103 = vmatpush1.bf16.msra.mxu1 %v11984_v22  ;;  %v13296_v10 = vpack.c.bf16 %v2920_v43, %v2916_v57  ;;  %v2853_v45 = vadd.f32 %v2852_v35, %v2740_v23  ;;  %v12001_v39 = vld [vmem:[#allocation8 + $0x4] ss:$16 sps:$4 sm:$0xff]   ;;  %v2851_v22 = vadd.f32 %v2850_v49, %v2738_v18  ;;  %v11999_v35 = vld [vmem:[#allocation8] ss:$16 sps:$4 sm:$0xff]  }
 0x22a   :  { %v2854_v32 = vpop.f32.mrf.mxu1  ;;  %4856 = vmatpush1.bf16.msra.mxu0 %v11987_v29  ;;  %v2743_v26 = vpop.f32.mrf.mxu0  ;;  %4104 = vmatprep.subr.bf16.mxu1 %v11992_v47  ;;  %v11996_v47 = vld [vmem:[#allocation8 + $0x608] ss:$16 sps:$4 sm:$0xff]  }
 0x22b   :  { %v2855_v53 = vadd.f32 %v2854_v32, %v2742_v61  ;;  %v2744_v14 = vadd.f32 %v2743_v26, %v13239_v51  ;;  %3928 = vmatprep.mubr.bf16.mxu1 %v13296_v10  ;;  %4857 = vmatprep.subr.bf16.mxu0 %v11995_v1  ;;  %v2924_v1 = vmax.f32 %v2853_v45, 0.0  ;;  %v12007_v32 = vld [vmem:[#allocation8 + $0x1e4] ss:$16 sps:$4 sm:$0xff]  }
 0x22c   :  { %v2856_v63 = vpop.f32.mrf.mxu1  ;;  %v2747_v57 = vpop.f32.mrf.mxu0  ;;  %3929 = vmatmul.mubr.bf16.gmra.mxu1 %v13298_v42  ;;  %4042 = vmatmul.mubr.bf16.gmra.mxu0 %v13203_v36  ;;  %v2923_v36 = vmax.f32 %v2851_v22, 0.0 }
 0x22d   :  { %v2857_v21 = vadd.f32 %v2856_v63, %v2744_v14  ;;  %4051 = vmatprep.mubr.bf16.mxu0 %v13211_v19  ;;  %4105 = vmatpush1.bf16.msra.mxu1 %v11990_v55  ;;  %v2927_v43 = vmax.f32 %v2855_v53, 0.0  ;;  %v2748_v26 = vadd.f32 %v2747_v57, %v13243_v2  ;;  %v12005_v63 = vld [vmem:[#allocation8 + $0x1e0] ss:$16 sps:$4 sm:$0xff]  }
 0x22e   :  { %v2860_v29 = vpop.f32.mrf.mxu1  ;;  %4858 = vmatpush1.bf16.msra.mxu0 %v11993_v48  ;;  %v2749_v23 = vpop.f32.mrf.mxu0  ;;  %4106 = vmatprep.subr.bf16.mxu1 %v11998_v13  ;;  %v12002_v13 = vld [vmem:[#allocation8 + $0x7e8] ss:$16 sps:$4 sm:$0xff]  }
 0x22f   :  { %v2928_v61 = vmax.f32 %v2857_v21, 0.0  ;;  %v2750_v49 = vadd.f32 %v2749_v23, %v13239_v51  ;;  %4859 = vmatprep.subr.bf16.mxu0 %v12001_v39  ;;  %v13310_v53 = vpack.c.bf16 %v2927_v43, %v2923_v36  ;;  %v12010_v21 = vld [vmem:[#allocation8 + $0x7cc] ss:$16 sps:$4 sm:$0xff]  }
 0x230   :  { %v2862_v18 = vpop.f32.mrf.mxu1  ;;  %v2751_v14 = vpop.f32.mrf.mxu0  ;;  %v12016_v36 = vld [vmem:[#allocation8 + $0x7ac] ss:$16 sps:$4 sm:$0xff]  }
 0x231   :  { %v2752_v19 = vadd.f32 %v2751_v14, %v13243_v2  ;;  %4107 = vmatpush1.bf16.msra.mxu1 %v11996_v47  ;;  %v13308_v48 = vpack.c.bf16 %v2928_v61, %v2924_v1  ;;  %v2863_v39 = vadd.f32 %v2862_v18, %v2750_v49  ;;  %v12013_v14 = vld [vmem:[#allocation8 + $0x1c4] ss:$16 sps:$4 sm:$0xff]   ;;  %v2861_v47 = vadd.f32 %v2860_v29, %v2748_v26  ;;  %v12011_v18 = vld [vmem:[#allocation8 + $0x1c0] ss:$16 sps:$4 sm:$0xff]  }
 0x232   :  { %v2864_v55 = vpop.f32.mrf.mxu1  ;;  %4860 = vmatpush1.bf16.msra.mxu0 %v11999_v35  ;;  %v2753_v45 = vpop.f32.mrf.mxu0  ;;  %4108 = vmatprep.subr.bf16.mxu1 %v12004_v15  ;;  %v12008_v15 = vld [vmem:[#allocation8 + $0x7c8] ss:$16 sps:$4 sm:$0xff]  }
 0x233   :  { %v2865_v23 = vadd.f32 %v2864_v55, %v2752_v19  ;;  %v2754_v22 = vadd.f32 %v2753_v45, %v13239_v51  ;;  %3938 = vmatprep.mubr.bf16.mxu1 %v13308_v48  ;;  %4861 = vmatprep.subr.bf16.mxu0 %v12007_v32  ;;  %v2932_v32 = vmax.f32 %v2863_v39, 0.0  ;;  %v12019_v55 = vld [vmem:[#allocation8 + $0x1a4] ss:$16 sps:$4 sm:$0xff]  }
 0x234   :  { %v2866_v57 = vpop.f32.mrf.mxu1  ;;  %v2757_v1 = vpop.f32.mrf.mxu0  ;;  %3939 = vmatmul.mubr.bf16.gmra.mxu1 %v13310_v53  ;;  %4052 = vmatmul.mubr.bf16.gmra.mxu0 %v13213_v20  ;;  %v2931_v20 = vmax.f32 %v2861_v47, 0.0 }
 0x235   :  { %v2867_v43 = vadd.f32 %v2866_v57, %v2754_v22  ;;  %4061 = vmatprep.mubr.bf16.mxu0 %v13221_v25  ;;  %4109 = vmatpush2.bf16.msra.mxu1 %v12002_v13  ;;  %v2935_v61 = vmax.f32 %v2865_v23, 0.0  ;;  %v2758_v45 = vadd.f32 %v2757_v1, %v13243_v2  ;;  %v12017_v57 = vld [vmem:[#allocation8 + $0x1a0] ss:$16 sps:$4 sm:$0xff]  }
 0x236   :  { %v2870_v35 = vpop.f32.mrf.mxu1  ;;  %4862 = vmatpush2.bf16.msra.mxu0 %v12005_v63  ;;  %v2759_v49 = vpop.f32.mrf.mxu0  ;;  %4110 = vmatprep.subr.bf16.mxu1 %v12010_v21  ;;  %v12014_v21 = vld [vmem:[#allocation8 + $0x7a8] ss:$16 sps:$4 sm:$0xff]  }
 0x237   :  { %v2936_v19 = vmax.f32 %v2867_v43, 0.0  ;;  %v2760_v29 = vadd.f32 %v2759_v49, %v13239_v51  ;;  %4863 = vmatprep.subr.bf16.mxu0 %v12013_v14  ;;  %v13322_v23 = vpack.c.bf16 %v2935_v61, %v2931_v20  ;;  %v12022_v43 = vld [vmem:[#allocation8 + $0x78c] ss:$16 sps:$4 sm:$0xff]  }
 0x238   :  { %v2872_v26 = vpop.f32.mrf.mxu1  ;;  %v2761_v22 = vpop.f32.mrf.mxu0  ;;  %v12028_v20 = vld [vmem:[#allocation8 + $0x76c] ss:$16 sps:$4 sm:$0xff]  }
 0x239   :  { %v2762_v25 = vadd.f32 %v2761_v22, %v13243_v2  ;;  %4111 = vmatpush2.bf16.msra.mxu1 %v12008_v15  ;;  %v13320_v63 = vpack.c.bf16 %v2936_v19, %v2932_v32  ;;  %v2873_v14 = vadd.f32 %v2872_v26, %v2760_v29  ;;  %v12025_v22 = vld [vmem:[#allocation8 + $0x184] ss:$16 sps:$4 sm:$0xff]   ;;  %v2871_v15 = vadd.f32 %v2870_v35, %v2758_v45  ;;  %v12023_v26 = vld [vmem:[#allocation8 + $0x180] ss:$16 sps:$4 sm:$0xff]  }
 0x23a   :  { %v2874_v13 = vpop.f32.mrf.mxu1  ;;  %4864 = vmatpush2.bf16.msra.mxu0 %v12011_v18  ;;  %v2763_v39 = vpop.f32.mrf.mxu0  ;;  %4112 = vmatprep.subr.bf16.mxu1 %v12016_v36  ;;  %v12020_v36 = vld [vmem:[#allocation8 + $0x788] ss:$16 sps:$4 sm:$0xff]  }
 0x23b   :  { %v2875_v49 = vadd.f32 %v2874_v13, %v2762_v25  ;;  %v2764_v47 = vadd.f32 %v2763_v39, %v13239_v51  ;;  %3948 = vmatprep.mubr.bf16.mxu1 %v13320_v63  ;;  %4865 = vmatprep.subr.bf16.mxu0 %v12019_v55  ;;  %v2940_v55 = vmax.f32 %v2873_v14, 0.0  ;;  %v12031_v13 = vld [vmem:[#allocation8 + $0x164] ss:$16 sps:$4 sm:$0xff]  }
 0x23c   :  { %v2876_v1 = vpop.f32.mrf.mxu1  ;;  %v2767_v32 = vpop.f32.mrf.mxu0  ;;  %3949 = vmatmul.mubr.bf16.gmra.mxu1 %v13322_v23  ;;  %4062 = vmatmul.mubr.bf16.gmra.mxu0 %v13223_v28  ;;  %v2939_v28 = vmax.f32 %v2871_v15, 0.0 }
 0x23d   :  { %v2877_v61 = vadd.f32 %v2876_v1, %v2764_v47  ;;  %4071 = vmatprep.mubr.bf16.mxu0 %v13231_v40  ;;  %4113 = vmatpush2.bf16.msra.mxu1 %v12014_v21  ;;  %v2943_v19 = vmax.f32 %v2875_v49, 0.0  ;;  %v2768_v39 = vadd.f32 %v2767_v32, %v13243_v2  ;;  %v12029_v1 = vld [vmem:[#allocation8 + $0x160] ss:$16 sps:$4 sm:$0xff]  }
 0x23e   :  { %v2880_v18 = vpop.f32.mrf.mxu1  ;;  %4866 = vmatpush2.bf16.msra.mxu0 %v12017_v57  ;;  %v2769_v29 = vpop.f32.mrf.mxu0  ;;  %4114 = vmatprep.subr.bf16.mxu1 %v12022_v43  ;;  %v12026_v43 = vld [vmem:[#allocation8 + $0x768] ss:$16 sps:$4 sm:$0xff]  }
 0x23f   :  { %v2944_v25 = vmax.f32 %v2877_v61, 0.0  ;;  %v2770_v35 = vadd.f32 %v2769_v29, %v13239_v51  ;;  %4867 = vmatprep.subr.bf16.mxu0 %v12025_v22  ;;  %v13334_v49 = vpack.c.bf16 %v2943_v19, %v2939_v28  ;;  %v12034_v61 = vld [vmem:[#allocation8 + $0x74c] ss:$16 sps:$4 sm:$0xff]   ;;  %v2881_v32 = vadd.f32 %v2880_v18, %v2768_v39  ;;  %v12038_v28 = vld [vmem:[#allocation8 + $0x728] ss:$16 sps:$4 sm:$0xff]  }
 0x240   :  { %v2882_v45 = vpop.f32.mrf.mxu1  ;;  %v2771_v47 = vpop.f32.mrf.mxu0  ;;  %v12046_v39 = vld [vmem:[#allocation8 + $0x70c] ss:$16 sps:$4 sm:$0xff]  }
 0x241   :  { %v2772_v40 = vadd.f32 %v2771_v47, %v13243_v2  ;;  %4115 = vmatpush2.bf16.msra.mxu1 %v12020_v36  ;;  %v13332_v57 = vpack.c.bf16 %v2944_v25, %v2940_v55  ;;  %v2883_v22 = vadd.f32 %v2882_v45, %v2770_v35  ;;  %v12037_v2 = vld [vmem:[#allocation8 + $0x144] ss:$16 sps:$4 sm:$0xff]   ;;  %v12035_v55 = vld [vmem:[#allocation8 + $0x140] ss:$16 sps:$4 sm:$0xff]   ;;  %v2947_v18 = vmax.f32 %v2881_v32, 0.0 }
 0x242   :  { %v2884_v21 = vpop.f32.mrf.mxu1  ;;  %4868 = vmatpush2.bf16.msra.mxu0 %v12023_v26  ;;  %v2773_v14 = vpop.f32.mrf.mxu0  ;;  %4116 = vmatprep.subr.bf16.mxu1 %v12028_v20  ;;  %v12032_v26 = vld [vmem:[#allocation8 + $0x748] ss:$16 sps:$4 sm:$0xff]   ;;  %v12043_v45 = vld [vmem:[#allocation8 + $0x124] ss:$16 sps:$4 sm:$0xff]   ;;  %v12062_v32 = vld [vmem:[#allocation8 + $0x2a0] ss:$16 sps:$4 sm:$0xff]  }
 0x243   :  { %v2885_v29 = vadd.f32 %v2884_v21, %v2772_v40  ;;  %v2774_v15 = vadd.f32 %v2773_v14, %v13239_v51  ;;  %3958 = vmatprep.mubr.bf16.mxu1 %v13332_v57  ;;  %4869 = vmatprep.subr.bf16.mxu0 %v12031_v13  ;;  %v12040_v51 = vld [vmem:[#allocation8 + $0x72c] ss:$16 sps:$4 sm:$0xff]   ;;  %v2948_v25 = vmax.f32 %v2883_v22, 0.0  ;;  %v12049_v47 = vld [vmem:[#allocation8 + $0x104] ss:$16 sps:$4 sm:$0xff]  }
 0x244   :  { %v2886_v36 = vpop.f32.mrf.mxu1  ;;  %3959 = vmatmul.mubr.bf16.gmra.mxu1 %v13334_v49  ;;  %4072 = vmatmul.mubr.bf16.gmra.mxu0 %v13233_v31  ;;  %v12044_v40 = vld [vmem:[#allocation8 + $0x708] ss:$16 sps:$4 sm:$0xff]   ;;  %v12047_v21 = vld [vmem:[#allocation8 + $0x100] ss:$16 sps:$4 sm:$0xff]   ;;  %v12055_v14 = vld [vmem:[#allocation8 + $0xec] ss:$16 sps:$4 sm:$0xff]  }
 0x245   :  { %v2887_v19 = vadd.f32 %v2886_v36, %v2774_v15  ;;  %4081 = vmatprep.mubr.bf16.mxu0 %v13249_v62  ;;  %4117 = vmatpush2.bf16.msra.mxu1 %v12026_v43  ;;  %v2951_v20 = vmax.f32 %v2885_v29, 0.0  ;;  %v12041_v62 = vld [vmem:[#allocation8 + $0x120] ss:$16 sps:$4 sm:$0xff]   ;;  %v12052_v43 = vld [vmem:[#allocation8 + $0x2e4] ss:$16 sps:$4 sm:$0xff]  }
 0x246   :  { %4870 = vmatpush2.bf16.msra.mxu0 %v12029_v1  ;;  %4118 = vmatprep.subr.bf16.mxu1 %v12034_v61  ;;  %v12050_v1 = vld [vmem:[#allocation8 + $0x2e0] ss:$16 sps:$4 sm:$0xff]   ;;  %v12053_v61 = vld [vmem:[#allocation8 + $0xe8] ss:$16 sps:$4 sm:$0xff]   ;;  %v12058_v22 = vld [vmem:[#allocation8 + $0x2c4] ss:$16 sps:$4 sm:$0xff]  }
 0x247   :  { %v2952_v35 = vmax.f32 %v2887_v19, 0.0  ;;  %4871 = vmatprep.subr.bf16.mxu0 %v12037_v2  ;;  %v13343_v31 = vpack.c.bf16 %v2951_v20, %v2947_v18  ;;  %v12059_v29 = vld [vmem:[#allocation8 + $0xc8] ss:$16 sps:$4 sm:$0xff]   ;;  %v12064_v15 = vld [vmem:[#allocation8 + $0x2a4] ss:$16 sps:$4 sm:$0xff]  }
 0x248   :  { %v12067_v2 = vld [vmem:[#allocation8 + $0xac] ss:$16 sps:$4 sm:$0xff]   ;;  %v12070_v36 = vld [vmem:[#allocation8 + $0x284] ss:$16 sps:$4 sm:$0xff]   ;;  %v12068_v19 = vld [vmem:[#allocation8 + $0x280] ss:$16 sps:$4 sm:$0xff]  }
 0x249   :  { %4119 = vmatpush2.bf16.msra.mxu1 %v12032_v26  ;;  %v13341_v13 = vpack.c.bf16 %v2952_v35, %v2948_v25  ;;  %v12071_v26 = vld [vmem:[#allocation8 + $0x88] ss:$16 sps:$4 sm:$0xff]   ;;  %v12076_v20 = vld [vmem:[#allocation8 + $0x264] ss:$16 sps:$4 sm:$0xff]  }
 0x24a   :  { %4872 = vmatpush2.bf16.msra.mxu0 %v12035_v55  ;;  %4120 = vmatprep.subr.bf16.mxu1 %v12040_v51  ;;  %v1052_v55 = vadd.f32 %v13003_v8, %v12944_v50  ;;  %v12079_v51 = vld [vmem:[#allocation8 + $0x6c] ss:$16 sps:$4 sm:$0xff]   ;;  %v12077_v25 = vld [vmem:[#allocation8 + $0x68] ss:$16 sps:$4 sm:$0xff]   ;;  %v12082_v35 = vld [vmem:[#allocation8 + $0x244] ss:$16 sps:$4 sm:$0xff]  }
 0x24b   :  { %3968 = vmatprep.mubr.bf16.mxu1 %v13341_v13  ;;  %4873 = vmatprep.subr.bf16.mxu0 %v12043_v45  ;;  %v12085_v45 = vld [vmem:[#allocation8 + $0x4c] ss:$16 sps:$4 sm:$0xff]   ;;  %v12080_v8 = vld [vmem:[#allocation8 + $0x240] ss:$16 sps:$4 sm:$0xff]   ;;  %v12083_v18 = vld [vmem:[#allocation8 + $0x48] ss:$16 sps:$4 sm:$0xff]  }
 0x24c   :  { %3969 = vmatmul.mubr.bf16.gmra.mxu1 %v13343_v31  ;;  %4082 = vmatmul.mubr.bf16.gmra.mxu0 %v13251_v4  ;;  %v12061_v4 = vld [vmem:[#allocation8 + $0xcc] ss:$16 sps:$4 sm:$0xff]  }
 0x24d   :  { %4121 = vmatpush2.bf16.msra.mxu1 %v12038_v28  ;;  %4124 = vmatprep.mubr.bf16.mxu1 %v13260_v5  ;;  %v12056_v5 = vld [vmem:[#allocation8 + $0x2c0] ss:$16 sps:$4 sm:$0xff]   ;;  %v12088_v28 = vld [vmem:[#allocation8 + $0x224] ss:$16 sps:$4 sm:$0xff]  }
 0x24e   :  { %4874 = vmatpush2.bf16.msra.mxu0 %v12041_v62  ;;  %4877 = vmatprep.mubr.bf16.mxu0 %v12963_v11 }
 0x24f   :  { %4122 = vmatprep.subr.bf16.mxu1 %v12046_v39  ;;  %4875 = vmatprep.subr.bf16.mxu0 %v12049_v47  ;;  %v1456_v39 = vmax.f32 %v12998_v7, 0.0  ;;  %v12086_v47 = vld [vmem:[#allocation8 + $0x220] ss:$16 sps:$4 sm:$0xff]  }
 0x250   :  { %v12092_v7 = vld [vmem:[#allocation8 + $0x200] ss:$16 sps:$4 sm:$0xff]  }
 0x251   :  { %4123 = vmatpush2.bf16.msra.mxu1 %v12044_v40  ;;  %v12094_v40 = vld [vmem:[#allocation8 + $0x204] ss:$16 sps:$4 sm:$0xff]  }
 0x252   :  { %4876 = vmatpush2.bf16.msra.mxu0 %v12047_v21  ;;  %4958 = vmatprep.subr.bf16.mxu1 %v12052_v43 }
 0x253   :  { %5071 = vmatprep.subr.bf16.mxu0 %v12055_v14  ;;  %v12097_v14 = vld [vmem:[#allocation8 + $0xc] ss:$16 sps:$4 sm:$0xff]  }
 0x254   :  { %4125 = vmatmul.mubr.bf16.vlgmr.msra.gmra.mxu1 %v13262_v58  ;;  %v12065_v58 = vld [vmem:[#allocation8 + $0xa8] ss:$16 sps:$4 sm:$0xff]  }
 0x255   :  { %4878 = vmatmul.mubr.bf16.vlgmr.msra.gmra.mxu0 %v12959_v56  ;;  %4134 = vmatprep.mubr.bf16.mxu1 %v13272_v44  ;;  %v12073_v44 = vld [vmem:[#allocation8 + $0x8c] ss:$16 sps:$4 sm:$0xff]  }
 0x256   :  { %4887 = vmatprep.mubr.bf16.mxu0 %v12975_v9  ;;  %4959 = vmatpush1.bf16.msra.mxu1 %v12050_v1  ;;  %v12100_v1 = vld [vmem:[#allocation8 + $0x3e4] ss:$16 sps:$4 sm:$0xff]  }
 0x257   :  { %5072 = vmatpush1.bf16.msra.mxu0 %v12053_v61  ;;  %4960 = vmatprep.subr.bf16.mxu1 %v12058_v22  ;;  %v1464_v22 = vmax.f32 %v13015_v30, 0.0  ;;  %v12104_v30 = vld [vmem:[#allocation8 + $0x3c0] ss:$16 sps:$4 sm:$0xff]  }
 0x258   :  { %5073 = vmatprep.subr.bf16.mxu0 %v12061_v4  ;;  %v12098_v4 = vld [vmem:[#allocation8 + $0x3e0] ss:$16 sps:$4 sm:$0xff]  }
 0x25a   :  { %4961 = vmatpush1.bf16.msra.mxu1 %v12056_v5  ;;  %v12106_v5 = vld [vmem:[#allocation8 + $0x3c4] ss:$16 sps:$4 sm:$0xff]  }
 0x25b   :  { %5074 = vmatpush1.bf16.msra.mxu0 %v12059_v29  ;;  %4962 = vmatprep.subr.bf16.mxu1 %v12064_v15 }
 0x25c   :  { %4135 = vmatmul.mubr.bf16.gmra.mxu1 %v13274_v60  ;;  %5075 = vmatprep.subr.bf16.mxu0 %v12067_v2  ;;  %v12074_v60 = vld [vmem:[#allocation8 + $0x260] ss:$16 sps:$4 sm:$0xff]   ;;  %v12109_v2 = vld [vmem:[#allocation8 + $0x1cc] ss:$16 sps:$4 sm:$0xff]  }
 0x25d   :  { %4888 = vmatmul.mubr.bf16.gmra.mxu0 %v12971_v6  ;;  %4144 = vmatprep.mubr.bf16.mxu1 %v13284_v37  ;;  %v1165_v37 = vadd.f32 %v13005_v54, %v1052_v55  ;;  %v1062_v54 = vadd.f32 %v13018_v38, %v12944_v50  ;;  %v12095_v38 = vld [vmem:[#allocation8 + $0x8] ss:$16 sps:$4 sm:$0xff]   ;;  %v12121_v55 = vld [vmem:[#allocation8 + $0x18c] ss:$16 sps:$4 sm:$0xff]  }
 0x25e   :  { %4897 = vmatprep.mubr.bf16.mxu0 %v12987_v24  ;;  %4963 = vmatpush1.bf16.msra.mxu1 %v12062_v32  ;;  %v12112_v32 = vld [vmem:[#allocation8 + $0x3a4] ss:$16 sps:$4 sm:$0xff]  }
 0x25f   :  { %5076 = vmatpush1.bf16.msra.mxu0 %v12065_v58  ;;  %4964 = vmatprep.subr.bf16.mxu1 %v12070_v36  ;;  %v1460_v62 = vmax.f32 %v1165_v37, 0.0  ;;  %v1175_v21 = vadd.f32 %v13020_v52, %v1062_v54  ;;  %v1072_v52 = vadd.f32 %v13033_v3, %v12944_v50  ;;  %v12107_v3 = vld [vmem:[#allocation8 + $0x1c8] ss:$16 sps:$4 sm:$0xff]   ;;  %v1472_v36 = vmax.f32 %v13030_v27, 0.0  ;;  %v12116_v27 = vld [vmem:[#allocation8 + $0x380] ss:$16 sps:$4 sm:$0xff]  }
 0x260   :  { %5077 = vmatprep.subr.bf16.mxu0 %v12073_v44  ;;  %v12110_v44 = vld [vmem:[#allocation8 + $0x3a0] ss:$16 sps:$4 sm:$0xff]   ;;  %v12133_v54 = vld [vmem:[#allocation8 + $0x14c] ss:$16 sps:$4 sm:$0xff]  }
 0x261   :  { %v13370_v43 = vpack.c.bf16 %v1460_v62, %v1456_v39  ;;  %v1468_v61 = vmax.f32 %v1175_v21, 0.0  ;;  %v1185_v29 = vadd.f32 %v13035_v17, %v1072_v52  ;;  %v1082_v17 = vadd.f32 %v13056_v12, %v12944_v50  ;;  %v15953_v50 = vld [vmem:[#allocation54_spill] sm:$0xff]  ;;  %v15954_v12 = vld [vmem:[#allocation57_spill] sm:$0xff] }
 0x262   :  { %4965 = vmatpush1.bf16.msra.mxu1 %v12068_v19  ;;  %v12118_v19 = vld [vmem:[#allocation8 + $0x384] ss:$16 sps:$4 sm:$0xff]   ;;  %v12128_v39 = vld [vmem:[#allocation8 + $0x340] ss:$16 sps:$4 sm:$0xff]  }
 0x263   :  { %5078 = vmatpush1.bf16.msra.mxu0 %v12071_v26  ;;  %4966 = vmatprep.subr.bf16.mxu1 %v12076_v20  ;;  %v13380_v15 = vpack.c.bf16 %v1468_v61, %v1464_v22  ;;  %v1476_v58 = vmax.f32 %v1185_v29, 0.0  ;;  %v1195_v26 = vadd.f32 %v13058_v34, %v1082_v17  ;;  %v12119_v34 = vld [vmem:[#allocation8 + $0x188] ss:$16 sps:$4 sm:$0xff]   ;;  %v15958_v21 = vld [vmem:[#allocation61_spill] sm:$0xff]  ;;  %v12142_v52 = vld [vmem:[#allocation8 + $0x304] ss:$16 sps:$4 sm:$0xff]  }
 0x264   :  { %4145 = vmatmul.mubr.bf16.gmra.mxu1 %v13286_v46  ;;  %5079 = vmatprep.subr.bf16.mxu0 %v12079_v51  ;;  %v12091_v46 = vld [vmem:[#allocation8 + $0x2c] ss:$16 sps:$4 sm:$0xff]   ;;  %v1238_v51 = vadd.f32 %v15954_v12, %v15953_v50  ;;  %v5327_v29 = vld [vmem:[#allocation5 + $0x3e0] sm:$0xff] }
 0x265   :  { %4898 = vmatmul.mubr.bf16.gmra.mxu0 %v12983_v16  ;;  %4154 = vmatprep.mubr.bf16.mxu1 %v13296_v10  ;;  %v12089_v10 = vld [vmem:[#allocation8 + $0x28] ss:$16 sps:$4 sm:$0xff]   ;;  %v13390_v20 = vpack.c.bf16 %v1476_v58, %v1472_v36  ;;  %v15962_v58 = vld [vmem:[#allocation65_spill] sm:$0xff] }
 0x266   :  { %4907 = vmatprep.mubr.bf16.mxu0 %v13001_v33  ;;  %4967 = vmatpush1.bf16.msra.mxu1 %v12074_v60  ;;  %v12124_v60 = vld [vmem:[#allocation8 + $0x364] ss:$16 sps:$4 sm:$0xff]   ;;  %v12151_v12 = vld [vmem:[#allocation8 + $0x2cc] ss:$16 sps:$4 sm:$0xff]  }
 0x267   :  { %5080 = vmatpush1.bf16.msra.mxu0 %v12077_v25  ;;  %4968 = vmatprep.subr.bf16.mxu1 %v12082_v35  ;;  %v12127_v25 = vld [vmem:[#allocation8 + $0x16c] ss:$16 sps:$4 sm:$0xff]  }
 0x268   :  { %5081 = vmatprep.subr.bf16.mxu0 %v12085_v45  ;;  %v15955_v35 = vld [vmem:[#allocation53_spill] sm:$0xff] }
 0x269   :  { %v1480_v37 = vmax.f32 %v15955_v35, 0.0  ;;  %v12122_v45 = vld [vmem:[#allocation8 + $0x360] ss:$16 sps:$4 sm:$0xff]  }
 0x26a   :  { %4969 = vmatpush1.bf16.msra.mxu1 %v12080_v8  ;;  %v15956_v8 = vld [vmem:[#allocation58_spill] sm:$0xff] }
 0x26b   :  { %5082 = vmatpush1.bf16.msra.mxu0 %v12083_v18  ;;  %4970 = vmatprep.subr.bf16.mxu1 %v12088_v28  ;;  %v12125_v18 = vld [vmem:[#allocation8 + $0x168] ss:$16 sps:$4 sm:$0xff]   ;;  %v12130_v28 = vld [vmem:[#allocation8 + $0x344] ss:$16 sps:$4 sm:$0xff]  }
 0x26c   :  { %4155 = vmatmul.mubr.bf16.gmra.mxu1 %v13298_v42  ;;  %5083 = vmatprep.subr.bf16.mxu0 %v12091_v46  ;;  %v12103_v42 = vld [vmem:[#allocation8 + $0x1ec] ss:$16 sps:$4 sm:$0xff]   ;;  %v5319_v35 = vld [vmem:[#allocation5 + $0x2e0] sm:$0xff] }
 0x26d   :  { %4908 = vmatmul.mubr.bf16.gmra.mxu0 %v12995_v41  ;;  %4164 = vmatprep.mubr.bf16.mxu1 %v13308_v48  ;;  %v12101_v48 = vld [vmem:[#allocation8 + $0x1e8] ss:$16 sps:$4 sm:$0xff]   ;;  %v15957_v46 = vld [vmem:[#allocation51_spill] sm:$0xff] }
 0x26e   :  { %4917 = vmatprep.mubr.bf16.mxu0 %v13370_v43  ;;  %4971 = vmatpush1.bf16.msra.mxu1 %v12086_v47 }
 0x26f   :  { %5084 = vmatpush1.bf16.msra.mxu0 %v12089_v10  ;;  %4972 = vmatprep.subr.bf16.mxu1 %v12094_v40  ;;  %v12131_v10 = vld [vmem:[#allocation8 + $0x148] ss:$16 sps:$4 sm:$0xff]   ;;  %v12136_v40 = vld [vmem:[#allocation8 + $0x324] ss:$16 sps:$4 sm:$0xff]  }
 0x270   :  { %5085 = vmatprep.subr.bf16.mxu0 %v12097_v14  ;;  %v12139_v14 = vld [vmem:[#allocation8 + $0x12c] ss:$16 sps:$4 sm:$0xff]  }
 0x272   :  { %4973 = vmatpush1.bf16.msra.mxu1 %v12092_v7  ;;  %v15959_v7 = vld [vmem:[#allocation56_spill] sm:$0xff] }
 0x273   :  { %5086 = vmatpush1.bf16.msra.mxu0 %v12095_v38  ;;  %4974 = vmatprep.subr.bf16.mxu1 %v12100_v1  ;;  %v1426_v38 = vmax.f32 %v15959_v7, 0.0  ;;  %v12134_v1 = vld [vmem:[#allocation8 + $0x320] ss:$16 sps:$4 sm:$0xff]  }
 0x274   :  { %4165 = vmatmul.mubr.bf16.gmra.mxu1 %v13310_v53  ;;  %5087 = vmatprep.subr.bf16.mxu0 %v12103_v42  ;;  %v12115_v53 = vld [vmem:[#allocation8 + $0x1ac] ss:$16 sps:$4 sm:$0xff]   ;;  %v15960_v42 = vld [vmem:[#allocation62_spill] sm:$0xff] }
 0x275   :  { %4918 = vmatmul.mubr.bf16.gmra.mxu0 %v13012_v59  ;;  %4174 = vmatprep.mubr.bf16.mxu1 %v13320_v63  ;;  %v12113_v63 = vld [vmem:[#allocation8 + $0x1a8] ss:$16 sps:$4 sm:$0xff]  }
 0x276   :  { %4927 = vmatprep.mubr.bf16.mxu0 %v13380_v15  ;;  %4975 = vmatpush2.bf16.msra.mxu1 %v12098_v4  ;;  %v12145_v4 = vld [vmem:[#allocation8 + $0x10c] ss:$16 sps:$4 sm:$0xff]  }
 0x277   :  { %5088 = vmatpush2.bf16.msra.mxu0 %v12101_v48  ;;  %4976 = vmatprep.subr.bf16.mxu1 %v12106_v5  ;;  %v15961_v48 = vld [vmem:[#allocation55_spill] sm:$0xff]  ;;  %v5325_v5 = vld [vmem:[#allocation5 + $0x3a0] sm:$0xff] }
 0x278   :  { %5089 = vmatprep.subr.bf16.mxu0 %v12109_v2  ;;  %v12140_v2 = vld [vmem:[#allocation8 + $0x300] ss:$16 sps:$4 sm:$0xff]   ;;  %v11315_v17 = vcombine.high %v5325_v5, %v5327_v29 }
 0x27a   :  { %4977 = vmatpush2.bf16.msra.mxu1 %v12104_v30  ;;  %v12143_v30 = vld [vmem:[#allocation8 + $0x108] ss:$16 sps:$4 sm:$0xff]  }
 0x27b   :  { %5090 = vmatpush2.bf16.msra.mxu0 %v12107_v3  ;;  %4978 = vmatprep.subr.bf16.mxu1 %v12112_v32  ;;  %v12148_v3 = vld [vmem:[#allocation8 + $0x2ec] ss:$16 sps:$4 sm:$0xff]  }
 0x27c   :  { %4175 = vmatmul.mubr.bf16.gmra.mxu1 %v13322_v23  ;;  %5091 = vmatprep.subr.bf16.mxu0 %v12115_v53  ;;  %v1484_v23 = vmax.f32 %v1195_v26, 0.0  ;;  %v15963_v53 = vld [vmem:[#allocation60_spill] sm:$0xff] }
 0x27d   :  { %4928 = vmatmul.mubr.bf16.gmra.mxu0 %v13027_v0  ;;  %4184 = vmatprep.mubr.bf16.mxu1 %v13332_v57  ;;  %v1351_v57 = vadd.f32 %v15956_v8, %v1238_v51  ;;  %v1434_v36 = vmax.f32 %v15963_v53, 0.0  ;;  %v11314_v51 = vcombine.low %v5325_v5, %v5327_v29  ;;  %v15966_v8 = vld [vmem:[#allocation69_spill] sm:$0xff]  ;;  %v12155_v29 = vld [vmem:[#allocation8 + $0x288] ss:$16 sps:$4 sm:$0xff]  }
 0x27e   :  { %4937 = vmatprep.mubr.bf16.mxu0 %v13390_v20  ;;  %4979 = vmatpush2.bf16.msra.mxu1 %v12110_v44  ;;  %v13400_v62 = vpack.c.bf16 %v1484_v23, %v1480_v37  ;;  %v5321_v44 = vld [vmem:[#allocation5 + $0x320] sm:$0xff]  ;;  %v12149_v37 = vld [vmem:[#allocation8 + $0x2c8] ss:$16 sps:$4 sm:$0xff]  }
 0x27f   :  { %5092 = vmatpush2.bf16.msra.mxu0 %v12113_v63  ;;  %4980 = vmatprep.subr.bf16.mxu1 %v12118_v19  ;;  %v1430_v47 = vmax.f32 %v1351_v57, 0.0  ;;  %v5323_v63 = vld [vmem:[#allocation5 + $0x360] sm:$0xff]  ;;  %v12146_v19 = vld [vmem:[#allocation8 + $0x2e8] ss:$16 sps:$4 sm:$0xff]   ;;  %v1268_v57 = vadd.f32 %v15966_v8, %v15953_v50 }
 0x280   :  { %5093 = vmatprep.subr.bf16.mxu0 %v12121_v55  ;;  %v5311_v5 = vld [vmem:[#allocation5 + $0x1e0] sm:$0xff] }
 0x281   :  { %v13408_v61 = vpack.c.bf16 %v1430_v47, %v1426_v38  ;;  %v5303_v8 = vld [vmem:[#allocation5 + $0xe0] sm:$0xff] }
 0x282   :  { %4981 = vmatpush2.bf16.msra.mxu1 %v12116_v27 }
 0x283   :  { %5094 = vmatpush2.bf16.msra.mxu0 %v12119_v34  ;;  %4982 = vmatprep.subr.bf16.mxu1 %v12124_v60  ;;  %v15965_v34 = vld [vmem:[#allocation59_spill] sm:$0xff]  ;;  %v11311_v60 = vcombine.high %v5321_v44, %v5323_v63 }
 0x284   :  { %4185 = vmatmul.mubr.bf16.gmra.mxu1 %v13334_v49  ;;  %5095 = vmatprep.subr.bf16.mxu0 %v12127_v25  ;;  %v1248_v49 = vadd.f32 %v15958_v21, %v15953_v50  ;;  %v5317_v25 = vld [vmem:[#allocation5 + $0x2a0] sm:$0xff]  ;;  %v12152_v21 = vld [vmem:[#allocation8 + $0x2a8] ss:$16 sps:$4 sm:$0xff]  }
 0x285   :  { %4938 = vmatmul.mubr.bf16.gmra.mxu0 %v15957_v46  ;;  %4194 = vmatprep.mubr.bf16.mxu1 %v13341_v13  ;;  %v12137_v13 = vld [vmem:[#allocation8 + $0x128] ss:$16 sps:$4 sm:$0xff]  }
 0x286   :  { %4947 = vmatprep.mubr.bf16.mxu0 %v13400_v62  ;;  %4983 = vmatpush2.bf16.msra.mxu1 %v12122_v45  ;;  %v1361_v22 = vadd.f32 %v15960_v42, %v1248_v49  ;;  %v15968_v49 = vld [vmem:[#allocation70_spill] sm:$0xff] }
 0x287   :  { %5096 = vmatpush2.bf16.msra.mxu0 %v12125_v18  ;;  %4984 = vmatprep.subr.bf16.mxu1 %v12130_v28  ;;  %v12154_v28 = vld [vmem:[#allocation8 + $0x2ac] ss:$16 sps:$4 sm:$0xff]  }
 0x288   :  { %5097 = vmatprep.subr.bf16.mxu0 %v12133_v54  ;;  %v1438_v32 = vmax.f32 %v1361_v22, 0.0  ;;  %v11307_v54 = vcombine.high %v5317_v25, %v5319_v35 }
 0x28a   :  { %4985 = vmatpush2.bf16.msra.mxu1 %v12128_v39  ;;  %v13421_v27 = vpack.c.bf16 %v1438_v32, %v1434_v36  ;;  %v15967_v39 = vld [vmem:[#allocation64_spill] sm:$0xff] }
 0x28b   :  { %5098 = vmatpush2.bf16.msra.mxu0 %v12131_v10  ;;  %4986 = vmatprep.subr.bf16.mxu1 %v12136_v40  ;;  %v1442_v47 = vmax.f32 %v15967_v39, 0.0  ;;  %v5313_v40 = vld [vmem:[#allocation5 + $0x220] sm:$0xff] }
 0x28c   :  { %4195 = vmatmul.mubr.bf16.gmra.mxu1 %v13343_v31  ;;  %5099 = vmatprep.subr.bf16.mxu0 %v12139_v14  ;;  %v1258_v31 = vadd.f32 %v15962_v58, %v15953_v50  ;;  %v1381_v14 = vadd.f32 %v15968_v49, %v1268_v57  ;;  %v12160_v58 = vld [vmem:[#allocation8 + $0x26c] ss:$16 sps:$4 sm:$0xff]   ;;  %v12161_v57 = vld [vmem:[#allocation8 + $0x248] ss:$16 sps:$4 sm:$0xff]  }
 0x28d   :  { %4948 = vmatmul.mubr.bf16.gmra.mxu0 %v15961_v48  ;;  %4990 = vmatprep.mubr.bf16.mxu1 %v13408_v61 }
 0x28e   :  { %4987 = vmatpush2.bf16.msra.mxu1 %v12134_v1  ;;  %5103 = vmatprep.mubr.bf16.mxu0 %v12963_v11  ;;  %v15964_v11 = vld [vmem:[#allocation66_spill] sm:$0xff]  ;;  %v12157_v1 = vld [vmem:[#allocation8 + $0x28c] ss:$16 sps:$4 sm:$0xff]  }
 0x28f   :  { %5100 = vmatpush2.bf16.msra.mxu0 %v12137_v13  ;;  %4988 = vmatprep.subr.bf16.mxu1 %v12142_v52  ;;  %v1371_v26 = vadd.f32 %v15964_v11, %v1258_v31  ;;  %v11306_v13 = vcombine.low %v5317_v25, %v5319_v35  ;;  %v15969_v52 = vld [vmem:[#allocation63_spill] sm:$0xff] }
 0x290   :  { %5101 = vmatprep.subr.bf16.mxu0 %v12145_v4  ;;  %v5309_v4 = vld [vmem:[#allocation5 + $0x1a0] sm:$0xff]  ;;  %v15973_v25 = vld [vmem:[#allocation67_spill] sm:$0xff] }
 0x291   :  { %v1446_v45 = vmax.f32 %v1371_v26, 0.0  ;;  %v11299_v31 = vcombine.high %v5309_v4, %v5311_v5 }
 0x292   :  { %4989 = vmatpush2.bf16.msra.mxu1 %v12140_v2  ;;  %v1454_v2 = vmax.f32 %v1381_v14, 0.0  ;;  %v5297_v14 = vld [vmem:[#allocation5 + $0x20] sm:$0xff] }
 0x293   :  { %5102 = vmatpush2.bf16.msra.mxu0 %v12143_v30  ;;  %5184 = vmatprep.subr.bf16.mxu1 %v12148_v3  ;;  %v13439_v38 = vpack.c.bf16 %v1446_v45, %v1442_v47  ;;  %v15970_v30 = vld [vmem:[#allocation73_spill] sm:$0xff] }
 0x294   :  { %v13419_v55 = vpop.f32.mrf.mxu0  ;;  %6087 = vmatprep.subr.bf16.mxu0 %v11315_v17  ;;  %v1278_v3 = vadd.f32 %v15970_v30, %v15953_v50  ;;  %v15971_v17 = vld [vmem:[#allocation68_spill] sm:$0xff]  ;;  %v5301_v45 = vld [vmem:[#allocation5 + $0xa0] sm:$0xff]  ;;  %v12166_v47 = vld [vmem:[#allocation8 + $0x22c] ss:$16 sps:$4 sm:$0xff]  }
 0x295   :  { %4991 = vmatmul.mubr.bf16.vlgmr.msra.gmra.mxu1 %v15965_v34  ;;  %v1450_v53 = vmax.f32 %v15971_v17, 0.0  ;;  %v15977_v30 = vld [vmem:[#allocation71_spill] sm:$0xff]  ;;  %v12167_v17 = vld [vmem:[#allocation8 + $0x208] ss:$16 sps:$4 sm:$0xff]  }
 0x296   :  { %5104 = vmatmul.mubr.bf16.vlgmr.msra.gmra.mxu0 %v12959_v56  ;;  %5000 = vmatprep.mubr.bf16.mxu1 %v13421_v27  ;;  %v13426_v23 = vpop.f32.mrf.mxu0  ;;  %v11310_v56 = vcombine.low %v5321_v44, %v5323_v63  ;;  %v5305_v44 = vld [vmem:[#allocation5 + $0x120] sm:$0xff]  ;;  %v12158_v63 = vld [vmem:[#allocation8 + $0x268] ss:$16 sps:$4 sm:$0xff]  }
 0x297   :  { %5113 = vmatprep.mubr.bf16.mxu0 %v12975_v9  ;;  %5185 = vmatpush1.bf16.msra.mxu1 %v12146_v19  ;;  %v5315_v9 = vld [vmem:[#allocation5 + $0x260] sm:$0xff] }
 0x298   :  { %v13431_v18 = vpop.f32.mrf.mxu0  ;;  %5186 = vmatprep.subr.bf16.mxu1 %v12151_v12  ;;  %6088 = vmatpush1.bf16.msra.mxu0 %v11314_v51  ;;  %v11303_v42 = vcombine.high %v5313_v40, %v5315_v9  ;;  %v15972_v19 = vld [vmem:[#allocation74_spill] sm:$0xff]  ;;  %v13457_v12 = vpack.c.bf16 %v1454_v2, %v1450_v53  ;;  %v12163_v51 = vld [vmem:[#allocation8 + $0x24c] ss:$16 sps:$4 sm:$0xff]   ;;  %v11290_v2 = vcombine.low %v5301_v45, %v5303_v8 }
 0x299   :  { %6089 = vmatprep.subr.bf16.mxu0 %v11311_v60  ;;  %v1391_v11 = vadd.f32 %v15972_v19, %v1278_v3  ;;  %v11298_v60 = vcombine.low %v5309_v4, %v5311_v5  ;;  %v12172_v19 = vld [vmem:[#allocation8 + $0x3ec] ss:$16 sps:$4 sm:$0xff]  }
 0x29a   :  { %v13434_v10 = vpop.f32.mrf.mxu0 }
 0x29b   :  { %5187 = vmatpush1.bf16.msra.mxu1 %v12149_v37 }
 0x29c   :  { %v13437_v7 = vpop.f32.mrf.mxu0  ;;  %5188 = vmatprep.subr.bf16.mxu1 %v12154_v28  ;;  %6090 = vmatpush1.bf16.msra.mxu0 %v11310_v56  ;;  %v1462_v28 = vmax.f32 %v1391_v11, 0.0  ;;  %v15974_v56 = vld [vmem:[#allocation77_spill] sm:$0xff] }
 0x29d   :  { %5001 = vmatmul.mubr.bf16.gmra.mxu1 %v15969_v52  ;;  %6091 = vmatprep.subr.bf16.mxu0 %v11307_v54  ;;  %v1288_v54 = vadd.f32 %v15974_v56, %v15953_v50 }
 0x29e   :  { %5114 = vmatmul.mubr.bf16.gmra.mxu0 %v12971_v6  ;;  %5010 = vmatprep.mubr.bf16.mxu1 %v13439_v38  ;;  %v13444_v22 = vpop.f32.mrf.mxu0  ;;  %v11302_v6 = vcombine.low %v5313_v40, %v5315_v9  ;;  %v11291_v40 = vcombine.high %v5301_v45, %v5303_v8  ;;  %v15975_v9 = vld [vmem:[#allocation72_spill] sm:$0xff]  ;;  %v5353_v45 = vld [vmem:[#allocation5 + $0x720] sm:$0xff] }
 0x29f   :  { %5123 = vmatprep.mubr.bf16.mxu0 %v12987_v24  ;;  %5189 = vmatpush1.bf16.msra.mxu1 %v12152_v21  ;;  %v5307_v24 = vld [vmem:[#allocation5 + $0x160] sm:$0xff]  ;;  %v1458_v21 = vmax.f32 %v15975_v9, 0.0  ;;  %v12170_v8 = vld [vmem:[#allocation8 + $0x3e8] ss:$16 sps:$4 sm:$0xff]  }
 0x2a0   :  { %v13449_v32 = vpop.f32.mrf.mxu0  ;;  %5190 = vmatprep.subr.bf16.mxu1 %v12157_v1  ;;  %6092 = vmatpush1.bf16.msra.mxu0 %v11306_v13  ;;  %v11295_v35 = vcombine.high %v5305_v44, %v5307_v24  ;;  %v12164_v1 = vld [vmem:[#allocation8 + $0x228] ss:$16 sps:$4 sm:$0xff]  }
 0x2a1   :  { %6093 = vmatprep.subr.bf16.mxu0 %v11303_v42  ;;  %v15976_v13 = vld [vmem:[#allocation78_spill] sm:$0xff]  ;;  %v13475_v5 = vpack.c.bf16 %v1462_v28, %v1458_v21 }
 0x2a2   :  { %v13452_v36 = vpop.f32.mrf.mxu0  ;;  %v1401_v42 = vadd.f32 %v15976_v13, %v1288_v54 }
 0x2a3   :  { %5191 = vmatpush1.bf16.msra.mxu1 %v12155_v29  ;;  %v12169_v29 = vld [vmem:[#allocation8 + $0x20c] ss:$16 sps:$4 sm:$0xff]  }
 0x2a4   :  { %v13455_v26 = vpop.f32.mrf.mxu0  ;;  %5192 = vmatprep.subr.bf16.mxu1 %v12160_v58  ;;  %6094 = vmatpush1.bf16.msra.mxu0 %v11302_v6  ;;  %v5357_v6 = vld [vmem:[#allocation5 + $0x7a0] sm:$0xff]  ;;  %v1470_v53 = vmax.f32 %v1401_v42, 0.0 }
 0x2a5   :  { %5011 = vmatmul.mubr.bf16.gmra.mxu1 %v15973_v25  ;;  %6095 = vmatprep.subr.bf16.mxu0 %v11299_v31  ;;  %v5359_v31 = vld [vmem:[#allocation5 + $0x7e0] sm:$0xff] }
 0x2a6   :  { %5124 = vmatmul.mubr.bf16.gmra.mxu0 %v12983_v16  ;;  %5020 = vmatprep.mubr.bf16.mxu1 %v13457_v12  ;;  %v13462_v37 = vpop.f32.mrf.mxu0  ;;  %v11294_v16 = vcombine.low %v5305_v44, %v5307_v24  ;;  %v15978_v44 = vld [vmem:[#allocation81_spill] sm:$0xff]  ;;  %v11347_v11 = vcombine.high %v5357_v6, %v5359_v31 }
 0x2a7   :  { %5133 = vmatprep.mubr.bf16.mxu0 %v13001_v33  ;;  %5193 = vmatpush1.bf16.msra.mxu1 %v12158_v63  ;;  %v5299_v33 = vld [vmem:[#allocation5 + $0x60] sm:$0xff]  ;;  %v1298_v24 = vadd.f32 %v15978_v44, %v15953_v50 }
 0x2a8   :  { %v13467_v39 = vpop.f32.mrf.mxu0  ;;  %5194 = vmatprep.subr.bf16.mxu1 %v12163_v51  ;;  %6096 = vmatpush1.bf16.msra.mxu0 %v11298_v60  ;;  %v11287_v3 = vcombine.high %v5297_v14, %v5299_v33  ;;  %v15979_v51 = vld [vmem:[#allocation76_spill] sm:$0xff]  ;;  %v15982_v42 = vld [vmem:[#allocation85_spill] sm:$0xff] }
 0x2a9   :  { %6097 = vmatprep.subr.bf16.mxu0 %v11295_v35  ;;  %v1466_v60 = vmax.f32 %v15979_v51, 0.0  ;;  %v5345_v44 = vld [vmem:[#allocation5 + $0x620] sm:$0xff]  ;;  %v12181_v51 = vld [vmem:[#allocation8 + $0x38c] ss:$16 sps:$4 sm:$0xff]  }
 0x2aa   :  { %v13470_v49 = vpop.f32.mrf.mxu0 }
 0x2ab   :  { %5195 = vmatpush1.bf16.msra.mxu1 %v12161_v57  ;;  %v15980_v57 = vld [vmem:[#allocation82_spill] sm:$0xff]  ;;  %v13493_v54 = vpack.c.bf16 %v1470_v53, %v1466_v60 }
 0x2ac   :  { %v13473_v4 = vpop.f32.mrf.mxu0  ;;  %5196 = vmatprep.subr.bf16.mxu1 %v12166_v47  ;;  %6098 = vmatpush1.bf16.msra.mxu0 %v11294_v16  ;;  %v1411_v28 = vadd.f32 %v15980_v57, %v1298_v24  ;;  %v12175_v47 = vld [vmem:[#allocation8 + $0x3cc] ss:$16 sps:$4 sm:$0xff]   ;;  %v11346_v16 = vcombine.low %v5357_v6, %v5359_v31  ;;  %v15983_v31 = vld [vmem:[#allocation80_spill] sm:$0xff]  ;;  %v5341_v57 = vld [vmem:[#allocation5 + $0x5a0] sm:$0xff] }
 0x2ad   :  { %5021 = vmatmul.mubr.bf16.gmra.mxu1 %v15977_v30  ;;  %6099 = vmatprep.subr.bf16.mxu0 %v11291_v40  ;;  %v15981_v40 = vld [vmem:[#allocation75_spill] sm:$0xff]  ;;  %v12176_v24 = vld [vmem:[#allocation8 + $0x3a8] ss:$16 sps:$4 sm:$0xff]  }
 0x2ae   :  { %5134 = vmatmul.mubr.bf16.gmra.mxu0 %v12995_v41  ;;  %5030 = vmatprep.mubr.bf16.mxu1 %v13475_v5  ;;  %v13480_v58 = vpop.f32.mrf.mxu0  ;;  %v11286_v41 = vcombine.low %v5297_v14, %v5299_v33  ;;  %v5349_v14 = vld [vmem:[#allocation5 + $0x6a0] sm:$0xff]  ;;  %v1478_v13 = vmax.f32 %v1411_v28, 0.0 }
 0x2af   :  { %5143 = vmatprep.mubr.bf16.mxu0 %v13370_v43  ;;  %5197 = vmatpush1.bf16.msra.mxu1 %v12164_v1  ;;  %v5355_v43 = vld [vmem:[#allocation5 + $0x760] sm:$0xff]  ;;  %v12173_v1 = vld [vmem:[#allocation8 + $0x3c8] ss:$16 sps:$4 sm:$0xff]  }
 0x2b0   :  { %v13485_v63 = vpop.f32.mrf.mxu0  ;;  %5198 = vmatprep.subr.bf16.mxu1 %v12169_v29  ;;  %6100 = vmatpush1.bf16.msra.mxu0 %v11290_v2  ;;  %v11343_v9 = vcombine.high %v5353_v45, %v5355_v43  ;;  %v5351_v33 = vld [vmem:[#allocation5 + $0x6e0] sm:$0xff]  ;;  %v1308_v29 = vadd.f32 %v15982_v42, %v15953_v50 }
 0x2b1   :  { %6101 = vmatprep.subr.bf16.mxu0 %v11287_v3  ;;  %v12178_v3 = vld [vmem:[#allocation8 + $0x3ac] ss:$16 sps:$4 sm:$0xff]   ;;  %v11339_v6 = vcombine.high %v5349_v14, %v5351_v33  ;;  %v11338_v60 = vcombine.low %v5349_v14, %v5351_v33  ;;  %v5343_v28 = vld [vmem:[#allocation5 + $0x5e0] sm:$0xff] }
 0x2b2   :  { %v13488_v35 = vpop.f32.mrf.mxu0  ;;  %v12184_v14 = vld [vmem:[#allocation8 + $0x36c] ss:$16 sps:$4 sm:$0xff]  }
 0x2b3   :  { %5199 = vmatpush1.bf16.msra.mxu1 %v12167_v17  ;;  %v1474_v17 = vmax.f32 %v15983_v31, 0.0  ;;  %v12187_v31 = vld [vmem:[#allocation8 + $0x34c] ss:$16 sps:$4 sm:$0xff]  }
 0x2b4   :  { %v13491_v56 = vpop.f32.mrf.mxu0  ;;  %5200 = vmatprep.subr.bf16.mxu1 %v12172_v19  ;;  %6102 = vmatpush1.bf16.msra.mxu0 %v11286_v41  ;;  %v15984_v19 = vld [vmem:[#allocation86_spill] sm:$0xff] }
 0x2b5   :  { %5031 = vmatmul.mubr.bf16.gmra.mxu1 %v15981_v40  ;;  %6103 = vmatprep.subr.bf16.mxu0 %v11347_v11  ;;  %v1421_v41 = vadd.f32 %v15984_v19, %v1308_v29  ;;  %v13511_v50 = vpack.c.bf16 %v1478_v13, %v1474_v17  ;;  %v5337_v29 = vld [vmem:[#allocation5 + $0x520] sm:$0xff]  ;;  %v11330_v17 = vcombine.low %v5341_v57, %v5343_v28 }
 0x2b6   :  { %5144 = vmatmul.mubr.bf16.gmra.mxu0 %v13012_v59  ;;  %5040 = vmatprep.mubr.bf16.mxu1 %v13493_v54  ;;  %v13498_v21 = vpop.f32.mrf.mxu0  ;;  %v11342_v59 = vcombine.low %v5353_v45, %v5355_v43  ;;  %v15985_v45 = vld [vmem:[#allocation79_spill] sm:$0xff]  ;;  %v5333_v19 = vld [vmem:[#allocation5 + $0x4a0] sm:$0xff] }
 0x2b7   :  { %5153 = vmatprep.mubr.bf16.mxu0 %v13380_v15  ;;  %5201 = vmatpush2.bf16.msra.mxu1 %v12170_v8  ;;  %v5347_v15 = vld [vmem:[#allocation5 + $0x660] sm:$0xff] }
 0x2b8   :  { %v13503_v2 = vpop.f32.mrf.mxu0  ;;  %5202 = vmatprep.subr.bf16.mxu1 %v12175_v47  ;;  %6104 = vmatpush2.bf16.msra.mxu0 %v11346_v16  ;;  %v11335_v43 = vcombine.high %v5345_v44, %v5347_v15  ;;  %v12179_v47 = vld [vmem:[#allocation8 + $0x388] ss:$16 sps:$4 sm:$0xff]   ;;  %v1486_v16 = vmax.f32 %v1421_v41, 0.0  ;;  %v11334_v33 = vcombine.low %v5345_v44, %v5347_v15  ;;  %v5335_v41 = vld [vmem:[#allocation5 + $0x4e0] sm:$0xff] }
 0x2b9   :  { %6105 = vmatprep.subr.bf16.mxu0 %v11343_v9 }
 0x2ba   :  { %v13506_v53 = vpop.f32.mrf.mxu0 }
 0x2bb   :  { %5203 = vmatpush2.bf16.msra.mxu1 %v12173_v1  ;;  %v11331_v1 = vcombine.high %v5341_v57, %v5343_v28  ;;  %v11323_v28 = vcombine.high %v5333_v19, %v5335_v41 }
 0x2bc   :  { %v13509_v11 = vpop.f32.mrf.mxu0  ;;  %5204 = vmatprep.subr.bf16.mxu1 %v12178_v3  ;;  %6106 = vmatpush2.bf16.msra.mxu0 %v11342_v59  ;;  %v5339_v3 = vld [vmem:[#allocation5 + $0x560] sm:$0xff]  ;;  %v12182_v59 = vld [vmem:[#allocation8 + $0x368] ss:$16 sps:$4 sm:$0xff]  }
 0x2bd   :  { %5041 = vmatmul.mubr.bf16.gmra.mxu1 %v15985_v45  ;;  %6107 = vmatprep.subr.bf16.mxu0 %v11339_v6  ;;  %v11327_v44 = vcombine.high %v5337_v29, %v5339_v3  ;;  %v11326_v57 = vcombine.low %v5337_v29, %v5339_v3 }
 0x2be   :  { %5154 = vmatmul.mubr.bf16.gmra.mxu0 %v13027_v0  ;;  %5050 = vmatprep.mubr.bf16.mxu1 %v13511_v50  ;;  %v13516_v8 = vpop.f32.mrf.mxu0  ;;  %v15986_v0 = vld [vmem:[#allocation84_spill] sm:$0xff] }
 0x2bf   :  { %5163 = vmatprep.mubr.bf16.mxu0 %v13390_v20  ;;  %5205 = vmatpush2.bf16.msra.mxu1 %v12176_v24  ;;  %v1482_v13 = vmax.f32 %v15986_v0, 0.0  ;;  %v15987_v24 = vld [vmem:[#allocation83_spill] sm:$0xff] }
 0x2c0   :  { %v13519_v9 = vpop.f32.mrf.mxu0  ;;  %5206 = vmatprep.subr.bf16.mxu1 %v12181_v51  ;;  %6108 = vmatpush2.bf16.msra.mxu0 %v11338_v60  ;;  %v12185_v51 = vld [vmem:[#allocation8 + $0x348] ss:$16 sps:$4 sm:$0xff]   ;;  %v15990_v0 = vld [vmem:[#allocation87_spill] sm:$0xff] }
 0x2c1   :  { %6109 = vmatprep.subr.bf16.mxu0 %v11335_v43  ;;  %v13526_v6 = vpack.c.bf16 %v1486_v16, %v1482_v13  ;;  %v12190_v43 = vld [vmem:[#allocation8 + $0x32c] ss:$16 sps:$4 sm:$0xff]   ;;  %v5331_v16 = vld [vmem:[#allocation5 + $0x460] sm:$0xff] }
 0x2c2   :  { %v13522_v42 = vpop.f32.mrf.mxu0  ;;  %v5389_v13 = vld [vmem:[#allocation5 + $0xba0] sm:$0xff] }
 0x2c3   :  { %5207 = vmatpush2.bf16.msra.mxu1 %v12179_v47 }
 0x2c4   :  { %v13524_v20 = vpop.f32.mrf.mxu0  ;;  %5208 = vmatprep.subr.bf16.mxu1 %v12184_v14  ;;  %6110 = vmatpush2.bf16.msra.mxu0 %v11334_v33  ;;  %v12188_v14 = vld [vmem:[#allocation8 + $0x328] ss:$16 sps:$4 sm:$0xff]  }
 0x2c5   :  { %5051 = vmatmul.mubr.bf16.gmra.mxu1 %v15987_v24  ;;  %6111 = vmatprep.subr.bf16.mxu0 %v11331_v1  ;;  %v11322_v1 = vcombine.low %v5333_v19, %v5335_v41 }
 0x2c6   :  { %5164 = vmatmul.mubr.bf16.gmra.mxu0 %v15957_v46  ;;  %5060 = vmatprep.mubr.bf16.mxu1 %v13526_v6  ;;  %v13531_v15 = vpop.f32.mrf.mxu0  ;;  %v5329_v46 = vld [vmem:[#allocation5 + $0x420] sm:$0xff] }
 0x2c7   :  { %5173 = vmatprep.mubr.bf16.mxu0 %v13400_v62  ;;  %5209 = vmatpush2.bf16.msra.mxu1 %v12182_v59  ;;  %v12193_v62 = vld [vmem:[#allocation8 + $0x30c] ss:$16 sps:$4 sm:$0xff]   ;;  %v5391_v59 = vld [vmem:[#allocation5 + $0xbe0] sm:$0xff]  ;;  %v11319_v29 = vcombine.high %v5329_v46, %v5331_v16  ;;  %v11318_v41 = vcombine.low %v5329_v46, %v5331_v16 }
 0x2c8   :  { %v13534_v60 = vpop.f32.mrf.mxu0  ;;  %5210 = vmatprep.subr.bf16.mxu1 %v12187_v31  ;;  %6112 = vmatpush2.bf16.msra.mxu0 %v11330_v17  ;;  %v5326_v31 = vld [vmem:[#allocation5 + $0x3a8] sm:$0xff]  ;;  %v11379_v19 = vcombine.high %v5389_v13, %v5391_v59  ;;  %v5381_v46 = vld [vmem:[#allocation5 + $0xaa0] sm:$0xff] }
 0x2c9   :  { %6113 = vmatprep.subr.bf16.mxu0 %v11327_v44  ;;  %v5328_v17 = vld [vmem:[#allocation5 + $0x3e8] sm:$0xff]  ;;  %v5383_v16 = vld [vmem:[#allocation5 + $0xae0] sm:$0xff] }
 0x2ca   :  { %v13536_v47 = vpop.f32.mrf.mxu0  ;;  %v12191_v44 = vld [vmem:[#allocation8 + $0x308] ss:$16 sps:$4 sm:$0xff]  }
 0x2cb   :  { %15988 = vst [vmem:[#allocation54_spill] sm:$0xff] %v13536_v47  ;;  %5211 = vmatpush2.bf16.msra.mxu1 %v12185_v51  ;;  %v15992_v51 = vld [vmem:[#allocation16_spill] sm:$0xff] }
 0x2cc   :  { %v13538_v33 = vpop.f32.mrf.mxu0  ;;  %5212 = vmatprep.subr.bf16.mxu1 %v12190_v43  ;;  %6114 = vmatpush2.bf16.msra.mxu0 %v11326_v57  ;;  %v5385_v57 = vld [vmem:[#allocation5 + $0xb20] sm:$0xff] }
 0x2cd   :  { %15989 = vst [vmem:[#allocation57_spill] sm:$0xff] %v13538_v33  ;;  %5061 = vmatmul.mubr.bf16.gmra.mxu1 %v15990_v0  ;;  %6115 = vmatprep.subr.bf16.mxu0 %v11323_v28  ;;  %v5387_v28 = vld [vmem:[#allocation5 + $0xb60] sm:$0xff]  ;;  %v5324_v33 = vld [vmem:[#allocation5 + $0x368] sm:$0xff] }
 0x2ce   :  { %5174 = vmatmul.mubr.bf16.gmra.mxu0 %v15961_v48  ;;  %5216 = vmatprep.mubr.bf16.mxu1 %v13408_v61  ;;  %v13543_v3 = vpop.f32.mrf.mxu0  ;;  %v11317_v48 = vcombine.high %v5326_v31, %v5328_v17  ;;  %v11378_v61 = vcombine.low %v5389_v13, %v5391_v59 }
 0x2cf   :  { %15991 = vst [vmem:[#allocation53_spill] sm:$0xff] %v13543_v3  ;;  %5213 = vmatpush2.bf16.msra.mxu1 %v12188_v14  ;;  %6119 = vmatprep.mubr.bf16.mxu0 %v15992_v51  ;;  %v5322_v3 = vld [vmem:[#allocation5 + $0x328] sm:$0xff]  ;;  %v11375_v51 = vcombine.high %v5385_v57, %v5387_v28 }
 0x2d0   :  { %v13546_v43 = vpop.f32.mrf.mxu0  ;;  %5214 = vmatprep.subr.bf16.mxu1 %v12193_v62  ;;  %6116 = vmatpush2.bf16.msra.mxu0 %v11322_v1  ;;  %v11316_v1 = vcombine.low %v5326_v31, %v5328_v17  ;;  %v11313_v13 = vcombine.high %v5322_v3, %v5324_v33  ;;  %v11371_v31 = vcombine.high %v5381_v46, %v5383_v16  ;;  %v15996_v17 = vld [vmem:[#allocation18_spill] sm:$0xff] }
 0x2d1   :  { %6117 = vmatprep.subr.bf16.mxu0 %v11319_v29 }
 0x2d2   :  { %v13548_v0 = vpop.f32.mrf.mxu0 }
 0x2d3   :  { %5215 = vmatpush2.bf16.msra.mxu1 %v12191_v44 }
 0x2d4   :  { %v3900_v14 = vpop.f32.mrf.mxu1  ;;  %v13550_v47 = vpop.f32.mrf.mxu0  ;;  %6200 = vmatprep.subr.bf16.mxu1 %v11379_v19  ;;  %6118 = vmatpush2.bf16.msra.mxu0 %v11318_v41  ;;  %v11374_v19 = vcombine.low %v5385_v57, %v5387_v28  ;;  %v5318_v41 = vld [vmem:[#allocation5 + $0x2a8] sm:$0xff] }
 0x2d5   :  { %v13553_v62 = vadd.f32 %v3900_v14, %v13419_v55  ;;  %6313 = vmatprep.subr.bf16.mxu0 %v11317_v48  ;;  %v5320_v55 = vld [vmem:[#allocation5 + $0x2e8] sm:$0xff]  ;;  %v5377_v48 = vld [vmem:[#allocation5 + $0xa20] sm:$0xff] }
 0x2d6   :  { %5217 = vmatmul.mubr.bf16.vlgmr.msra.gmra.mxu1 %v15965_v34  ;;  %v3902_v29 = vpop.f32.mrf.mxu1  ;;  %v13556_v44 = vpop.f32.mrf.mxu0  ;;  %v11309_v28 = vcombine.high %v5318_v41, %v5320_v55 }
 0x2d7   :  { %15993 = vst [vmem:[#allocation58_spill] sm:$0xff] %v13553_v62  ;;  %15994 = vst [vmem:[#allocation51_spill] sm:$0xff] %v13556_v44  ;;  %5226 = vmatprep.mubr.bf16.mxu1 %v13421_v27  ;;  %6201 = vmatpush1.bf16.msra.mxu1 %v11378_v61  ;;  %v13560_v59 = vadd.f32 %v3902_v29, %v13426_v23  ;;  %v5379_v44 = vld [vmem:[#allocation5 + $0xa60] sm:$0xff]  ;;  %v11312_v27 = vcombine.low %v5322_v3, %v5324_v33  ;;  %v15998_v61 = vld [vmem:[#allocation20_spill] sm:$0xff] }
 0x2d8   :  { %v3904_v14 = vpop.f32.mrf.mxu1  ;;  %v13562_v62 = vpop.f32.mrf.mxu0  ;;  %6202 = vmatprep.subr.bf16.mxu1 %v11375_v51  ;;  %6120 = vmatmul.mubr.bf16.vlgmr.msra.gmra.mxu0 %v15996_v17  ;;  %v11370_v29 = vcombine.low %v5381_v46, %v5383_v16  ;;  %v5316_v17 = vld [vmem:[#allocation5 + $0x268] sm:$0xff]  ;;  %v5373_v3 = vld [vmem:[#allocation5 + $0x9a0] sm:$0xff] }
 0x2d9   :  { %15995 = vst [vmem:[#allocation61_spill] sm:$0xff] %v13562_v62  ;;  %v13566_v34 = vadd.f32 %v3904_v14, %v13431_v18  ;;  %6314 = vmatpush1.bf16.msra.mxu0 %v11316_v1  ;;  %6129 = vmatprep.mubr.bf16.mxu0 %v15998_v61  ;;  %v5314_v62 = vld [vmem:[#allocation5 + $0x228] sm:$0xff]  ;;  %v11367_v1 = vcombine.high %v5377_v48, %v5379_v44 }
 0x2da   :  { %v3906_v23 = vpop.f32.mrf.mxu1  ;;  %v13569_v57 = vpop.f32.mrf.mxu0  ;;  %6315 = vmatprep.subr.bf16.mxu0 %v11313_v13  ;;  %v11308_v13 = vcombine.low %v5318_v41, %v5320_v55  ;;  %v11305_v46 = vcombine.high %v5314_v62, %v5316_v17 }
 0x2db   :  { %15997 = vst [vmem:[#allocation56_spill] sm:$0xff] %v13566_v34  ;;  %6203 = vmatpush1.bf16.msra.mxu1 %v11374_v19  ;;  %v13572_v51 = vadd.f32 %v3906_v23, %v13434_v10  ;;  %v5375_v34 = vld [vmem:[#allocation5 + $0x9e0] sm:$0xff]  ;;  %v5312_v23 = vld [vmem:[#allocation5 + $0x1e8] sm:$0xff] }
 0x2dc   :  { %v3910_v18 = vpop.f32.mrf.mxu1  ;;  %v13574_v14 = vpop.f32.mrf.mxu0  ;;  %6204 = vmatprep.subr.bf16.mxu1 %v11371_v31  ;;  %v11366_v31 = vcombine.low %v5377_v48, %v5379_v44  ;;  %v11363_v41 = vcombine.high %v5373_v3, %v5375_v34 }
 0x2dd   :  { %v13577_v33 = vadd.f32 %v3910_v18, %v13437_v7  ;;  %6316 = vmatpush1.bf16.msra.mxu0 %v11312_v27  ;;  %v5310_v7 = vld [vmem:[#allocation5 + $0x1a8] sm:$0xff]  ;;  %v5369_v27 = vld [vmem:[#allocation5 + $0x920] sm:$0xff] }
 0x2de   :  { %5227 = vmatmul.mubr.bf16.gmra.mxu1 %v15969_v52  ;;  %v3912_v19 = vpop.f32.mrf.mxu1  ;;  %v13580_v10 = vpop.f32.mrf.mxu0  ;;  %6317 = vmatprep.subr.bf16.mxu0 %v11309_v28  ;;  %v16001_v52 = vld [vmem:[#allocation22_spill] sm:$0xff]  ;;  %v11301_v48 = vcombine.high %v5310_v7, %v5312_v23 }
 0x2df   :  { %15999 = vst [vmem:[#allocation62_spill] sm:$0xff] %v13577_v33  ;;  %5236 = vmatprep.mubr.bf16.mxu1 %v13439_v38  ;;  %6205 = vmatpush1.bf16.msra.mxu1 %v11370_v29  ;;  %v13584_v16 = vadd.f32 %v3912_v19, %v13444_v22  ;;  %v5371_v28 = vld [vmem:[#allocation5 + $0x960] sm:$0xff]  ;;  %v11304_v38 = vcombine.low %v5314_v62, %v5316_v17  ;;  %v16003_v29 = vld [vmem:[#allocation24_spill] sm:$0xff] }
 0x2e0   :  { %v3914_v18 = vpop.f32.mrf.mxu1  ;;  %v13586_v33 = vpop.f32.mrf.mxu0  ;;  %6206 = vmatprep.subr.bf16.mxu1 %v11367_v1  ;;  %6130 = vmatmul.mubr.bf16.gmra.mxu0 %v16001_v52  ;;  %v11362_v19 = vcombine.low %v5373_v3, %v5375_v34  ;;  %v5308_v52 = vld [vmem:[#allocation5 + $0x168] sm:$0xff]  ;;  %v5365_v17 = vld [vmem:[#allocation5 + $0x8a0] sm:$0xff] }
 0x2e1   :  { %16000 = vst [vmem:[#allocation55_spill] sm:$0xff] %v13586_v33  ;;  %v13590_v55 = vadd.f32 %v3914_v18, %v13449_v32  ;;  %6318 = vmatpush1.bf16.msra.mxu0 %v11308_v13  ;;  %6139 = vmatprep.mubr.bf16.mxu0 %v16003_v29  ;;  %v5306_v33 = vld [vmem:[#allocation5 + $0x128] sm:$0xff]  ;;  %v11359_v13 = vcombine.high %v5369_v27, %v5371_v28 }
 0x2e2   :  { %v3916_v22 = vpop.f32.mrf.mxu1  ;;  %v13593_v44 = vpop.f32.mrf.mxu0  ;;  %6319 = vmatprep.subr.bf16.mxu0 %v11305_v46  ;;  %v11300_v46 = vcombine.low %v5310_v7, %v5312_v23  ;;  %v11297_v34 = vcombine.high %v5306_v33, %v5308_v52 }
 0x2e3   :  { %16002 = vst [vmem:[#allocation65_spill] sm:$0xff] %v13590_v55  ;;  %6207 = vmatpush1.bf16.msra.mxu1 %v11366_v31  ;;  %v13596_v1 = vadd.f32 %v3916_v22, %v13452_v36  ;;  %v5367_v55 = vld [vmem:[#allocation5 + $0x8e0] sm:$0xff]  ;;  %v5304_v22 = vld [vmem:[#allocation5 + $0xe8] sm:$0xff] }
 0x2e4   :  { %v3920_v32 = vpop.f32.mrf.mxu1  ;;  %v13598_v18 = vpop.f32.mrf.mxu0  ;;  %6208 = vmatprep.subr.bf16.mxu1 %v11363_v41  ;;  %v11358_v41 = vcombine.low %v5369_v27, %v5371_v28  ;;  %v11355_v7 = vcombine.high %v5365_v17, %v5367_v55 }
 0x2e5   :  { %v13601_v62 = vadd.f32 %v3920_v32, %v13455_v26  ;;  %6320 = vmatpush1.bf16.msra.mxu0 %v11304_v38  ;;  %v5302_v26 = vld [vmem:[#allocation5 + $0xa8] sm:$0xff]  ;;  %v5361_v38 = vld [vmem:[#allocation5 + $0x820] sm:$0xff] }
 0x2e6   :  { %5237 = vmatmul.mubr.bf16.gmra.mxu1 %v15973_v25  ;;  %v3922_v31 = vpop.f32.mrf.mxu1  ;;  %v13604_v36 = vpop.f32.mrf.mxu0  ;;  %6321 = vmatprep.subr.bf16.mxu0 %v11301_v48  ;;  %v16006_v25 = vld [vmem:[#allocation26_spill] sm:$0xff]  ;;  %v11293_v28 = vcombine.high %v5302_v26, %v5304_v22 }
 0x2e7   :  { %16004 = vst [vmem:[#allocation60_spill] sm:$0xff] %v13601_v62  ;;  %5246 = vmatprep.mubr.bf16.mxu1 %v13457_v12  ;;  %6209 = vmatpush1.bf16.msra.mxu1 %v11362_v19  ;;  %v13608_v3 = vadd.f32 %v3922_v31, %v13462_v37  ;;  %v5363_v48 = vld [vmem:[#allocation5 + $0x860] sm:$0xff]  ;;  %v11296_v12 = vcombine.low %v5306_v33, %v5308_v52  ;;  %v16008_v19 = vld [vmem:[#allocation28_spill] sm:$0xff] }
 0x2e8   :  { %v3924_v32 = vpop.f32.mrf.mxu1  ;;  %v13610_v62 = vpop.f32.mrf.mxu0  ;;  %6210 = vmatprep.subr.bf16.mxu1 %v11359_v13  ;;  %6140 = vmatmul.mubr.bf16.gmra.mxu0 %v16006_v25  ;;  %v11354_v31 = vcombine.low %v5365_v17, %v5367_v55  ;;  %v5300_v25 = vld [vmem:[#allocation5 + $0x68] sm:$0xff]  ;;  %v5421_v52 = vld [vmem:[#allocation5 + $0xfa0] sm:$0xff] }
 0x2e9   :  { %16005 = vst [vmem:[#allocation66_spill] sm:$0xff] %v13610_v62  ;;  %v13614_v23 = vadd.f32 %v3924_v32, %v13467_v39  ;;  %6322 = vmatpush1.bf16.msra.mxu0 %v11300_v46  ;;  %6149 = vmatprep.mubr.bf16.mxu0 %v16008_v19  ;;  %v5298_v62 = vld [vmem:[#allocation5 + $0x28] sm:$0xff]  ;;  %v11351_v46 = vcombine.high %v5361_v38, %v5363_v48 }
 0x2ea   :  { %v3926_v37 = vpop.f32.mrf.mxu1  ;;  %v13617_v27 = vpop.f32.mrf.mxu0  ;;  %6323 = vmatprep.subr.bf16.mxu0 %v11297_v34  ;;  %v11292_v34 = vcombine.low %v5302_v26, %v5304_v22  ;;  %v11289_v55 = vcombine.high %v5298_v62, %v5300_v25 }
 0x2eb   :  { %16007 = vst [vmem:[#allocation59_spill] sm:$0xff] %v13614_v23  ;;  %6211 = vmatpush1.bf16.msra.mxu1 %v11358_v41  ;;  %v13620_v13 = vadd.f32 %v3926_v37, %v13470_v49  ;;  %v5423_v23 = vld [vmem:[#allocation5 + $0xfe0] sm:$0xff]  ;;  %v5360_v37 = vld [vmem:[#allocation5 + $0x7e8] sm:$0xff] }
 0x2ec   :  { %v3930_v39 = vpop.f32.mrf.mxu1  ;;  %v13622_v32 = vpop.f32.mrf.mxu0  ;;  %6212 = vmatprep.subr.bf16.mxu1 %v11355_v7  ;;  %v11350_v7 = vcombine.low %v5361_v38, %v5363_v48  ;;  %v11411_v26 = vcombine.high %v5421_v52, %v5423_v23 }
 0x2ed   :  { %v13625_v33 = vadd.f32 %v3930_v39, %v13473_v4  ;;  %6324 = vmatpush1.bf16.msra.mxu0 %v11296_v12  ;;  %v5358_v4 = vld [vmem:[#allocation5 + $0x7a8] sm:$0xff]  ;;  %v5417_v12 = vld [vmem:[#allocation5 + $0xf20] sm:$0xff] }
 0x2ee   :  { %5247 = vmatmul.mubr.bf16.gmra.mxu1 %v15977_v30  ;;  %v3932_v41 = vpop.f32.mrf.mxu1  ;;  %v13628_v49 = vpop.f32.mrf.mxu0  ;;  %6325 = vmatprep.subr.bf16.mxu0 %v11293_v28  ;;  %v16011_v30 = vld [vmem:[#allocation30_spill] sm:$0xff]  ;;  %v11349_v48 = vcombine.high %v5358_v4, %v5360_v37 }
 0x2ef   :  { %16009 = vst [vmem:[#allocation69_spill] sm:$0xff] %v13625_v33  ;;  %5256 = vmatprep.mubr.bf16.mxu1 %v13475_v5  ;;  %6213 = vmatpush1.bf16.msra.mxu1 %v11354_v31  ;;  %v13632_v17 = vadd.f32 %v3932_v41, %v13480_v58  ;;  %v5419_v28 = vld [vmem:[#allocation5 + $0xf60] sm:$0xff]  ;;  %v11288_v5 = vcombine.low %v5298_v62, %v5300_v25  ;;  %v16013_v31 = vld [vmem:[#allocation32_spill] sm:$0xff] }
 0x2f0   :  { %v3934_v39 = vpop.f32.mrf.mxu1  ;;  %v13634_v33 = vpop.f32.mrf.mxu0  ;;  %6214 = vmatprep.subr.bf16.mxu1 %v11351_v46  ;;  %6150 = vmatmul.mubr.bf16.gmra.mxu0 %v16011_v30  ;;  %v11410_v41 = vcombine.low %v5421_v52, %v5423_v23  ;;  %v5356_v30 = vld [vmem:[#allocation5 + $0x768] sm:$0xff]  ;;  %v5413_v25 = vld [vmem:[#allocation5 + $0xea0] sm:$0xff] }
 0x2f1   :  { %16010 = vst [vmem:[#allocation64_spill] sm:$0xff] %v13634_v33  ;;  %v13638_v22 = vadd.f32 %v3934_v39, %v13485_v63  ;;  %6326 = vmatpush1.bf16.msra.mxu0 %v11292_v34  ;;  %6159 = vmatprep.mubr.bf16.mxu0 %v16013_v31  ;;  %v5354_v33 = vld [vmem:[#allocation5 + $0x728] sm:$0xff]  ;;  %v11407_v34 = vcombine.high %v5417_v12, %v5419_v28 }
 0x2f2   :  { %v3936_v58 = vpop.f32.mrf.mxu1  ;;  %v13641_v38 = vpop.f32.mrf.mxu0  ;;  %6327 = vmatprep.subr.bf16.mxu0 %v11289_v55  ;;  %v11348_v55 = vcombine.low %v5358_v4, %v5360_v37  ;;  %v11345_v23 = vcombine.high %v5354_v33, %v5356_v30 }
 0x2f3   :  { %16012 = vst [vmem:[#allocation70_spill] sm:$0xff] %v13638_v22  ;;  %6215 = vmatpush1.bf16.msra.mxu1 %v11350_v7  ;;  %v13644_v46 = vadd.f32 %v3936_v58, %v13488_v35  ;;  %v5415_v22 = vld [vmem:[#allocation5 + $0xee0] sm:$0xff]  ;;  %v5352_v58 = vld [vmem:[#allocation5 + $0x6e8] sm:$0xff] }
 0x2f4   :  { %v3940_v63 = vpop.f32.mrf.mxu1  ;;  %v13646_v39 = vpop.f32.mrf.mxu0  ;;  %6216 = vmatprep.subr.bf16.mxu1 %v11411_v26  ;;  %v11406_v26 = vcombine.low %v5417_v12, %v5419_v28  ;;  %v11403_v4 = vcombine.high %v5413_v25, %v5415_v22 }
 0x2f5   :  { %v13649_v62 = vadd.f32 %v3940_v63, %v13491_v56  ;;  %6328 = vmatpush1.bf16.msra.mxu0 %v11288_v5  ;;  %v5350_v56 = vld [vmem:[#allocation5 + $0x6a8] sm:$0xff]  ;;  %v5409_v5 = vld [vmem:[#allocation5 + $0xe20] sm:$0xff] }
 0x2f6   :  { %5257 = vmatmul.mubr.bf16.gmra.mxu1 %v15981_v40  ;;  %v3942_v7 = vpop.f32.mrf.mxu1  ;;  %v13652_v35 = vpop.f32.mrf.mxu0  ;;  %6329 = vmatprep.subr.bf16.mxu0 %v11349_v48  ;;  %v16016_v40 = vld [vmem:[#allocation34_spill] sm:$0xff]  ;;  %v11341_v28 = vcombine.high %v5350_v56, %v5352_v58 }
 0x2f7   :  { %16014 = vst [vmem:[#allocation63_spill] sm:$0xff] %v13649_v62  ;;  %5266 = vmatprep.mubr.bf16.mxu1 %v13493_v54  ;;  %6217 = vmatpush2.bf16.msra.mxu1 %v11410_v41  ;;  %v13656_v52 = vadd.f32 %v3942_v7, %v13498_v21  ;;  %v5411_v48 = vld [vmem:[#allocation5 + $0xe60] sm:$0xff]  ;;  %v11344_v54 = vcombine.low %v5354_v33, %v5356_v30  ;;  %v16018_v41 = vld [vmem:[#allocation36_spill] sm:$0xff] }
 0x2f8   :  { %v3944_v63 = vpop.f32.mrf.mxu1  ;;  %v13658_v62 = vpop.f32.mrf.mxu0  ;;  %6218 = vmatprep.subr.bf16.mxu1 %v11407_v34  ;;  %6160 = vmatmul.mubr.bf16.gmra.mxu0 %v16016_v40  ;;  %v11402_v7 = vcombine.low %v5413_v25, %v5415_v22  ;;  %v5348_v40 = vld [vmem:[#allocation5 + $0x668] sm:$0xff]  ;;  %v5405_v30 = vld [vmem:[#allocation5 + $0xda0] sm:$0xff] }
 0x2f9   :  { %16015 = vst [vmem:[#allocation73_spill] sm:$0xff] %v13658_v62  ;;  %v13662_v37 = vadd.f32 %v3944_v63, %v13503_v2  ;;  %6330 = vmatpush2.bf16.msra.mxu0 %v11348_v55  ;;  %6169 = vmatprep.mubr.bf16.mxu0 %v16018_v41  ;;  %v5346_v62 = vld [vmem:[#allocation5 + $0x628] sm:$0xff]  ;;  %v11399_v55 = vcombine.high %v5409_v5, %v5411_v48 }
 0x2fa   :  { %v3946_v21 = vpop.f32.mrf.mxu1  ;;  %v13665_v12 = vpop.f32.mrf.mxu0  ;;  %6331 = vmatprep.subr.bf16.mxu0 %v11345_v23  ;;  %v11340_v23 = vcombine.low %v5350_v56, %v5352_v58  ;;  %v11337_v22 = vcombine.high %v5346_v62, %v5348_v40 }
 0x2fb   :  { %16017 = vst [vmem:[#allocation68_spill] sm:$0xff] %v13662_v37  ;;  %6219 = vmatpush2.bf16.msra.mxu1 %v11406_v26  ;;  %v13668_v34 = vadd.f32 %v3946_v21, %v13506_v53  ;;  %v5407_v37 = vld [vmem:[#allocation5 + $0xde0] sm:$0xff]  ;;  %v5344_v21 = vld [vmem:[#allocation5 + $0x5e8] sm:$0xff] }
 0x2fc   :  { %v3950_v2 = vpop.f32.mrf.mxu1  ;;  %v13670_v63 = vpop.f32.mrf.mxu0  ;;  %6220 = vmatprep.subr.bf16.mxu1 %v11403_v4  ;;  %v11398_v4 = vcombine.low %v5409_v5, %v5411_v48  ;;  %v11395_v56 = vcombine.high %v5405_v30, %v5407_v37 }
 0x2fd   :  { %16019 = vst [vmem:[#allocation74_spill] sm:$0xff] %v13668_v34  ;;  %v13673_v33 = vadd.f32 %v3950_v2, %v13509_v11  ;;  %6332 = vmatpush2.bf16.msra.mxu0 %v11344_v54  ;;  %v5342_v11 = vld [vmem:[#allocation5 + $0x5a8] sm:$0xff]  ;;  %v5401_v54 = vld [vmem:[#allocation5 + $0xd20] sm:$0xff] }
 0x2fe   :  { %5267 = vmatmul.mubr.bf16.gmra.mxu1 %v15985_v45  ;;  %v3952_v26 = vpop.f32.mrf.mxu1  ;;  %v13676_v53 = vpop.f32.mrf.mxu0  ;;  %6333 = vmatprep.subr.bf16.mxu0 %v11341_v28  ;;  %v16021_v45 = vld [vmem:[#allocation38_spill] sm:$0xff]  ;;  %v11333_v48 = vcombine.high %v5342_v11, %v5344_v21 }
 0x2ff   :  { %5276 = vmatprep.mubr.bf16.mxu1 %v13511_v50  ;;  %6221 = vmatpush2.bf16.msra.mxu1 %v11402_v7  ;;  %v13680_v25 = vadd.f32 %v3952_v26, %v13516_v8  ;;  %v5403_v28 = vld [vmem:[#allocation5 + $0xd60] sm:$0xff]  ;;  %v11336_v50 = vcombine.low %v5346_v62, %v5348_v40  ;;  %v16023_v7 = vld [vmem:[#allocation40_spill] sm:$0xff]  ;;  %v11394_v26 = vcombine.low %v5405_v30, %v5407_v37 }
 0x300   :  { %v3954_v2 = vpop.f32.mrf.mxu1  ;;  %v13682_v34 = vpop.f32.mrf.mxu0  ;;  %6222 = vmatprep.subr.bf16.mxu1 %v11399_v55  ;;  %6170 = vmatmul.mubr.bf16.gmra.mxu0 %v16021_v45  ;;  %v5340_v45 = vld [vmem:[#allocation5 + $0x568] sm:$0xff]  ;;  %v5397_v40 = vld [vmem:[#allocation5 + $0xca0] sm:$0xff] }
 0x301   :  { %16020 = vst [vmem:[#allocation67_spill] sm:$0xff] %v13682_v34  ;;  %v13686_v58 = vadd.f32 %v3954_v2, %v13519_v9  ;;  %6334 = vmatpush2.bf16.msra.mxu0 %v11340_v23  ;;  %6179 = vmatprep.mubr.bf16.mxu0 %v16023_v7  ;;  %v5338_v34 = vld [vmem:[#allocation5 + $0x528] sm:$0xff]  ;;  %v11391_v23 = vcombine.high %v5401_v54, %v5403_v28 }
 0x302   :  { %v3956_v8 = vpop.f32.mrf.mxu1  ;;  %v13689_v5 = vpop.f32.mrf.mxu0  ;;  %6335 = vmatprep.subr.bf16.mxu0 %v11337_v22  ;;  %v11332_v22 = vcombine.low %v5342_v11, %v5344_v21  ;;  %v11329_v37 = vcombine.high %v5338_v34, %v5340_v45 }
 0x303   :  { %16022 = vst [vmem:[#allocation77_spill] sm:$0xff] %v13686_v58  ;;  %6223 = vmatpush2.bf16.msra.mxu1 %v11398_v4  ;;  %v13692_v55 = vadd.f32 %v3956_v8, %v13522_v42  ;;  %v5399_v58 = vld [vmem:[#allocation5 + $0xce0] sm:$0xff]  ;;  %v5336_v8 = vld [vmem:[#allocation5 + $0x4e8] sm:$0xff] }
 0x304   :  { %v3960_v9 = vpop.f32.mrf.mxu1  ;;  %v13694_v2 = vpop.f32.mrf.mxu0  ;;  %6224 = vmatprep.subr.bf16.mxu1 %v11395_v56  ;;  %v11390_v56 = vcombine.low %v5401_v54, %v5403_v28  ;;  %v11387_v11 = vcombine.high %v5397_v40, %v5399_v58 }
 0x305   :  { %16024 = vst [vmem:[#allocation72_spill] sm:$0xff] %v13692_v55  ;;  %v13697_v62 = vadd.f32 %v3960_v9, %v13524_v20  ;;  %6336 = vmatpush2.bf16.msra.mxu0 %v11336_v50  ;;  %v5334_v20 = vld [vmem:[#allocation5 + $0x4a8] sm:$0xff]  ;;  %v5393_v50 = vld [vmem:[#allocation5 + $0xc20] sm:$0xff] }
 0x306   :  { %5277 = vmatmul.mubr.bf16.gmra.mxu1 %v15987_v24  ;;  %v3962_v4 = vpop.f32.mrf.mxu1  ;;  %v13700_v42 = vpop.f32.mrf.mxu0  ;;  %6337 = vmatprep.subr.bf16.mxu0 %v11333_v48  ;;  %v16027_v24 = vld [vmem:[#allocation42_spill] sm:$0xff]  ;;  %v11325_v28 = vcombine.high %v5334_v20, %v5336_v8 }
 0x307   :  { %5286 = vmatprep.mubr.bf16.mxu1 %v13526_v6  ;;  %6225 = vmatpush2.bf16.msra.mxu1 %v11394_v26  ;;  %v13704_v30 = vadd.f32 %v3962_v4, %v13531_v15  ;;  %v5395_v48 = vld [vmem:[#allocation5 + $0xc60] sm:$0xff]  ;;  %v11328_v6 = vcombine.low %v5338_v34, %v5340_v45  ;;  %v16029_v26 = vld [vmem:[#allocation44_spill] sm:$0xff] }
 0x308   :  { %v3964_v9 = vpop.f32.mrf.mxu1  ;;  %v13706_v55 = vpop.f32.mrf.mxu0  ;;  %6226 = vmatprep.subr.bf16.mxu1 %v11391_v23  ;;  %6180 = vmatmul.mubr.bf16.gmra.mxu0 %v16027_v24  ;;  %v16031_v4 = vld [vmem:[#allocation54_spill] sm:$0xff]  ;;  %v16033_v34 = vld [vmem:[#allocation57_spill] sm:$0xff] }
 0x309   :  { %16025 = vst [vmem:[#allocation78_spill] sm:$0xff] %v13704_v30  ;;  %16026 = vst [vmem:[#allocation71_spill] sm:$0xff] %v13706_v55  ;;  %v13710_v21 = vadd.f32 %v3964_v9, %v13534_v60  ;;  %6338 = vmatpush2.bf16.msra.mxu0 %v11332_v22  ;;  %6189 = vmatprep.mubr.bf16.mxu0 %v16029_v26  ;;  %v11386_v55 = vcombine.low %v5397_v40, %v5399_v58  ;;  %v5330_v24 = vld [vmem:[#allocation5 + $0x428] sm:$0xff]  ;;  %v16036_v40 = vld [vmem:[#allocation53_spill] sm:$0xff] }
 0x30a   :  { %v3966_v15 = vpop.f32.mrf.mxu1  ;;  %v13713_v54 = vpop.f32.mrf.mxu0  ;;  %6339 = vmatprep.subr.bf16.mxu0 %v11329_v37  ;;  %v5332_v30 = vld [vmem:[#allocation5 + $0x468] sm:$0xff]  ;;  %v11383_v22 = vcombine.high %v5393_v50, %v5395_v48  ;;  %v11324_v37 = vcombine.low %v5334_v20, %v5336_v8 }
 0x30b   :  { %16028 = vst [vmem:[#allocation81_spill] sm:$0xff] %v13710_v21  ;;  %16030 = vst [vmem:[#allocation76_spill] sm:$0xff] %v13713_v54  ;;  %6227 = vmatpush2.bf16.msra.mxu1 %v11390_v56  ;;  %v13716_v23 = vadd.f32 %v3966_v15, %v16031_v4  ;;  %v5390_v21 = vld [vmem:[#allocation5 + $0xba8] sm:$0xff]  ;;  %v11321_v58 = vcombine.high %v5330_v24, %v5332_v30 }
 0x30c   :  { %v3970_v60 = vpop.f32.mrf.mxu1  ;;  %v13718_v9 = vpop.f32.mrf.mxu0  ;;  %6228 = vmatprep.subr.bf16.mxu1 %v11387_v11  ;;  %v5392_v26 = vld [vmem:[#allocation5 + $0xbe8] sm:$0xff]  ;;  %v11382_v11 = vcombine.low %v5393_v50, %v5395_v48 }
 0x30d   :  { %16032 = vst [vmem:[#allocation82_spill] sm:$0xff] %v13716_v23  ;;  %v13721_v45 = vadd.f32 %v3970_v60, %v16033_v34  ;;  %6340 = vmatpush2.bf16.msra.mxu0 %v11328_v6  ;;  %v16034_v54 = vld [vmem:[#allocation87_spill] sm:$0xff]  ;;  %v16037_v23 = vld [vmem:[#allocation17_spill] sm:$0xff]  ;;  %v11381_v6 = vcombine.high %v5390_v21, %v5392_v26  ;;  %v16039_v20 = vld [vmem:[#allocation46_spill] sm:$0xff] }
 0x30e   :  { %5287 = vmatmul.mubr.bf16.gmra.mxu1 %v16034_v54  ;;  %v3972_v56 = vpop.f32.mrf.mxu1  ;;  %v13724_v15 = vpop.f32.mrf.mxu0  ;;  %6341 = vmatprep.subr.bf16.mxu0 %v11325_v28  ;;  %v5386_v54 = vld [vmem:[#allocation5 + $0xb28] sm:$0xff] }
 0x30f   :  { %16035 = vst [vmem:[#allocation75_spill] sm:$0xff] %v13724_v15  ;;  %6229 = vmatpush2.bf16.msra.mxu1 %v11386_v55  ;;  %v13727_v4 = vadd.f32 %v3972_v56, %v16036_v40  ;;  %6232 = vmatprep.mubr.bf16.mxu1 %v16037_v23  ;;  %v5388_v28 = vld [vmem:[#allocation5 + $0xb68] sm:$0xff]  ;;  %v11320_v55 = vcombine.low %v5330_v24, %v5332_v30  ;;  %v16040_v15 = vld [vmem:[#allocation16_spill] sm:$0xff] }
 0x310   :  { %v3974_v60 = vpop.f32.mrf.mxu1  ;;  %v13730_v34 = vpop.f32.mrf.mxu0  ;;  %6230 = vmatprep.subr.bf16.mxu1 %v11383_v22  ;;  %6190 = vmatmul.mubr.bf16.gmra.mxu0 %v16039_v20  ;;  %v11380_v22 = vcombine.low %v5390_v21, %v5392_v26  ;;  %v5384_v30 = vld [vmem:[#allocation5 + $0xae8] sm:$0xff]  ;;  %v11376_v26 = vcombine.low %v5386_v54, %v5388_v28 }
 0x311   :  { %16038 = vst [vmem:[#allocation85_spill] sm:$0xff] %v13730_v34  ;;  %v13734_v8 = vadd.f32 %v3974_v60, %v13546_v43  ;;  %6342 = vmatpush2.bf16.msra.mxu0 %v11324_v37  ;;  %6345 = vmatprep.mubr.bf16.mxu0 %v16040_v15  ;;  %v11377_v34 = vcombine.high %v5386_v54, %v5388_v28  ;;  %v5382_v37 = vld [vmem:[#allocation5 + $0xaa8] sm:$0xff] }
 0x312   :  { %v3976_v56 = vpop.f32.mrf.mxu1  ;;  %v13737_v50 = vpop.f32.mrf.mxu0  ;;  %6343 = vmatprep.subr.bf16.mxu0 %v11321_v58  ;;  %v16044_v24 = vld [vmem:[#allocation58_spill] sm:$0xff] }
 0x313   :  { %16041 = vst [vmem:[#allocation80_spill] sm:$0xff] %v13737_v50  ;;  %6231 = vmatpush2.bf16.msra.mxu1 %v11382_v11  ;;  %v13740_v48 = vadd.f32 %v3976_v56, %v13548_v0  ;;  %v16045_v50 = vld [vmem:[#allocation19_spill] sm:$0xff] }
 0x314   :  { %v4126_v40 = vpop.f32.mrf.mxu1  ;;  %6426 = vmatprep.subr.bf16.mxu1 %v11381_v6  ;;  %v16046_v0 = vld [vmem:[#allocation51_spill] sm:$0xff]  ;;  %v16047_v6 = vld [vmem:[#allocation21_spill] sm:$0xff] }
 0x315   :  { %16042 = vst [vmem:[#allocation86_spill] sm:$0xff] %v13740_v48  ;;  %v13743_v43 = vadd.f32 %v4126_v40, %v13550_v47  ;;  %v4879_v60 = vpop.f32.mrf.mxu0  ;;  %6344 = vmatpush2.bf16.msra.mxu0 %v11320_v55  ;;  %v11373_v55 = vcombine.high %v5382_v37, %v5384_v30  ;;  %v16048_v40 = vld [vmem:[#allocation18_spill] sm:$0xff] }
 0x316   :  { %v13746_v15 = vadd.f32 %v4879_v60, %v16044_v24  ;;  %6233 = vmatmul.mubr.bf16.vlgmr.msra.gmra.mxu1 %v16045_v50  ;;  %v4128_v58 = vpop.f32.mrf.mxu1  ;;  %v16049_v60 = vld [vmem:[#allocation61_spill] sm:$0xff] }
 0x317   :  { %16043 = vst [vmem:[#allocation79_spill] sm:$0xff] %v13743_v43  ;;  %6427 = vmatpush1.bf16.msra.mxu1 %v11380_v22  ;;  %v13750_v11 = vadd.f32 %v4128_v58, %v16046_v0  ;;  %v4881_v21 = vpop.f32.mrf.mxu0  ;;  %6242 = vmatprep.mubr.bf16.mxu1 %v16047_v6  ;;  %v5378_v22 = vld [vmem:[#allocation5 + $0xa28] sm:$0xff]  ;;  %v16051_v58 = vld [vmem:[#allocation56_spill] sm:$0xff]  ;;  %v11372_v0 = vcombine.low %v5382_v37, %v5384_v30 }
 0x318   :  { %v13754_v47 = vadd.f32 %v4881_v21, %v13560_v59  ;;  %v4130_v56 = vpop.f32.mrf.mxu1  ;;  %6428 = vmatprep.subr.bf16.mxu1 %v11377_v34  ;;  %6346 = vmatmul.mubr.bf16.vlgmr.msra.gmra.mxu0 %v16048_v40  ;;  %v5380_v43 = vld [vmem:[#allocation5 + $0xa68] sm:$0xff] }
 0x319   :  { %v13758_v24 = vadd.f32 %v4130_v56, %v16049_v60  ;;  %v4883_v48 = vpop.f32.mrf.mxu0  ;;  %6355 = vmatprep.mubr.bf16.mxu0 %v15998_v61  ;;  %v11369_v60 = vcombine.high %v5378_v22, %v5380_v43  ;;  %v11368_v30 = vcombine.low %v5378_v22, %v5380_v43 }
 0x31a   :  { %v13762_v54 = vadd.f32 %v4883_v48, %v16051_v58  ;;  %v4132_v28 = vpop.f32.mrf.mxu1  ;;  %v5376_v48 = vld [vmem:[#allocation5 + $0x9e8] sm:$0xff] }
 0x31b   :  { %16050 = vst [vmem:[#allocation84_spill] sm:$0xff] %v13758_v24  ;;  %6429 = vmatpush1.bf16.msra.mxu1 %v11376_v26  ;;  %v13765_v59 = vadd.f32 %v4132_v28, %v13569_v57  ;;  %v4885_v34 = vpop.f32.mrf.mxu0  ;;  %v5374_v24 = vld [vmem:[#allocation5 + $0x9a8] sm:$0xff] }
 0x31c   :  { %16052 = vst [vmem:[#allocation83_spill] sm:$0xff] %v13762_v54  ;;  %v13768_v21 = vadd.f32 %v4885_v34, %v13572_v51  ;;  %v4136_v56 = vpop.f32.mrf.mxu1  ;;  %6430 = vmatprep.subr.bf16.mxu1 %v11373_v55  ;;  %v16055_v58 = vld [vmem:[#allocation62_spill] sm:$0xff]  ;;  %v16056_v26 = vld [vmem:[#allocation23_spill] sm:$0xff]  ;;  %v16057_v55 = vld [vmem:[#allocation25_spill] sm:$0xff]  ;;  %v11365_v34 = vcombine.high %v5374_v24, %v5376_v48 }
 0x31d   :  { %16053 = vst [vmem:[#allocation54_spill] sm:$0xff] %v13765_v59  ;;  %v13771_v40 = vadd.f32 %v4136_v56, %v13574_v14  ;;  %v4889_v61 = vpop.f32.mrf.mxu0  ;;  %v16058_v56 = vld [vmem:[#allocation22_spill] sm:$0xff] }
 0x31e   :  { %v13774_v54 = vadd.f32 %v4889_v61, %v16055_v58  ;;  %6243 = vmatmul.mubr.bf16.gmra.mxu1 %v16056_v26  ;;  %v4138_v57 = vpop.f32.mrf.mxu1  ;;  %v16059_v61 = vld [vmem:[#allocation55_spill] sm:$0xff] }
 0x31f   :  { %16054 = vst [vmem:[#allocation57_spill] sm:$0xff] %v13771_v40  ;;  %6431 = vmatpush1.bf16.msra.mxu1 %v11372_v0  ;;  %v13778_v37 = vadd.f32 %v4138_v57, %v13580_v10  ;;  %v4891_v51 = vpop.f32.mrf.mxu0  ;;  %6252 = vmatprep.mubr.bf16.mxu1 %v16057_v55  ;;  %v5370_v0 = vld [vmem:[#allocation5 + $0x928] sm:$0xff]  ;;  %v16061_v10 = vld [vmem:[#allocation65_spill] sm:$0xff]  ;;  %v12196_v57 = vld [vmem:[#allocation8 + $0x8e4] ss:$16 sps:$4 sm:$0xff]  }
 0x320   :  { %v13782_v14 = vadd.f32 %v4891_v51, %v13584_v16  ;;  %v4140_v28 = vpop.f32.mrf.mxu1  ;;  %6432 = vmatprep.subr.bf16.mxu1 %v11369_v60  ;;  %6356 = vmatmul.mubr.bf16.gmra.mxu0 %v16058_v56  ;;  %v5372_v40 = vld [vmem:[#allocation5 + $0x968] sm:$0xff]  ;;  %v11364_v51 = vcombine.low %v5374_v24, %v5376_v48  ;;  %v12194_v56 = vld [vmem:[#allocation8 + $0x8e0] ss:$16 sps:$4 sm:$0xff]   ;;  %v12199_v48 = vld [vmem:[#allocation8 + $0x8c4] ss:$16 sps:$4 sm:$0xff]  }
 0x321   :  { %v13786_v58 = vadd.f32 %v4140_v28, %v16059_v61  ;;  %v4893_v59 = vpop.f32.mrf.mxu0  ;;  %6365 = vmatprep.mubr.bf16.mxu0 %v16003_v29  ;;  %7403 = vmatprep.subr.bf16.mxu0 %v12196_v57  ;;  %v11360_v57 = vcombine.low %v5370_v0, %v5372_v40 }
 0x322   :  { %v13790_v43 = vadd.f32 %v4893_v59, %v16061_v10  ;;  %v4142_v22 = vpop.f32.mrf.mxu1  ;;  %v5366_v10 = vld [vmem:[#allocation5 + $0x8a8] sm:$0xff]  ;;  %7404 = vmatpush1.bf16.msra.mxu0 %v12194_v56 }
 0x323   :  { %16060 = vst [vmem:[#allocation87_spill] sm:$0xff] %v13786_v58  ;;  %6433 = vmatpush1.bf16.msra.mxu1 %v11368_v30  ;;  %v13793_v16 = vadd.f32 %v4142_v22, %v13593_v44  ;;  %v4895_v60 = vpop.f32.mrf.mxu0  ;;  %v11361_v58 = vcombine.high %v5370_v0, %v5372_v40  ;;  %v16065_v30 = vld [vmem:[#allocation60_spill] sm:$0xff]  ;;  %v16066_v22 = vld [vmem:[#allocation27_spill] sm:$0xff]  ;;  %7405 = vmatprep.subr.bf16.mxu0 %v12199_v48 }
 0x324   :  { %16062 = vst [vmem:[#allocation53_spill] sm:$0xff] %v13790_v43  ;;  %v13796_v28 = vadd.f32 %v4895_v60, %v13596_v1  ;;  %v4146_v61 = vpop.f32.mrf.mxu1  ;;  %6434 = vmatprep.subr.bf16.mxu1 %v11365_v34  ;;  %v5368_v43 = vld [vmem:[#allocation5 + $0x8e8] sm:$0xff]  ;;  %v16067_v60 = vld [vmem:[#allocation29_spill] sm:$0xff] }
 0x325   :  { %16063 = vst [vmem:[#allocation17_spill] sm:$0xff] %v13793_v16  ;;  %v13799_v29 = vadd.f32 %v4146_v61, %v13598_v18  ;;  %v4899_v59 = vpop.f32.mrf.mxu0  ;;  %v12197_v18 = vld [vmem:[#allocation8 + $0x8c0] ss:$16 sps:$4 sm:$0xff]   ;;  %v16069_v16 = vld [vmem:[#allocation66_spill] sm:$0xff] }
 0x326   :  { %v13802_v44 = vadd.f32 %v4899_v59, %v16065_v30  ;;  %6253 = vmatmul.mubr.bf16.gmra.mxu1 %v16066_v22  ;;  %v4148_v24 = vpop.f32.mrf.mxu1  ;;  %v11357_v59 = vcombine.high %v5366_v10, %v5368_v43  ;;  %v16068_v30 = vld [vmem:[#allocation26_spill] sm:$0xff]  ;;  %v16071_v40 = vld [vmem:[#allocation59_spill] sm:$0xff]  ;;  %7406 = vmatpush1.bf16.msra.mxu0 %v12197_v18 }
 0x327   :  { %16064 = vst [vmem:[#allocation46_spill] sm:$0xff] %v13799_v29  ;;  %6435 = vmatpush1.bf16.msra.mxu1 %v11364_v51  ;;  %v13806_v1 = vadd.f32 %v4148_v24, %v13604_v36  ;;  %v4901_v34 = vpop.f32.mrf.mxu0  ;;  %6262 = vmatprep.mubr.bf16.mxu1 %v16067_v60  ;;  %v5362_v22 = vld [vmem:[#allocation5 + $0x828] sm:$0xff] }
 0x328   :  { %v13810_v61 = vadd.f32 %v4901_v34, %v13608_v3  ;;  %v4150_v56 = vpop.f32.mrf.mxu1  ;;  %6436 = vmatprep.subr.bf16.mxu1 %v11361_v58  ;;  %6366 = vmatmul.mubr.bf16.gmra.mxu0 %v16068_v30  ;;  %v5364_v36 = vld [vmem:[#allocation5 + $0x868] sm:$0xff]  ;;  %v12202_v3 = vld [vmem:[#allocation8 + $0x8a4] ss:$16 sps:$4 sm:$0xff]   ;;  %v11356_v30 = vcombine.low %v5366_v10, %v5368_v43 }
 0x329   :  { %v13814_v29 = vadd.f32 %v4150_v56, %v16069_v16  ;;  %v4903_v51 = vpop.f32.mrf.mxu0  ;;  %6375 = vmatprep.mubr.bf16.mxu0 %v16008_v19  ;;  %v12200_v16 = vld [vmem:[#allocation8 + $0x8a0] ss:$16 sps:$4 sm:$0xff]   ;;  %v11353_v19 = vcombine.high %v5362_v22, %v5364_v36  ;;  %7407 = vmatprep.subr.bf16.mxu0 %v12202_v3  ;;  %v5422_v18 = vld [vmem:[#allocation5 + $0xfa8] sm:$0xff]  ;;  %v12205_v10 = vld [vmem:[#allocation8 + $0x884] ss:$16 sps:$4 sm:$0xff]  }
 0x32a   :  { %v13818_v0 = vadd.f32 %v4903_v51, %v16071_v40  ;;  %v4152_v24 = vpop.f32.mrf.mxu1  ;;  %v5424_v40 = vld [vmem:[#allocation5 + $0xfe8] sm:$0xff]  ;;  %7408 = vmatpush1.bf16.msra.mxu0 %v12200_v16  ;;  %v16077_v3 = vld [vmem:[#allocation33_spill] sm:$0xff] }
 0x32b   :  { %16070 = vst [vmem:[#allocation58_spill] sm:$0xff] %v13814_v29  ;;  %6437 = vmatpush1.bf16.msra.mxu1 %v11360_v57  ;;  %v13821_v58 = vadd.f32 %v4152_v24, %v13617_v27  ;;  %v4905_v34 = vpop.f32.mrf.mxu0  ;;  %v16075_v57 = vld [vmem:[#allocation69_spill] sm:$0xff]  ;;  %v16076_v27 = vld [vmem:[#allocation31_spill] sm:$0xff]  ;;  %v11352_v24 = vcombine.low %v5362_v22, %v5364_v36  ;;  %7409 = vmatprep.subr.bf16.mxu0 %v12205_v10  ;;  %v16081_v22 = vld [vmem:[#allocation70_spill] sm:$0xff] }
 0x32c   :  { %16072 = vst [vmem:[#allocation19_spill] sm:$0xff] %v13818_v0  ;;  %v13824_v56 = vadd.f32 %v4905_v34, %v13620_v13  ;;  %v4156_v29 = vpop.f32.mrf.mxu1  ;;  %6438 = vmatprep.subr.bf16.mxu1 %v11357_v59 }
 0x32d   :  { %16073 = vst [vmem:[#allocation51_spill] sm:$0xff] %v13821_v58  ;;  %v13827_v48 = vadd.f32 %v4156_v29, %v13622_v32  ;;  %v4909_v51 = vpop.f32.mrf.mxu0  ;;  %v12203_v29 = vld [vmem:[#allocation8 + $0x880] ss:$16 sps:$4 sm:$0xff]   ;;  %v16079_v58 = vld [vmem:[#allocation64_spill] sm:$0xff] }
 0x32e   :  { %v13830_v0 = vadd.f32 %v4909_v51, %v16075_v57  ;;  %6263 = vmatmul.mubr.bf16.gmra.mxu1 %v16076_v27  ;;  %v4158_v43 = vpop.f32.mrf.mxu1  ;;  %v11413_v51 = vcombine.high %v5422_v18, %v5424_v40  ;;  %v16078_v57 = vld [vmem:[#allocation30_spill] sm:$0xff]  ;;  %7410 = vmatpush1.bf16.msra.mxu0 %v12203_v29 }
 0x32f   :  { %16074 = vst [vmem:[#allocation21_spill] sm:$0xff] %v13827_v48  ;;  %6439 = vmatpush1.bf16.msra.mxu1 %v11356_v30  ;;  %v13834_v13 = vadd.f32 %v4158_v43, %v13628_v49  ;;  %v4911_v59 = vpop.f32.mrf.mxu0  ;;  %6272 = vmatprep.mubr.bf16.mxu1 %v16077_v3  ;;  %v5418_v48 = vld [vmem:[#allocation5 + $0xf28] sm:$0xff] }
 0x330   :  { %v13838_v32 = vadd.f32 %v4911_v59, %v13632_v17  ;;  %v4160_v34 = vpop.f32.mrf.mxu1  ;;  %6440 = vmatprep.subr.bf16.mxu1 %v11353_v19  ;;  %6376 = vmatmul.mubr.bf16.gmra.mxu0 %v16078_v57  ;;  %v5420_v49 = vld [vmem:[#allocation5 + $0xf68] sm:$0xff]  ;;  %v12208_v17 = vld [vmem:[#allocation8 + $0x864] ss:$16 sps:$4 sm:$0xff]   ;;  %v11412_v57 = vcombine.low %v5422_v18, %v5424_v40 }
 0x331   :  { %v13842_v16 = vadd.f32 %v4160_v34, %v16079_v58  ;;  %v4913_v30 = vpop.f32.mrf.mxu0  ;;  %6385 = vmatprep.mubr.bf16.mxu0 %v16013_v31  ;;  %v12206_v58 = vld [vmem:[#allocation8 + $0x860] ss:$16 sps:$4 sm:$0xff]   ;;  %v11409_v31 = vcombine.high %v5418_v48, %v5420_v49  ;;  %7411 = vmatprep.subr.bf16.mxu0 %v12208_v17  ;;  %v5414_v29 = vld [vmem:[#allocation5 + $0xea8] sm:$0xff]  ;;  %v12211_v40 = vld [vmem:[#allocation8 + $0x844] ss:$16 sps:$4 sm:$0xff]  }
 0x332   :  { %v13846_v36 = vadd.f32 %v4913_v30, %v16081_v22  ;;  %v4162_v43 = vpop.f32.mrf.mxu1  ;;  %v5416_v22 = vld [vmem:[#allocation5 + $0xee8] sm:$0xff]  ;;  %7412 = vmatpush1.bf16.msra.mxu0 %v12206_v58  ;;  %v16087_v17 = vld [vmem:[#allocation37_spill] sm:$0xff] }
 0x333   :  { %16080 = vst [vmem:[#allocation61_spill] sm:$0xff] %v13842_v16  ;;  %6441 = vmatpush1.bf16.msra.mxu1 %v11352_v24  ;;  %v13849_v19 = vadd.f32 %v4162_v43, %v13641_v38  ;;  %v4915_v59 = vpop.f32.mrf.mxu0  ;;  %v16085_v24 = vld [vmem:[#allocation63_spill] sm:$0xff]  ;;  %v11408_v43 = vcombine.low %v5418_v48, %v5420_v49  ;;  %7413 = vmatprep.subr.bf16.mxu0 %v12211_v40  ;;  %v16091_v48 = vld [vmem:[#allocation68_spill] sm:$0xff] }
 0x334   :  { %16082 = vst [vmem:[#allocation56_spill] sm:$0xff] %v13846_v36  ;;  %v13852_v34 = vadd.f32 %v4915_v59, %v13644_v46  ;;  %v4166_v16 = vpop.f32.mrf.mxu1  ;;  %6442 = vmatprep.subr.bf16.mxu1 %v11413_v51  ;;  %v16086_v38 = vld [vmem:[#allocation35_spill] sm:$0xff] }
 0x335   :  { %16083 = vst [vmem:[#allocation62_spill] sm:$0xff] %v13849_v19  ;;  %v13855_v10 = vadd.f32 %v4166_v16, %v13646_v39  ;;  %v4919_v30 = vpop.f32.mrf.mxu0  ;;  %v12209_v39 = vld [vmem:[#allocation8 + $0x840] ss:$16 sps:$4 sm:$0xff]  }
 0x336   :  { %v13858_v36 = vadd.f32 %v4919_v30, %v16085_v24  ;;  %6273 = vmatmul.mubr.bf16.gmra.mxu1 %v16086_v38  ;;  %v4168_v18 = vpop.f32.mrf.mxu1  ;;  %v11405_v30 = vcombine.high %v5414_v29, %v5416_v22  ;;  %v16088_v24 = vld [vmem:[#allocation34_spill] sm:$0xff]  ;;  %v16089_v19 = vld [vmem:[#allocation73_spill] sm:$0xff]  ;;  %7414 = vmatpush1.bf16.msra.mxu0 %v12209_v39 }
 0x337   :  { %16084 = vst [vmem:[#allocation23_spill] sm:$0xff] %v13855_v10  ;;  %6443 = vmatpush2.bf16.msra.mxu1 %v11412_v57  ;;  %v13862_v46 = vadd.f32 %v4168_v18, %v13652_v35  ;;  %v4921_v51 = vpop.f32.mrf.mxu0  ;;  %6282 = vmatprep.mubr.bf16.mxu1 %v16087_v17  ;;  %v5410_v10 = vld [vmem:[#allocation5 + $0xe28] sm:$0xff] }
 0x338   :  { %v13866_v16 = vadd.f32 %v4921_v51, %v13656_v52  ;;  %v4170_v59 = vpop.f32.mrf.mxu1  ;;  %6444 = vmatprep.subr.bf16.mxu1 %v11409_v31  ;;  %6386 = vmatmul.mubr.bf16.gmra.mxu0 %v16088_v24  ;;  %v5412_v35 = vld [vmem:[#allocation5 + $0xe68] sm:$0xff]  ;;  %v12214_v52 = vld [vmem:[#allocation8 + $0x824] ss:$16 sps:$4 sm:$0xff]  }
 0x339   :  { %v13870_v58 = vadd.f32 %v4170_v59, %v16089_v19  ;;  %v4923_v57 = vpop.f32.mrf.mxu0  ;;  %6395 = vmatprep.mubr.bf16.mxu0 %v16018_v41  ;;  %v11404_v19 = vcombine.low %v5414_v29, %v5416_v22  ;;  %v12212_v59 = vld [vmem:[#allocation8 + $0x820] ss:$16 sps:$4 sm:$0xff]   ;;  %7415 = vmatprep.subr.bf16.mxu0 %v12214_v52  ;;  %v5408_v41 = vld [vmem:[#allocation5 + $0xde8] sm:$0xff] }
 0x33a   :  { %v13874_v49 = vadd.f32 %v4923_v57, %v16091_v48  ;;  %v4172_v18 = vpop.f32.mrf.mxu1  ;;  %v5406_v48 = vld [vmem:[#allocation5 + $0xda8] sm:$0xff]  ;;  %7416 = vmatpush1.bf16.msra.mxu0 %v12212_v59  ;;  %v16096_v52 = vld [vmem:[#allocation41_spill] sm:$0xff] }
 0x33b   :  { %16090 = vst [vmem:[#allocation25_spill] sm:$0xff] %v13870_v58  ;;  %6445 = vmatpush2.bf16.msra.mxu1 %v11408_v43  ;;  %v13877_v31 = vadd.f32 %v4172_v18, %v13665_v12  ;;  %v13879_v51 = vpop.f32.mrf.mxu0  ;;  %v11401_v58 = vcombine.high %v5410_v10, %v5412_v35  ;;  %v16095_v43 = vld [vmem:[#allocation39_spill] sm:$0xff]  ;;  %v12217_v18 = vld [vmem:[#allocation8 + $0x804] ss:$16 sps:$4 sm:$0xff]  }
 0x33c   :  { %16093 = vst [vmem:[#allocation65_spill] sm:$0xff] %v13879_v51  ;;  %v4176_v24 = vpop.f32.mrf.mxu1  ;;  %6446 = vmatprep.subr.bf16.mxu1 %v11405_v30  ;;  %v11400_v30 = vcombine.low %v5410_v10, %v5412_v35  ;;  %v16098_v51 = vld [vmem:[#allocation67_spill] sm:$0xff]  ;;  %7417 = vmatprep.subr.bf16.mxu0 %v12217_v18  ;;  %v16100_v10 = vld [vmem:[#allocation77_spill] sm:$0xff] }
 0x33d   :  { %16092 = vst [vmem:[#allocation55_spill] sm:$0xff] %v13877_v31  ;;  %v13882_v40 = vadd.f32 %v4176_v24, %v13670_v63  ;;  %v4929_v57 = vpop.f32.mrf.mxu0  ;;  %v12215_v63 = vld [vmem:[#allocation8 + $0x800] ss:$16 sps:$4 sm:$0xff]  }
 0x33e   :  { %v13885_v39 = vadd.f32 %v4929_v57, %v13673_v33  ;;  %6283 = vmatmul.mubr.bf16.gmra.mxu1 %v16095_v43  ;;  %v4178_v12 = vpop.f32.mrf.mxu1  ;;  %v11397_v33 = vcombine.high %v5406_v48, %v5408_v41  ;;  %v16097_v57 = vld [vmem:[#allocation38_spill] sm:$0xff]  ;;  %7418 = vmatpush1.bf16.msra.mxu0 %v12215_v63 }
 0x33f   :  { %16094 = vst [vmem:[#allocation60_spill] sm:$0xff] %v13882_v40  ;;  %6447 = vmatpush2.bf16.msra.mxu1 %v11404_v19  ;;  %v13889_v29 = vadd.f32 %v4178_v12, %v13676_v53  ;;  %v4931_v22 = vpop.f32.mrf.mxu0  ;;  %6292 = vmatprep.mubr.bf16.mxu1 %v16096_v52  ;;  %v5402_v40 = vld [vmem:[#allocation5 + $0xd28] sm:$0xff] }
 0x340   :  { %v13893_v24 = vadd.f32 %v4931_v22, %v13680_v25  ;;  %v4180_v31 = vpop.f32.mrf.mxu1  ;;  %6448 = vmatprep.subr.bf16.mxu1 %v11401_v58  ;;  %6396 = vmatmul.mubr.bf16.gmra.mxu0 %v16097_v57  ;;  %v5404_v53 = vld [vmem:[#allocation5 + $0xd68] sm:$0xff]  ;;  %v12220_v25 = vld [vmem:[#allocation8 + $0x9e4] ss:$16 sps:$4 sm:$0xff]  }
 0x341   :  { %v13897_v59 = vadd.f32 %v4180_v31, %v16098_v51  ;;  %v4933_v19 = vpop.f32.mrf.mxu0  ;;  %6405 = vmatprep.mubr.bf16.mxu0 %v16023_v7  ;;  %v11396_v31 = vcombine.low %v5406_v48, %v5408_v41  ;;  %v12218_v51 = vld [vmem:[#allocation8 + $0x9e0] ss:$16 sps:$4 sm:$0xff]   ;;  %7419 = vmatprep.subr.bf16.mxu0 %v12220_v25  ;;  %v5400_v7 = vld [vmem:[#allocation5 + $0xce8] sm:$0xff] }
 0x342   :  { %v13901_v35 = vadd.f32 %v4933_v19, %v16100_v10  ;;  %v4182_v12 = vpop.f32.mrf.mxu1  ;;  %v5398_v10 = vld [vmem:[#allocation5 + $0xca8] sm:$0xff]  ;;  %7420 = vmatpush2.bf16.msra.mxu0 %v12218_v51  ;;  %v16106_v25 = vld [vmem:[#allocation45_spill] sm:$0xff] }
 0x343   :  { %16099 = vst [vmem:[#allocation66_spill] sm:$0xff] %v13897_v59  ;;  %6449 = vmatpush2.bf16.msra.mxu1 %v11400_v30  ;;  %v13904_v58 = vadd.f32 %v4182_v12, %v13689_v5  ;;  %v13906_v22 = vpop.f32.mrf.mxu0  ;;  %v11393_v59 = vcombine.high %v5402_v40, %v5404_v53  ;;  %v16104_v30 = vld [vmem:[#allocation43_spill] sm:$0xff]  ;;  %v12223_v12 = vld [vmem:[#allocation8 + $0x9c4] ss:$16 sps:$4 sm:$0xff]  }
 0x344   :  { %16102 = vst [vmem:[#allocation69_spill] sm:$0xff] %v13906_v22  ;;  %v4186_v57 = vpop.f32.mrf.mxu1  ;;  %6450 = vmatprep.subr.bf16.mxu1 %v11397_v33  ;;  %v11392_v33 = vcombine.low %v5402_v40, %v5404_v53  ;;  %7421 = vmatprep.subr.bf16.mxu0 %v12223_v12  ;;  %v16113_v40 = vld [vmem:[#allocation81_spill] sm:$0xff] }
 0x345   :  { %16101 = vst [vmem:[#allocation59_spill] sm:$0xff] %v13904_v58  ;;  %v13909_v18 = vadd.f32 %v4186_v57, %v13694_v2  ;;  %v4939_v19 = vpop.f32.mrf.mxu0  ;;  %v12221_v2 = vld [vmem:[#allocation8 + $0x9c0] ss:$16 sps:$4 sm:$0xff]   ;;  %v16107_v57 = vld [vmem:[#allocation78_spill] sm:$0xff] }
 0x346   :  { %v13912_v63 = vadd.f32 %v4939_v19, %v13697_v62  ;;  %6293 = vmatmul.mubr.bf16.gmra.mxu1 %v16104_v30  ;;  %v4188_v5 = vpop.f32.mrf.mxu1  ;;  %v11389_v62 = vcombine.high %v5398_v10, %v5400_v7  ;;  %v16109_v19 = vld [vmem:[#allocation42_spill] sm:$0xff]  ;;  %7422 = vmatpush2.bf16.msra.mxu0 %v12221_v2  ;;  %v16117_v2 = vld [vmem:[#allocation47_spill] sm:$0xff] }
 0x347   :  { %16103 = vst [vmem:[#allocation64_spill] sm:$0xff] %v13909_v18  ;;  %6451 = vmatpush2.bf16.msra.mxu1 %v11396_v31  ;;  %v13916_v41 = vadd.f32 %v4188_v5, %v13700_v42  ;;  %v4941_v48 = vpop.f32.mrf.mxu0  ;;  %6302 = vmatprep.mubr.bf16.mxu1 %v16106_v25  ;;  %v16110_v18 = vld [vmem:[#allocation71_spill] sm:$0xff]  ;;  %v16112_v5 = vld [vmem:[#allocation44_spill] sm:$0xff] }
 0x348   :  { %v13920_v58 = vadd.f32 %v4941_v48, %v16107_v57  ;;  %v4190_v22 = vpop.f32.mrf.mxu1  ;;  %6452 = vmatprep.subr.bf16.mxu1 %v11393_v59  ;;  %6406 = vmatmul.mubr.bf16.gmra.mxu0 %v16109_v19  ;;  %v5394_v30 = vld [vmem:[#allocation5 + $0xc28] sm:$0xff]  ;;  %v12226_v48 = vld [vmem:[#allocation8 + $0x9a4] ss:$16 sps:$4 sm:$0xff]  }
 0x349   :  { %16105 = vst [vmem:[#allocation70_spill] sm:$0xff] %v13916_v41  ;;  %v13924_v51 = vadd.f32 %v4190_v22, %v16110_v18  ;;  %v4943_v31 = vpop.f32.mrf.mxu0  ;;  %v5396_v42 = vld [vmem:[#allocation5 + $0xc68] sm:$0xff]  ;;  %6415 = vmatprep.mubr.bf16.mxu0 %v16112_v5  ;;  %v16114_v59 = vld [vmem:[#allocation76_spill] sm:$0xff]  ;;  %v11388_v22 = vcombine.low %v5398_v10, %v5400_v7  ;;  %v12224_v18 = vld [vmem:[#allocation8 + $0x9a0] ss:$16 sps:$4 sm:$0xff]   ;;  %7423 = vmatprep.subr.bf16.mxu0 %v12226_v48 }
 0x34a   :  { %16108 = vst [vmem:[#allocation63_spill] sm:$0xff] %v13920_v58  ;;  %v13928_v53 = vadd.f32 %v4943_v31, %v16113_v40  ;;  %v4192_v41 = vpop.f32.mrf.mxu1  ;;  %v11385_v58 = vcombine.high %v5394_v30, %v5396_v42  ;;  %7424 = vmatpush2.bf16.msra.mxu0 %v12224_v18  ;;  %v12227_v48 = vld [vmem:[#allocation8 + $0x980] ss:$16 sps:$4 sm:$0xff]  }
 0x34b   :  { %16111 = vst [vmem:[#allocation73_spill] sm:$0xff] %v13924_v51  ;;  %6453 = vmatpush2.bf16.msra.mxu1 %v11392_v33  ;;  %v13931_v57 = vadd.f32 %v4192_v41, %v16114_v59  ;;  %v13933_v19 = vpop.f32.mrf.mxu0  ;;  %v12229_v41 = vld [vmem:[#allocation8 + $0x984] ss:$16 sps:$4 sm:$0xff]   ;;  %v16118_v59 = vld [vmem:[#allocation75_spill] sm:$0xff] }
 0x34c   :  { %16116 = vst [vmem:[#allocation67_spill] sm:$0xff] %v13933_v19  ;;  %v4196_v51 = vpop.f32.mrf.mxu1  ;;  %6454 = vmatprep.subr.bf16.mxu1 %v11389_v62  ;;  %v11384_v62 = vcombine.low %v5394_v30, %v5396_v42  ;;  %7425 = vmatprep.subr.bf16.mxu0 %v12229_v41  ;;  %v12232_v30 = vld [vmem:[#allocation8 + $0x964] ss:$16 sps:$4 sm:$0xff]   ;;  %v16124_v41 = vld [vmem:[#allocation79_spill] sm:$0xff] }
 0x34d   :  { %16115 = vst [vmem:[#allocation68_spill] sm:$0xff] %v13931_v57  ;;  %v13936_v12 = vadd.f32 %v4196_v51, %v13718_v9  ;;  %v4949_v31 = vpop.f32.mrf.mxu0  ;;  %v16120_v42 = vld [vmem:[#allocation80_spill] sm:$0xff]  ;;  %v12236_v19 = vld [vmem:[#allocation8 + $0x920] ss:$16 sps:$4 sm:$0xff]  }
 0x34e   :  { %v13939_v40 = vadd.f32 %v4949_v31, %v13721_v45  ;;  %6303 = vmatmul.mubr.bf16.gmra.mxu1 %v16117_v2  ;;  %v4198_v33 = vpop.f32.mrf.mxu1  ;;  %v16119_v45 = vld [vmem:[#allocation85_spill] sm:$0xff]  ;;  %7426 = vmatpush2.bf16.msra.mxu0 %v12227_v48 }
 0x34f   :  { %6455 = vmatpush2.bf16.msra.mxu1 %v11388_v22  ;;  %v13943_v7 = vadd.f32 %v4198_v33, %v16118_v59  ;;  %v4951_v10 = vpop.f32.mrf.mxu0  ;;  %6458 = vmatprep.mubr.bf16.mxu1 %v16037_v23 }
 0x350   :  { %v13947_v9 = vadd.f32 %v4951_v10, %v13727_v4  ;;  %v4200_v51 = vpop.f32.mrf.mxu1  ;;  %6456 = vmatprep.subr.bf16.mxu1 %v11385_v58  ;;  %6416 = vmatmul.mubr.bf16.gmra.mxu0 %v16039_v20  ;;  %v12230_v58 = vld [vmem:[#allocation8 + $0x960] ss:$16 sps:$4 sm:$0xff]  }
 0x351   :  { %v13951_v31 = vadd.f32 %v4200_v51, %v16119_v45  ;;  %v4953_v18 = vpop.f32.mrf.mxu0  ;;  %7427 = vmatprep.subr.bf16.mxu0 %v12232_v30 }
 0x352   :  { %v13954_v22 = vadd.f32 %v4953_v18, %v13734_v8  ;;  %v4202_v33 = vpop.f32.mrf.mxu1  ;;  %7428 = vmatpush2.bf16.msra.mxu0 %v12230_v58  ;;  %v12235_v8 = vld [vmem:[#allocation8 + $0x944] ss:$16 sps:$4 sm:$0xff]   ;;  %v12233_v18 = vld [vmem:[#allocation8 + $0x940] ss:$16 sps:$4 sm:$0xff]  }
 0x353   :  { %6457 = vmatpush2.bf16.msra.mxu1 %v11384_v62  ;;  %v13957_v59 = vadd.f32 %v4202_v33, %v16120_v42  ;;  %v13959_v4 = vpop.f32.mrf.mxu0  ;;  %7429 = vmatprep.subr.bf16.mxu0 %v12235_v8 }
 0x354   :  { %16122 = vst [vmem:[#allocation78_spill] sm:$0xff] %v13959_v4 }
 0x355   :  { %16121 = vst [vmem:[#allocation77_spill] sm:$0xff] %v13957_v59  ;;  %v4992_v10 = vpop.f32.mrf.mxu1 }
 0x356   :  { %v13962_v51 = vadd.f32 %v4992_v10, %v13746_v15  ;;  %v5105_v45 = vpop.f32.mrf.mxu0  ;;  %6459 = vmatmul.mubr.bf16.vlgmr.msra.gmra.mxu1 %v16045_v50  ;;  %v16126_v10 = vld [vmem:[#allocation83_spill] sm:$0xff]  ;;  %7430 = vmatpush2.bf16.msra.mxu0 %v12233_v18  ;;  %v12241_v18 = vld [vmem:[#allocation8 + $0x904] ss:$16 sps:$4 sm:$0xff]  }
 0x357   :  { %v13966_v48 = vadd.f32 %v5105_v45, %v16124_v41  ;;  %v4994_v62 = vpop.f32.mrf.mxu1  ;;  %6468 = vmatprep.mubr.bf16.mxu1 %v16047_v6  ;;  %v12238_v45 = vld [vmem:[#allocation8 + $0x924] ss:$16 sps:$4 sm:$0xff]  }
 0x358   :  { %16123 = vst [vmem:[#allocation71_spill] sm:$0xff] %v13962_v51  ;;  %v13970_v33 = vadd.f32 %v4994_v62, %v13754_v47  ;;  %v5107_v30 = vpop.f32.mrf.mxu0  ;;  %v16128_v41 = vld [vmem:[#allocation84_spill] sm:$0xff]  ;;  %7431 = vmatprep.subr.bf16.mxu0 %v12238_v45 }
 0x359   :  { %v13973_v15 = vadd.f32 %v5107_v30, %v13750_v11  ;;  %v4996_v42 = vpop.f32.mrf.mxu1 }
 0x35a   :  { %16125 = vst [vmem:[#allocation44_spill] sm:$0xff] %v13970_v33  ;;  %v13976_v59 = vadd.f32 %v4996_v42, %v16126_v10  ;;  %v5109_v58 = vpop.f32.mrf.mxu0  ;;  %7432 = vmatpush2.bf16.msra.mxu0 %v12236_v19  ;;  %v16132_v42 = vld [vmem:[#allocation57_spill] sm:$0xff] }
 0x35b   :  { %v13979_v57 = vadd.f32 %v5109_v58, %v16128_v41  ;;  %v4998_v4 = vpop.f32.mrf.mxu1  ;;  %7433 = vmatprep.subr.bf16.mxu0 %v12241_v18  ;;  %v12242_v33 = vld [vmem:[#allocation8 + $0xae0] ss:$16 sps:$4 sm:$0xff]  }
 0x35c   :  { %16127 = vst [vmem:[#allocation81_spill] sm:$0xff] %v13976_v59  ;;  %v13982_v47 = vadd.f32 %v4998_v4, %v13768_v21  ;;  %v13984_v62 = vpop.f32.mrf.mxu0  ;;  %v12239_v21 = vld [vmem:[#allocation8 + $0x900] ss:$16 sps:$4 sm:$0xff]  }
 0x35d   :  { %16130 = vst [vmem:[#allocation75_spill] sm:$0xff] %v13984_v62  ;;  %v5002_v11 = vpop.f32.mrf.mxu1 }
 0x35e   :  { %16129 = vst [vmem:[#allocation76_spill] sm:$0xff] %v13982_v47  ;;  %v13987_v8 = vadd.f32 %v5002_v11, %v13774_v54  ;;  %v5115_v30 = vpop.f32.mrf.mxu0  ;;  %6469 = vmatmul.mubr.bf16.gmra.mxu1 %v16056_v26  ;;  %v16134_v11 = vld [vmem:[#allocation53_spill] sm:$0xff]  ;;  %7434 = vmatpush2.bf16.msra.mxu0 %v12239_v21 }
 0x35f   :  { %v13991_v10 = vadd.f32 %v5115_v30, %v16132_v42  ;;  %v5004_v58 = vpop.f32.mrf.mxu1  ;;  %6478 = vmatprep.mubr.bf16.mxu1 %v16057_v55  ;;  %v12244_v30 = vld [vmem:[#allocation8 + $0xae4] ss:$16 sps:$4 sm:$0xff]   ;;  %v12247_v42 = vld [vmem:[#allocation8 + $0x8ec] ss:$16 sps:$4 sm:$0xff]  }
 0x360   :  { %16131 = vst [vmem:[#allocation85_spill] sm:$0xff] %v13987_v8  ;;  %v13995_v4 = vadd.f32 %v5004_v58, %v13782_v14  ;;  %v5117_v45 = vpop.f32.mrf.mxu0  ;;  %v16136_v8 = vld [vmem:[#allocation87_spill] sm:$0xff]  ;;  %7516 = vmatprep.subr.bf16.mxu1 %v12244_v30  ;;  %7629 = vmatprep.subr.bf16.mxu0 %v12247_v42 }
 0x361   :  { %v13998_v54 = vadd.f32 %v5117_v45, %v13778_v37  ;;  %v5006_v41 = vpop.f32.mrf.mxu1  ;;  %7517 = vmatpush1.bf16.msra.mxu1 %v12242_v33  ;;  %v16140_v45 = vld [vmem:[#allocation27_spill] sm:$0xff] }
 0x362   :  { %16133 = vst [vmem:[#allocation80_spill] sm:$0xff] %v13995_v4  ;;  %v14001_v62 = vadd.f32 %v5006_v41, %v16134_v11  ;;  %v5119_v19 = vpop.f32.mrf.mxu0  ;;  %v12250_v41 = vld [vmem:[#allocation8 + $0xac4] ss:$16 sps:$4 sm:$0xff]   ;;  %v16143_v42 = vld [vmem:[#allocation19_spill] sm:$0xff] }
 0x363   :  { %v14004_v47 = vadd.f32 %v5119_v19, %v16136_v8  ;;  %v5008_v59 = vpop.f32.mrf.mxu1  ;;  %v16141_v8 = vld [vmem:[#allocation46_spill] sm:$0xff]  ;;  %7518 = vmatprep.subr.bf16.mxu1 %v12250_v41 }
 0x364   :  { %16135 = vst [vmem:[#allocation79_spill] sm:$0xff] %v14001_v62  ;;  %v14007_v14 = vadd.f32 %v5008_v59, %v13796_v28  ;;  %v14009_v18 = vpop.f32.mrf.mxu0  ;;  %v12248_v28 = vld [vmem:[#allocation8 + $0xac0] ss:$16 sps:$4 sm:$0xff]  }
 0x365   :  { %16138 = vst [vmem:[#allocation84_spill] sm:$0xff] %v14009_v18  ;;  %v5012_v37 = vpop.f32.mrf.mxu1  ;;  %7519 = vmatpush1.bf16.msra.mxu1 %v12248_v28  ;;  %v12254_v62 = vld [vmem:[#allocation8 + $0xaa0] ss:$16 sps:$4 sm:$0xff]  }
 0x366   :  { %16137 = vst [vmem:[#allocation83_spill] sm:$0xff] %v14007_v14  ;;  %v14012_v58 = vadd.f32 %v5012_v37, %v13802_v44  ;;  %v5125_v21 = vpop.f32.mrf.mxu0  ;;  %6479 = vmatmul.mubr.bf16.gmra.mxu1 %v16140_v45 }
 0x367   :  { %v14016_v11 = vadd.f32 %v5125_v21, %v16141_v8  ;;  %v5014_v19 = vpop.f32.mrf.mxu1  ;;  %6488 = vmatprep.mubr.bf16.mxu1 %v16067_v60  ;;  %v12256_v21 = vld [vmem:[#allocation8 + $0xaa4] ss:$16 sps:$4 sm:$0xff]  }
 0x368   :  { %16139 = vst [vmem:[#allocation57_spill] sm:$0xff] %v14012_v58  ;;  %v14020_v59 = vadd.f32 %v5014_v19, %v13810_v61  ;;  %v5127_v30 = vpop.f32.mrf.mxu0  ;;  %v16145_v8 = vld [vmem:[#allocation58_spill] sm:$0xff]  ;;  %7520 = vmatprep.subr.bf16.mxu1 %v12256_v21 }
 0x369   :  { %v14023_v33 = vadd.f32 %v5127_v30, %v13806_v1  ;;  %v5016_v44 = vpop.f32.mrf.mxu1  ;;  %7521 = vmatpush1.bf16.msra.mxu1 %v12254_v62  ;;  %v12262_v30 = vld [vmem:[#allocation8 + $0xa84] ss:$16 sps:$4 sm:$0xff]  }
 0x36a   :  { %16142 = vst [vmem:[#allocation53_spill] sm:$0xff] %v14020_v59  ;;  %v14026_v37 = vadd.f32 %v5016_v44, %v16143_v42  ;;  %v5129_v18 = vpop.f32.mrf.mxu0  ;;  %v16149_v44 = vld [vmem:[#allocation21_spill] sm:$0xff]  ;;  %7522 = vmatprep.subr.bf16.mxu1 %v12262_v30 }
 0x36b   :  { %v14029_v58 = vadd.f32 %v5129_v18, %v16145_v8  ;;  %v5018_v14 = vpop.f32.mrf.mxu1  ;;  %v16151_v8 = vld [vmem:[#allocation56_spill] sm:$0xff] }
 0x36c   :  { %16144 = vst [vmem:[#allocation87_spill] sm:$0xff] %v14026_v37  ;;  %v14032_v61 = vadd.f32 %v5018_v14, %v13824_v56  ;;  %v14034_v19 = vpop.f32.mrf.mxu0  ;;  %v12260_v56 = vld [vmem:[#allocation8 + $0xa80] ss:$16 sps:$4 sm:$0xff]  }
 0x36d   :  { %16147 = vst [vmem:[#allocation19_spill] sm:$0xff] %v14034_v19  ;;  %v5022_v1 = vpop.f32.mrf.mxu1  ;;  %7523 = vmatpush1.bf16.msra.mxu1 %v12260_v56  ;;  %v12266_v37 = vld [vmem:[#allocation8 + $0xa60] ss:$16 sps:$4 sm:$0xff]  }
 0x36e   :  { %16146 = vst [vmem:[#allocation46_spill] sm:$0xff] %v14032_v61  ;;  %v14037_v41 = vadd.f32 %v5022_v1, %v13830_v0  ;;  %v5135_v28 = vpop.f32.mrf.mxu0  ;;  %6489 = vmatmul.mubr.bf16.gmra.mxu1 %v16076_v27 }
 0x36f   :  { %v14041_v18 = vadd.f32 %v5135_v28, %v16149_v44  ;;  %v5024_v42 = vpop.f32.mrf.mxu1  ;;  %6498 = vmatprep.mubr.bf16.mxu1 %v16077_v3  ;;  %v12268_v28 = vld [vmem:[#allocation8 + $0xa64] ss:$16 sps:$4 sm:$0xff]   ;;  %v16153_v44 = vld [vmem:[#allocation61_spill] sm:$0xff] }
 0x370   :  { %16148 = vst [vmem:[#allocation58_spill] sm:$0xff] %v14037_v41  ;;  %v14045_v14 = vadd.f32 %v5024_v42, %v13838_v32  ;;  %v5137_v21 = vpop.f32.mrf.mxu0  ;;  %7524 = vmatprep.subr.bf16.mxu1 %v12268_v28 }
 0x371   :  { %v14048_v62 = vadd.f32 %v5137_v21, %v13834_v13  ;;  %v5026_v0 = vpop.f32.mrf.mxu1  ;;  %7525 = vmatpush1.bf16.msra.mxu1 %v12266_v37  ;;  %v12274_v21 = vld [vmem:[#allocation8 + $0xa44] ss:$16 sps:$4 sm:$0xff]  }
 0x372   :  { %16150 = vst [vmem:[#allocation21_spill] sm:$0xff] %v14045_v14  ;;  %v14051_v1 = vadd.f32 %v5026_v0, %v16151_v8  ;;  %v5139_v19 = vpop.f32.mrf.mxu0  ;;  %v16157_v0 = vld [vmem:[#allocation23_spill] sm:$0xff]  ;;  %7526 = vmatprep.subr.bf16.mxu1 %v12274_v21 }
 0x373   :  { %v14054_v41 = vadd.f32 %v5139_v19, %v16153_v44  ;;  %v5028_v61 = vpop.f32.mrf.mxu1 }
 0x374   :  { %16152 = vst [vmem:[#allocation56_spill] sm:$0xff] %v14051_v1  ;;  %v14057_v32 = vadd.f32 %v5028_v61, %v13852_v34  ;;  %v14059_v42 = vpop.f32.mrf.mxu0  ;;  %v12272_v34 = vld [vmem:[#allocation8 + $0xa40] ss:$16 sps:$4 sm:$0xff]  }
 0x375   :  { %16155 = vst [vmem:[#allocation88_spill] sm:$0xff] %v14059_v42  ;;  %v5032_v13 = vpop.f32.mrf.mxu1  ;;  %7527 = vmatpush1.bf16.msra.mxu1 %v12272_v34  ;;  %v16164_v34 = vld [vmem:[#allocation60_spill] sm:$0xff]  ;;  %v12302_v1 = vld [vmem:[#allocation8 + $0xba0] ss:$16 sps:$4 sm:$0xff]  }
 0x376   :  { %16154 = vst [vmem:[#allocation61_spill] sm:$0xff] %v14057_v32  ;;  %v14062_v30 = vadd.f32 %v5032_v13, %v13858_v36  ;;  %v5145_v56 = vpop.f32.mrf.mxu0  ;;  %6499 = vmatmul.mubr.bf16.gmra.mxu1 %v16086_v38  ;;  %v12278_v32 = vld [vmem:[#allocation8 + $0xa20] ss:$16 sps:$4 sm:$0xff]  }
 0x377   :  { %v14066_v19 = vadd.f32 %v5145_v56, %v16157_v0  ;;  %v5034_v8 = vpop.f32.mrf.mxu1  ;;  %6508 = vmatprep.mubr.bf16.mxu1 %v16087_v17  ;;  %v12280_v56 = vld [vmem:[#allocation8 + $0xa24] ss:$16 sps:$4 sm:$0xff]   ;;  %v16160_v0 = vld [vmem:[#allocation25_spill] sm:$0xff] }
 0x378   :  { %16156 = vst [vmem:[#allocation89_spill] sm:$0xff] %v14062_v30  ;;  %v14070_v61 = vadd.f32 %v5034_v8, %v13866_v16  ;;  %v5147_v28 = vpop.f32.mrf.mxu0  ;;  %7528 = vmatprep.subr.bf16.mxu1 %v12280_v56 }
 0x379   :  { %v14073_v37 = vadd.f32 %v5147_v28, %v13862_v46  ;;  %v5036_v36 = vpop.f32.mrf.mxu1  ;;  %7529 = vmatpush1.bf16.msra.mxu1 %v12278_v32 }
 0x37a   :  { %16158 = vst [vmem:[#allocation23_spill] sm:$0xff] %v14070_v61  ;;  %v14076_v44 = vadd.f32 %v5036_v36, %v13874_v49  ;;  %v5149_v13 = vpop.f32.mrf.mxu0  ;;  %v12286_v49 = vld [vmem:[#allocation8 + $0xa04] ss:$16 sps:$4 sm:$0xff]  }
 0x37b   :  { %v14079_v42 = vadd.f32 %v5149_v13, %v16160_v0  ;;  %v14081_v30 = vpop.f32.mrf.mxu1  ;;  %v12284_v13 = vld [vmem:[#allocation8 + $0xa00] ss:$16 sps:$4 sm:$0xff]   ;;  %7530 = vmatprep.subr.bf16.mxu1 %v12286_v49 }
 0x37c   :  { %16159 = vst [vmem:[#allocation90_spill] sm:$0xff] %v14076_v44  ;;  %16161 = vst [vmem:[#allocation25_spill] sm:$0xff] %v14081_v30  ;;  %v14083_v16 = vpop.f32.mrf.mxu0  ;;  %v12290_v44 = vld [vmem:[#allocation8 + $0xbe0] ss:$16 sps:$4 sm:$0xff]  }
 0x37d   :  { %16162 = vst [vmem:[#allocation91_spill] sm:$0xff] %v14083_v16  ;;  %v5042_v21 = vpop.f32.mrf.mxu1  ;;  %7531 = vmatpush1.bf16.msra.mxu1 %v12284_v13  ;;  %v16171_v13 = vld [vmem:[#allocation43_spill] sm:$0xff] }
 0x37e   :  { %v14086_v46 = vadd.f32 %v5042_v21, %v13885_v39  ;;  %v5155_v8 = vpop.f32.mrf.mxu0  ;;  %6509 = vmatmul.mubr.bf16.gmra.mxu1 %v16095_v43 }
 0x37f   :  { %v14090_v28 = vadd.f32 %v5155_v8, %v16164_v34  ;;  %v5044_v36 = vpop.f32.mrf.mxu1  ;;  %6518 = vmatprep.mubr.bf16.mxu1 %v16096_v52  ;;  %v12292_v8 = vld [vmem:[#allocation8 + $0xbe4] ss:$16 sps:$4 sm:$0xff]  }
 0x380   :  { %16163 = vst [vmem:[#allocation92_spill] sm:$0xff] %v14086_v46  ;;  %v14094_v0 = vadd.f32 %v5044_v36, %v13893_v24  ;;  %v5157_v56 = vpop.f32.mrf.mxu0  ;;  %v16167_v34 = vld [vmem:[#allocation66_spill] sm:$0xff]  ;;  %7532 = vmatprep.subr.bf16.mxu1 %v12292_v8 }
 0x381   :  { %v14097_v32 = vadd.f32 %v5157_v56, %v13889_v29  ;;  %v5046_v39 = vpop.f32.mrf.mxu1  ;;  %7533 = vmatpush2.bf16.msra.mxu1 %v12290_v44  ;;  %v16172_v56 = vld [vmem:[#allocation64_spill] sm:$0xff]  ;;  %v16175_v44 = vld [vmem:[#allocation70_spill] sm:$0xff] }
 0x382   :  { %16165 = vst [vmem:[#allocation60_spill] sm:$0xff] %v14094_v0  ;;  %v14100_v21 = vadd.f32 %v5046_v39, %v13901_v35  ;;  %v5159_v16 = vpop.f32.mrf.mxu0  ;;  %v12298_v35 = vld [vmem:[#allocation8 + $0xbc4] ss:$16 sps:$4 sm:$0xff]  }
 0x383   :  { %v14103_v30 = vadd.f32 %v5159_v16, %v16167_v34  ;;  %v14105_v46 = vpop.f32.mrf.mxu1  ;;  %v12296_v34 = vld [vmem:[#allocation8 + $0xbc0] ss:$16 sps:$4 sm:$0xff]   ;;  %7534 = vmatprep.subr.bf16.mxu1 %v12298_v35 }
 0x384   :  { %16166 = vst [vmem:[#allocation93_spill] sm:$0xff] %v14100_v21  ;;  %16168 = vst [vmem:[#allocation66_spill] sm:$0xff] %v14105_v46  ;;  %v14107_v24 = vpop.f32.mrf.mxu0  ;;  %v16173_v46 = vld [vmem:[#allocation63_spill] sm:$0xff] }
 0x385   :  { %16169 = vst [vmem:[#allocation94_spill] sm:$0xff] %v14107_v24  ;;  %v5052_v49 = vpop.f32.mrf.mxu1  ;;  %7535 = vmatpush2.bf16.msra.mxu1 %v12296_v34 }
 0x386   :  { %v14110_v29 = vadd.f32 %v5052_v49, %v13912_v63  ;;  %v5165_v36 = vpop.f32.mrf.mxu0  ;;  %6519 = vmatmul.mubr.bf16.gmra.mxu1 %v16171_v13 }
 0x387   :  { %v14114_v39 = vadd.f32 %v5165_v36, %v16172_v56  ;;  %v5054_v16 = vpop.f32.mrf.mxu1  ;;  %6528 = vmatprep.mubr.bf16.mxu1 %v16106_v25  ;;  %v12304_v36 = vld [vmem:[#allocation8 + $0xba4] ss:$16 sps:$4 sm:$0xff]   ;;  %v16177_v56 = vld [vmem:[#allocation73_spill] sm:$0xff] }
 0x388   :  { %16170 = vst [vmem:[#allocation95_spill] sm:$0xff] %v14110_v29  ;;  %v14118_v21 = vadd.f32 %v5054_v16, %v16173_v46  ;;  %v5167_v8 = vpop.f32.mrf.mxu0  ;;  %7536 = vmatprep.subr.bf16.mxu1 %v12304_v36 }
 0x389   :  { %v14121_v24 = vadd.f32 %v5167_v8, %v16175_v44  ;;  %v5056_v63 = vpop.f32.mrf.mxu1  ;;  %7537 = vmatpush2.bf16.msra.mxu1 %v12302_v1  ;;  %v12308_v44 = vld [vmem:[#allocation8 + $0xb80] ss:$16 sps:$4 sm:$0xff]  }
 0x38a   :  { %16174 = vst [vmem:[#allocation64_spill] sm:$0xff] %v14118_v21  ;;  %v14124_v49 = vadd.f32 %v5056_v63, %v13928_v53  ;;  %v5169_v29 = vpop.f32.mrf.mxu0  ;;  %v12310_v53 = vld [vmem:[#allocation8 + $0xb84] ss:$16 sps:$4 sm:$0xff]  }
 0x38b   :  { %v14127_v0 = vadd.f32 %v5169_v29, %v16177_v56  ;;  %v14129_v61 = vpop.f32.mrf.mxu1  ;;  %7538 = vmatprep.subr.bf16.mxu1 %v12310_v53 }
 0x38c   :  { %16176 = vst [vmem:[#allocation63_spill] sm:$0xff] %v14124_v49  ;;  %16178 = vst [vmem:[#allocation70_spill] sm:$0xff] %v14129_v61  ;;  %v14131_v46 = vpop.f32.mrf.mxu0  ;;  %v12314_v61 = vld [vmem:[#allocation8 + $0xb60] ss:$16 sps:$4 sm:$0xff]  }
 0x38d   :  { %16179 = vst [vmem:[#allocation73_spill] sm:$0xff] %v14131_v46  ;;  %v5062_v35 = vpop.f32.mrf.mxu1  ;;  %7539 = vmatpush2.bf16.msra.mxu1 %v12308_v44  ;;  %v12316_v46 = vld [vmem:[#allocation8 + $0xb64] ss:$16 sps:$4 sm:$0xff]   ;;  %v12320_v44 = vld [vmem:[#allocation8 + $0xb40] ss:$16 sps:$4 sm:$0xff]  }
 0x38e   :  { %v14134_v16 = vadd.f32 %v5062_v35, %v13939_v40  ;;  %v5175_v34 = vpop.f32.mrf.mxu0  ;;  %6529 = vmatmul.mubr.bf16.gmra.mxu1 %v16117_v2  ;;  %7540 = vmatprep.subr.bf16.mxu1 %v12316_v46 }
 0x38f   :  { %v14138_v8 = vadd.f32 %v5175_v34, %v13936_v12  ;;  %v5064_v29 = vpop.f32.mrf.mxu1 }
 0x390   :  { %16180 = vst [vmem:[#allocation96_spill] sm:$0xff] %v14134_v16  ;;  %v14141_v63 = vadd.f32 %v5064_v29, %v13947_v9  ;;  %v5177_v56 = vpop.f32.mrf.mxu0 }
 0x391   :  { %v14144_v36 = vadd.f32 %v5177_v56, %v13943_v7  ;;  %v5066_v1 = vpop.f32.mrf.mxu1  ;;  %7541 = vmatpush2.bf16.msra.mxu1 %v12314_v61  ;;  %v12322_v7 = vld [vmem:[#allocation8 + $0xb44] ss:$16 sps:$4 sm:$0xff]  }
 0x392   :  { %16181 = vst [vmem:[#allocation97_spill] sm:$0xff] %v14141_v63  ;;  %v14147_v40 = vadd.f32 %v5066_v1, %v13954_v22  ;;  %v5179_v35 = vpop.f32.mrf.mxu0  ;;  %7542 = vmatprep.subr.bf16.mxu1 %v12322_v7  ;;  %v12328_v61 = vld [vmem:[#allocation8 + $0xb24] ss:$16 sps:$4 sm:$0xff]  }
 0x393   :  { %v14150_v12 = vadd.f32 %v5179_v35, %v13951_v31  ;;  %v14152_v34 = vpop.f32.mrf.mxu1 }
 0x394   :  { %16182 = vst [vmem:[#allocation98_spill] sm:$0xff] %v14147_v40  ;;  %16183 = vst [vmem:[#allocation99_spill] sm:$0xff] %v14152_v34  ;;  %v14154_v9 = vpop.f32.mrf.mxu0 }
 0x395   :  { %16184 = vst [vmem:[#allocation100_spill] sm:$0xff] %v14154_v9  ;;  %7543 = vmatpush2.bf16.msra.mxu1 %v12320_v44  ;;  %v12326_v9 = vld [vmem:[#allocation8 + $0xb20] ss:$16 sps:$4 sm:$0xff]  }
 0x396   :  { %v5218_v53 = vpop.f32.mrf.mxu1  ;;  %7544 = vmatprep.subr.bf16.mxu1 %v12328_v61 }
 0x397   :  { %v14157_v29 = vadd.f32 %v5218_v53, %v13966_v48 }
 0x398   :  { %v5220_v22 = vpop.f32.mrf.mxu1  ;;  %v14159_v56 = vpop.f32.mrf.mxu0 }
 0x399   :  { %16185 = vst [vmem:[#allocation101_spill] sm:$0xff] %v14157_v29  ;;  %v14162_v31 = vadd.f32 %v5220_v22, %v13973_v15  ;;  %7545 = vmatpush2.bf16.msra.mxu1 %v12326_v9  ;;  %v12334_v15 = vld [vmem:[#allocation8 + $0xb04] ss:$16 sps:$4 sm:$0xff]   ;;  %v12332_v22 = vld [vmem:[#allocation8 + $0xb00] ss:$16 sps:$4 sm:$0xff]  }
 0x39a   :  { %v5222_v1 = vpop.f32.mrf.mxu1  ;;  %v14164_v35 = vpop.f32.mrf.mxu0  ;;  %7546 = vmatprep.subr.bf16.mxu1 %v12334_v15  ;;  %v12340_v9 = vld [vmem:[#allocation8 + $0xaec] ss:$16 sps:$4 sm:$0xff]  }
 0x39b   :  { %16186 = vst [vmem:[#allocation102_spill] sm:$0xff] %v14162_v31  ;;  %v14167_v46 = vadd.f32 %v5222_v1, %v13979_v57 }
 0x39c   :  { %v14169_v34 = vpop.f32.mrf.mxu1  ;;  %v14171_v48 = vpop.f32.mrf.mxu0 }
 0x39d   :  { %16187 = vst [vmem:[#allocation103_spill] sm:$0xff] %v14167_v46  ;;  %16188 = vst [vmem:[#allocation104_spill] sm:$0xff] %v14169_v34  ;;  %7547 = vmatpush2.bf16.msra.mxu1 %v12332_v22 }
 0x39e   :  { %v5228_v53 = vpop.f32.mrf.mxu1  ;;  %v14173_v7 = vpop.f32.mrf.mxu0  ;;  %7742 = vmatprep.subr.bf16.mxu1 %v12340_v9 }
 0x39f   :  { %v14176_v44 = vadd.f32 %v5228_v53, %v13991_v10 }
 0x3a0   :  { %v5230_v31 = vpop.f32.mrf.mxu1  ;;  %v14178_v29 = vpop.f32.mrf.mxu0 }
 0x3a1   :  { %16189 = vst [vmem:[#allocation105_spill] sm:$0xff] %v14176_v44  ;;  %v14181_v57 = vadd.f32 %v5230_v31, %v13998_v54 }
 0x3a2   :  { %v5232_v1 = vpop.f32.mrf.mxu1  ;;  %v14183_v34 = vpop.f32.mrf.mxu0 }
 0x3a3   :  { %16190 = vst [vmem:[#allocation106_spill] sm:$0xff] %v14181_v57  ;;  %v14186_v61 = vadd.f32 %v5232_v1, %v14004_v47 }
 0x3a4   :  { %v14188_v46 = vpop.f32.mrf.mxu1  ;;  %v14190_v10 = vpop.f32.mrf.mxu0 }
 0x3a5   :  { %16191 = vst [vmem:[#allocation107_spill] sm:$0xff] %v14186_v61  ;;  %16192 = vst [vmem:[#allocation108_spill] sm:$0xff] %v14188_v46 }
 0x3a6   :  { %v5238_v53 = vpop.f32.mrf.mxu1  ;;  %v14192_v44 = vpop.f32.mrf.mxu0 }
 0x3a7   :  { %v14195_v15 = vadd.f32 %v5238_v53, %v14016_v11 }
 0x3a8   :  { %v5240_v54 = vpop.f32.mrf.mxu1  ;;  %v14197_v31 = vpop.f32.mrf.mxu0 }
 0x3a9   :  { %16193 = vst [vmem:[#allocation109_spill] sm:$0xff] %v14195_v15  ;;  %v14200_v22 = vadd.f32 %v5240_v54, %v14023_v33 }
 0x3aa   :  { %v5242_v57 = vpop.f32.mrf.mxu1  ;;  %v14202_v47 = vpop.f32.mrf.mxu0 }
 0x3ab   :  { %16194 = vst [vmem:[#allocation110_spill] sm:$0xff] %v14200_v22  ;;  %v14205_v1 = vadd.f32 %v5242_v57, %v14029_v58 }
 0x3ac   :  { %v14207_v46 = vpop.f32.mrf.mxu1  ;;  %v14209_v9 = vpop.f32.mrf.mxu0 }
 0x3ad   :  { %16195 = vst [vmem:[#allocation111_spill] sm:$0xff] %v14205_v1  ;;  %16196 = vst [vmem:[#allocation112_spill] sm:$0xff] %v14207_v46 }
 0x3ae   :  { %v5248_v61 = vpop.f32.mrf.mxu1  ;;  %v14211_v40 = vpop.f32.mrf.mxu0 }
 0x3af   :  { %v14214_v11 = vadd.f32 %v5248_v61, %v14041_v18 }
 0x3b0   :  { %v5250_v53 = vpop.f32.mrf.mxu1  ;;  %v14216_v15 = vpop.f32.mrf.mxu0 }
 0x3b1   :  { %16197 = vst [vmem:[#allocation113_spill] sm:$0xff] %v14214_v11  ;;  %v14219_v33 = vadd.f32 %v5250_v53, %v14048_v62 }
 0x3b2   :  { %v5252_v54 = vpop.f32.mrf.mxu1  ;;  %v14221_v22 = vpop.f32.mrf.mxu0 }
 0x3b3   :  { %16198 = vst [vmem:[#allocation114_spill] sm:$0xff] %v14219_v33  ;;  %v14224_v58 = vadd.f32 %v5252_v54, %v14054_v41 }
 0x3b4   :  { %v14226_v57 = vpop.f32.mrf.mxu1  ;;  %v14228_v46 = vpop.f32.mrf.mxu0 }
 0x3b5   :  { %16199 = vst [vmem:[#allocation115_spill] sm:$0xff] %v14224_v58  ;;  %16200 = vst [vmem:[#allocation116_spill] sm:$0xff] %v14226_v57 }
 0x3b6   :  { %v5258_v1 = vpop.f32.mrf.mxu1  ;;  %v14230_v63 = vpop.f32.mrf.mxu0 }
 0x3b7   :  { %v14233_v18 = vadd.f32 %v5258_v1, %v14066_v19 }
 0x3b8   :  { %v5260_v61 = vpop.f32.mrf.mxu1  ;;  %v14235_v11 = vpop.f32.mrf.mxu0 }
 0x3b9   :  { %16201 = vst [vmem:[#allocation117_spill] sm:$0xff] %v14233_v18  ;;  %v14238_v62 = vadd.f32 %v5260_v61, %v14073_v37 }
 0x3ba   :  { %v5262_v53 = vpop.f32.mrf.mxu1  ;;  %v14240_v33 = vpop.f32.mrf.mxu0 }
 0x3bb   :  { %16202 = vst [vmem:[#allocation118_spill] sm:$0xff] %v14238_v62  ;;  %v14243_v41 = vadd.f32 %v5262_v53, %v14079_v42 }
 0x3bc   :  { %v14245_v54 = vpop.f32.mrf.mxu1  ;;  %v14247_v57 = vpop.f32.mrf.mxu0 }
 0x3bd   :  { %16203 = vst [vmem:[#allocation119_spill] sm:$0xff] %v14243_v41  ;;  %16204 = vst [vmem:[#allocation120_spill] sm:$0xff] %v14245_v54 }
 0x3be   :  { %v5268_v58 = vpop.f32.mrf.mxu1  ;;  %v14249_v16 = vpop.f32.mrf.mxu0 }
 0x3bf   :  { %v14252_v19 = vadd.f32 %v5268_v58, %v14090_v28 }
 0x3c0   :  { %v5270_v1 = vpop.f32.mrf.mxu1  ;;  %v14254_v18 = vpop.f32.mrf.mxu0 }
 0x3c1   :  { %16205 = vst [vmem:[#allocation121_spill] sm:$0xff] %v14252_v19  ;;  %v14257_v37 = vadd.f32 %v5270_v1, %v14097_v32 }
 0x3c2   :  { %v5272_v61 = vpop.f32.mrf.mxu1  ;;  %v14259_v62 = vpop.f32.mrf.mxu0 }
 0x3c3   :  { %16206 = vst [vmem:[#allocation122_spill] sm:$0xff] %v14257_v37  ;;  %v14262_v42 = vadd.f32 %v5272_v61, %v14103_v30 }
 0x3c4   :  { %v14264_v53 = vpop.f32.mrf.mxu1  ;;  %v14266_v54 = vpop.f32.mrf.mxu0 }
 0x3c5   :  { %16207 = vst [vmem:[#allocation123_spill] sm:$0xff] %v14262_v42  ;;  %16208 = vst [vmem:[#allocation124_spill] sm:$0xff] %v14264_v53 }
 0x3c6   :  { %v5278_v41 = vpop.f32.mrf.mxu1  ;;  %v14268_v49 = vpop.f32.mrf.mxu0 }
 0x3c7   :  { %v14271_v28 = vadd.f32 %v5278_v41, %v14114_v39 }
 0x3c8   :  { %v5280_v58 = vpop.f32.mrf.mxu1  ;;  %v14273_v19 = vpop.f32.mrf.mxu0 }
 0x3c9   :  { %16209 = vst [vmem:[#allocation125_spill] sm:$0xff] %v14271_v28  ;;  %v14276_v32 = vadd.f32 %v5280_v58, %v14121_v24  ;;  %v14294_v24 = vld [vmem:[#allocation7 + $0x8] sm:$0xf] }
 0x3ca   :  { %v5282_v1 = vpop.f32.mrf.mxu1  ;;  %v14278_v37 = vpop.f32.mrf.mxu0 }
 0x3cb   :  { %16210 = vst [vmem:[#allocation126_spill] sm:$0xff] %v14276_v32  ;;  %v14281_v30 = vadd.f32 %v5282_v1, %v14127_v0 }
 0x3cc   :  { %v14283_v61 = vpop.f32.mrf.mxu1  ;;  %v14285_v53 = vpop.f32.mrf.mxu0 }
 0x3cd   :  { %16211 = vst [vmem:[#allocation127_spill] sm:$0xff] %v14281_v30  ;;  %16212 = vst [vmem:[#allocation128_spill] sm:$0xff] %v14283_v61  ;;  %v16216_v30 = vld [vmem:[#allocation48_spill] sm:$0xff] }
 0x3ce   :  { %v5288_v42 = vpop.f32.mrf.mxu1  ;;  %v14287_v21 = vpop.f32.mrf.mxu0  ;;  %v14306_v32 = vrot.slane %v14294_v24, %v16216_v30 }
 0x3cf   :  { %v14290_v39 = vadd.f32 %v5288_v42, %v14138_v8 }
 0x3d0   :  { %v5290_v41 = vpop.f32.mrf.mxu1  ;;  %v14292_v28 = vpop.f32.mrf.mxu0 }
 0x3d1   :  { %16213 = vst [vmem:[#allocation129_spill] sm:$0xff] %v14290_v39  ;;  %v14297_v58 = vadd.f32 %v5290_v41, %v14144_v36  ;;  %v16218_v39 = vld [vmem:[#allocation49_spill] sm:$0xff] }
 0x3d2   :  { %v5292_v0 = vpop.f32.mrf.mxu1  ;;  %v14299_v1 = vpop.f32.mrf.mxu0  ;;  %v14314_v14 = vrot.slane %v14294_v24, %v16218_v39 }
 0x3d3   :  { %16214 = vst [vmem:[#allocation130_spill] sm:$0xff] %v14297_v58  ;;  %v14302_v61 = vadd.f32 %v5292_v0, %v14150_v12  ;;  %v6122_v58 = vadd.f32 %v14159_v56, %v14306_v32 }
 0x3d4   :  { %v14308_v8 = vpop.f32.mrf.mxu1  ;;  %v14310_v42 = vpop.f32.mrf.mxu0  ;;  %v6128_v39 = vadd.f32 %v14173_v7, %v14314_v14  ;;  %v6134_v7 = vadd.f32 %v14183_v34, %v14314_v14 }
 0x3d5   :  { %16215 = vst [vmem:[#allocation131_spill] sm:$0xff] %v14302_v61  ;;  %16217 = vst [vmem:[#allocation132_spill] sm:$0xff] %v14308_v8  ;;  %v6124_v61 = vadd.f32 %v14164_v35, %v14314_v14  ;;  %v6126_v8 = vadd.f32 %v14171_v48, %v14306_v32  ;;  %v6132_v48 = vadd.f32 %v14178_v29, %v14306_v32 }
 0x3d6   :  { %v6234_v36 = vpop.f32.mrf.mxu1  ;;  %v14316_v41 = vpop.f32.mrf.mxu0 }
 0x3d7   :  { %v6235_v2 = vadd.f32 %v6234_v36, %v6122_v58  ;;  %v12259_v36 = vld [vmem:[#allocation8 + $0x8ac] ss:$16 sps:$4 sm:$0xff]  }
 0x3d8   :  { %v6236_v12 = vpop.f32.mrf.mxu1  ;;  %v14320_v0 = vpop.f32.mrf.mxu0 }
 0x3d9   :  { %v6237_v4 = vadd.f32 %v6236_v12, %v6124_v61  ;;  %v6539_v38 = vmax.f32 %v6235_v2, 0.0  ;;  %v6138_v2 = vadd.f32 %v14192_v44, %v14314_v14 }
 0x3da   :  { %v6238_v30 = vpop.f32.mrf.mxu1  ;;  %v14326_v59 = vpop.f32.mrf.mxu0 }
 0x3db   :  { %v6239_v51 = vadd.f32 %v6238_v30, %v6126_v8  ;;  %v6540_v17 = vmax.f32 %v6237_v4, 0.0  ;;  %v6136_v30 = vadd.f32 %v14190_v10, %v14306_v32  ;;  %v12251_v10 = vld [vmem:[#allocation8 + $0x8c8] ss:$16 sps:$4 sm:$0xff]  }
 0x3dc   :  { %v6240_v25 = vpop.f32.mrf.mxu1  ;;  %v14330_v56 = vpop.f32.mrf.mxu0 }
 0x3dd   :  { %v6241_v13 = vadd.f32 %v6240_v25, %v6128_v39  ;;  %v6543_v52 = vmax.f32 %v6239_v51, 0.0  ;;  %v12245_v25 = vld [vmem:[#allocation8 + $0x8e8] ss:$16 sps:$4 sm:$0xff]  }
 0x3de   :  { %v6244_v43 = vpop.f32.mrf.mxu1  ;;  %v14334_v27 = vpop.f32.mrf.mxu0 }
 0x3df   :  { %v6544_v35 = vmax.f32 %v6241_v13, 0.0  ;;  %v14342_v51 = vpack.c.bf16 %v6543_v52, %v6539_v38  ;;  %v12253_v13 = vld [vmem:[#allocation8 + $0x8cc] ss:$16 sps:$4 sm:$0xff]   ;;  %v6245_v58 = vadd.f32 %v6244_v43, %v6132_v48  ;;  %v6144_v48 = vadd.f32 %v14202_v47, %v14314_v14 }
 0x3e0   :  { %v6246_v3 = vpop.f32.mrf.mxu1  ;;  %v14348_v34 = vpop.f32.mrf.mxu0 }
 0x3e1   :  { %v14340_v61 = vpack.c.bf16 %v6544_v35, %v6540_v17  ;;  %v6247_v29 = vadd.f32 %v6246_v3, %v6134_v7  ;;  %v6547_v44 = vmax.f32 %v6245_v58, 0.0  ;;  %v6142_v3 = vadd.f32 %v14197_v31, %v14306_v32 }
 0x3e2   :  { %v6248_v4 = vpop.f32.mrf.mxu1  ;;  %v14352_v43 = vpop.f32.mrf.mxu0  ;;  %v6148_v31 = vadd.f32 %v14211_v40, %v14314_v14 }
 0x3e3   :  { %v6249_v39 = vadd.f32 %v6248_v4, %v6136_v30  ;;  %7435 = vmatprep.mubr.bf16.mxu0 %v14340_v61  ;;  %v6548_v12 = vmax.f32 %v6247_v29, 0.0  ;;  %v6146_v30 = vadd.f32 %v14209_v9, %v14306_v32  ;;  %v12257_v4 = vld [vmem:[#allocation8 + $0x8a8] ss:$16 sps:$4 sm:$0xff]   ;;  %v12265_v29 = vld [vmem:[#allocation8 + $0x88c] ss:$16 sps:$4 sm:$0xff]  }
 0x3e4   :  { %v6250_v8 = vpop.f32.mrf.mxu1  ;;  %7436 = vmatmul.mubr.bf16.vlgmr.msra.gmra.mxu0 %v14342_v51  ;;  %v14366_v9 = vpop.f32.mrf.mxu0 }
 0x3e5   :  { %v6251_v17 = vadd.f32 %v6250_v8, %v6138_v2  ;;  %7630 = vmatpush1.bf16.msra.mxu0 %v12245_v25  ;;  %v6551_v38 = vmax.f32 %v6249_v39, 0.0 }
 0x3e6   :  { %v6254_v52 = vpop.f32.mrf.mxu1  ;;  %7631 = vmatprep.subr.bf16.mxu0 %v12253_v13 }
 0x3e7   :  { %v6552_v35 = vmax.f32 %v6251_v17, 0.0  ;;  %v14360_v13 = vpack.c.bf16 %v6551_v38, %v6547_v44  ;;  %v6255_v47 = vadd.f32 %v6254_v52, %v6142_v3  ;;  %v14370_v52 = vpop.f32.mrf.mxu0  ;;  %v6154_v3 = vadd.f32 %v14221_v22, %v14314_v14 }
 0x3e8   :  { %v6256_v7 = vpop.f32.mrf.mxu1 }
 0x3e9   :  { %7632 = vmatpush1.bf16.msra.mxu0 %v12251_v10  ;;  %v14358_v25 = vpack.c.bf16 %v6552_v35, %v6548_v12  ;;  %v6257_v39 = vadd.f32 %v6256_v7, %v6144_v48  ;;  %v12263_v10 = vld [vmem:[#allocation8 + $0x888] ss:$16 sps:$4 sm:$0xff]   ;;  %v6555_v40 = vmax.f32 %v6255_v47, 0.0  ;;  %v6152_v7 = vadd.f32 %v14216_v15, %v14306_v32 }
 0x3ea   :  { %v6258_v2 = vpop.f32.mrf.mxu1  ;;  %7633 = vmatprep.subr.bf16.mxu0 %v12259_v36  ;;  %v12271_v36 = vld [vmem:[#allocation8 + $0x86c] ss:$16 sps:$4 sm:$0xff]   ;;  %v6158_v15 = vadd.f32 %v14230_v63, %v14314_v14 }
 0x3eb   :  { %v6259_v58 = vadd.f32 %v6258_v2, %v6146_v30  ;;  %7445 = vmatprep.mubr.bf16.mxu0 %v14358_v25  ;;  %v6556_v35 = vmax.f32 %v6257_v39, 0.0  ;;  %v6156_v30 = vadd.f32 %v14228_v46, %v14306_v32  ;;  %v12269_v2 = vld [vmem:[#allocation8 + $0x868] ss:$16 sps:$4 sm:$0xff]   ;;  %v12277_v39 = vld [vmem:[#allocation8 + $0x84c] ss:$16 sps:$4 sm:$0xff]   ;;  %v14384_v46 = vpop.f32.mrf.mxu0 }
 0x3ec   :  { %v6260_v8 = vpop.f32.mrf.mxu1  ;;  %7446 = vmatmul.mubr.bf16.gmra.mxu0 %v14360_v13 }
 0x3ed   :  { %v6261_v17 = vadd.f32 %v6260_v8, %v6148_v31  ;;  %7634 = vmatpush1.bf16.msra.mxu0 %v12257_v4  ;;  %v6559_v38 = vmax.f32 %v6259_v58, 0.0 }
 0x3ee   :  { %v6264_v12 = vpop.f32.mrf.mxu1  ;;  %7635 = vmatprep.subr.bf16.mxu0 %v12265_v29 }
 0x3ef   :  { %v6560_v44 = vmax.f32 %v6261_v17, 0.0  ;;  %v14378_v29 = vpack.c.bf16 %v6559_v38, %v6555_v40  ;;  %v6265_v22 = vadd.f32 %v6264_v12, %v6152_v7  ;;  %v14388_v12 = vpop.f32.mrf.mxu0  ;;  %v6164_v7 = vadd.f32 %v14240_v33, %v14314_v14 }
 0x3f0   :  { %v6266_v48 = vpop.f32.mrf.mxu1 }
 0x3f1   :  { %7636 = vmatpush1.bf16.msra.mxu0 %v12263_v10  ;;  %v14376_v4 = vpack.c.bf16 %v6560_v44, %v6556_v35  ;;  %v6267_v58 = vadd.f32 %v6266_v48, %v6154_v3  ;;  %v12275_v10 = vld [vmem:[#allocation8 + $0x848] ss:$16 sps:$4 sm:$0xff]   ;;  %v6563_v63 = vmax.f32 %v6265_v22, 0.0  ;;  %v6162_v48 = vadd.f32 %v14235_v11, %v14306_v32 }
 0x3f2   :  { %v6268_v31 = vpop.f32.mrf.mxu1  ;;  %7637 = vmatprep.subr.bf16.mxu0 %v12271_v36  ;;  %v12283_v36 = vld [vmem:[#allocation8 + $0x82c] ss:$16 sps:$4 sm:$0xff]   ;;  %v6168_v11 = vadd.f32 %v14249_v16, %v14314_v14 }
 0x3f3   :  { %v6269_v47 = vadd.f32 %v6268_v31, %v6156_v30  ;;  %7455 = vmatprep.mubr.bf16.mxu0 %v14376_v4  ;;  %v6564_v44 = vmax.f32 %v6267_v58, 0.0  ;;  %v6166_v30 = vadd.f32 %v14247_v57, %v14306_v32  ;;  %v12281_v31 = vld [vmem:[#allocation8 + $0x828] ss:$16 sps:$4 sm:$0xff]   ;;  %v12289_v58 = vld [vmem:[#allocation8 + $0x80c] ss:$16 sps:$4 sm:$0xff]   ;;  %v14402_v57 = vpop.f32.mrf.mxu0 }
 0x3f4   :  { %v6270_v8 = vpop.f32.mrf.mxu1  ;;  %7456 = vmatmul.mubr.bf16.gmra.mxu0 %v14378_v29 }
 0x3f5   :  { %v6271_v17 = vadd.f32 %v6270_v8, %v6158_v15  ;;  %7638 = vmatpush1.bf16.msra.mxu0 %v12269_v2  ;;  %v6567_v38 = vmax.f32 %v6269_v47, 0.0 }
 0x3f6   :  { %v6274_v35 = vpop.f32.mrf.mxu1  ;;  %7639 = vmatprep.subr.bf16.mxu0 %v12277_v39 }
 0x3f7   :  { %v6568_v40 = vmax.f32 %v6271_v17, 0.0  ;;  %v14396_v39 = vpack.c.bf16 %v6567_v38, %v6563_v63  ;;  %v6275_v33 = vadd.f32 %v6274_v35, %v6162_v48  ;;  %v14406_v35 = vpop.f32.mrf.mxu0  ;;  %v6174_v48 = vadd.f32 %v14259_v62, %v14314_v14 }
 0x3f8   :  { %v6276_v3 = vpop.f32.mrf.mxu1 }
 0x3f9   :  { %7640 = vmatpush1.bf16.msra.mxu0 %v12275_v10  ;;  %v14394_v2 = vpack.c.bf16 %v6568_v40, %v6564_v44  ;;  %v6277_v47 = vadd.f32 %v6276_v3, %v6164_v7  ;;  %v12287_v10 = vld [vmem:[#allocation8 + $0x808] ss:$16 sps:$4 sm:$0xff]   ;;  %v6571_v16 = vmax.f32 %v6275_v33, 0.0  ;;  %v6172_v3 = vadd.f32 %v14254_v18, %v14306_v32 }
 0x3fa   :  { %v6278_v15 = vpop.f32.mrf.mxu1  ;;  %7641 = vmatprep.subr.bf16.mxu0 %v12283_v36  ;;  %v12295_v36 = vld [vmem:[#allocation8 + $0x9ec] ss:$16 sps:$4 sm:$0xff]   ;;  %v6178_v18 = vadd.f32 %v14268_v49, %v14314_v14 }
 0x3fb   :  { %v6279_v22 = vadd.f32 %v6278_v15, %v6166_v30  ;;  %7465 = vmatprep.mubr.bf16.mxu0 %v14394_v2  ;;  %v6572_v40 = vmax.f32 %v6277_v47, 0.0  ;;  %v6176_v30 = vadd.f32 %v14266_v54, %v14306_v32  ;;  %v12293_v15 = vld [vmem:[#allocation8 + $0x9e8] ss:$16 sps:$4 sm:$0xff]   ;;  %v12301_v47 = vld [vmem:[#allocation8 + $0x9cc] ss:$16 sps:$4 sm:$0xff]   ;;  %v14420_v54 = vpop.f32.mrf.mxu0 }
 0x3fc   :  { %v6280_v8 = vpop.f32.mrf.mxu1  ;;  %7466 = vmatmul.mubr.bf16.gmra.mxu0 %v14396_v39 }
 0x3fd   :  { %v6281_v17 = vadd.f32 %v6280_v8, %v6168_v11  ;;  %7642 = vmatpush1.bf16.msra.mxu0 %v12281_v31  ;;  %v6575_v38 = vmax.f32 %v6279_v22, 0.0 }
 0x3fe   :  { %v6284_v44 = vpop.f32.mrf.mxu1  ;;  %7643 = vmatprep.subr.bf16.mxu0 %v12289_v58 }
 0x3ff   :  { %v6576_v63 = vmax.f32 %v6281_v17, 0.0  ;;  %v14414_v58 = vpack.c.bf16 %v6575_v38, %v6571_v16  ;;  %v6285_v62 = vadd.f32 %v6284_v44, %v6172_v3  ;;  %v14424_v44 = vpop.f32.mrf.mxu0  ;;  %v6184_v3 = vadd.f32 %v14278_v37, %v14314_v14 }
 0x400   :  { %v6286_v7 = vpop.f32.mrf.mxu1 }
 0x401   :  { %7644 = vmatpush1.bf16.msra.mxu0 %v12287_v10  ;;  %v14412_v31 = vpack.c.bf16 %v6576_v63, %v6572_v40  ;;  %v6287_v22 = vadd.f32 %v6286_v7, %v6174_v48  ;;  %v12299_v10 = vld [vmem:[#allocation8 + $0x9c8] ss:$16 sps:$4 sm:$0xff]   ;;  %v6579_v49 = vmax.f32 %v6285_v62, 0.0  ;;  %v6182_v7 = vadd.f32 %v14273_v19, %v14306_v32 }
 0x402   :  { %v6288_v11 = vpop.f32.mrf.mxu1  ;;  %7645 = vmatprep.subr.bf16.mxu0 %v12295_v36  ;;  %v12307_v36 = vld [vmem:[#allocation8 + $0x9ac] ss:$16 sps:$4 sm:$0xff]   ;;  %v6188_v19 = vadd.f32 %v14287_v21, %v14314_v14 }
 0x403   :  { %v6289_v33 = vadd.f32 %v6288_v11, %v6176_v30  ;;  %7475 = vmatprep.mubr.bf16.mxu0 %v14412_v31  ;;  %v6580_v63 = vmax.f32 %v6287_v22, 0.0  ;;  %v6186_v30 = vadd.f32 %v14285_v53, %v14306_v32  ;;  %v12305_v11 = vld [vmem:[#allocation8 + $0x9a8] ss:$16 sps:$4 sm:$0xff]   ;;  %v12313_v22 = vld [vmem:[#allocation8 + $0x98c] ss:$16 sps:$4 sm:$0xff]   ;;  %v14438_v53 = vpop.f32.mrf.mxu0 }
 0x404   :  { %v6290_v8 = vpop.f32.mrf.mxu1  ;;  %7476 = vmatmul.mubr.bf16.gmra.mxu0 %v14414_v58 }
 0x405   :  { %v6291_v17 = vadd.f32 %v6290_v8, %v6178_v18  ;;  %7646 = vmatpush2.bf16.msra.mxu0 %v12293_v15  ;;  %v6583_v38 = vmax.f32 %v6289_v33, 0.0 }
 0x406   :  { %v6294_v40 = vpop.f32.mrf.mxu1  ;;  %7647 = vmatprep.subr.bf16.mxu0 %v12301_v47 }
 0x407   :  { %v6584_v16 = vmax.f32 %v6291_v17, 0.0  ;;  %v14432_v47 = vpack.c.bf16 %v6583_v38, %v6579_v49  ;;  %v6295_v37 = vadd.f32 %v6294_v40, %v6182_v7  ;;  %v14442_v40 = vpop.f32.mrf.mxu0  ;;  %v6194_v7 = vadd.f32 %v14299_v1, %v14314_v14 }
 0x408   :  { %v6296_v48 = vpop.f32.mrf.mxu1 }
 0x409   :  { %7648 = vmatpush2.bf16.msra.mxu0 %v12299_v10  ;;  %v14430_v15 = vpack.c.bf16 %v6584_v16, %v6580_v63  ;;  %v6297_v33 = vadd.f32 %v6296_v48, %v6184_v3  ;;  %v12311_v10 = vld [vmem:[#allocation8 + $0x988] ss:$16 sps:$4 sm:$0xff]   ;;  %v6587_v21 = vmax.f32 %v6295_v37, 0.0  ;;  %v6192_v48 = vadd.f32 %v14292_v28, %v14306_v32 }
 0x40a   :  { %v6298_v18 = vpop.f32.mrf.mxu1  ;;  %7649 = vmatprep.subr.bf16.mxu0 %v12307_v36  ;;  %v12319_v36 = vld [vmem:[#allocation8 + $0x96c] ss:$16 sps:$4 sm:$0xff]   ;;  %v6198_v28 = vadd.f32 %v14316_v41, %v14314_v14  ;;  %v12323_v14 = vld [vmem:[#allocation8 + $0x948] ss:$16 sps:$4 sm:$0xff]  }
 0x40b   :  { %v6299_v62 = vadd.f32 %v6298_v18, %v6186_v30  ;;  %7485 = vmatprep.mubr.bf16.mxu0 %v14430_v15  ;;  %v6588_v16 = vmax.f32 %v6297_v33, 0.0  ;;  %v6196_v30 = vadd.f32 %v14310_v42, %v14306_v32  ;;  %v12317_v18 = vld [vmem:[#allocation8 + $0x968] ss:$16 sps:$4 sm:$0xff]   ;;  %v12325_v33 = vld [vmem:[#allocation8 + $0x94c] ss:$16 sps:$4 sm:$0xff]  }
 0x40c   :  { %v6300_v8 = vpop.f32.mrf.mxu1  ;;  %7486 = vmatmul.mubr.bf16.gmra.mxu0 %v14432_v47 }
 0x40d   :  { %v6301_v17 = vadd.f32 %v6300_v8, %v6188_v19  ;;  %7650 = vmatpush2.bf16.msra.mxu0 %v12305_v11  ;;  %v6591_v38 = vmax.f32 %v6299_v62, 0.0  ;;  %v16219_v8 = vld [vmem:[#allocation50_spill] sm:$0xff] }
 0x40e   :  { %v6304_v63 = vpop.f32.mrf.mxu1  ;;  %7651 = vmatprep.subr.bf16.mxu0 %v12313_v22  ;;  %v14457_v32 = vrot.slane %v14294_v24, %v16219_v8  ;;  %v7945_v8 = vld [vmem:[#allocation5 + $0x370] sm:$0xff] }
 0x40f   :  { %v6592_v49 = vmax.f32 %v6301_v17, 0.0  ;;  %v14450_v22 = vpack.c.bf16 %v6591_v38, %v6587_v21  ;;  %v6305_v1 = vadd.f32 %v6304_v63, %v6192_v48  ;;  %v14460_v17 = vpop.f32.mrf.mxu0  ;;  %v12331_v63 = vld [vmem:[#allocation8 + $0x92c] ss:$16 sps:$4 sm:$0xff]  }
 0x410   :  { %v6306_v3 = vpop.f32.mrf.mxu1 }
 0x411   :  { %7652 = vmatpush2.bf16.msra.mxu0 %v12311_v10  ;;  %v14448_v11 = vpack.c.bf16 %v6592_v49, %v6588_v16  ;;  %v6307_v62 = vadd.f32 %v6306_v3, %v6194_v7  ;;  %v16220_v10 = vld [vmem:[#allocation52_spill] sm:$0xff]  ;;  %v6595_v48 = vmax.f32 %v6305_v1, 0.0  ;;  %v6348_v3 = vadd.f32 %v14320_v0, %v14457_v32 }
 0x412   :  { %v6308_v19 = vpop.f32.mrf.mxu1  ;;  %7653 = vmatprep.subr.bf16.mxu0 %v12319_v36  ;;  %v14464_v38 = vrot.slane %v14294_v24, %v16220_v10 }
 0x413   :  { %v6309_v37 = vadd.f32 %v6308_v19, %v6196_v30  ;;  %7495 = vmatprep.mubr.bf16.mxu0 %v14448_v11  ;;  %v6596_v49 = vmax.f32 %v6307_v62, 0.0  ;;  %v14468_v30 = vpop.f32.mrf.mxu0 }
 0x414   :  { %v6310_v42 = vpop.f32.mrf.mxu1  ;;  %7496 = vmatmul.mubr.bf16.gmra.mxu0 %v14450_v22  ;;  %v6350_v24 = vadd.f32 %v14326_v59, %v14464_v38  ;;  %v6354_v0 = vadd.f32 %v14334_v27, %v14464_v38  ;;  %v7947_v59 = vld [vmem:[#allocation5 + $0x3b0] sm:$0xff] }
 0x415   :  { %v6311_v36 = vadd.f32 %v6310_v42, %v6198_v28  ;;  %7654 = vmatpush2.bf16.msra.mxu0 %v12317_v18  ;;  %v6599_v41 = vmax.f32 %v6309_v37, 0.0  ;;  %v6352_v18 = vadd.f32 %v14330_v56, %v14457_v32  ;;  %v12337_v37 = vld [vmem:[#allocation8 + $0x90c] ss:$16 sps:$4 sm:$0xff]  }
 0x416   :  { %v6460_v16 = vpop.f32.mrf.mxu1  ;;  %7655 = vmatprep.subr.bf16.mxu0 %v12325_v33  ;;  %v12329_v33 = vld [vmem:[#allocation8 + $0x928] ss:$16 sps:$4 sm:$0xff]  }
 0x417   :  { %v6600_v21 = vmax.f32 %v6311_v36, 0.0  ;;  %v14476_v28 = vpack.c.bf16 %v6599_v41, %v6595_v48  ;;  %v7949_v36 = vld [vmem:[#allocation5 + $0x3f0] sm:$0xff]  ;;  %v6461_v10 = vadd.f32 %v6460_v16, %v6348_v3  ;;  %v6358_v16 = vadd.f32 %v14348_v34, %v14457_v32 }
 0x418   :  { %v6462_v7 = vpop.f32.mrf.mxu1  ;;  %v11571_v27 = vcombine.high %v7947_v59, %v7949_v36  ;;  %v11570_v34 = vcombine.low %v7947_v59, %v7949_v36 }
 0x419   :  { %7656 = vmatpush2.bf16.msra.mxu0 %v12323_v14  ;;  %v14474_v19 = vpack.c.bf16 %v6600_v21, %v6596_v49  ;;  %v6463_v1 = vadd.f32 %v6462_v7, %v6350_v24  ;;  %v14482_v14 = vpop.f32.mrf.mxu0  ;;  %v6541_v24 = vmax.f32 %v6461_v10, 0.0 }
 0x41a   :  { %v6464_v62 = vpop.f32.mrf.mxu1  ;;  %7657 = vmatprep.subr.bf16.mxu0 %v12331_v63  ;;  %v12335_v63 = vld [vmem:[#allocation8 + $0x908] ss:$16 sps:$4 sm:$0xff]  }
 0x41b   :  { %v6465_v42 = vadd.f32 %v6464_v62, %v6352_v18  ;;  %7505 = vmatprep.mubr.bf16.mxu0 %v14474_v19  ;;  %v6542_v48 = vmax.f32 %v6463_v1, 0.0  ;;  %v14487_v18 = vpop.f32.mrf.mxu0  ;;  %v7943_v62 = vld [vmem:[#allocation5 + $0x330] sm:$0xff] }
 0x41c   :  { %v6466_v56 = vpop.f32.mrf.mxu1  ;;  %7506 = vmatmul.mubr.bf16.gmra.mxu0 %v14476_v28 }
 0x41d   :  { %v6467_v41 = vadd.f32 %v6466_v56, %v6354_v0  ;;  %7658 = vmatpush2.bf16.msra.mxu0 %v12329_v33  ;;  %7661 = vmatprep.mubr.bf16.mxu0 %v14340_v61  ;;  %v6545_v49 = vmax.f32 %v6465_v42, 0.0  ;;  %v6360_v33 = vadd.f32 %v14352_v43, %v14464_v38  ;;  %v6362_v61 = vadd.f32 %v14366_v9, %v14457_v32  ;;  %v12338_v0 = vld [vmem:[#allocation8 + $0xae8] ss:$16 sps:$4 sm:$0xff]   ;;  %v12343_v42 = vld [vmem:[#allocation8 + $0xacc] ss:$16 sps:$4 sm:$0xff]  }
 0x41e   :  { %v6470_v21 = vpop.f32.mrf.mxu1  ;;  %7659 = vmatprep.subr.bf16.mxu0 %v12337_v37  ;;  %v6364_v56 = vadd.f32 %v14370_v52, %v14464_v38  ;;  %v11567_v43 = vcombine.high %v7943_v62, %v7945_v8  ;;  %v12341_v52 = vld [vmem:[#allocation8 + $0xac8] ss:$16 sps:$4 sm:$0xff]  }
 0x41f   :  { %v6546_v7 = vmax.f32 %v6467_v41, 0.0  ;;  %v14495_v1 = vpack.c.bf16 %v6545_v49, %v6541_v24  ;;  %v6471_v45 = vadd.f32 %v6470_v21, %v6358_v16  ;;  %v7939_v49 = vld [vmem:[#allocation5 + $0x2b0] sm:$0xff]  ;;  %v11566_v21 = vcombine.low %v7943_v62, %v7945_v8  ;;  %v12344_v62 = vld [vmem:[#allocation8 + $0xaa8] ss:$16 sps:$4 sm:$0xff]  }
 0x420   :  { %v6472_v3 = vpop.f32.mrf.mxu1 }
 0x421   :  { %7660 = vmatpush2.bf16.msra.mxu0 %v12335_v63  ;;  %v14493_v37 = vpack.c.bf16 %v6546_v7, %v6542_v48  ;;  %v6473_v41 = vadd.f32 %v6472_v3, %v6360_v33  ;;  %v14502_v63 = vpop.f32.mrf.mxu0  ;;  %v7941_v48 = vld [vmem:[#allocation5 + $0x2f0] sm:$0xff]  ;;  %v12346_v7 = vld [vmem:[#allocation8 + $0xaac] ss:$16 sps:$4 sm:$0xff]  }
 0x422   :  { %v6474_v10 = vpop.f32.mrf.mxu1  ;;  %8709 = vmatprep.subr.bf16.mxu0 %v11571_v27  ;;  %v11563_v3 = vcombine.high %v7939_v49, %v7941_v48  ;;  %v7937_v33 = vld [vmem:[#allocation5 + $0x270] sm:$0xff] }
 0x423   :  { %v6475_v60 = vadd.f32 %v6474_v10, %v6362_v61  ;;  %7548 = vmatprep.mubr.bf16.mxu1 %v14493_v37  ;;  %v6550_v24 = vmax.f32 %v6473_v41, 0.0  ;;  %v6549_v61 = vmax.f32 %v6471_v45, 0.0  ;;  %v6368_v10 = vadd.f32 %v14384_v46, %v14457_v32  ;;  %v12349_v45 = vld [vmem:[#allocation8 + $0xa8c] ss:$16 sps:$4 sm:$0xff]  }
 0x424   :  { %v6476_v9 = vpop.f32.mrf.mxu1  ;;  %7549 = vmatmul.mubr.bf16.vlgmr.msra.gmra.mxu1 %v14495_v1  ;;  %7662 = vmatmul.mubr.bf16.vlgmr.msra.gmra.mxu0 %v14342_v51  ;;  %v7935_v51 = vld [vmem:[#allocation5 + $0x230] sm:$0xff]  ;;  %v11562_v46 = vcombine.low %v7939_v49, %v7941_v48 }
 0x425   :  { %v6477_v59 = vadd.f32 %v6476_v9, %v6364_v56  ;;  %7671 = vmatprep.mubr.bf16.mxu0 %v14358_v25  ;;  %7743 = vmatpush1.bf16.msra.mxu1 %v12338_v0  ;;  %v6553_v36 = vmax.f32 %v6475_v60, 0.0  ;;  %v14507_v25 = vpop.f32.mrf.mxu0  ;;  %v6370_v60 = vadd.f32 %v14388_v12, %v14464_v38  ;;  %v6372_v0 = vadd.f32 %v14402_v57, %v14457_v32 }
 0x426   :  { %v6480_v27 = vpop.f32.mrf.mxu1  ;;  %7744 = vmatprep.subr.bf16.mxu1 %v12343_v42  ;;  %8710 = vmatpush1.bf16.msra.mxu0 %v11570_v34  ;;  %v11559_v41 = vcombine.high %v7935_v51, %v7937_v33 }
 0x427   :  { %v6554_v16 = vmax.f32 %v6477_v59, 0.0  ;;  %8711 = vmatprep.subr.bf16.mxu0 %v11567_v43  ;;  %v14515_v42 = vpack.c.bf16 %v6553_v36, %v6549_v61  ;;  %v6374_v43 = vadd.f32 %v14406_v35, %v14464_v38  ;;  %v6481_v57 = vadd.f32 %v6480_v27, %v6368_v10  ;;  %v7931_v36 = vld [vmem:[#allocation5 + $0x1b0] sm:$0xff]  ;;  %v12347_v35 = vld [vmem:[#allocation8 + $0xa88] ss:$16 sps:$4 sm:$0xff]  }
 0x428   :  { %v6482_v56 = vpop.f32.mrf.mxu1  ;;  %v11558_v27 = vcombine.low %v7935_v51, %v7937_v33  ;;  %v7929_v10 = vld [vmem:[#allocation5 + $0x170] sm:$0xff]  ;;  %v12350_v33 = vld [vmem:[#allocation8 + $0xa68] ss:$16 sps:$4 sm:$0xff]  }
 0x429   :  { %7745 = vmatpush1.bf16.msra.mxu1 %v12341_v52  ;;  %v14513_v8 = vpack.c.bf16 %v6554_v16, %v6550_v24  ;;  %v6483_v9 = vadd.f32 %v6482_v56, %v6370_v60  ;;  %v14522_v52 = vpop.f32.mrf.mxu0  ;;  %v12352_v24 = vld [vmem:[#allocation8 + $0xa6c] ss:$16 sps:$4 sm:$0xff]   ;;  %v6557_v56 = vmax.f32 %v6481_v57, 0.0  ;;  %v6378_v60 = vadd.f32 %v14420_v54, %v14457_v32 }
 0x42a   :  { %v6484_v34 = vpop.f32.mrf.mxu1  ;;  %7746 = vmatprep.subr.bf16.mxu1 %v12346_v7  ;;  %8712 = vmatpush1.bf16.msra.mxu0 %v11566_v21  ;;  %v7933_v7 = vld [vmem:[#allocation5 + $0x1f0] sm:$0xff] }
 0x42b   :  { %v6485_v12 = vadd.f32 %v6484_v34, %v6372_v0  ;;  %7558 = vmatprep.mubr.bf16.mxu1 %v14513_v8  ;;  %8713 = vmatprep.subr.bf16.mxu0 %v11563_v3  ;;  %v6558_v16 = vmax.f32 %v6483_v9, 0.0  ;;  %v11555_v61 = vcombine.high %v7931_v36, %v7933_v7  ;;  %v6382_v34 = vadd.f32 %v14438_v53, %v14457_v32 }
 0x42c   :  { %v6486_v59 = vpop.f32.mrf.mxu1  ;;  %7559 = vmatmul.mubr.bf16.gmra.mxu1 %v14515_v42  ;;  %7672 = vmatmul.mubr.bf16.gmra.mxu0 %v14360_v13  ;;  %v7927_v13 = vld [vmem:[#allocation5 + $0x130] sm:$0xff]  ;;  %v11554_v54 = vcombine.low %v7931_v36, %v7933_v7  ;;  %v6384_v9 = vadd.f32 %v14442_v40, %v14464_v38  ;;  %v12353_v40 = vld [vmem:[#allocation8 + $0xa48] ss:$16 sps:$4 sm:$0xff]  }
 0x42d   :  { %v6487_v49 = vadd.f32 %v6486_v59, %v6374_v43  ;;  %7681 = vmatprep.mubr.bf16.mxu0 %v14376_v4  ;;  %7747 = vmatpush1.bf16.msra.mxu1 %v12344_v62  ;;  %v6561_v48 = vmax.f32 %v6485_v12, 0.0  ;;  %v14527_v4 = vpop.f32.mrf.mxu0  ;;  %v6380_v62 = vadd.f32 %v14424_v44, %v14464_v38  ;;  %v11551_v43 = vcombine.high %v7927_v13, %v7929_v10 }
 0x42e   :  { %v6490_v21 = vpop.f32.mrf.mxu1  ;;  %7748 = vmatprep.subr.bf16.mxu1 %v12349_v45  ;;  %8714 = vmatpush1.bf16.msra.mxu0 %v11562_v46 }
 0x42f   :  { %v6562_v3 = vmax.f32 %v6487_v49, 0.0  ;;  %8715 = vmatprep.subr.bf16.mxu0 %v11559_v41  ;;  %v14535_v45 = vpack.c.bf16 %v6561_v48, %v6557_v56  ;;  %v12355_v41 = vld [vmem:[#allocation8 + $0xa4c] ss:$16 sps:$4 sm:$0xff]   ;;  %v6491_v53 = vadd.f32 %v6490_v21, %v6378_v60  ;;  %v14542_v59 = vpop.f32.mrf.mxu0  ;;  %v7923_v49 = vld [vmem:[#allocation5 + $0xb0] sm:$0xff]  ;;  %v11550_v21 = vcombine.low %v7927_v13, %v7929_v10  ;;  %v12356_v10 = vld [vmem:[#allocation8 + $0xa28] ss:$16 sps:$4 sm:$0xff]  }
 0x430   :  { %v6492_v0 = vpop.f32.mrf.mxu1  ;;  %v6388_v60 = vadd.f32 %v14460_v17, %v14457_v32 }
 0x431   :  { %7749 = vmatpush1.bf16.msra.mxu1 %v12347_v35  ;;  %v14533_v51 = vpack.c.bf16 %v6562_v3, %v6558_v16  ;;  %v6493_v12 = vadd.f32 %v6492_v0, %v6380_v62  ;;  %v7925_v35 = vld [vmem:[#allocation5 + $0xf0] sm:$0xff]  ;;  %v6565_v56 = vmax.f32 %v6491_v53, 0.0  ;;  %v6390_v62 = vadd.f32 %v14468_v30, %v14464_v38 }
 0x432   :  { %v6494_v46 = vpop.f32.mrf.mxu1  ;;  %7750 = vmatprep.subr.bf16.mxu1 %v12352_v24  ;;  %8716 = vmatpush1.bf16.msra.mxu0 %v11558_v27  ;;  %v12358_v24 = vld [vmem:[#allocation8 + $0xa2c] ss:$16 sps:$4 sm:$0xff]   ;;  %v11547_v3 = vcombine.high %v7923_v49, %v7925_v35  ;;  %v11546_v17 = vcombine.low %v7923_v49, %v7925_v35  ;;  %v7979_v53 = vld [vmem:[#allocation5 + $0x7b0] sm:$0xff] }
 0x433   :  { %v6495_v44 = vadd.f32 %v6494_v46, %v6382_v34  ;;  %7568 = vmatprep.mubr.bf16.mxu1 %v14533_v51  ;;  %8717 = vmatprep.subr.bf16.mxu0 %v11555_v61  ;;  %v6566_v27 = vmax.f32 %v6493_v12, 0.0  ;;  %v7921_v61 = vld [vmem:[#allocation5 + $0x70] sm:$0xff]  ;;  %v6392_v34 = vadd.f32 %v14482_v14, %v14457_v32 }
 0x434   :  { %v6496_v57 = vpop.f32.mrf.mxu1  ;;  %7569 = vmatmul.mubr.bf16.gmra.mxu1 %v14535_v45  ;;  %7682 = vmatmul.mubr.bf16.gmra.mxu0 %v14378_v29  ;;  %v7919_v29 = vld [vmem:[#allocation5 + $0x30] sm:$0xff] }
 0x435   :  { %v6497_v36 = vadd.f32 %v6496_v57, %v6384_v9  ;;  %7691 = vmatprep.mubr.bf16.mxu0 %v14394_v2  ;;  %7751 = vmatpush1.bf16.msra.mxu1 %v12350_v33  ;;  %v6569_v7 = vmax.f32 %v6495_v44, 0.0  ;;  %v14547_v2 = vpop.f32.mrf.mxu0  ;;  %v7981_v57 = vld [vmem:[#allocation5 + $0x7f0] sm:$0xff] }
 0x436   :  { %v6500_v48 = vpop.f32.mrf.mxu1  ;;  %7752 = vmatprep.subr.bf16.mxu1 %v12355_v41  ;;  %8718 = vmatpush1.bf16.msra.mxu0 %v11554_v54  ;;  %v12361_v41 = vld [vmem:[#allocation8 + $0xa0c] ss:$16 sps:$4 sm:$0xff]   ;;  %v11543_v54 = vcombine.high %v7919_v29, %v7921_v61 }
 0x437   :  { %v6570_v16 = vmax.f32 %v6497_v36, 0.0  ;;  %8719 = vmatprep.subr.bf16.mxu0 %v11551_v43  ;;  %v14555_v33 = vpack.c.bf16 %v6569_v7, %v6565_v56  ;;  %v6394_v43 = vadd.f32 %v14487_v18, %v14464_v38  ;;  %v6501_v14 = vadd.f32 %v6500_v48, %v6388_v60  ;;  %v14562_v44 = vpop.f32.mrf.mxu0  ;;  %v12359_v18 = vld [vmem:[#allocation8 + $0xa08] ss:$16 sps:$4 sm:$0xff]  }
 0x438   :  { %v6502_v0 = vpop.f32.mrf.mxu1  ;;  %v11542_v7 = vcombine.low %v7919_v29, %v7921_v61  ;;  %v6400_v60 = vadd.f32 %v14507_v25, %v14464_v38  ;;  %v12362_v61 = vld [vmem:[#allocation8 + $0xbe8] ss:$16 sps:$4 sm:$0xff]  }
 0x439   :  { %7753 = vmatpush1.bf16.msra.mxu1 %v12353_v40  ;;  %v14553_v13 = vpack.c.bf16 %v6570_v16, %v6566_v27  ;;  %v6503_v9 = vadd.f32 %v6502_v0, %v6390_v62  ;;  %v12364_v40 = vld [vmem:[#allocation8 + $0xbec] ss:$16 sps:$4 sm:$0xff]   ;;  %v7977_v27 = vld [vmem:[#allocation5 + $0x770] sm:$0xff]  ;;  %v6573_v16 = vmax.f32 %v6501_v14, 0.0  ;;  %v6402_v0 = vadd.f32 %v14522_v52, %v14457_v32 }
 0x43a   :  { %v6504_v46 = vpop.f32.mrf.mxu1  ;;  %7754 = vmatprep.subr.bf16.mxu1 %v12358_v24  ;;  %8720 = vmatpush1.bf16.msra.mxu0 %v11550_v21  ;;  %v11603_v21 = vcombine.high %v7979_v53, %v7981_v57 }
 0x43b   :  { %v6505_v30 = vadd.f32 %v6504_v46, %v6392_v34  ;;  %7578 = vmatprep.mubr.bf16.mxu1 %v14553_v13  ;;  %8721 = vmatprep.subr.bf16.mxu0 %v11547_v3  ;;  %v6574_v48 = vmax.f32 %v6503_v9, 0.0  ;;  %v6398_v3 = vadd.f32 %v14502_v63, %v14457_v32  ;;  %v11602_v46 = vcombine.low %v7979_v53, %v7981_v57  ;;  %v7971_v9 = vld [vmem:[#allocation5 + $0x6b0] sm:$0xff]  ;;  %v12370_v57 = vld [vmem:[#allocation8 + $0xbac] ss:$16 sps:$4 sm:$0xff]  }
 0x43c   :  { %v6506_v12 = vpop.f32.mrf.mxu1  ;;  %7579 = vmatmul.mubr.bf16.gmra.mxu1 %v14555_v33  ;;  %7692 = vmatmul.mubr.bf16.gmra.mxu0 %v14396_v39  ;;  %v7975_v39 = vld [vmem:[#allocation5 + $0x730] sm:$0xff] }
 0x43d   :  { %v6507_v49 = vadd.f32 %v6506_v12, %v6394_v43  ;;  %7701 = vmatprep.mubr.bf16.mxu0 %v14412_v31  ;;  %7755 = vmatpush1.bf16.msra.mxu1 %v12356_v10  ;;  %v6577_v35 = vmax.f32 %v6505_v30, 0.0  ;;  %v6413_v31 = vpop.f32.mrf.mxu0  ;;  %v12367_v10 = vld [vmem:[#allocation8 + $0xbcc] ss:$16 sps:$4 sm:$0xff]   ;;  %v11599_v63 = vcombine.high %v7975_v39, %v7977_v27  ;;  %v7973_v30 = vld [vmem:[#allocation5 + $0x6f0] sm:$0xff] }
 0x43e   :  { %v6510_v36 = vpop.f32.mrf.mxu1  ;;  %7756 = vmatprep.subr.bf16.mxu1 %v12361_v41  ;;  %8722 = vmatpush1.bf16.msra.mxu0 %v11546_v17  ;;  %v6404_v41 = vadd.f32 %v14527_v4, %v14464_v38  ;;  %v12365_v4 = vld [vmem:[#allocation8 + $0xbc8] ss:$16 sps:$4 sm:$0xff]  }
 0x43f   :  { %v6578_v24 = vmax.f32 %v6507_v49, 0.0  ;;  %8723 = vmatprep.subr.bf16.mxu0 %v11543_v54  ;;  %v14573_v62 = vpack.c.bf16 %v6577_v35, %v6573_v16  ;;  %v6511_v52 = vadd.f32 %v6510_v36, %v6398_v3  ;;  %v14580_v43 = vpop.f32.mrf.mxu0  ;;  %v11598_v49 = vcombine.low %v7975_v39, %v7977_v27  ;;  %v12368_v27 = vld [vmem:[#allocation8 + $0xba8] ss:$16 sps:$4 sm:$0xff]  }
 0x440   :  { %v6512_v56 = vpop.f32.mrf.mxu1  ;;  %v11595_v36 = vcombine.high %v7971_v9, %v7973_v30  ;;  %v6412_v16 = vadd.f32 %v14562_v44, %v14457_v32 }
 0x441   :  { %7757 = vmatpush1.bf16.msra.mxu1 %v12359_v18  ;;  %v14571_v29 = vpack.c.bf16 %v6578_v24, %v6574_v48  ;;  %v6513_v17 = vadd.f32 %v6512_v56, %v6400_v60  ;;  %v6408_v48 = vadd.f32 %v14542_v59, %v14457_v32  ;;  %v12373_v60 = vld [vmem:[#allocation8 + $0xb8c] ss:$16 sps:$4 sm:$0xff]  }
 0x442   :  { %v6514_v34 = vpop.f32.mrf.mxu1  ;;  %7758 = vmatprep.subr.bf16.mxu1 %v12364_v40  ;;  %8724 = vmatpush1.bf16.msra.mxu0 %v11542_v7  ;;  %v7969_v40 = vld [vmem:[#allocation5 + $0x670] sm:$0xff]  ;;  %v6581_v7 = vmax.f32 %v6511_v52, 0.0 }
 0x443   :  { %v6515_v25 = vadd.f32 %v6514_v34, %v6402_v0  ;;  %7588 = vmatprep.mubr.bf16.mxu1 %v14571_v29  ;;  %8725 = vmatprep.subr.bf16.mxu0 %v11603_v21  ;;  %v6582_v18 = vmax.f32 %v6513_v17, 0.0  ;;  %v6410_v21 = vadd.f32 %v14547_v2, %v14464_v38  ;;  %v11594_v0 = vcombine.low %v7971_v9, %v7973_v30 }
 0x444   :  { %v6516_v54 = vpop.f32.mrf.mxu1  ;;  %7589 = vmatmul.mubr.bf16.gmra.mxu1 %v14573_v62  ;;  %7702 = vmatmul.mubr.bf16.gmra.mxu0 %v14414_v58  ;;  %v7967_v58 = vld [vmem:[#allocation5 + $0x630] sm:$0xff] }
 0x445   :  { %v6517_v14 = vadd.f32 %v6516_v54, %v6404_v41  ;;  %7711 = vmatprep.mubr.bf16.mxu0 %v14430_v15  ;;  %7759 = vmatpush2.bf16.msra.mxu1 %v12362_v61  ;;  %v6585_v12 = vmax.f32 %v6515_v25, 0.0  ;;  %v6419_v15 = vpop.f32.mrf.mxu0  ;;  %v11591_v59 = vcombine.high %v7967_v58, %v7969_v40  ;;  %v6414_v61 = vadd.f32 %v6413_v31, %v14464_v38  ;;  %v7965_v41 = vld [vmem:[#allocation5 + $0x5f0] sm:$0xff]  ;;  %v12371_v25 = vld [vmem:[#allocation8 + $0xb88] ss:$16 sps:$4 sm:$0xff]   ;;  %v12376_v54 = vld [vmem:[#allocation8 + $0xb6c] ss:$16 sps:$4 sm:$0xff]  }
 0x446   :  { %v6520_v53 = vpop.f32.mrf.mxu1  ;;  %7760 = vmatprep.subr.bf16.mxu1 %v12367_v10  ;;  %8726 = vmatpush2.bf16.msra.mxu0 %v11602_v46  ;;  %v11590_v9 = vcombine.low %v7967_v58, %v7969_v40  ;;  %v12374_v58 = vld [vmem:[#allocation8 + $0xb68] ss:$16 sps:$4 sm:$0xff]  }
 0x447   :  { %v6586_v35 = vmax.f32 %v6517_v14, 0.0  ;;  %8727 = vmatprep.subr.bf16.mxu0 %v11599_v63  ;;  %v14591_v3 = vpack.c.bf16 %v6585_v12, %v6581_v7  ;;  %v6521_v2 = vadd.f32 %v6520_v53, %v6408_v48  ;;  %v6421_v44 = vpop.f32.mrf.mxu0  ;;  %v7963_v63 = vld [vmem:[#allocation5 + $0x5b0] sm:$0xff]  ;;  %v12379_v48 = vld [vmem:[#allocation8 + $0xb4c] ss:$16 sps:$4 sm:$0xff]  }
 0x448   :  { %v6522_v24 = vpop.f32.mrf.mxu1  ;;  %v7959_v12 = vld [vmem:[#allocation5 + $0x530] sm:$0xff] }
 0x449   :  { %7761 = vmatpush2.bf16.msra.mxu1 %v12365_v4  ;;  %v14589_v39 = vpack.c.bf16 %v6586_v35, %v6582_v18  ;;  %v6523_v34 = vadd.f32 %v6522_v24, %v6410_v21  ;;  %v11587_v4 = vcombine.high %v7963_v63, %v7965_v41  ;;  %v7961_v53 = vld [vmem:[#allocation5 + $0x570] sm:$0xff]  ;;  %v6420_v18 = vadd.f32 %v6419_v15, %v14464_v38 }
 0x44a   :  { %v6524_v56 = vpop.f32.mrf.mxu1  ;;  %7762 = vmatprep.subr.bf16.mxu1 %v12370_v57  ;;  %8728 = vmatpush2.bf16.msra.mxu0 %v11598_v49  ;;  %v6418_v57 = vadd.f32 %v14580_v43, %v14457_v32  ;;  %v6423_v49 = vpop.f32.mrf.mxu0  ;;  %v6422_v35 = vadd.f32 %v6421_v44, %v14457_v32  ;;  %v11586_v24 = vcombine.low %v7963_v63, %v7965_v41  ;;  %v7951_v63 = vld [vmem:[#allocation5 + $0x430] sm:$0xff] }
 0x44b   :  { %v6525_v10 = vadd.f32 %v6524_v56, %v6412_v16  ;;  %7598 = vmatprep.mubr.bf16.mxu1 %v14589_v39  ;;  %8729 = vmatprep.subr.bf16.mxu0 %v11595_v36  ;;  %v6590_v30 = vmax.f32 %v6523_v34, 0.0  ;;  %v11583_v21 = vcombine.high %v7959_v12, %v7961_v53  ;;  %v6424_v43 = vadd.f32 %v6423_v49, %v14464_v38  ;;  %v7955_v56 = vld [vmem:[#allocation5 + $0x4b0] sm:$0xff]  ;;  %v12382_v38 = vld [vmem:[#allocation8 + $0xb2c] ss:$16 sps:$4 sm:$0xff]  }
 0x44c   :  { %v6526_v46 = vpop.f32.mrf.mxu1  ;;  %7599 = vmatmul.mubr.bf16.gmra.mxu1 %v14591_v3  ;;  %7712 = vmatmul.mubr.bf16.gmra.mxu0 %v14432_v47  ;;  %v6589_v47 = vmax.f32 %v6521_v2, 0.0  ;;  %v11582_v34 = vcombine.low %v7959_v12, %v7961_v53  ;;  %v7953_v41 = vld [vmem:[#allocation5 + $0x470] sm:$0xff] }
 0x44d   :  { %v6527_v17 = vadd.f32 %v6526_v46, %v6414_v61  ;;  %7721 = vmatprep.mubr.bf16.mxu0 %v14448_v11  ;;  %7763 = vmatpush2.bf16.msra.mxu1 %v12368_v27  ;;  %v6593_v31 = vmax.f32 %v6525_v10, 0.0  ;;  %v11574_v53 = vcombine.low %v7951_v63, %v7953_v41  ;;  %v16221_v49 = vld [vmem:[#allocation16_spill] sm:$0xff] }
 0x44e   :  { %v6530_v52 = vpop.f32.mrf.mxu1  ;;  %7764 = vmatprep.subr.bf16.mxu1 %v12373_v60  ;;  %8730 = vmatpush2.bf16.msra.mxu0 %v11594_v0  ;;  %v7957_v60 = vld [vmem:[#allocation5 + $0x4f0] sm:$0xff] }
 0x44f   :  { %v6594_v14 = vmax.f32 %v6527_v17, 0.0  ;;  %8731 = vmatprep.subr.bf16.mxu0 %v11591_v59  ;;  %v14604_v40 = vpack.c.bf16 %v6593_v31, %v6589_v47  ;;  %v6531_v32 = vadd.f32 %v6530_v52, %v6418_v57  ;;  %v12377_v59 = vld [vmem:[#allocation8 + $0xb48] ss:$16 sps:$4 sm:$0xff]   ;;  %v11579_v44 = vcombine.high %v7955_v56, %v7957_v60  ;;  %v8011_v52 = vld [vmem:[#allocation5 + $0xbb0] sm:$0xff] }
 0x450   :  { %v6532_v11 = vpop.f32.mrf.mxu1  ;;  %v12380_v17 = vld [vmem:[#allocation8 + $0xb28] ss:$16 sps:$4 sm:$0xff]   ;;  %v11578_v31 = vcombine.low %v7955_v56, %v7957_v60  ;;  %v8007_v47 = vld [vmem:[#allocation5 + $0xb30] sm:$0xff] }
 0x451   :  { %7765 = vmatpush2.bf16.msra.mxu1 %v12371_v25  ;;  %v14602_v36 = vpack.c.bf16 %v6594_v14, %v6590_v30  ;;  %v6533_v16 = vadd.f32 %v6532_v11, %v6420_v18  ;;  %v6597_v46 = vmax.f32 %v6531_v32, 0.0  ;;  %v7948_v30 = vld [vmem:[#allocation5 + $0x3b8] sm:$0xff]  ;;  %v8009_v57 = vld [vmem:[#allocation5 + $0xb70] sm:$0xff]  ;;  %v16222_v32 = vld [vmem:[#allocation18_spill] sm:$0xff] }
 0x452   :  { %v6534_v7 = vpop.f32.mrf.mxu1  ;;  %7766 = vmatprep.subr.bf16.mxu1 %v12376_v54  ;;  %8732 = vmatpush2.bf16.msra.mxu0 %v11590_v9  ;;  %v8013_v54 = vld [vmem:[#allocation5 + $0xbf0] sm:$0xff]  ;;  %v11575_v9 = vcombine.high %v7951_v63, %v7953_v41  ;;  %v7950_v14 = vld [vmem:[#allocation5 + $0x3f8] sm:$0xff] }
 0x453   :  { %v6535_v27 = vadd.f32 %v6534_v7, %v6422_v35  ;;  %7608 = vmatprep.mubr.bf16.mxu1 %v14602_v36  ;;  %8733 = vmatprep.subr.bf16.mxu0 %v11587_v4  ;;  %v6598_v10 = vmax.f32 %v6533_v16, 0.0  ;;  %v12383_v4 = vld [vmem:[#allocation8 + $0xb08] ss:$16 sps:$4 sm:$0xff]   ;;  %v11635_v12 = vcombine.high %v8011_v52, %v8013_v54  ;;  %v11573_v11 = vcombine.high %v7948_v30, %v7950_v14  ;;  %v8003_v7 = vld [vmem:[#allocation5 + $0xab0] sm:$0xff] }
 0x454   :  { %v6536_v15 = vpop.f32.mrf.mxu1  ;;  %7609 = vmatmul.mubr.bf16.gmra.mxu1 %v14604_v40  ;;  %7722 = vmatmul.mubr.bf16.gmra.mxu0 %v14450_v22  ;;  %v11634_v18 = vcombine.low %v8011_v52, %v8013_v54  ;;  %v7944_v35 = vld [vmem:[#allocation5 + $0x338] sm:$0xff]  ;;  %v8001_v56 = vld [vmem:[#allocation5 + $0xa70] sm:$0xff] }
 0x455   :  { %v6537_v0 = vadd.f32 %v6536_v15, %v6424_v43  ;;  %7731 = vmatprep.mubr.bf16.mxu0 %v14474_v19  ;;  %7767 = vmatpush2.bf16.msra.mxu1 %v12374_v58  ;;  %v6601_v61 = vmax.f32 %v6535_v27, 0.0  ;;  %v12385_v19 = vld [vmem:[#allocation8 + $0xb0c] ss:$16 sps:$4 sm:$0xff]   ;;  %v11631_v58 = vcombine.high %v8007_v47, %v8009_v57  ;;  %v7999_v15 = vld [vmem:[#allocation5 + $0xa30] sm:$0xff] }
 0x456   :  { %7768 = vmatprep.subr.bf16.mxu1 %v12379_v48  ;;  %8734 = vmatpush2.bf16.msra.mxu0 %v11586_v24  ;;  %v11572_v48 = vcombine.low %v7948_v30, %v7950_v14  ;;  %v7940_v43 = vld [vmem:[#allocation5 + $0x2b8] sm:$0xff]  ;;  %v7993_v52 = vld [vmem:[#allocation5 + $0x970] sm:$0xff] }
 0x457   :  { %v6602_v2 = vmax.f32 %v6537_v0, 0.0  ;;  %8735 = vmatprep.subr.bf16.mxu0 %v11583_v21  ;;  %v14613_v25 = vpack.c.bf16 %v6601_v61, %v6597_v46  ;;  %v11630_v21 = vcombine.low %v8007_v47, %v8009_v57  ;;  %v7942_v16 = vld [vmem:[#allocation5 + $0x2f8] sm:$0xff]  ;;  %v11622_v46 = vcombine.low %v7999_v15, %v8001_v56 }
 0x458   :  { %v16223_v0 = vld [vmem:[#allocation20_spill] sm:$0xff] }
 0x459   :  { %7769 = vmatpush2.bf16.msra.mxu1 %v12377_v59  ;;  %v14611_v22 = vpack.c.bf16 %v6602_v2, %v6598_v10  ;;  %v11565_v59 = vcombine.high %v7940_v43, %v7942_v16  ;;  %v7936_v61 = vld [vmem:[#allocation5 + $0x238] sm:$0xff]  ;;  %v7997_v10 = vld [vmem:[#allocation5 + $0x9f0] sm:$0xff]  ;;  %v11564_v2 = vcombine.low %v7940_v43, %v7942_v16 }
 0x45a   :  { %7770 = vmatprep.subr.bf16.mxu1 %v12382_v38  ;;  %8736 = vmatpush2.bf16.msra.mxu0 %v11582_v34  ;;  %v11623_v38 = vcombine.high %v7999_v15, %v8001_v56  ;;  %v7995_v34 = vld [vmem:[#allocation5 + $0x9b0] sm:$0xff]  ;;  %v7932_v63 = vld [vmem:[#allocation5 + $0x1b8] sm:$0xff] }
 0x45b   :  { %7618 = vmatprep.mubr.bf16.mxu1 %v14611_v22  ;;  %8737 = vmatprep.subr.bf16.mxu0 %v11579_v44  ;;  %v7934_v41 = vld [vmem:[#allocation5 + $0x1f8] sm:$0xff]  ;;  %v11618_v30 = vcombine.low %v7995_v34, %v7997_v10  ;;  %v8045_v15 = vld [vmem:[#allocation5 + $0xff0] sm:$0xff] }
 0x45c   :  { %7619 = vmatmul.mubr.bf16.gmra.mxu1 %v14613_v25  ;;  %7732 = vmatmul.mubr.bf16.gmra.mxu0 %v14476_v28  ;;  %v7946_v28 = vld [vmem:[#allocation5 + $0x378] sm:$0xff]  ;;  %v11556_v47 = vcombine.low %v7932_v63, %v7934_v41 }
 0x45d   :  { %7771 = vmatpush2.bf16.msra.mxu1 %v12380_v17  ;;  %7774 = vmatprep.mubr.bf16.mxu1 %v14493_v37  ;;  %v8005_v37 = vld [vmem:[#allocation5 + $0xaf0] sm:$0xff]  ;;  %v11569_v24 = vcombine.high %v7944_v35, %v7946_v28  ;;  %v11568_v60 = vcombine.low %v7944_v35, %v7946_v28  ;;  %v11619_v17 = vcombine.high %v7995_v34, %v7997_v10  ;;  %v7928_v14 = vld [vmem:[#allocation5 + $0x138] sm:$0xff] }
 0x45e   :  { %7772 = vmatprep.subr.bf16.mxu1 %v12385_v19  ;;  %8738 = vmatpush2.bf16.msra.mxu0 %v11578_v31  ;;  %v11627_v27 = vcombine.high %v8003_v7, %v8005_v37  ;;  %v16224_v19 = vld [vmem:[#allocation22_spill] sm:$0xff]  ;;  %v7991_v31 = vld [vmem:[#allocation5 + $0x930] sm:$0xff]  ;;  %v7926_v35 = vld [vmem:[#allocation5 + $0xf8] sm:$0xff] }
 0x45f   :  { %8739 = vmatprep.subr.bf16.mxu0 %v11575_v9  ;;  %8741 = vmatprep.mubr.bf16.mxu0 %v16221_v49  ;;  %v16225_v9 = vld [vmem:[#allocation24_spill] sm:$0xff] }
 0x460   :  { %v7920_v43 = vld [vmem:[#allocation5 + $0x38] sm:$0xff]  ;;  %v8039_v34 = vld [vmem:[#allocation5 + $0xf30] sm:$0xff] }
 0x461   :  { %7773 = vmatpush2.bf16.msra.mxu1 %v12383_v4  ;;  %v11615_v4 = vcombine.high %v7991_v31, %v7993_v52  ;;  %v8041_v10 = vld [vmem:[#allocation5 + $0xf70] sm:$0xff] }
 0x462   :  { %8822 = vmatprep.subr.bf16.mxu1 %v11635_v12  ;;  %8740 = vmatpush2.bf16.msra.mxu0 %v11574_v53  ;;  %v7987_v12 = vld [vmem:[#allocation5 + $0x8b0] sm:$0xff] }
 0x463   :  { %8935 = vmatprep.subr.bf16.mxu0 %v11573_v11  ;;  %v7989_v53 = vld [vmem:[#allocation5 + $0x8f0] sm:$0xff]  ;;  %v11614_v11 = vcombine.low %v7991_v31, %v7993_v52 }
 0x464   :  { %7775 = vmatmul.mubr.bf16.vlgmr.msra.gmra.mxu1 %v14495_v1  ;;  %v11626_v1 = vcombine.low %v8003_v7, %v8005_v37  ;;  %v11611_v28 = vcombine.high %v7987_v12, %v7989_v53  ;;  %v7983_v7 = vld [vmem:[#allocation5 + $0x830] sm:$0xff] }
 0x465   :  { %7784 = vmatprep.mubr.bf16.mxu1 %v14513_v8  ;;  %8823 = vmatpush1.bf16.msra.mxu1 %v11634_v18  ;;  %v7938_v8 = vld [vmem:[#allocation5 + $0x278] sm:$0xff]  ;;  %v7985_v37 = vld [vmem:[#allocation5 + $0x870] sm:$0xff] }
 0x466   :  { %8824 = vmatprep.subr.bf16.mxu1 %v11631_v58  ;;  %8742 = vmatmul.mubr.bf16.vlgmr.msra.gmra.mxu0 %v16222_v32  ;;  %v11561_v44 = vcombine.high %v7936_v61, %v7938_v8  ;;  %v11560_v54 = vcombine.low %v7936_v61, %v7938_v8  ;;  %v7924_v18 = vld [vmem:[#allocation5 + $0xb8] sm:$0xff]  ;;  %v16226_v58 = vld [vmem:[#allocation26_spill] sm:$0xff]  ;;  %v11607_v16 = vcombine.high %v7983_v7, %v7985_v37  ;;  %v8037_v31 = vld [vmem:[#allocation5 + $0xef0] sm:$0xff] }
 0x467   :  { %8936 = vmatpush1.bf16.msra.mxu0 %v11572_v48  ;;  %8751 = vmatprep.mubr.bf16.mxu0 %v16223_v0  ;;  %v11548_v56 = vcombine.low %v7924_v18, %v7926_v35  ;;  %v7982_v61 = vld [vmem:[#allocation5 + $0x7f8] sm:$0xff] }
 0x468   :  { %8937 = vmatprep.subr.bf16.mxu0 %v11569_v24  ;;  %v16227_v24 = vld [vmem:[#allocation28_spill] sm:$0xff] }
 0x469   :  { %8825 = vmatpush1.bf16.msra.mxu1 %v11630_v21  ;;  %v11610_v21 = vcombine.low %v7987_v12, %v7989_v53  ;;  %v8031_v12 = vld [vmem:[#allocation5 + $0xe30] sm:$0xff] }
 0x46a   :  { %8826 = vmatprep.subr.bf16.mxu1 %v11627_v27  ;;  %v8043_v27 = vld [vmem:[#allocation5 + $0xfb0] sm:$0xff] }
 0x46b   :  { %8938 = vmatpush1.bf16.msra.mxu0 %v11568_v60  ;;  %v11667_v8 = vcombine.high %v8043_v27, %v8045_v15  ;;  %v8033_v53 = vld [vmem:[#allocation5 + $0xe70] sm:$0xff] }
 0x46c   :  { %7785 = vmatmul.mubr.bf16.gmra.mxu1 %v14515_v42  ;;  %8939 = vmatprep.subr.bf16.mxu0 %v11565_v59  ;;  %v11557_v42 = vcombine.high %v7932_v63, %v7934_v41  ;;  %v11606_v59 = vcombine.low %v7983_v7, %v7985_v37  ;;  %v7976_v63 = vld [vmem:[#allocation5 + $0x738] sm:$0xff]  ;;  %v11663_v41 = vcombine.high %v8039_v34, %v8041_v10  ;;  %v8029_v7 = vld [vmem:[#allocation5 + $0xdf0] sm:$0xff] }
 0x46d   :  { %7794 = vmatprep.mubr.bf16.mxu1 %v14533_v51  ;;  %8827 = vmatpush1.bf16.msra.mxu1 %v11626_v1  ;;  %v7930_v51 = vld [vmem:[#allocation5 + $0x178] sm:$0xff] }
 0x46e   :  { %8828 = vmatprep.subr.bf16.mxu1 %v11623_v38  ;;  %8752 = vmatmul.mubr.bf16.gmra.mxu0 %v16224_v19  ;;  %v11553_v57 = vcombine.high %v7928_v14, %v7930_v51  ;;  %v11552_v48 = vcombine.low %v7928_v14, %v7930_v51  ;;  %v7980_v1 = vld [vmem:[#allocation5 + $0x7b8] sm:$0xff]  ;;  %v16228_v38 = vld [vmem:[#allocation30_spill] sm:$0xff] }
 0x46f   :  { %8940 = vmatpush1.bf16.msra.mxu0 %v11564_v2  ;;  %8761 = vmatprep.mubr.bf16.mxu0 %v16225_v9  ;;  %v11604_v52 = vcombine.low %v7980_v1, %v7982_v61  ;;  %v7974_v14 = vld [vmem:[#allocation5 + $0x6f8] sm:$0xff] }
 0x470   :  { %8941 = vmatprep.subr.bf16.mxu0 %v11561_v44  ;;  %v16229_v44 = vld [vmem:[#allocation32_spill] sm:$0xff] }
 0x471   :  { %8829 = vmatpush1.bf16.msra.mxu1 %v11622_v46  ;;  %v11666_v46 = vcombine.low %v8043_v27, %v8045_v15  ;;  %v8023_v27 = vld [vmem:[#allocation5 + $0xd30] sm:$0xff] }
 0x472   :  { %8830 = vmatprep.subr.bf16.mxu1 %v11619_v17  ;;  %v8035_v17 = vld [vmem:[#allocation5 + $0xeb0] sm:$0xff] }
 0x473   :  { %8942 = vmatpush1.bf16.msra.mxu0 %v11560_v54  ;;  %v11659_v51 = vcombine.high %v8035_v17, %v8037_v31  ;;  %v8025_v15 = vld [vmem:[#allocation5 + $0xd70] sm:$0xff] }
 0x474   :  { %7795 = vmatmul.mubr.bf16.gmra.mxu1 %v14535_v45  ;;  %8943 = vmatprep.subr.bf16.mxu0 %v11557_v42  ;;  %v11549_v45 = vcombine.high %v7924_v18, %v7926_v35  ;;  %v11662_v42 = vcombine.low %v8039_v34, %v8041_v10  ;;  %v7968_v18 = vld [vmem:[#allocation5 + $0x638] sm:$0xff]  ;;  %v11655_v35 = vcombine.high %v8031_v12, %v8033_v53  ;;  %v8021_v34 = vld [vmem:[#allocation5 + $0xcf0] sm:$0xff] }
 0x475   :  { %7804 = vmatprep.mubr.bf16.mxu1 %v14553_v13  ;;  %8831 = vmatpush1.bf16.msra.mxu1 %v11618_v30  ;;  %v7922_v13 = vld [vmem:[#allocation5 + $0x78] sm:$0xff] }
 0x476   :  { %8832 = vmatprep.subr.bf16.mxu1 %v11615_v4  ;;  %8762 = vmatmul.mubr.bf16.gmra.mxu0 %v16226_v58  ;;  %v11545_v60 = vcombine.high %v7920_v43, %v7922_v13  ;;  %v11544_v2 = vcombine.low %v7920_v43, %v7922_v13  ;;  %v7972_v30 = vld [vmem:[#allocation5 + $0x6b8] sm:$0xff]  ;;  %v16230_v4 = vld [vmem:[#allocation34_spill] sm:$0xff] }
 0x477   :  { %8944 = vmatpush1.bf16.msra.mxu0 %v11556_v47  ;;  %8771 = vmatprep.mubr.bf16.mxu0 %v16227_v24  ;;  %v11596_v37 = vcombine.low %v7972_v30, %v7974_v14  ;;  %v7966_v43 = vld [vmem:[#allocation5 + $0x5f8] sm:$0xff] }
 0x478   :  { %8945 = vmatprep.subr.bf16.mxu0 %v11553_v57  ;;  %v16231_v57 = vld [vmem:[#allocation36_spill] sm:$0xff] }
 0x479   :  { %8833 = vmatpush1.bf16.msra.mxu1 %v11614_v11  ;;  %v11658_v11 = vcombine.low %v8035_v17, %v8037_v31  ;;  %v8015_v17 = vld [vmem:[#allocation5 + $0xc30] sm:$0xff] }
 0x47a   :  { %8834 = vmatprep.subr.bf16.mxu1 %v11611_v28  ;;  %v8027_v28 = vld [vmem:[#allocation5 + $0xdb0] sm:$0xff] }
 0x47b   :  { %8946 = vmatpush1.bf16.msra.mxu0 %v11552_v48  ;;  %v11651_v13 = vcombine.high %v8027_v28, %v8029_v7  ;;  %v8017_v31 = vld [vmem:[#allocation5 + $0xc70] sm:$0xff] }
 0x47c   :  { %7805 = vmatmul.mubr.bf16.gmra.mxu1 %v14555_v33  ;;  %8947 = vmatprep.subr.bf16.mxu0 %v11549_v45  ;;  %v11605_v33 = vcombine.high %v7980_v1, %v7982_v61  ;;  %v11654_v45 = vcombine.low %v8031_v12, %v8033_v53  ;;  %v7960_v1 = vld [vmem:[#allocation5 + $0x538] sm:$0xff]  ;;  %v11647_v61 = vcombine.high %v8023_v27, %v8025_v15 }
 0x47d   :  { %7814 = vmatprep.mubr.bf16.mxu1 %v14571_v29  ;;  %8835 = vmatpush1.bf16.msra.mxu1 %v11610_v21  ;;  %v7978_v29 = vld [vmem:[#allocation5 + $0x778] sm:$0xff] }
 0x47e   :  { %8836 = vmatprep.subr.bf16.mxu1 %v11607_v16  ;;  %8772 = vmatmul.mubr.bf16.gmra.mxu0 %v16228_v38  ;;  %v11601_v54 = vcombine.high %v7976_v63, %v7978_v29  ;;  %v11600_v47 = vcombine.low %v7976_v63, %v7978_v29  ;;  %v7964_v21 = vld [vmem:[#allocation5 + $0x5b8] sm:$0xff]  ;;  %v16232_v16 = vld [vmem:[#allocation38_spill] sm:$0xff] }
 0x47f   :  { %8948 = vmatpush1.bf16.msra.mxu0 %v11548_v56  ;;  %8781 = vmatprep.mubr.bf16.mxu0 %v16229_v44  ;;  %v11588_v10 = vcombine.low %v7964_v21, %v7966_v43  ;;  %v7958_v63 = vld [vmem:[#allocation5 + $0x4f8] sm:$0xff] }
 0x480   :  { %8949 = vmatprep.subr.bf16.mxu0 %v11545_v60  ;;  %v16233_v60 = vld [vmem:[#allocation40_spill] sm:$0xff] }
 0x481   :  { %8837 = vmatpush1.bf16.msra.mxu1 %v11606_v59  ;;  %v11650_v59 = vcombine.low %v8027_v28, %v8029_v7  ;;  %v8004_v28 = vld [vmem:[#allocation5 + $0xab8] sm:$0xff] }
 0x482   :  { %8838 = vmatprep.subr.bf16.mxu1 %v11667_v8  ;;  %v8019_v8 = vld [vmem:[#allocation5 + $0xcb0] sm:$0xff]  ;;  %v8006_v7 = vld [vmem:[#allocation5 + $0xaf8] sm:$0xff] }
 0x483   :  { %8950 = vmatpush1.bf16.msra.mxu0 %v11544_v2  ;;  %v11643_v29 = vcombine.high %v8019_v8, %v8021_v34 }
 0x484   :  { %7815 = vmatmul.mubr.bf16.gmra.mxu1 %v14573_v62  ;;  %8951 = vmatprep.subr.bf16.mxu0 %v11605_v33  ;;  %v11597_v62 = vcombine.high %v7972_v30, %v7974_v14  ;;  %v11646_v33 = vcombine.low %v8023_v27, %v8025_v15  ;;  %v11639_v30 = vcombine.high %v8015_v17, %v8017_v31  ;;  %v8012_v14 = vld [vmem:[#allocation5 + $0xbb8] sm:$0xff] }
 0x485   :  { %7824 = vmatprep.mubr.bf16.mxu1 %v14589_v39  ;;  %8839 = vmatpush2.bf16.msra.mxu1 %v11666_v46  ;;  %v7970_v39 = vld [vmem:[#allocation5 + $0x678] sm:$0xff]  ;;  %v11628_v27 = vcombine.low %v8004_v28, %v8006_v7 }
 0x486   :  { %8840 = vmatprep.subr.bf16.mxu1 %v11663_v41  ;;  %8782 = vmatmul.mubr.bf16.gmra.mxu0 %v16230_v4  ;;  %v11593_v48 = vcombine.high %v7968_v18, %v7970_v39  ;;  %v11592_v56 = vcombine.low %v7968_v18, %v7970_v39  ;;  %v7956_v46 = vld [vmem:[#allocation5 + $0x4b8] sm:$0xff]  ;;  %v16234_v41 = vld [vmem:[#allocation42_spill] sm:$0xff] }
 0x487   :  { %8952 = vmatpush2.bf16.msra.mxu0 %v11604_v52  ;;  %8791 = vmatprep.mubr.bf16.mxu0 %v16231_v57  ;;  %v11580_v12 = vcombine.low %v7956_v46, %v7958_v63  ;;  %v8010_v18 = vld [vmem:[#allocation5 + $0xb78] sm:$0xff] }
 0x488   :  { %8953 = vmatprep.subr.bf16.mxu0 %v11601_v54  ;;  %v11642_v54 = vcombine.low %v8019_v8, %v8021_v34  ;;  %v7994_v8 = vld [vmem:[#allocation5 + $0x978] sm:$0xff] }
 0x489   :  { %8841 = vmatpush2.bf16.msra.mxu1 %v11662_v42  ;;  %v7952_v42 = vld [vmem:[#allocation5 + $0x438] sm:$0xff] }
 0x48a   :  { %8842 = vmatprep.subr.bf16.mxu1 %v11659_v51  ;;  %v8014_v51 = vld [vmem:[#allocation5 + $0xbf8] sm:$0xff] }
 0x48b   :  { %8954 = vmatpush2.bf16.msra.mxu0 %v11600_v47  ;;  %v11638_v47 = vcombine.low %v8015_v17, %v8017_v31  ;;  %v7990_v17 = vld [vmem:[#allocation5 + $0x8f8] sm:$0xff] }
 0x48c   :  { %7825 = vmatmul.mubr.bf16.gmra.mxu1 %v14591_v3  ;;  %8955 = vmatprep.subr.bf16.mxu0 %v11597_v62  ;;  %v11589_v3 = vcombine.high %v7964_v21, %v7966_v43  ;;  %v11637_v62 = vcombine.high %v8012_v14, %v8014_v51  ;;  %v8000_v21 = vld [vmem:[#allocation5 + $0xa38] sm:$0xff] }
 0x48d   :  { %7834 = vmatprep.mubr.bf16.mxu1 %v14602_v36  ;;  %8843 = vmatpush2.bf16.msra.mxu1 %v11658_v11  ;;  %v7962_v36 = vld [vmem:[#allocation5 + $0x578] sm:$0xff] }
 0x48e   :  { %8844 = vmatprep.subr.bf16.mxu1 %v11655_v35  ;;  %8792 = vmatmul.mubr.bf16.gmra.mxu0 %v16232_v16  ;;  %v11585_v2 = vcombine.high %v7960_v1, %v7962_v36  ;;  %v11584_v52 = vcombine.low %v7960_v1, %v7962_v36  ;;  %v8008_v11 = vld [vmem:[#allocation5 + $0xb38] sm:$0xff]  ;;  %v11636_v35 = vcombine.low %v8012_v14, %v8014_v51 }
 0x48f   :  { %8956 = vmatpush2.bf16.msra.mxu0 %v11596_v37  ;;  %8801 = vmatprep.mubr.bf16.mxu0 %v16233_v60  ;;  %v8002_v43 = vld [vmem:[#allocation5 + $0xa78] sm:$0xff] }
 0x490   :  { %8957 = vmatprep.subr.bf16.mxu0 %v11593_v48  ;;  %v11632_v48 = vcombine.low %v8008_v11, %v8010_v18  ;;  %v7986_v14 = vld [vmem:[#allocation5 + $0x878] sm:$0xff] }
 0x491   :  { %8845 = vmatpush2.bf16.msra.mxu1 %v11654_v45 }
 0x492   :  { %8846 = vmatprep.subr.bf16.mxu1 %v11651_v13 }
 0x493   :  { %8958 = vmatpush2.bf16.msra.mxu0 %v11592_v56  ;;  %v11625_v56 = vcombine.high %v8000_v21, %v8002_v43 }
 0x494   :  { %7835 = vmatmul.mubr.bf16.gmra.mxu1 %v14604_v40  ;;  %8959 = vmatprep.subr.bf16.mxu0 %v11589_v3  ;;  %v11581_v40 = vcombine.high %v7956_v46, %v7958_v63  ;;  %v7996_v3 = vld [vmem:[#allocation5 + $0x9b8] sm:$0xff] }
 0x495   :  { %7844 = vmatprep.mubr.bf16.mxu1 %v14611_v22  ;;  %8847 = vmatpush2.bf16.msra.mxu1 %v11650_v59  ;;  %v7954_v22 = vld [vmem:[#allocation5 + $0x478] sm:$0xff] }
 0x496   :  { %8848 = vmatprep.subr.bf16.mxu1 %v11647_v61  ;;  %8802 = vmatmul.mubr.bf16.gmra.mxu0 %v16234_v41  ;;  %v11577_v53 = vcombine.high %v7952_v42, %v7954_v22  ;;  %v11576_v39 = vcombine.low %v7952_v42, %v7954_v22  ;;  %v7998_v59 = vld [vmem:[#allocation5 + $0x9f8] sm:$0xff] }
 0x497   :  { %8960 = vmatpush2.bf16.msra.mxu0 %v11588_v10  ;;  %8811 = vmatprep.mubr.bf16.mxu0 %v16112_v5  ;;  %v7992_v61 = vld [vmem:[#allocation5 + $0x938] sm:$0xff]  ;;  %v12388_v10 = vld [vmem:[#allocation8 + $0xce4] ss:$16 sps:$4 sm:$0xff]  }
 0x498   :  { %8961 = vmatprep.subr.bf16.mxu0 %v11585_v2  ;;  %v11620_v2 = vcombine.low %v7996_v3, %v7998_v59  ;;  %v11617_v63 = vcombine.high %v7992_v61, %v7994_v8 }
 0x499   :  { %8849 = vmatpush2.bf16.msra.mxu1 %v11646_v33  ;;  %v12386_v33 = vld [vmem:[#allocation8 + $0xce0] ss:$16 sps:$4 sm:$0xff]  }
 0x49a   :  { %8850 = vmatprep.subr.bf16.mxu1 %v11643_v29  ;;  %v7988_v29 = vld [vmem:[#allocation5 + $0x8b8] sm:$0xff] }
 0x49b   :  { %8962 = vmatpush2.bf16.msra.mxu0 %v11584_v52  ;;  %v12391_v52 = vld [vmem:[#allocation8 + $0xcc4] ss:$16 sps:$4 sm:$0xff]   ;;  %v11613_v22 = vcombine.high %v7988_v29, %v7990_v17 }
 0x49c   :  { %7845 = vmatmul.mubr.bf16.gmra.mxu1 %v14613_v25  ;;  %8963 = vmatprep.subr.bf16.mxu0 %v11581_v40  ;;  %v11633_v25 = vcombine.high %v8008_v11, %v8010_v18  ;;  %v16236_v40 = vld [vmem:[#allocation29_spill] sm:$0xff] }
 0x49d   :  { %8851 = vmatpush2.bf16.msra.mxu1 %v11642_v54  ;;  %8854 = vmatprep.mubr.bf16.mxu1 %v16037_v23  ;;  %v12389_v54 = vld [vmem:[#allocation8 + $0xcc0] ss:$16 sps:$4 sm:$0xff]   ;;  %v8044_v18 = vld [vmem:[#allocation5 + $0xfb8] sm:$0xff] }
 0x49e   :  { %8852 = vmatprep.subr.bf16.mxu1 %v11639_v30  ;;  %8812 = vmatmul.mubr.bf16.gmra.mxu0 %v16039_v20  ;;  %v7984_v30 = vld [vmem:[#allocation5 + $0x838] sm:$0xff] }
 0x49f   :  { %8964 = vmatpush2.bf16.msra.mxu0 %v11580_v12  ;;  %8967 = vmatprep.mubr.bf16.mxu0 %v16221_v49  ;;  %v11629_v49 = vcombine.high %v8004_v28, %v8006_v7  ;;  %v12394_v12 = vld [vmem:[#allocation8 + $0xca4] ss:$16 sps:$4 sm:$0xff]   ;;  %v11609_v11 = vcombine.high %v7984_v30, %v7986_v14  ;;  %v16238_v28 = vld [vmem:[#allocation33_spill] sm:$0xff] }
 0x4a0   :  { %8965 = vmatprep.subr.bf16.mxu0 %v11577_v53  ;;  %v11612_v53 = vcombine.low %v7988_v29, %v7990_v17  ;;  %v12395_v7 = vld [vmem:[#allocation8 + $0xc80] ss:$16 sps:$4 sm:$0xff]  }
 0x4a1   :  { %8853 = vmatpush2.bf16.msra.mxu1 %v11638_v47  ;;  %v12392_v47 = vld [vmem:[#allocation8 + $0xca0] ss:$16 sps:$4 sm:$0xff]  }
 0x4a2   :  { %9048 = vmatprep.subr.bf16.mxu1 %v11637_v62 }
 0x4a3   :  { %8966 = vmatpush2.bf16.msra.mxu0 %v11576_v39  ;;  %v8046_v39 = vld [vmem:[#allocation5 + $0xff8] sm:$0xff] }
 0x4a4   :  { %v14652_v37 = vpop.f32.mrf.mxu0  ;;  %8855 = vmatmul.mubr.bf16.vlgmr.msra.gmra.mxu1 %v16045_v50  ;;  %10025 = vmatprep.subr.bf16.mxu0 %v12388_v10  ;;  %v16239_v10 = vld [vmem:[#allocation35_spill] sm:$0xff] }
 0x4a5   :  { %9049 = vmatpush1.bf16.msra.mxu1 %v11636_v35  ;;  %8864 = vmatprep.mubr.bf16.mxu1 %v16047_v6  ;;  %v16237_v35 = vld [vmem:[#allocation31_spill] sm:$0xff] }
 0x4a6   :  { %v14656_v45 = vpop.f32.mrf.mxu0  ;;  %9050 = vmatprep.subr.bf16.mxu1 %v11633_v25  ;;  %8968 = vmatmul.mubr.bf16.vlgmr.msra.gmra.mxu0 %v16222_v32  ;;  %v11624_v32 = vcombine.low %v8000_v21, %v8002_v43  ;;  %v11608_v25 = vcombine.low %v7984_v30, %v7986_v14  ;;  %v8040_v21 = vld [vmem:[#allocation5 + $0xf38] sm:$0xff]  ;;  %v12404_v14 = vld [vmem:[#allocation8 + $0xc20] ss:$16 sps:$4 sm:$0xff]  }
 0x4a7   :  { %8977 = vmatprep.mubr.bf16.mxu0 %v16223_v0  ;;  %v11621_v0 = vcombine.high %v7996_v3, %v7998_v59  ;;  %10026 = vmatpush1.bf16.msra.mxu0 %v12386_v33  ;;  %v8042_v43 = vld [vmem:[#allocation5 + $0xf78] sm:$0xff]  ;;  %v11668_v3 = vcombine.low %v8044_v18, %v8046_v39  ;;  %v12398_v59 = vld [vmem:[#allocation8 + $0xc60] ss:$16 sps:$4 sm:$0xff]  }
 0x4a8   :  { %v14660_v13 = vpop.f32.mrf.mxu0  ;;  %10027 = vmatprep.subr.bf16.mxu0 %v12391_v52  ;;  %v16240_v33 = vld [vmem:[#allocation37_spill] sm:$0xff] }
 0x4a9   :  { %9051 = vmatpush1.bf16.msra.mxu1 %v11632_v48  ;;  %v8032_v52 = vld [vmem:[#allocation5 + $0xe38] sm:$0xff] }
 0x4aa   :  { %v14662_v15 = vpop.f32.mrf.mxu0  ;;  %9052 = vmatprep.subr.bf16.mxu1 %v11629_v49  ;;  %v11669_v49 = vcombine.high %v8044_v18, %v8046_v39  ;;  %v16242_v18 = vld [vmem:[#allocation39_spill] sm:$0xff] }
 0x4ab   :  { %10028 = vmatpush1.bf16.msra.mxu0 %v12389_v54 }
 0x4ac   :  { %v14664_v1 = vpop.f32.mrf.mxu0  ;;  %8865 = vmatmul.mubr.bf16.gmra.mxu1 %v16056_v26  ;;  %10029 = vmatprep.subr.bf16.mxu0 %v12394_v12 }
 0x4ad   :  { %9053 = vmatpush1.bf16.msra.mxu1 %v11628_v27  ;;  %8874 = vmatprep.mubr.bf16.mxu1 %v16057_v55 }
 0x4ae   :  { %v14668_v36 = vpop.f32.mrf.mxu0  ;;  %9054 = vmatprep.subr.bf16.mxu1 %v11625_v56  ;;  %8978 = vmatmul.mubr.bf16.gmra.mxu0 %v16224_v19  ;;  %v16235_v19 = vld [vmem:[#allocation27_spill] sm:$0xff]  ;;  %v12400_v56 = vld [vmem:[#allocation8 + $0xc64] ss:$16 sps:$4 sm:$0xff]  }
 0x4af   :  { %8987 = vmatprep.mubr.bf16.mxu0 %v16225_v9  ;;  %v11616_v9 = vcombine.low %v7992_v61, %v7994_v8  ;;  %10030 = vmatpush1.bf16.msra.mxu0 %v12392_v47  ;;  %v8036_v61 = vld [vmem:[#allocation5 + $0xeb8] sm:$0xff] }
 0x4b0   :  { %v14672_v34 = vpop.f32.mrf.mxu0  ;;  %v8038_v8 = vld [vmem:[#allocation5 + $0xef8] sm:$0xff] }
 0x4b1   :  { %9055 = vmatpush1.bf16.msra.mxu1 %v11624_v32  ;;  %v11661_v17 = vcombine.high %v8036_v61, %v8038_v8  ;;  %v11660_v30 = vcombine.low %v8036_v61, %v8038_v8  ;;  %v8028_v47 = vld [vmem:[#allocation5 + $0xdb8] sm:$0xff] }
 0x4b2   :  { %v14674_v46 = vpop.f32.mrf.mxu0  ;;  %9056 = vmatprep.subr.bf16.mxu1 %v11621_v0  ;;  %v11665_v0 = vcombine.high %v8040_v21, %v8042_v43 }
 0x4b4   :  { %v14676_v31 = vpop.f32.mrf.mxu0  ;;  %8875 = vmatmul.mubr.bf16.gmra.mxu1 %v16235_v19 }
 0x4b5   :  { %9057 = vmatpush1.bf16.msra.mxu1 %v11620_v2  ;;  %8884 = vmatprep.mubr.bf16.mxu1 %v16236_v40  ;;  %v11664_v2 = vcombine.low %v8040_v21, %v8042_v43  ;;  %v8024_v21 = vld [vmem:[#allocation5 + $0xd38] sm:$0xff] }
 0x4b6   :  { %v14680_v42 = vpop.f32.mrf.mxu0  ;;  %9058 = vmatprep.subr.bf16.mxu1 %v11617_v63  ;;  %8988 = vmatmul.mubr.bf16.gmra.mxu0 %v16226_v58  ;;  %v12401_v63 = vld [vmem:[#allocation8 + $0xc40] ss:$16 sps:$4 sm:$0xff]   ;;  %v8026_v43 = vld [vmem:[#allocation5 + $0xd78] sm:$0xff] }
 0x4b7   :  { %8997 = vmatprep.mubr.bf16.mxu0 %v16227_v24  ;;  %v12397_v24 = vld [vmem:[#allocation8 + $0xc84] ss:$16 sps:$4 sm:$0xff]   ;;  %v11649_v8 = vcombine.high %v8024_v21, %v8026_v43 }
 0x4b8   :  { %v14684_v51 = vpop.f32.mrf.mxu0  ;;  %10031 = vmatprep.subr.bf16.mxu0 %v12397_v24  ;;  %v16243_v24 = vld [vmem:[#allocation41_spill] sm:$0xff] }
 0x4b9   :  { %9059 = vmatpush1.bf16.msra.mxu1 %v11616_v9  ;;  %10032 = vmatpush1.bf16.msra.mxu0 %v12395_v7  ;;  %v8034_v9 = vld [vmem:[#allocation5 + $0xe78] sm:$0xff] }
 0x4ba   :  { %v14686_v62 = vpop.f32.mrf.mxu0  ;;  %9060 = vmatprep.subr.bf16.mxu1 %v11613_v22  ;;  %10033 = vmatprep.subr.bf16.mxu0 %v12400_v56  ;;  %v12406_v22 = vld [vmem:[#allocation8 + $0xc24] ss:$16 sps:$4 sm:$0xff]   ;;  %v11656_v39 = vcombine.low %v8032_v52, %v8034_v9 }
 0x4bc   :  { %v14688_v58 = vpop.f32.mrf.mxu0  ;;  %8885 = vmatmul.mubr.bf16.gmra.mxu1 %v16237_v35 }
 0x4bd   :  { %9061 = vmatpush1.bf16.msra.mxu1 %v11612_v53  ;;  %8894 = vmatprep.mubr.bf16.mxu1 %v16238_v28  ;;  %v11657_v53 = vcombine.high %v8032_v52, %v8034_v9  ;;  %v16246_v52 = vld [vmem:[#allocation45_spill] sm:$0xff] }
 0x4be   :  { %v14692_v48 = vpop.f32.mrf.mxu0  ;;  %9062 = vmatprep.subr.bf16.mxu1 %v11609_v11  ;;  %8998 = vmatmul.mubr.bf16.gmra.mxu0 %v16228_v38  ;;  %v8030_v11 = vld [vmem:[#allocation5 + $0xdf8] sm:$0xff]  ;;  %v12413_v9 = vld [vmem:[#allocation8 + $0xdc0] ss:$16 sps:$4 sm:$0xff]  }
 0x4bf   :  { %9007 = vmatprep.mubr.bf16.mxu0 %v16229_v44  ;;  %10034 = vmatpush1.bf16.msra.mxu0 %v12398_v59  ;;  %v12403_v44 = vld [vmem:[#allocation8 + $0xc44] ss:$16 sps:$4 sm:$0xff]   ;;  %v11652_v59 = vcombine.low %v8028_v47, %v8030_v11 }
 0x4c0   :  { %v14696_v27 = vpop.f32.mrf.mxu0  ;;  %10035 = vmatprep.subr.bf16.mxu0 %v12403_v44  ;;  %v8020_v44 = vld [vmem:[#allocation5 + $0xcb8] sm:$0xff] }
 0x4c1   :  { %9063 = vmatpush1.bf16.msra.mxu1 %v11608_v25  ;;  %v12407_v25 = vld [vmem:[#allocation8 + $0xc00] ss:$16 sps:$4 sm:$0xff]  }
 0x4c2   :  { %v14698_v32 = vpop.f32.mrf.mxu0  ;;  %9064 = vmatprep.subr.bf16.mxu1 %v11669_v49  ;;  %v11653_v49 = vcombine.high %v8028_v47, %v8030_v11  ;;  %v12418_v11 = vld [vmem:[#allocation8 + $0xda4] ss:$16 sps:$4 sm:$0xff]  }
 0x4c3   :  { %10036 = vmatpush1.bf16.msra.mxu0 %v12401_v63  ;;  %v16245_v63 = vld [vmem:[#allocation43_spill] sm:$0xff] }
 0x4c4   :  { %v14700_v38 = vpop.f32.mrf.mxu0  ;;  %8895 = vmatmul.mubr.bf16.gmra.mxu1 %v16239_v10  ;;  %10037 = vmatprep.subr.bf16.mxu0 %v12406_v22 }
 0x4c5   :  { %9065 = vmatpush2.bf16.msra.mxu1 %v11668_v3  ;;  %8904 = vmatprep.mubr.bf16.mxu1 %v16240_v33  ;;  %v12412_v3 = vld [vmem:[#allocation8 + $0xde4] ss:$16 sps:$4 sm:$0xff]  }
 0x4c6   :  { %v14704_v29 = vpop.f32.mrf.mxu0  ;;  %9066 = vmatprep.subr.bf16.mxu1 %v11665_v0  ;;  %9008 = vmatmul.mubr.bf16.gmra.mxu0 %v16230_v4  ;;  %v12410_v0 = vld [vmem:[#allocation8 + $0xde0] ss:$16 sps:$4 sm:$0xff]  }
 0x4c7   :  { %9017 = vmatprep.mubr.bf16.mxu0 %v16231_v57  ;;  %10038 = vmatpush1.bf16.msra.mxu0 %v12404_v14  ;;  %v12409_v57 = vld [vmem:[#allocation8 + $0xc04] ss:$16 sps:$4 sm:$0xff]   ;;  %v8016_v14 = vld [vmem:[#allocation5 + $0xc38] sm:$0xff] }
 0x4c8   :  { %v14708_v54 = vpop.f32.mrf.mxu0  ;;  %10039 = vmatprep.subr.bf16.mxu0 %v12409_v57 }
 0x4c9   :  { %9067 = vmatpush2.bf16.msra.mxu1 %v11664_v2  ;;  %v8022_v2 = vld [vmem:[#allocation5 + $0xcf8] sm:$0xff] }
 0x4ca   :  { %v14710_v12 = vpop.f32.mrf.mxu0  ;;  %9068 = vmatprep.subr.bf16.mxu1 %v11661_v17  ;;  %v11648_v17 = vcombine.low %v8024_v21, %v8026_v43  ;;  %v11644_v57 = vcombine.low %v8020_v44, %v8022_v2  ;;  %v12421_v43 = vld [vmem:[#allocation8 + $0xd84] ss:$16 sps:$4 sm:$0xff]  }
 0x4cb   :  { %16241 = vst [vmem:[#allocation16_spill] sm:$0xff] %v14710_v12  ;;  %10040 = vmatpush1.bf16.msra.mxu0 %v12407_v25 }
 0x4cc   :  { %v14712_v4 = vpop.f32.mrf.mxu0  ;;  %8905 = vmatmul.mubr.bf16.gmra.mxu1 %v16242_v18  ;;  %10041 = vmatprep.subr.bf16.mxu0 %v12412_v3  ;;  %v12419_v3 = vld [vmem:[#allocation8 + $0xd80] ss:$16 sps:$4 sm:$0xff]  }
 0x4cd   :  { %9069 = vmatpush2.bf16.msra.mxu1 %v11660_v30  ;;  %8914 = vmatprep.mubr.bf16.mxu1 %v16243_v24  ;;  %v11645_v30 = vcombine.high %v8020_v44, %v8022_v2  ;;  %v12422_v44 = vld [vmem:[#allocation8 + $0xd60] ss:$16 sps:$4 sm:$0xff]  }
 0x4ce   :  { %v14716_v7 = vpop.f32.mrf.mxu0  ;;  %9070 = vmatprep.subr.bf16.mxu1 %v11657_v53  ;;  %9018 = vmatmul.mubr.bf16.gmra.mxu0 %v16232_v16  ;;  %v8018_v53 = vld [vmem:[#allocation5 + $0xc78] sm:$0xff] }
 0x4cf   :  { %9027 = vmatprep.mubr.bf16.mxu0 %v16233_v60  ;;  %10042 = vmatpush2.bf16.msra.mxu0 %v12410_v0  ;;  %v12415_v60 = vld [vmem:[#allocation8 + $0xdc4] ss:$16 sps:$4 sm:$0xff]  }
 0x4d0   :  { %v14720_v56 = vpop.f32.mrf.mxu0  ;;  %10043 = vmatprep.subr.bf16.mxu0 %v12415_v60 }
 0x4d1   :  { %9071 = vmatpush2.bf16.msra.mxu1 %v11656_v39  ;;  %v12416_v39 = vld [vmem:[#allocation8 + $0xda0] ss:$16 sps:$4 sm:$0xff]  }
 0x4d2   :  { %v14722_v61 = vpop.f32.mrf.mxu0  ;;  %9072 = vmatprep.subr.bf16.mxu1 %v11653_v49  ;;  %v11641_v49 = vcombine.high %v8016_v14, %v8018_v53 }
 0x4d3   :  { %16244 = vst [vmem:[#allocation18_spill] sm:$0xff] %v14722_v61  ;;  %10044 = vmatpush2.bf16.msra.mxu0 %v12413_v9 }
 0x4d4   :  { %v14724_v16 = vpop.f32.mrf.mxu0  ;;  %8915 = vmatmul.mubr.bf16.gmra.mxu1 %v16245_v63  ;;  %10045 = vmatprep.subr.bf16.mxu0 %v12418_v11 }
 0x4d5   :  { %9073 = vmatpush2.bf16.msra.mxu1 %v11652_v59  ;;  %8924 = vmatprep.mubr.bf16.mxu1 %v16246_v52 }
 0x4d6   :  { %v14728_v22 = vpop.f32.mrf.mxu0  ;;  %9074 = vmatprep.subr.bf16.mxu1 %v11649_v8  ;;  %9028 = vmatmul.mubr.bf16.gmra.mxu0 %v16234_v41  ;;  %v16248_v41 = vld [vmem:[#allocation47_spill] sm:$0xff]  ;;  %v12424_v8 = vld [vmem:[#allocation8 + $0xd64] ss:$16 sps:$4 sm:$0xff]  }
 0x4d7   :  { %9037 = vmatprep.mubr.bf16.mxu0 %v16112_v5  ;;  %10046 = vmatpush2.bf16.msra.mxu0 %v12416_v39  ;;  %v11640_v5 = vcombine.low %v8016_v14, %v8018_v53  ;;  %v16250_v53 = vld [vmem:[#allocation71_spill] sm:$0xff] }
 0x4d8   :  { %v14732_v47 = vpop.f32.mrf.mxu0  ;;  %10047 = vmatprep.subr.bf16.mxu0 %v12421_v43  ;;  %v16251_v43 = vld [vmem:[#allocation44_spill] sm:$0xff] }
 0x4d9   :  { %9075 = vmatpush2.bf16.msra.mxu1 %v11648_v17 }
 0x4da   :  { %v14734_v25 = vpop.f32.mrf.mxu0  ;;  %9076 = vmatprep.subr.bf16.mxu1 %v11645_v30 }
 0x4db   :  { %16247 = vst [vmem:[#allocation20_spill] sm:$0xff] %v14734_v25  ;;  %10048 = vmatpush2.bf16.msra.mxu0 %v12419_v3 }
 0x4dc   :  { %v14736_v21 = vpop.f32.mrf.mxu0  ;;  %8925 = vmatmul.mubr.bf16.gmra.mxu1 %v16248_v41  ;;  %10049 = vmatprep.subr.bf16.mxu0 %v12424_v8 }
 0x4dd   :  { %9077 = vmatpush2.bf16.msra.mxu1 %v11644_v57  ;;  %9080 = vmatprep.mubr.bf16.mxu1 %v16037_v23  ;;  %v12427_v23 = vld [vmem:[#allocation8 + $0xd44] ss:$16 sps:$4 sm:$0xff]  }
 0x4de   :  { %v14740_v59 = vpop.f32.mrf.mxu0  ;;  %9078 = vmatprep.subr.bf16.mxu1 %v11641_v49  ;;  %9038 = vmatmul.mubr.bf16.gmra.mxu0 %v16039_v20  ;;  %v12425_v20 = vld [vmem:[#allocation8 + $0xd40] ss:$16 sps:$4 sm:$0xff]  }
 0x4df   :  { %10050 = vmatpush2.bf16.msra.mxu0 %v12422_v44  ;;  %v16253_v44 = vld [vmem:[#allocation81_spill] sm:$0xff] }
 0x4e0   :  { %v14743_v0 = vpop.f32.mrf.mxu0  ;;  %10051 = vmatprep.subr.bf16.mxu0 %v12427_v23 }
 0x4e1   :  { %9079 = vmatpush2.bf16.msra.mxu1 %v11640_v5 }
 0x4e2   :  { %v14745_v2 = vpop.f32.mrf.mxu0 }
 0x4e3   :  { %16249 = vst [vmem:[#allocation22_spill] sm:$0xff] %v14745_v2  ;;  %10052 = vmatpush2.bf16.msra.mxu0 %v12425_v20  ;;  %v12433_v20 = vld [vmem:[#allocation8 + $0xd04] ss:$16 sps:$4 sm:$0xff]  }
 0x4e4   :  { %v7550_v60 = vpop.f32.mrf.mxu1  ;;  %v14747_v17 = vpop.f32.mrf.mxu0  ;;  %9081 = vmatmul.mubr.bf16.vlgmr.msra.gmra.mxu1 %v16045_v50  ;;  %v12430_v50 = vld [vmem:[#allocation8 + $0xd24] ss:$16 sps:$4 sm:$0xff]  }
 0x4e5   :  { %v7551_v9 = vadd.f32 %v7550_v60, %v14652_v37  ;;  %9090 = vmatprep.mubr.bf16.mxu1 %v16047_v6  ;;  %v12428_v37 = vld [vmem:[#allocation8 + $0xd20] ss:$16 sps:$4 sm:$0xff]   ;;  %10053 = vmatprep.subr.bf16.mxu0 %v12430_v50 }
 0x4e6   :  { %v7552_v30 = vpop.f32.mrf.mxu1  ;;  %v14752_v14 = vpop.f32.mrf.mxu0 }
 0x4e7   :  { %v14755_v11 = vadd.f32 %v7551_v9, %v16250_v53  ;;  %v7553_v57 = vadd.f32 %v7552_v30, %v14656_v45  ;;  %10054 = vmatpush2.bf16.msra.mxu0 %v12428_v37  ;;  %v16254_v30 = vld [vmem:[#allocation76_spill] sm:$0xff] }
 0x4e8   :  { %v7554_v39 = vpop.f32.mrf.mxu1  ;;  %v14758_v49 = vpop.f32.mrf.mxu0  ;;  %10055 = vmatprep.subr.bf16.mxu0 %v12433_v20  ;;  %v16258_v20 = vld [vmem:[#allocation79_spill] sm:$0xff] }
 0x4e9   :  { %v14761_v5 = vadd.f32 %v7553_v57, %v16251_v43  ;;  %v7555_v6 = vadd.f32 %v7554_v39, %v14660_v13  ;;  %v12431_v57 = vld [vmem:[#allocation8 + $0xd00] ss:$16 sps:$4 sm:$0xff]  }
 0x4ea   :  { %v7556_v3 = vpop.f32.mrf.mxu1  ;;  %v14764_v8 = vpop.f32.mrf.mxu0 }
 0x4eb   :  { %16252 = vst [vmem:[#allocation24_spill] sm:$0xff] %v14764_v8  ;;  %v14767_v60 = vadd.f32 %v7555_v6, %v16253_v44  ;;  %v7557_v45 = vadd.f32 %v7556_v3, %v14662_v15  ;;  %v16255_v15 = vld [vmem:[#allocation85_spill] sm:$0xff]  ;;  %10056 = vmatpush2.bf16.msra.mxu0 %v12431_v57  ;;  %v12436_v3 = vld [vmem:[#allocation8 + $0xee4] ss:$16 sps:$4 sm:$0xff]  }
 0x4ec   :  { %v7560_v23 = vpop.f32.mrf.mxu1  ;;  %v14770_v9 = vpop.f32.mrf.mxu0  ;;  %9091 = vmatmul.mubr.bf16.gmra.mxu1 %v16056_v26  ;;  %v12439_v44 = vld [vmem:[#allocation8 + $0xcec] ss:$16 sps:$4 sm:$0xff]   ;;  %10138 = vmatprep.subr.bf16.mxu1 %v12436_v3  ;;  %v12440_v3 = vld [vmem:[#allocation8 + $0xec0] ss:$16 sps:$4 sm:$0xff]  }
 0x4ed   :  { %v14774_v53 = vadd.f32 %v7557_v45, %v16254_v30  ;;  %v7561_v13 = vadd.f32 %v7560_v23, %v14664_v1  ;;  %9100 = vmatprep.mubr.bf16.mxu1 %v16057_v55  ;;  %v16256_v45 = vld [vmem:[#allocation80_spill] sm:$0xff]  ;;  %v12434_v23 = vld [vmem:[#allocation8 + $0xee0] ss:$16 sps:$4 sm:$0xff]   ;;  %10251 = vmatprep.subr.bf16.mxu0 %v12439_v44 }
 0x4ee   :  { %v7562_v39 = vpop.f32.mrf.mxu1  ;;  %v14778_v50 = vpop.f32.mrf.mxu0  ;;  %10139 = vmatpush1.bf16.msra.mxu1 %v12434_v23 }
 0x4ef   :  { %v14781_v43 = vadd.f32 %v7561_v13, %v16255_v15  ;;  %v7563_v6 = vadd.f32 %v7562_v39, %v14668_v36  ;;  %v12442_v15 = vld [vmem:[#allocation8 + $0xec4] ss:$16 sps:$4 sm:$0xff]  }
 0x4f0   :  { %v7564_v26 = vpop.f32.mrf.mxu1  ;;  %v14784_v37 = vpop.f32.mrf.mxu0  ;;  %10140 = vmatprep.subr.bf16.mxu1 %v12442_v15  ;;  %v16266_v15 = vld [vmem:[#allocation87_spill] sm:$0xff] }
 0x4f1   :  { %v14787_v1 = vadd.f32 %v7563_v6, %v16256_v45  ;;  %v7565_v55 = vadd.f32 %v7564_v26, %v14672_v34  ;;  %v16259_v6 = vld [vmem:[#allocation83_spill] sm:$0xff] }
 0x4f2   :  { %v7566_v30 = vpop.f32.mrf.mxu1  ;;  %v14790_v8 = vpop.f32.mrf.mxu0  ;;  %10141 = vmatpush1.bf16.msra.mxu1 %v12440_v3 }
 0x4f3   :  { %16257 = vst [vmem:[#allocation26_spill] sm:$0xff] %v14790_v8  ;;  %v14793_v13 = vadd.f32 %v7565_v55, %v16258_v20  ;;  %v7567_v36 = vadd.f32 %v7566_v30, %v14674_v46  ;;  %v16261_v46 = vld [vmem:[#allocation57_spill] sm:$0xff]  ;;  %v12448_v20 = vld [vmem:[#allocation8 + $0xea4] ss:$16 sps:$4 sm:$0xff]  }
 0x4f4   :  { %v7570_v57 = vpop.f32.mrf.mxu1  ;;  %v14796_v39 = vpop.f32.mrf.mxu0  ;;  %9101 = vmatmul.mubr.bf16.gmra.mxu1 %v16235_v19  ;;  %10142 = vmatprep.subr.bf16.mxu1 %v12448_v20 }
 0x4f5   :  { %v14800_v34 = vadd.f32 %v7567_v36, %v16259_v6  ;;  %v7571_v26 = vadd.f32 %v7570_v57, %v14676_v31  ;;  %9110 = vmatprep.mubr.bf16.mxu1 %v16236_v40  ;;  %v16263_v36 = vld [vmem:[#allocation53_spill] sm:$0xff] }
 0x4f6   :  { %v7572_v44 = vpop.f32.mrf.mxu1  ;;  %v14804_v45 = vpop.f32.mrf.mxu0  ;;  %v12446_v40 = vld [vmem:[#allocation8 + $0xea0] ss:$16 sps:$4 sm:$0xff]  }
 0x4f7   :  { %16260 = vst [vmem:[#allocation28_spill] sm:$0xff] %v14800_v34  ;;  %v14807_v55 = vadd.f32 %v7571_v26, %v16261_v46  ;;  %v7573_v23 = vadd.f32 %v7572_v44, %v14680_v42  ;;  %10143 = vmatpush1.bf16.msra.mxu1 %v12446_v40  ;;  %v12454_v46 = vld [vmem:[#allocation8 + $0xe84] ss:$16 sps:$4 sm:$0xff]  }
 0x4f8   :  { %v7574_v19 = vpop.f32.mrf.mxu1  ;;  %v14810_v30 = vpop.f32.mrf.mxu0  ;;  %10144 = vmatprep.subr.bf16.mxu1 %v12454_v46  ;;  %v16275_v46 = vld [vmem:[#allocation56_spill] sm:$0xff] }
 0x4f9   :  { %16262 = vst [vmem:[#allocation30_spill] sm:$0xff] %v14807_v55  ;;  %v14813_v6 = vadd.f32 %v7573_v23, %v16263_v36  ;;  %v7575_v31 = vadd.f32 %v7574_v19, %v14684_v51  ;;  %v16268_v23 = vld [vmem:[#allocation46_spill] sm:$0xff]  ;;  %v12452_v19 = vld [vmem:[#allocation8 + $0xe80] ss:$16 sps:$4 sm:$0xff]  }
 0x4fa   :  { %v7576_v57 = vpop.f32.mrf.mxu1  ;;  %v14816_v8 = vpop.f32.mrf.mxu0 }
 0x4fb   :  { %16264 = vst [vmem:[#allocation32_spill] sm:$0xff] %v14813_v6  ;;  %16265 = vst [vmem:[#allocation34_spill] sm:$0xff] %v14816_v8  ;;  %v14819_v26 = vadd.f32 %v7575_v31, %v16266_v15  ;;  %v7577_v42 = vadd.f32 %v7576_v57, %v14686_v62  ;;  %v16270_v62 = vld [vmem:[#allocation58_spill] sm:$0xff]  ;;  %10145 = vmatpush1.bf16.msra.mxu1 %v12452_v19 }
 0x4fc   :  { %v7580_v3 = vpop.f32.mrf.mxu1  ;;  %v14822_v44 = vpop.f32.mrf.mxu0  ;;  %9111 = vmatmul.mubr.bf16.gmra.mxu1 %v16237_v35 }
 0x4fd   :  { %16267 = vst [vmem:[#allocation36_spill] sm:$0xff] %v14819_v26  ;;  %v14826_v36 = vadd.f32 %v7577_v42, %v16268_v23  ;;  %v7581_v51 = vadd.f32 %v7580_v3, %v14688_v58  ;;  %9120 = vmatprep.mubr.bf16.mxu1 %v16238_v28  ;;  %v12460_v42 = vld [vmem:[#allocation8 + $0xe64] ss:$16 sps:$4 sm:$0xff]   ;;  %v16272_v23 = vld [vmem:[#allocation21_spill] sm:$0xff] }
 0x4fe   :  { %v7582_v20 = vpop.f32.mrf.mxu1  ;;  %v14830_v31 = vpop.f32.mrf.mxu0  ;;  %v12458_v28 = vld [vmem:[#allocation8 + $0xe60] ss:$16 sps:$4 sm:$0xff]   ;;  %10146 = vmatprep.subr.bf16.mxu1 %v12460_v42 }
 0x4ff   :  { %16269 = vst [vmem:[#allocation38_spill] sm:$0xff] %v14826_v36  ;;  %v14833_v40 = vadd.f32 %v7581_v51, %v16270_v62  ;;  %v7583_v57 = vadd.f32 %v7582_v20, %v14692_v48  ;;  %10147 = vmatpush1.bf16.msra.mxu1 %v12458_v28  ;;  %v12466_v62 = vld [vmem:[#allocation8 + $0xe44] ss:$16 sps:$4 sm:$0xff]  }
 0x500   :  { %v7584_v35 = vpop.f32.mrf.mxu1  ;;  %v14836_v15 = vpop.f32.mrf.mxu0  ;;  %10148 = vmatprep.subr.bf16.mxu1 %v12466_v62  ;;  %v16285_v62 = vld [vmem:[#allocation90_spill] sm:$0xff] }
 0x501   :  { %16271 = vst [vmem:[#allocation40_spill] sm:$0xff] %v14833_v40  ;;  %v14839_v8 = vadd.f32 %v7583_v57, %v16272_v23  ;;  %v7585_v58 = vadd.f32 %v7584_v35, %v14696_v27  ;;  %v16277_v57 = vld [vmem:[#allocation61_spill] sm:$0xff] }
 0x502   :  { %v7586_v3 = vpop.f32.mrf.mxu1  ;;  %v14842_v2 = vpop.f32.mrf.mxu0  ;;  %v12464_v35 = vld [vmem:[#allocation8 + $0xe40] ss:$16 sps:$4 sm:$0xff]  }
 0x503   :  { %16273 = vst [vmem:[#allocation42_spill] sm:$0xff] %v14839_v8  ;;  %16274 = vst [vmem:[#allocation27_spill] sm:$0xff] %v14842_v2  ;;  %v14845_v51 = vadd.f32 %v7585_v58, %v16275_v46  ;;  %v7587_v48 = vadd.f32 %v7586_v3, %v14698_v32  ;;  %v16279_v32 = vld [vmem:[#allocation89_spill] sm:$0xff]  ;;  %10149 = vmatpush1.bf16.msra.mxu1 %v12464_v35 }
 0x504   :  { %v7590_v19 = vpop.f32.mrf.mxu1  ;;  %v14848_v20 = vpop.f32.mrf.mxu0  ;;  %9121 = vmatmul.mubr.bf16.gmra.mxu1 %v16239_v10 }
 0x505   :  { %16276 = vst [vmem:[#allocation29_spill] sm:$0xff] %v14845_v51  ;;  %v14852_v23 = vadd.f32 %v7587_v48, %v16277_v57  ;;  %v7591_v27 = vadd.f32 %v7590_v19, %v14700_v38  ;;  %9130 = vmatprep.mubr.bf16.mxu1 %v16240_v33  ;;  %v12472_v48 = vld [vmem:[#allocation8 + $0xe24] ss:$16 sps:$4 sm:$0xff]   ;;  %v16281_v57 = vld [vmem:[#allocation23_spill] sm:$0xff] }
 0x506   :  { %v7592_v42 = vpop.f32.mrf.mxu1  ;;  %v14856_v58 = vpop.f32.mrf.mxu0  ;;  %v12470_v33 = vld [vmem:[#allocation8 + $0xe20] ss:$16 sps:$4 sm:$0xff]   ;;  %10150 = vmatprep.subr.bf16.mxu1 %v12472_v48  ;;  %v16287_v48 = vld [vmem:[#allocation92_spill] sm:$0xff] }
 0x507   :  { %16278 = vst [vmem:[#allocation31_spill] sm:$0xff] %v14852_v23  ;;  %v14859_v28 = vadd.f32 %v7591_v27, %v16279_v32  ;;  %v7593_v3 = vadd.f32 %v7592_v42, %v14704_v29  ;;  %10151 = vmatpush1.bf16.msra.mxu1 %v12470_v33  ;;  %v12478_v42 = vld [vmem:[#allocation8 + $0xe04] ss:$16 sps:$4 sm:$0xff]  }
 0x508   :  { %v7594_v10 = vpop.f32.mrf.mxu1  ;;  %v14862_v46 = vpop.f32.mrf.mxu0  ;;  %10152 = vmatprep.subr.bf16.mxu1 %v12478_v42  ;;  %v16293_v42 = vld [vmem:[#allocation93_spill] sm:$0xff] }
 0x509   :  { %16280 = vst [vmem:[#allocation33_spill] sm:$0xff] %v14859_v28  ;;  %v14865_v2 = vadd.f32 %v7593_v3, %v16281_v57  ;;  %v7595_v38 = vadd.f32 %v7594_v10, %v14708_v54  ;;  %v12476_v54 = vld [vmem:[#allocation8 + $0xe00] ss:$16 sps:$4 sm:$0xff]  }
 0x50a   :  { %v14868_v19 = vpop.f32.mrf.mxu1  ;;  %v14870_v25 = vpop.f32.mrf.mxu0 }
 0x50b   :  { %16282 = vst [vmem:[#allocation35_spill] sm:$0xff] %v14865_v2  ;;  %16283 = vst [vmem:[#allocation37_spill] sm:$0xff] %v14868_v19  ;;  %v14873_v27 = vadd.f32 %v7595_v38, %v16285_v62  ;;  %10153 = vmatpush1.bf16.msra.mxu1 %v12476_v54 }
 0x50c   :  { %16284 = vst [vmem:[#allocation39_spill] sm:$0xff] %v14870_v25  ;;  %v7600_v29 = vpop.f32.mrf.mxu1  ;;  %v14875_v35 = vpop.f32.mrf.mxu0  ;;  %9131 = vmatmul.mubr.bf16.gmra.mxu1 %v16242_v18  ;;  %v12484_v18 = vld [vmem:[#allocation8 + $0xfe4] ss:$16 sps:$4 sm:$0xff]  }
 0x50d   :  { %16286 = vst [vmem:[#allocation41_spill] sm:$0xff] %v14873_v27  ;;  %v7601_v32 = vadd.f32 %v7600_v29, %v14712_v4  ;;  %9140 = vmatprep.mubr.bf16.mxu1 %v16243_v24  ;;  %v16289_v25 = vld [vmem:[#allocation60_spill] sm:$0xff]  ;;  %v12482_v24 = vld [vmem:[#allocation8 + $0xfe0] ss:$16 sps:$4 sm:$0xff]   ;;  %10154 = vmatprep.subr.bf16.mxu1 %v12484_v18 }
 0x50e   :  { %v7602_v3 = vpop.f32.mrf.mxu1  ;;  %v14880_v10 = vpop.f32.mrf.mxu0 }
 0x50f   :  { %v14883_v57 = vadd.f32 %v7601_v32, %v16287_v48  ;;  %v7603_v38 = vadd.f32 %v7602_v3, %v14716_v7  ;;  %10155 = vmatpush2.bf16.msra.mxu1 %v12482_v24  ;;  %v12490_v3 = vld [vmem:[#allocation8 + $0xfc4] ss:$16 sps:$4 sm:$0xff]  }
 0x510   :  { %v7604_v33 = vpop.f32.mrf.mxu1  ;;  %v14886_v62 = vpop.f32.mrf.mxu0  ;;  %10156 = vmatprep.subr.bf16.mxu1 %v12490_v3  ;;  %v16301_v3 = vld [vmem:[#allocation63_spill] sm:$0xff] }
 0x511   :  { %16288 = vst [vmem:[#allocation43_spill] sm:$0xff] %v14883_v57  ;;  %v14889_v61 = vadd.f32 %v7603_v38, %v16289_v25  ;;  %v7605_v4 = vadd.f32 %v7604_v33, %v14720_v56  ;;  %v12488_v56 = vld [vmem:[#allocation8 + $0xfc0] ss:$16 sps:$4 sm:$0xff]  }
 0x512   :  { %v14892_v29 = vpop.f32.mrf.mxu1  ;;  %v14894_v27 = vpop.f32.mrf.mxu0  ;;  %v16295_v33 = vld [vmem:[#allocation95_spill] sm:$0xff] }
 0x513   :  { %16290 = vst [vmem:[#allocation45_spill] sm:$0xff] %v14889_v61  ;;  %16291 = vst [vmem:[#allocation47_spill] sm:$0xff] %v14892_v29  ;;  %v14897_v32 = vadd.f32 %v7605_v4, %v16293_v42  ;;  %10157 = vmatpush2.bf16.msra.mxu1 %v12488_v56 }
 0x514   :  { %16292 = vst [vmem:[#allocation71_spill] sm:$0xff] %v14894_v27  ;;  %v7610_v7 = vpop.f32.mrf.mxu1  ;;  %v14899_v54 = vpop.f32.mrf.mxu0  ;;  %9141 = vmatmul.mubr.bf16.gmra.mxu1 %v16245_v63  ;;  %v12496_v63 = vld [vmem:[#allocation8 + $0xfa4] ss:$16 sps:$4 sm:$0xff]  }
 0x515   :  { %16294 = vst [vmem:[#allocation44_spill] sm:$0xff] %v14897_v32  ;;  %v7611_v25 = vadd.f32 %v7610_v7, %v14724_v16  ;;  %9150 = vmatprep.mubr.bf16.mxu1 %v16246_v52  ;;  %v16297_v27 = vld [vmem:[#allocation64_spill] sm:$0xff]  ;;  %v12494_v52 = vld [vmem:[#allocation8 + $0xfa0] ss:$16 sps:$4 sm:$0xff]   ;;  %10158 = vmatprep.subr.bf16.mxu1 %v12496_v63 }
 0x516   :  { %v7612_v48 = vpop.f32.mrf.mxu1  ;;  %v14904_v38 = vpop.f32.mrf.mxu0 }
 0x517   :  { %v14907_v18 = vadd.f32 %v7611_v25, %v16295_v33  ;;  %v7613_v4 = vadd.f32 %v7612_v48, %v14728_v22  ;;  %10159 = vmatpush2.bf16.msra.mxu1 %v12494_v52  ;;  %v12502_v48 = vld [vmem:[#allocation8 + $0xf84] ss:$16 sps:$4 sm:$0xff]   ;;  %v12500_v33 = vld [vmem:[#allocation8 + $0xf80] ss:$16 sps:$4 sm:$0xff]  }
 0x518   :  { %v7614_v24 = vpop.f32.mrf.mxu1  ;;  %v14910_v42 = vpop.f32.mrf.mxu0  ;;  %10160 = vmatprep.subr.bf16.mxu1 %v12502_v48  ;;  %v16308_v48 = vld [vmem:[#allocation98_spill] sm:$0xff] }
 0x519   :  { %16296 = vst [vmem:[#allocation81_spill] sm:$0xff] %v14907_v18  ;;  %v14913_v32 = vadd.f32 %v7613_v4, %v16297_v27  ;;  %v7615_v16 = vadd.f32 %v7614_v24, %v14732_v47  ;;  %v16303_v24 = vld [vmem:[#allocation96_spill] sm:$0xff] }
 0x51a   :  { %v14916_v7 = vpop.f32.mrf.mxu1  ;;  %v14918_v61 = vpop.f32.mrf.mxu0 }
 0x51b   :  { %16298 = vst [vmem:[#allocation76_spill] sm:$0xff] %v14913_v32  ;;  %16299 = vst [vmem:[#allocation85_spill] sm:$0xff] %v14916_v7  ;;  %v14921_v25 = vadd.f32 %v7615_v16, %v16301_v3  ;;  %10161 = vmatpush2.bf16.msra.mxu1 %v12500_v33  ;;  %v12508_v3 = vld [vmem:[#allocation8 + $0xf64] ss:$16 sps:$4 sm:$0xff]  }
 0x51c   :  { %16300 = vst [vmem:[#allocation80_spill] sm:$0xff] %v14918_v61  ;;  %v7620_v22 = vpop.f32.mrf.mxu1  ;;  %v14923_v56 = vpop.f32.mrf.mxu0  ;;  %9151 = vmatmul.mubr.bf16.gmra.mxu1 %v16248_v41  ;;  %10162 = vmatprep.subr.bf16.mxu1 %v12508_v3  ;;  %v12514_v33 = vld [vmem:[#allocation8 + $0xf44] ss:$16 sps:$4 sm:$0xff]  }
 0x51d   :  { %16302 = vst [vmem:[#allocation79_spill] sm:$0xff] %v14921_v25  ;;  %v7621_v27 = vadd.f32 %v7620_v22, %v14736_v21  ;;  %v16305_v25 = vld [vmem:[#allocation97_spill] sm:$0xff] }
 0x51e   :  { %v7622_v47 = vpop.f32.mrf.mxu1  ;;  %v14927_v4 = vpop.f32.mrf.mxu0  ;;  %v12506_v22 = vld [vmem:[#allocation8 + $0xf60] ss:$16 sps:$4 sm:$0xff]  }
 0x51f   :  { %v14930_v61 = vadd.f32 %v7621_v27, %v16303_v24  ;;  %v7623_v63 = vadd.f32 %v7622_v47, %v14740_v59  ;;  %10163 = vmatpush2.bf16.msra.mxu1 %v12506_v22  ;;  %v12512_v24 = vld [vmem:[#allocation8 + $0xf40] ss:$16 sps:$4 sm:$0xff]   ;;  %v12520_v22 = vld [vmem:[#allocation8 + $0xf24] ss:$16 sps:$4 sm:$0xff]  }
 0x520   :  { %v7624_v16 = vpop.f32.mrf.mxu1  ;;  %v14933_v52 = vpop.f32.mrf.mxu0  ;;  %10164 = vmatprep.subr.bf16.mxu1 %v12514_v33  ;;  %v16316_v33 = vld [vmem:[#allocation103_spill] sm:$0xff] }
 0x521   :  { %16304 = vst [vmem:[#allocation83_spill] sm:$0xff] %v14930_v61  ;;  %v14936_v41 = vadd.f32 %v7623_v63, %v16305_v25  ;;  %v7625_v21 = vadd.f32 %v7624_v16, %v14743_v0  ;;  %v16311_v0 = vld [vmem:[#allocation101_spill] sm:$0xff] }
 0x522   :  { %v14939_v32 = vpop.f32.mrf.mxu1  ;;  %v14944_v27 = vpop.f32.mrf.mxu0 }
 0x523   :  { %16306 = vst [vmem:[#allocation57_spill] sm:$0xff] %v14936_v41  ;;  %16307 = vst [vmem:[#allocation53_spill] sm:$0xff] %v14939_v32  ;;  %v14942_v18 = vadd.f32 %v7625_v21, %v16308_v48  ;;  %10165 = vmatpush2.bf16.msra.mxu1 %v12512_v24  ;;  %v16313_v48 = vld [vmem:[#allocation102_spill] sm:$0xff] }
 0x524   :  { %16310 = vst [vmem:[#allocation46_spill] sm:$0xff] %v14944_v27  ;;  %v7776_v59 = vpop.f32.mrf.mxu1  ;;  %10166 = vmatprep.subr.bf16.mxu1 %v12520_v22  ;;  %v12526_v24 = vld [vmem:[#allocation8 + $0xf04] ss:$16 sps:$4 sm:$0xff]  }
 0x525   :  { %16309 = vst [vmem:[#allocation87_spill] sm:$0xff] %v14942_v18  ;;  %v7777_v47 = vadd.f32 %v7776_v59, %v14747_v17  ;;  %v12518_v59 = vld [vmem:[#allocation8 + $0xf20] ss:$16 sps:$4 sm:$0xff]  }
 0x526   :  { %v7778_v61 = vpop.f32.mrf.mxu1  ;;  %v14947_v25 = vpop.f32.mrf.mxu0 }
 0x527   :  { %v14950_v63 = vadd.f32 %v7777_v47, %v16311_v0  ;;  %v7779_v16 = vadd.f32 %v7778_v61, %v14752_v14  ;;  %10167 = vmatpush2.bf16.msra.mxu1 %v12518_v59  ;;  %v12532_v59 = vld [vmem:[#allocation8 + $0xeec] ss:$16 sps:$4 sm:$0xff]  }
 0x528   :  { %v7780_v3 = vpop.f32.mrf.mxu1  ;;  %v14953_v21 = vpop.f32.mrf.mxu0  ;;  %10168 = vmatprep.subr.bf16.mxu1 %v12526_v24  ;;  %v16323_v24 = vld [vmem:[#allocation107_spill] sm:$0xff] }
 0x529   :  { %16312 = vst [vmem:[#allocation58_spill] sm:$0xff] %v14950_v63  ;;  %v14956_v27 = vadd.f32 %v7779_v16, %v16313_v48  ;;  %v7781_v17 = vadd.f32 %v7780_v3, %v14758_v49  ;;  %v12524_v16 = vld [vmem:[#allocation8 + $0xf00] ss:$16 sps:$4 sm:$0xff]  }
 0x52a   :  { %v14959_v18 = vpop.f32.mrf.mxu1  ;;  %v14961_v41 = vpop.f32.mrf.mxu0  ;;  %v16318_v49 = vld [vmem:[#allocation105_spill] sm:$0xff] }
 0x52b   :  { %16314 = vst [vmem:[#allocation21_spill] sm:$0xff] %v14956_v27  ;;  %16315 = vst [vmem:[#allocation56_spill] sm:$0xff] %v14959_v18  ;;  %v14964_v47 = vadd.f32 %v7781_v17, %v16316_v33  ;;  %10169 = vmatpush2.bf16.msra.mxu1 %v12524_v16 }
 0x52c   :  { %v7786_v61 = vpop.f32.mrf.mxu1  ;;  %v14966_v14 = vpop.f32.mrf.mxu0  ;;  %10364 = vmatprep.subr.bf16.mxu1 %v12532_v59  ;;  %v16327_v59 = vld [vmem:[#allocation110_spill] sm:$0xff] }
 0x52d   :  { %16317 = vst [vmem:[#allocation61_spill] sm:$0xff] %v14964_v47  ;;  %v7787_v0 = vadd.f32 %v7786_v61, %v14770_v9  ;;  %v16320_v47 = vld [vmem:[#allocation106_spill] sm:$0xff] }
 0x52e   :  { %v7788_v48 = vpop.f32.mrf.mxu1  ;;  %v14969_v27 = vpop.f32.mrf.mxu0 }
 0x52f   :  { %v14972_v3 = vadd.f32 %v7787_v0, %v16318_v49  ;;  %v7789_v22 = vadd.f32 %v7788_v48, %v14778_v50 }
 0x530   :  { %v7790_v17 = vpop.f32.mrf.mxu1  ;;  %v14975_v33 = vpop.f32.mrf.mxu0 }
 0x531   :  { %16319 = vst [vmem:[#allocation89_spill] sm:$0xff] %v14972_v3  ;;  %v14978_v63 = vadd.f32 %v7789_v22, %v16320_v47  ;;  %v7791_v9 = vadd.f32 %v7790_v17, %v14784_v37  ;;  %v16325_v47 = vld [vmem:[#allocation109_spill] sm:$0xff] }
 0x532   :  { %v14981_v61 = vpop.f32.mrf.mxu1  ;;  %v14983_v18 = vpop.f32.mrf.mxu0 }
 0x533   :  { %16321 = vst [vmem:[#allocation23_spill] sm:$0xff] %v14978_v63  ;;  %16322 = vst [vmem:[#allocation90_spill] sm:$0xff] %v14981_v61  ;;  %v14986_v0 = vadd.f32 %v7791_v9, %v16323_v24 }
 0x534   :  { %v7796_v49 = vpop.f32.mrf.mxu1  ;;  %v14988_v50 = vpop.f32.mrf.mxu0 }
 0x535   :  { %16324 = vst [vmem:[#allocation92_spill] sm:$0xff] %v14986_v0  ;;  %v7797_v16 = vadd.f32 %v7796_v49, %v14796_v39  ;;  %v16330_v39 = vld [vmem:[#allocation111_spill] sm:$0xff] }
 0x536   :  { %v7798_v48 = vpop.f32.mrf.mxu1  ;;  %v14991_v3 = vpop.f32.mrf.mxu0 }
 0x537   :  { %v14994_v22 = vadd.f32 %v7797_v16, %v16325_v47  ;;  %v7799_v37 = vadd.f32 %v7798_v48, %v14804_v45 }
 0x538   :  { %v7800_v17 = vpop.f32.mrf.mxu1  ;;  %v14997_v63 = vpop.f32.mrf.mxu0 }
 0x539   :  { %16326 = vst [vmem:[#allocation60_spill] sm:$0xff] %v14994_v22  ;;  %v15000_v61 = vadd.f32 %v7799_v37, %v16327_v59  ;;  %v7801_v9 = vadd.f32 %v7800_v17, %v14810_v30  ;;  %v16332_v22 = vld [vmem:[#allocation113_spill] sm:$0xff] }
 0x53a   :  { %v15003_v24 = vpop.f32.mrf.mxu1  ;;  %v15005_v0 = vpop.f32.mrf.mxu0 }
 0x53b   :  { %16328 = vst [vmem:[#allocation93_spill] sm:$0xff] %v15000_v61  ;;  %16329 = vst [vmem:[#allocation95_spill] sm:$0xff] %v15003_v24  ;;  %v15008_v49 = vadd.f32 %v7801_v9, %v16330_v39  ;;  %v16334_v61 = vld [vmem:[#allocation114_spill] sm:$0xff] }
 0x53c   :  { %v7806_v32 = vpop.f32.mrf.mxu1  ;;  %v15010_v16 = vpop.f32.mrf.mxu0 }
 0x53d   :  { %16331 = vst [vmem:[#allocation64_spill] sm:$0xff] %v15008_v49  ;;  %v7807_v45 = vadd.f32 %v7806_v32, %v14822_v44  ;;  %v16337_v44 = vld [vmem:[#allocation115_spill] sm:$0xff] }
 0x53e   :  { %v7808_v48 = vpop.f32.mrf.mxu1  ;;  %v15013_v47 = vpop.f32.mrf.mxu0 }
 0x53f   :  { %v15016_v37 = vadd.f32 %v7807_v45, %v16332_v22  ;;  %v7809_v30 = vadd.f32 %v7808_v48, %v14830_v31 }
 0x540   :  { %v7810_v17 = vpop.f32.mrf.mxu1  ;;  %v15019_v59 = vpop.f32.mrf.mxu0 }
 0x541   :  { %16333 = vst [vmem:[#allocation63_spill] sm:$0xff] %v15016_v37  ;;  %v15022_v24 = vadd.f32 %v7809_v30, %v16334_v61  ;;  %v7811_v9 = vadd.f32 %v7810_v17, %v14836_v15  ;;  %v16339_v37 = vld [vmem:[#allocation117_spill] sm:$0xff] }
 0x542   :  { %v15025_v39 = vpop.f32.mrf.mxu1  ;;  %v15027_v49 = vpop.f32.mrf.mxu0 }
 0x543   :  { %16335 = vst [vmem:[#allocation96_spill] sm:$0xff] %v15022_v24  ;;  %16336 = vst [vmem:[#allocation97_spill] sm:$0xff] %v15025_v39  ;;  %v15030_v32 = vadd.f32 %v7811_v9, %v16337_v44  ;;  %v16341_v24 = vld [vmem:[#allocation118_spill] sm:$0xff] }
 0x544   :  { %v7816_v7 = vpop.f32.mrf.mxu1  ;;  %v15032_v22 = vpop.f32.mrf.mxu0 }
 0x545   :  { %16338 = vst [vmem:[#allocation98_spill] sm:$0xff] %v15030_v32  ;;  %v7817_v31 = vadd.f32 %v7816_v7, %v14848_v20  ;;  %v16344_v20 = vld [vmem:[#allocation119_spill] sm:$0xff] }
 0x546   :  { %v7818_v45 = vpop.f32.mrf.mxu1  ;;  %v15035_v48 = vpop.f32.mrf.mxu0 }
 0x547   :  { %v15038_v61 = vadd.f32 %v7817_v31, %v16339_v37  ;;  %v7819_v15 = vadd.f32 %v7818_v45, %v14856_v58 }
 0x548   :  { %v7820_v30 = vpop.f32.mrf.mxu1  ;;  %v15041_v17 = vpop.f32.mrf.mxu0 }
 0x549   :  { %16340 = vst [vmem:[#allocation101_spill] sm:$0xff] %v15038_v61  ;;  %v15044_v39 = vadd.f32 %v7819_v15, %v16341_v24  ;;  %v7821_v9 = vadd.f32 %v7820_v30, %v14862_v46  ;;  %v16346_v61 = vld [vmem:[#allocation121_spill] sm:$0xff] }
 0x54a   :  { %v15047_v44 = vpop.f32.mrf.mxu1  ;;  %v15049_v32 = vpop.f32.mrf.mxu0 }
 0x54b   :  { %16342 = vst [vmem:[#allocation102_spill] sm:$0xff] %v15044_v39  ;;  %16343 = vst [vmem:[#allocation103_spill] sm:$0xff] %v15047_v44  ;;  %v15052_v7 = vadd.f32 %v7821_v9, %v16344_v20  ;;  %v16348_v39 = vld [vmem:[#allocation122_spill] sm:$0xff] }
 0x54c   :  { %v7826_v57 = vpop.f32.mrf.mxu1  ;;  %v15054_v37 = vpop.f32.mrf.mxu0 }
 0x54d   :  { %16345 = vst [vmem:[#allocation105_spill] sm:$0xff] %v15052_v7  ;;  %v7827_v58 = vadd.f32 %v7826_v57, %v14875_v35  ;;  %v16351_v35 = vld [vmem:[#allocation123_spill] sm:$0xff] }
 0x54e   :  { %v7828_v31 = vpop.f32.mrf.mxu1  ;;  %v15057_v45 = vpop.f32.mrf.mxu0 }
 0x54f   :  { %v15060_v24 = vadd.f32 %v7827_v58, %v16346_v61  ;;  %v7829_v46 = vadd.f32 %v7828_v31, %v14880_v10 }
 0x550   :  { %v7830_v15 = vpop.f32.mrf.mxu1  ;;  %v15063_v30 = vpop.f32.mrf.mxu0 }
 0x551   :  { %16347 = vst [vmem:[#allocation106_spill] sm:$0xff] %v15060_v24  ;;  %v15066_v44 = vadd.f32 %v7829_v46, %v16348_v39  ;;  %v7831_v9 = vadd.f32 %v7830_v15, %v14886_v62  ;;  %v16353_v24 = vld [vmem:[#allocation125_spill] sm:$0xff] }
 0x552   :  { %v15069_v20 = vpop.f32.mrf.mxu1  ;;  %v15071_v7 = vpop.f32.mrf.mxu0 }
 0x553   :  { %16349 = vst [vmem:[#allocation107_spill] sm:$0xff] %v15066_v44  ;;  %16350 = vst [vmem:[#allocation109_spill] sm:$0xff] %v15069_v20  ;;  %v15074_v57 = vadd.f32 %v7831_v9, %v16351_v35  ;;  %v16355_v44 = vld [vmem:[#allocation126_spill] sm:$0xff] }
 0x554   :  { %v7836_v29 = vpop.f32.mrf.mxu1  ;;  %v15076_v61 = vpop.f32.mrf.mxu0 }
 0x555   :  { %16352 = vst [vmem:[#allocation110_spill] sm:$0xff] %v15074_v57  ;;  %v7837_v10 = vadd.f32 %v7836_v29, %v14899_v54  ;;  %v16358_v29 = vld [vmem:[#allocation127_spill] sm:$0xff] }
 0x556   :  { %v7838_v58 = vpop.f32.mrf.mxu1  ;;  %v15079_v31 = vpop.f32.mrf.mxu0 }
 0x557   :  { %v15082_v39 = vadd.f32 %v7837_v10, %v16353_v24  ;;  %v7839_v62 = vadd.f32 %v7838_v58, %v14904_v38 }
 0x558   :  { %v7840_v46 = vpop.f32.mrf.mxu1  ;;  %v15085_v15 = vpop.f32.mrf.mxu0 }
 0x559   :  { %16354 = vst [vmem:[#allocation111_spill] sm:$0xff] %v15082_v39  ;;  %v15088_v20 = vadd.f32 %v7839_v62, %v16355_v44  ;;  %v7841_v9 = vadd.f32 %v7840_v46, %v14910_v42  ;;  %v16360_v39 = vld [vmem:[#allocation129_spill] sm:$0xff]  ;;  %v15106_v62 = vld [vmem:[#allocation7 + $0xc] sm:$0xf] }
 0x55a   :  { %v15091_v35 = vpop.f32.mrf.mxu1  ;;  %v15093_v57 = vpop.f32.mrf.mxu0 }
 0x55b   :  { %16356 = vst [vmem:[#allocation113_spill] sm:$0xff] %v15088_v20  ;;  %16357 = vst [vmem:[#allocation114_spill] sm:$0xff] %v15091_v35  ;;  %v15096_v54 = vadd.f32 %v7841_v9, %v16358_v29  ;;  %v16362_v9 = vld [vmem:[#allocation130_spill] sm:$0xff]  ;;  %v16364_v35 = vld [vmem:[#allocation48_spill] sm:$0xff] }
 0x55c   :  { %v7846_v2 = vpop.f32.mrf.mxu1  ;;  %v15098_v24 = vpop.f32.mrf.mxu0 }
 0x55d   :  { %16359 = vst [vmem:[#allocation115_spill] sm:$0xff] %v15096_v54  ;;  %v7847_v38 = vadd.f32 %v7846_v2, %v14923_v56  ;;  %v15117_v2 = vrot.slane %v15106_v62, %v16364_v35 }
 0x55e   :  { %v7848_v10 = vpop.f32.mrf.mxu1  ;;  %v15101_v58 = vpop.f32.mrf.mxu0 }
 0x55f   :  { %v15104_v44 = vadd.f32 %v7847_v38, %v16360_v39  ;;  %v7849_v42 = vadd.f32 %v7848_v10, %v14927_v4  ;;  %v16366_v38 = vld [vmem:[#allocation49_spill] sm:$0xff]  ;;  %v16367_v4 = vld [vmem:[#allocation131_spill] sm:$0xff] }
 0x560   :  { %v7850_v46 = vpop.f32.mrf.mxu1  ;;  %v15109_v20 = vpop.f32.mrf.mxu0 }
 0x561   :  { %16361 = vst [vmem:[#allocation117_spill] sm:$0xff] %v15104_v44  ;;  %v15112_v29 = vadd.f32 %v7849_v42, %v16362_v9  ;;  %v7851_v54 = vadd.f32 %v7850_v46, %v14933_v52  ;;  %v15125_v44 = vrot.slane %v15106_v62, %v16366_v38  ;;  %v8744_v52 = vadd.f32 %v14947_v25, %v15117_v2 }
 0x562   :  { %v15119_v56 = vpop.f32.mrf.mxu1  ;;  %v15121_v39 = vpop.f32.mrf.mxu0 }
 0x563   :  { %16363 = vst [vmem:[#allocation118_spill] sm:$0xff] %v15112_v29  ;;  %16365 = vst [vmem:[#allocation119_spill] sm:$0xff] %v15119_v56  ;;  %v15128_v10 = vadd.f32 %v7851_v54, %v16367_v4  ;;  %v8746_v29 = vadd.f32 %v14953_v21, %v15125_v44  ;;  %v8748_v56 = vadd.f32 %v14961_v41, %v15117_v2 }
 0x564   :  { %v8856_v28 = vpop.f32.mrf.mxu1  ;;  %v15130_v42 = vpop.f32.mrf.mxu0  ;;  %v8750_v54 = vadd.f32 %v14966_v14, %v15125_v44  ;;  %v8754_v41 = vadd.f32 %v14969_v27, %v15117_v2  ;;  %v8756_v14 = vadd.f32 %v14975_v33, %v15125_v44 }
 0x565   :  { %16368 = vst [vmem:[#allocation121_spill] sm:$0xff] %v15128_v10  ;;  %v8857_v23 = vadd.f32 %v8856_v28, %v8744_v52  ;;  %v8758_v28 = vadd.f32 %v14983_v18, %v15117_v2  ;;  %v12443_v18 = vld [vmem:[#allocation8 + $0xcc8] ss:$16 sps:$4 sm:$0xff]  }
 0x566   :  { %v8858_v46 = vpop.f32.mrf.mxu1  ;;  %v15134_v9 = vpop.f32.mrf.mxu0 }
 0x567   :  { %v8859_v4 = vadd.f32 %v8858_v46, %v8746_v29  ;;  %v9161_v6 = vmax.f32 %v8857_v23, 0.0  ;;  %v8760_v23 = vadd.f32 %v14988_v50, %v15125_v44 }
 0x568   :  { %v8860_v19 = vpop.f32.mrf.mxu1  ;;  %v15140_v12 = vpop.f32.mrf.mxu0 }
 0x569   :  { %v8861_v10 = vadd.f32 %v8860_v19, %v8748_v56  ;;  %v9162_v26 = vmax.f32 %v8859_v4, 0.0 }
 0x56a   :  { %v8862_v51 = vpop.f32.mrf.mxu1  ;;  %v15144_v25 = vpop.f32.mrf.mxu0 }
 0x56b   :  { %v8863_v8 = vadd.f32 %v8862_v51, %v8750_v54  ;;  %v9165_v40 = vmax.f32 %v8861_v10, 0.0  ;;  %v12437_v51 = vld [vmem:[#allocation8 + $0xce8] ss:$16 sps:$4 sm:$0xff]   ;;  %v12451_v54 = vld [vmem:[#allocation8 + $0xcac] ss:$16 sps:$4 sm:$0xff]  }
 0x56c   :  { %v8866_v36 = vpop.f32.mrf.mxu1  ;;  %v15148_v34 = vpop.f32.mrf.mxu0 }
 0x56d   :  { %v9166_v21 = vmax.f32 %v8863_v8, 0.0  ;;  %v15156_v29 = vpack.c.bf16 %v9165_v40, %v9161_v6  ;;  %v12445_v8 = vld [vmem:[#allocation8 + $0xccc] ss:$16 sps:$4 sm:$0xff]   ;;  %v8867_v52 = vadd.f32 %v8866_v36, %v8754_v41  ;;  %v8766_v41 = vadd.f32 %v14997_v63, %v15125_v44 }
 0x56e   :  { %v8868_v55 = vpop.f32.mrf.mxu1  ;;  %v15162_v33 = vpop.f32.mrf.mxu0 }
 0x56f   :  { %v15154_v19 = vpack.c.bf16 %v9166_v21, %v9162_v26  ;;  %v8869_v27 = vadd.f32 %v8868_v55, %v8756_v14  ;;  %v9169_v50 = vmax.f32 %v8867_v52, 0.0  ;;  %v8764_v55 = vadd.f32 %v14991_v3, %v15117_v2 }
 0x570   :  { %v8870_v56 = vpop.f32.mrf.mxu1  ;;  %v15166_v36 = vpop.f32.mrf.mxu0  ;;  %v8770_v3 = vadd.f32 %v15010_v16, %v15125_v44 }
 0x571   :  { %v8871_v10 = vadd.f32 %v8870_v56, %v8758_v28  ;;  %10057 = vmatprep.mubr.bf16.mxu0 %v15154_v19  ;;  %v9170_v4 = vmax.f32 %v8869_v27, 0.0  ;;  %v8768_v28 = vadd.f32 %v15005_v0, %v15117_v2  ;;  %v12449_v56 = vld [vmem:[#allocation8 + $0xca8] ss:$16 sps:$4 sm:$0xff]   ;;  %v12457_v27 = vld [vmem:[#allocation8 + $0xc8c] ss:$16 sps:$4 sm:$0xff]  }
 0x572   :  { %v8872_v46 = vpop.f32.mrf.mxu1  ;;  %10058 = vmatmul.mubr.bf16.vlgmr.msra.gmra.mxu0 %v15156_v29  ;;  %v15180_v0 = vpop.f32.mrf.mxu0 }
 0x573   :  { %v8873_v26 = vadd.f32 %v8872_v46, %v8760_v23  ;;  %10252 = vmatpush1.bf16.msra.mxu0 %v12437_v51  ;;  %v9173_v6 = vmax.f32 %v8871_v10, 0.0 }
 0x574   :  { %v8876_v40 = vpop.f32.mrf.mxu1  ;;  %10253 = vmatprep.subr.bf16.mxu0 %v12445_v8 }
 0x575   :  { %v9174_v21 = vmax.f32 %v8873_v26, 0.0  ;;  %v15174_v8 = vpack.c.bf16 %v9173_v6, %v9169_v50  ;;  %v8877_v63 = vadd.f32 %v8876_v40, %v8764_v55  ;;  %v15184_v40 = vpop.f32.mrf.mxu0  ;;  %v8776_v55 = vadd.f32 %v15019_v59, %v15125_v44 }
 0x576   :  { %v8878_v14 = vpop.f32.mrf.mxu1 }
 0x577   :  { %10254 = vmatpush1.bf16.msra.mxu0 %v12443_v18  ;;  %v15172_v51 = vpack.c.bf16 %v9174_v21, %v9170_v4  ;;  %v8879_v10 = vadd.f32 %v8878_v14, %v8766_v41  ;;  %v12455_v18 = vld [vmem:[#allocation8 + $0xc88] ss:$16 sps:$4 sm:$0xff]   ;;  %v9177_v16 = vmax.f32 %v8877_v63, 0.0  ;;  %v8774_v14 = vadd.f32 %v15013_v47, %v15117_v2 }
 0x578   :  { %v8880_v23 = vpop.f32.mrf.mxu1  ;;  %10255 = vmatprep.subr.bf16.mxu0 %v12451_v54  ;;  %v12463_v54 = vld [vmem:[#allocation8 + $0xc6c] ss:$16 sps:$4 sm:$0xff]   ;;  %v8780_v47 = vadd.f32 %v15032_v22, %v15125_v44 }
 0x579   :  { %v8881_v52 = vadd.f32 %v8880_v23, %v8768_v28  ;;  %10067 = vmatprep.mubr.bf16.mxu0 %v15172_v51  ;;  %v9178_v21 = vmax.f32 %v8879_v10, 0.0  ;;  %v8778_v28 = vadd.f32 %v15027_v49, %v15117_v2  ;;  %v12461_v23 = vld [vmem:[#allocation8 + $0xc68] ss:$16 sps:$4 sm:$0xff]   ;;  %v12469_v10 = vld [vmem:[#allocation8 + $0xc4c] ss:$16 sps:$4 sm:$0xff]   ;;  %v15198_v49 = vpop.f32.mrf.mxu0 }
 0x57a   :  { %v8882_v46 = vpop.f32.mrf.mxu1  ;;  %10068 = vmatmul.mubr.bf16.gmra.mxu0 %v15174_v8 }
 0x57b   :  { %v8883_v26 = vadd.f32 %v8882_v46, %v8770_v3  ;;  %10256 = vmatpush1.bf16.msra.mxu0 %v12449_v56  ;;  %v9181_v6 = vmax.f32 %v8881_v52, 0.0 }
 0x57c   :  { %v8886_v4 = vpop.f32.mrf.mxu1  ;;  %10257 = vmatprep.subr.bf16.mxu0 %v12457_v27 }
 0x57d   :  { %v9182_v50 = vmax.f32 %v8883_v26, 0.0  ;;  %v15192_v27 = vpack.c.bf16 %v9181_v6, %v9177_v16  ;;  %v8887_v59 = vadd.f32 %v8886_v4, %v8774_v14  ;;  %v15202_v4 = vpop.f32.mrf.mxu0  ;;  %v8786_v14 = vadd.f32 %v15041_v17, %v15125_v44 }
 0x57e   :  { %v8888_v41 = vpop.f32.mrf.mxu1 }
 0x57f   :  { %10258 = vmatpush1.bf16.msra.mxu0 %v12455_v18  ;;  %v15190_v56 = vpack.c.bf16 %v9182_v50, %v9178_v21  ;;  %v8889_v52 = vadd.f32 %v8888_v41, %v8776_v55  ;;  %v12467_v18 = vld [vmem:[#allocation8 + $0xc48] ss:$16 sps:$4 sm:$0xff]   ;;  %v9185_v22 = vmax.f32 %v8887_v59, 0.0  ;;  %v8784_v41 = vadd.f32 %v15035_v48, %v15117_v2 }
 0x580   :  { %v8890_v3 = vpop.f32.mrf.mxu1  ;;  %10259 = vmatprep.subr.bf16.mxu0 %v12463_v54  ;;  %v12475_v54 = vld [vmem:[#allocation8 + $0xc2c] ss:$16 sps:$4 sm:$0xff]   ;;  %v8790_v48 = vadd.f32 %v15054_v37, %v15125_v44 }
 0x581   :  { %v8891_v63 = vadd.f32 %v8890_v3, %v8778_v28  ;;  %10077 = vmatprep.mubr.bf16.mxu0 %v15190_v56  ;;  %v9186_v50 = vmax.f32 %v8889_v52, 0.0  ;;  %v8788_v28 = vadd.f32 %v15049_v32, %v15117_v2  ;;  %v12473_v3 = vld [vmem:[#allocation8 + $0xc28] ss:$16 sps:$4 sm:$0xff]   ;;  %v12481_v52 = vld [vmem:[#allocation8 + $0xc0c] ss:$16 sps:$4 sm:$0xff]   ;;  %v15216_v32 = vpop.f32.mrf.mxu0 }
 0x582   :  { %v8892_v46 = vpop.f32.mrf.mxu1  ;;  %10078 = vmatmul.mubr.bf16.gmra.mxu0 %v15192_v27 }
 0x583   :  { %v8893_v26 = vadd.f32 %v8892_v46, %v8780_v47  ;;  %10260 = vmatpush1.bf16.msra.mxu0 %v12461_v23  ;;  %v9189_v6 = vmax.f32 %v8891_v63, 0.0 }
 0x584   :  { %v8896_v21 = vpop.f32.mrf.mxu1  ;;  %10261 = vmatprep.subr.bf16.mxu0 %v12469_v10 }
 0x585   :  { %v9190_v16 = vmax.f32 %v8893_v26, 0.0  ;;  %v15210_v10 = vpack.c.bf16 %v9189_v6, %v9185_v22  ;;  %v8897_v17 = vadd.f32 %v8896_v21, %v8784_v41  ;;  %v15220_v21 = vpop.f32.mrf.mxu0  ;;  %v8796_v41 = vadd.f32 %v15063_v30, %v15125_v44 }
 0x586   :  { %v8898_v55 = vpop.f32.mrf.mxu1 }
 0x587   :  { %10262 = vmatpush1.bf16.msra.mxu0 %v12467_v18  ;;  %v15208_v23 = vpack.c.bf16 %v9190_v16, %v9186_v50  ;;  %v8899_v63 = vadd.f32 %v8898_v55, %v8786_v14  ;;  %v12479_v18 = vld [vmem:[#allocation8 + $0xc08] ss:$16 sps:$4 sm:$0xff]   ;;  %v9193_v37 = vmax.f32 %v8897_v17, 0.0  ;;  %v8794_v55 = vadd.f32 %v15057_v45, %v15117_v2 }
 0x588   :  { %v8900_v47 = vpop.f32.mrf.mxu1  ;;  %10263 = vmatprep.subr.bf16.mxu0 %v12475_v54  ;;  %v12487_v54 = vld [vmem:[#allocation8 + $0xdec] ss:$16 sps:$4 sm:$0xff]   ;;  %v8800_v45 = vadd.f32 %v15076_v61, %v15125_v44 }
 0x589   :  { %v8901_v59 = vadd.f32 %v8900_v47, %v8788_v28  ;;  %10087 = vmatprep.mubr.bf16.mxu0 %v15208_v23  ;;  %v9194_v16 = vmax.f32 %v8899_v63, 0.0  ;;  %v8798_v28 = vadd.f32 %v15071_v7, %v15117_v2  ;;  %v12485_v47 = vld [vmem:[#allocation8 + $0xde8] ss:$16 sps:$4 sm:$0xff]   ;;  %v12493_v63 = vld [vmem:[#allocation8 + $0xdcc] ss:$16 sps:$4 sm:$0xff]   ;;  %v15234_v7 = vpop.f32.mrf.mxu0 }
 0x58a   :  { %v8902_v46 = vpop.f32.mrf.mxu1  ;;  %10088 = vmatmul.mubr.bf16.gmra.mxu0 %v15210_v10 }
 0x58b   :  { %v8903_v26 = vadd.f32 %v8902_v46, %v8790_v48  ;;  %10264 = vmatpush1.bf16.msra.mxu0 %v12473_v3  ;;  %v9197_v6 = vmax.f32 %v8901_v59, 0.0 }
 0x58c   :  { %v8906_v50 = vpop.f32.mrf.mxu1  ;;  %10265 = vmatprep.subr.bf16.mxu0 %v12481_v52 }
 0x58d   :  { %v9198_v22 = vmax.f32 %v8903_v26, 0.0  ;;  %v15228_v52 = vpack.c.bf16 %v9197_v6, %v9193_v37  ;;  %v8907_v30 = vadd.f32 %v8906_v50, %v8794_v55  ;;  %v15238_v50 = vpop.f32.mrf.mxu0  ;;  %v8806_v55 = vadd.f32 %v15085_v15, %v15125_v44 }
 0x58e   :  { %v8908_v14 = vpop.f32.mrf.mxu1 }
 0x58f   :  { %v15226_v3 = vpack.c.bf16 %v9198_v22, %v9194_v16  ;;  %10266 = vmatpush1.bf16.msra.mxu0 %v12479_v18  ;;  %v8909_v59 = vadd.f32 %v8908_v14, %v8796_v41  ;;  %v12491_v18 = vld [vmem:[#allocation8 + $0xdc8] ss:$16 sps:$4 sm:$0xff]   ;;  %v9201_v61 = vmax.f32 %v8907_v30, 0.0  ;;  %v8804_v14 = vadd.f32 %v15079_v31, %v15117_v2 }
 0x590   :  { %v8910_v48 = vpop.f32.mrf.mxu1  ;;  %10267 = vmatprep.subr.bf16.mxu0 %v12487_v54  ;;  %v12499_v54 = vld [vmem:[#allocation8 + $0xdac] ss:$16 sps:$4 sm:$0xff]   ;;  %v8810_v31 = vadd.f32 %v15098_v24, %v15125_v44 }
 0x591   :  { %v8911_v17 = vadd.f32 %v8910_v48, %v8798_v28  ;;  %10097 = vmatprep.mubr.bf16.mxu0 %v15226_v3  ;;  %v9202_v22 = vmax.f32 %v8909_v59, 0.0  ;;  %v8808_v28 = vadd.f32 %v15093_v57, %v15117_v2  ;;  %v12497_v48 = vld [vmem:[#allocation8 + $0xda8] ss:$16 sps:$4 sm:$0xff]   ;;  %v12505_v59 = vld [vmem:[#allocation8 + $0xd8c] ss:$16 sps:$4 sm:$0xff]   ;;  %v15252_v57 = vpop.f32.mrf.mxu0 }
 0x592   :  { %v8912_v46 = vpop.f32.mrf.mxu1  ;;  %10098 = vmatmul.mubr.bf16.gmra.mxu0 %v15228_v52 }
 0x593   :  { %v8913_v26 = vadd.f32 %v8912_v46, %v8800_v45  ;;  %10268 = vmatpush2.bf16.msra.mxu0 %v12485_v47  ;;  %v9205_v6 = vmax.f32 %v8911_v17, 0.0 }
 0x594   :  { %v8916_v16 = vpop.f32.mrf.mxu1  ;;  %10269 = vmatprep.subr.bf16.mxu0 %v12493_v63 }
 0x595   :  { %v9206_v37 = vmax.f32 %v8913_v26, 0.0  ;;  %v15246_v63 = vpack.c.bf16 %v9205_v6, %v9201_v61  ;;  %v8917_v15 = vadd.f32 %v8916_v16, %v8804_v14  ;;  %v15256_v16 = vpop.f32.mrf.mxu0  ;;  %v8816_v14 = vadd.f32 %v15109_v20, %v15125_v44 }
 0x596   :  { %v8918_v41 = vpop.f32.mrf.mxu1 }
 0x597   :  { %v15244_v47 = vpack.c.bf16 %v9206_v37, %v9202_v22  ;;  %10270 = vmatpush2.bf16.msra.mxu0 %v12491_v18  ;;  %v8919_v17 = vadd.f32 %v8918_v41, %v8806_v55  ;;  %v12503_v18 = vld [vmem:[#allocation8 + $0xd88] ss:$16 sps:$4 sm:$0xff]   ;;  %v9209_v24 = vmax.f32 %v8917_v15, 0.0  ;;  %v8814_v41 = vadd.f32 %v15101_v58, %v15117_v2 }
 0x598   :  { %v8920_v45 = vpop.f32.mrf.mxu1  ;;  %10271 = vmatprep.subr.bf16.mxu0 %v12499_v54  ;;  %v12511_v54 = vld [vmem:[#allocation8 + $0xd6c] ss:$16 sps:$4 sm:$0xff]   ;;  %v8820_v58 = vadd.f32 %v15130_v42, %v15125_v44  ;;  %v12515_v44 = vld [vmem:[#allocation8 + $0xd48] ss:$16 sps:$4 sm:$0xff]  }
 0x599   :  { %v8921_v30 = vadd.f32 %v8920_v45, %v8808_v28  ;;  %10107 = vmatprep.mubr.bf16.mxu0 %v15244_v47  ;;  %v9210_v37 = vmax.f32 %v8919_v17, 0.0  ;;  %v8818_v28 = vadd.f32 %v15121_v39, %v15117_v2  ;;  %v12509_v45 = vld [vmem:[#allocation8 + $0xd68] ss:$16 sps:$4 sm:$0xff]   ;;  %v12517_v17 = vld [vmem:[#allocation8 + $0xd4c] ss:$16 sps:$4 sm:$0xff]  }
 0x59a   :  { %v8922_v46 = vpop.f32.mrf.mxu1  ;;  %10108 = vmatmul.mubr.bf16.gmra.mxu0 %v15246_v63 }
 0x59b   :  { %v8923_v26 = vadd.f32 %v8922_v46, %v8810_v31  ;;  %10272 = vmatpush2.bf16.msra.mxu0 %v12497_v48  ;;  %v9213_v6 = vmax.f32 %v8921_v30, 0.0  ;;  %v16369_v46 = vld [vmem:[#allocation50_spill] sm:$0xff] }
 0x59c   :  { %v8926_v22 = vpop.f32.mrf.mxu1  ;;  %10273 = vmatprep.subr.bf16.mxu0 %v12505_v59  ;;  %v15271_v2 = vrot.slane %v15106_v62, %v16369_v46 }
 0x59d   :  { %v9214_v61 = vmax.f32 %v8923_v26, 0.0  ;;  %v15264_v59 = vpack.c.bf16 %v9213_v6, %v9209_v24  ;;  %v8927_v20 = vadd.f32 %v8926_v22, %v8814_v41  ;;  %v15274_v26 = vpop.f32.mrf.mxu0  ;;  %v12523_v22 = vld [vmem:[#allocation8 + $0xd2c] ss:$16 sps:$4 sm:$0xff]  }
 0x59e   :  { %v8928_v55 = vpop.f32.mrf.mxu1 }
 0x59f   :  { %v15262_v48 = vpack.c.bf16 %v9214_v61, %v9210_v37  ;;  %10274 = vmatpush2.bf16.msra.mxu0 %v12503_v18  ;;  %v8929_v30 = vadd.f32 %v8928_v55, %v8816_v14  ;;  %v16370_v18 = vld [vmem:[#allocation52_spill] sm:$0xff]  ;;  %v9217_v41 = vmax.f32 %v8927_v20, 0.0  ;;  %v8970_v55 = vadd.f32 %v15134_v9, %v15271_v2 }
 0x5a0   :  { %v8930_v31 = vpop.f32.mrf.mxu1  ;;  %10275 = vmatprep.subr.bf16.mxu0 %v12511_v54  ;;  %v15278_v6 = vrot.slane %v15106_v62, %v16370_v18 }
 0x5a1   :  { %v8931_v15 = vadd.f32 %v8930_v31, %v8818_v28  ;;  %10117 = vmatprep.mubr.bf16.mxu0 %v15262_v48  ;;  %v9218_v61 = vmax.f32 %v8929_v30, 0.0  ;;  %v15282_v28 = vpop.f32.mrf.mxu0 }
 0x5a2   :  { %v8932_v39 = vpop.f32.mrf.mxu1  ;;  %10118 = vmatmul.mubr.bf16.gmra.mxu0 %v15264_v59  ;;  %v8972_v62 = vadd.f32 %v15140_v12, %v15278_v6  ;;  %v8976_v9 = vadd.f32 %v15148_v34, %v15278_v6 }
 0x5a3   :  { %v8933_v54 = vadd.f32 %v8932_v39, %v8820_v58  ;;  %10276 = vmatpush2.bf16.msra.mxu0 %v12509_v45  ;;  %v9221_v42 = vmax.f32 %v8931_v15, 0.0  ;;  %v8974_v45 = vadd.f32 %v15144_v25, %v15271_v2  ;;  %v12529_v15 = vld [vmem:[#allocation8 + $0xd0c] ss:$16 sps:$4 sm:$0xff]   ;;  %v15296_v25 = vpop.f32.mrf.mxu0 }
 0x5a4   :  { %v9082_v37 = vpop.f32.mrf.mxu1  ;;  %10277 = vmatprep.subr.bf16.mxu0 %v12517_v17  ;;  %v12521_v17 = vld [vmem:[#allocation8 + $0xd28] ss:$16 sps:$4 sm:$0xff]  }
 0x5a5   :  { %v9222_v24 = vmax.f32 %v8933_v54, 0.0  ;;  %v15290_v58 = vpack.c.bf16 %v9221_v42, %v9217_v41  ;;  %v9083_v12 = vadd.f32 %v9082_v37, %v8970_v55  ;;  %v12527_v42 = vld [vmem:[#allocation8 + $0xd08] ss:$16 sps:$4 sm:$0xff]   ;;  %v15301_v55 = vpop.f32.mrf.mxu0 }
 0x5a6   :  { %v9084_v14 = vpop.f32.mrf.mxu1 }
 0x5a7   :  { %v15288_v31 = vpack.c.bf16 %v9222_v24, %v9218_v61  ;;  %10278 = vmatpush2.bf16.msra.mxu0 %v12515_v44  ;;  %v9085_v20 = vadd.f32 %v9084_v14, %v8972_v62  ;;  %v9163_v41 = vmax.f32 %v9083_v12, 0.0  ;;  %v8980_v14 = vadd.f32 %v15162_v33, %v15271_v2 }
 0x5a8   :  { %v9086_v30 = vpop.f32.mrf.mxu1  ;;  %10279 = vmatprep.subr.bf16.mxu0 %v12523_v22  ;;  %v8982_v62 = vadd.f32 %v15166_v36, %v15278_v6  ;;  %v8986_v33 = vadd.f32 %v15184_v40, %v15278_v6  ;;  %v12538_v40 = vld [vmem:[#allocation8 + $0xeac] ss:$16 sps:$4 sm:$0xff]  }
 0x5a9   :  { %v9087_v39 = vadd.f32 %v9086_v30, %v8974_v45  ;;  %10127 = vmatprep.mubr.bf16.mxu0 %v15288_v31  ;;  %v9164_v24 = vmax.f32 %v9085_v20, 0.0  ;;  %v8984_v45 = vadd.f32 %v15180_v0, %v15271_v2  ;;  %v15316_v0 = vpop.f32.mrf.mxu0 }
 0x5aa   :  { %v9088_v54 = vpop.f32.mrf.mxu1  ;;  %10128 = vmatmul.mubr.bf16.gmra.mxu0 %v15290_v58 }
 0x5ab   :  { %v9089_v44 = vadd.f32 %v9088_v54, %v8976_v9  ;;  %10280 = vmatpush2.bf16.msra.mxu0 %v12521_v17  ;;  %10283 = vmatprep.mubr.bf16.mxu0 %v15154_v19  ;;  %v9167_v22 = vmax.f32 %v9087_v39, 0.0  ;;  %v12530_v17 = vld [vmem:[#allocation8 + $0xee8] ss:$16 sps:$4 sm:$0xff]   ;;  %v12535_v9 = vld [vmem:[#allocation8 + $0xecc] ss:$16 sps:$4 sm:$0xff]  }
 0x5ac   :  { %v9092_v61 = vpop.f32.mrf.mxu1  ;;  %10281 = vmatprep.subr.bf16.mxu0 %v12529_v15 }
 0x5ad   :  { %v9168_v34 = vmax.f32 %v9089_v44, 0.0  ;;  %v15309_v30 = vpack.c.bf16 %v9167_v22, %v9163_v41  ;;  %v9093_v12 = vadd.f32 %v9092_v61, %v8980_v14  ;;  %v12533_v44 = vld [vmem:[#allocation8 + $0xec8] ss:$16 sps:$4 sm:$0xff]   ;;  %v8990_v61 = vadd.f32 %v15198_v49, %v15271_v2 }
 0x5ae   :  { %v9094_v37 = vpop.f32.mrf.mxu1  ;;  %v8996_v49 = vadd.f32 %v15220_v21, %v15278_v6  ;;  %v12544_v21 = vld [vmem:[#allocation8 + $0xe6c] ss:$16 sps:$4 sm:$0xff]  }
 0x5af   :  { %v15307_v19 = vpack.c.bf16 %v9168_v34, %v9164_v24  ;;  %10282 = vmatpush2.bf16.msra.mxu0 %v12527_v42  ;;  %v9095_v20 = vadd.f32 %v9094_v37, %v8982_v62  ;;  %v9171_v41 = vmax.f32 %v9093_v12, 0.0  ;;  %v15321_v37 = vpop.f32.mrf.mxu0 }
 0x5b0   :  { %v9096_v15 = vpop.f32.mrf.mxu1 }
 0x5b1   :  { %v9097_v39 = vadd.f32 %v9096_v15, %v8984_v45  ;;  %10170 = vmatprep.mubr.bf16.mxu1 %v15307_v19  ;;  %v9172_v24 = vmax.f32 %v9095_v20, 0.0  ;;  %v12536_v45 = vld [vmem:[#allocation8 + $0xea8] ss:$16 sps:$4 sm:$0xff]  }
 0x5b2   :  { %v9098_v36 = vpop.f32.mrf.mxu1  ;;  %10171 = vmatmul.mubr.bf16.vlgmr.msra.gmra.mxu1 %v15309_v30  ;;  %10284 = vmatmul.mubr.bf16.vlgmr.msra.gmra.mxu0 %v15156_v29  ;;  %v8992_v29 = vadd.f32 %v15202_v4, %v15278_v6 }
 0x5b3   :  { %v9099_v54 = vadd.f32 %v9098_v36, %v8986_v33  ;;  %10293 = vmatprep.mubr.bf16.mxu0 %v15172_v51  ;;  %10365 = vmatpush1.bf16.msra.mxu1 %v12530_v17  ;;  %v9175_v42 = vmax.f32 %v9097_v39, 0.0  ;;  %v8994_v51 = vadd.f32 %v15216_v32, %v15271_v2  ;;  %v15336_v32 = vpop.f32.mrf.mxu0  ;;  %v12539_v36 = vld [vmem:[#allocation8 + $0xe88] ss:$16 sps:$4 sm:$0xff]  }
 0x5b4   :  { %v9102_v22 = vpop.f32.mrf.mxu1  ;;  %10366 = vmatprep.subr.bf16.mxu1 %v12535_v9  ;;  %v12541_v9 = vld [vmem:[#allocation8 + $0xe8c] ss:$16 sps:$4 sm:$0xff]  }
 0x5b5   :  { %v9176_v34 = vmax.f32 %v9099_v54, 0.0  ;;  %v15329_v17 = vpack.c.bf16 %v9175_v42, %v9171_v41  ;;  %v9103_v4 = vadd.f32 %v9102_v22, %v8990_v61  ;;  %v9000_v22 = vadd.f32 %v15234_v7, %v15271_v2  ;;  %v15341_v41 = vpop.f32.mrf.mxu0 }
 0x5b6   :  { %v9104_v14 = vpop.f32.mrf.mxu1  ;;  %v9006_v7 = vadd.f32 %v15256_v16, %v15278_v6  ;;  %v12550_v16 = vld [vmem:[#allocation8 + $0xe2c] ss:$16 sps:$4 sm:$0xff]  }
 0x5b7   :  { %v15327_v62 = vpack.c.bf16 %v9176_v34, %v9172_v24  ;;  %10367 = vmatpush1.bf16.msra.mxu1 %v12533_v44  ;;  %v9105_v33 = vadd.f32 %v9104_v14, %v8992_v29  ;;  %v9179_v24 = vmax.f32 %v9103_v4, 0.0  ;;  %v12542_v14 = vld [vmem:[#allocation8 + $0xe68] ss:$16 sps:$4 sm:$0xff]  }
 0x5b8   :  { %v9106_v15 = vpop.f32.mrf.mxu1  ;;  %10368 = vmatprep.subr.bf16.mxu1 %v12538_v40 }
 0x5b9   :  { %v9107_v20 = vadd.f32 %v9106_v15, %v8994_v51  ;;  %10180 = vmatprep.mubr.bf16.mxu1 %v15327_v62  ;;  %v9180_v42 = vmax.f32 %v9105_v33, 0.0 }
 0x5ba   :  { %v9108_v39 = vpop.f32.mrf.mxu1  ;;  %10181 = vmatmul.mubr.bf16.gmra.mxu1 %v15329_v17  ;;  %10294 = vmatmul.mubr.bf16.gmra.mxu0 %v15174_v8  ;;  %v9002_v8 = vadd.f32 %v15238_v50, %v15278_v6 }
 0x5bb   :  { %v9109_v12 = vadd.f32 %v9108_v39, %v8996_v49  ;;  %10303 = vmatprep.mubr.bf16.mxu0 %v15190_v56  ;;  %10369 = vmatpush1.bf16.msra.mxu1 %v12536_v45  ;;  %v9183_v54 = vmax.f32 %v9107_v20, 0.0  ;;  %v9004_v56 = vadd.f32 %v15252_v57, %v15271_v2  ;;  %v12547_v45 = vld [vmem:[#allocation8 + $0xe4c] ss:$16 sps:$4 sm:$0xff]   ;;  %v15356_v57 = vpop.f32.mrf.mxu0  ;;  %v12545_v20 = vld [vmem:[#allocation8 + $0xe48] ss:$16 sps:$4 sm:$0xff]  }
 0x5bc   :  { %v9112_v44 = vpop.f32.mrf.mxu1  ;;  %10370 = vmatprep.subr.bf16.mxu1 %v12541_v9 }
 0x5bd   :  { %v9184_v40 = vmax.f32 %v9109_v12, 0.0  ;;  %v15349_v29 = vpack.c.bf16 %v9183_v54, %v9179_v24  ;;  %v9113_v50 = vadd.f32 %v9112_v44, %v9000_v22  ;;  %v9010_v44 = vadd.f32 %v15274_v26, %v15271_v2  ;;  %v12548_v24 = vld [vmem:[#allocation8 + $0xe28] ss:$16 sps:$4 sm:$0xff]  }
 0x5be   :  { %v9114_v34 = vpop.f32.mrf.mxu1  ;;  %v9016_v26 = vadd.f32 %v15301_v55, %v15278_v6  ;;  %v12556_v55 = vld [vmem:[#allocation8 + $0xfec] ss:$16 sps:$4 sm:$0xff]  }
 0x5bf   :  { %v15347_v61 = vpack.c.bf16 %v9184_v40, %v9180_v42  ;;  %10371 = vmatpush1.bf16.msra.mxu1 %v12539_v36  ;;  %v9115_v15 = vadd.f32 %v9114_v34, %v9002_v8  ;;  %v9187_v54 = vmax.f32 %v9113_v50, 0.0  ;;  %v15361_v42 = vpop.f32.mrf.mxu0  ;;  %v12553_v8 = vld [vmem:[#allocation8 + $0xe0c] ss:$16 sps:$4 sm:$0xff]  }
 0x5c0   :  { %v9116_v51 = vpop.f32.mrf.mxu1  ;;  %10372 = vmatprep.subr.bf16.mxu1 %v12544_v21 }
 0x5c1   :  { %v9117_v9 = vadd.f32 %v9116_v51, %v9004_v56  ;;  %10190 = vmatprep.mubr.bf16.mxu1 %v15347_v61  ;;  %v9188_v12 = vmax.f32 %v9115_v15, 0.0 }
 0x5c2   :  { %v9118_v49 = vpop.f32.mrf.mxu1  ;;  %10191 = vmatmul.mubr.bf16.gmra.mxu1 %v15349_v29  ;;  %10304 = vmatmul.mubr.bf16.gmra.mxu0 %v15192_v27  ;;  %v9012_v27 = vadd.f32 %v15282_v28, %v15278_v6 }
 0x5c3   :  { %v9119_v33 = vadd.f32 %v9118_v49, %v9006_v7  ;;  %10313 = vmatprep.mubr.bf16.mxu0 %v15208_v23  ;;  %10373 = vmatpush1.bf16.msra.mxu1 %v12542_v14  ;;  %v9191_v4 = vmax.f32 %v9117_v9, 0.0  ;;  %v9014_v23 = vadd.f32 %v15296_v25, %v15271_v2  ;;  %v9033_v25 = vpop.f32.mrf.mxu0  ;;  %v12551_v7 = vld [vmem:[#allocation8 + $0xe08] ss:$16 sps:$4 sm:$0xff]  }
 0x5c4   :  { %v9122_v39 = vpop.f32.mrf.mxu1  ;;  %10374 = vmatprep.subr.bf16.mxu1 %v12547_v45 }
 0x5c5   :  { %v9192_v36 = vmax.f32 %v9119_v33, 0.0  ;;  %v15369_v22 = vpack.c.bf16 %v9191_v4, %v9187_v54  ;;  %v9123_v28 = vadd.f32 %v9122_v39, %v9010_v44  ;;  %v9035_v39 = vpop.f32.mrf.mxu0  ;;  %v12559_v44 = vld [vmem:[#allocation8 + $0xfcc] ss:$16 sps:$4 sm:$0xff]  }
 0x5c6   :  { %v9124_v21 = vpop.f32.mrf.mxu1 }
 0x5c7   :  { %v15367_v40 = vpack.c.bf16 %v9192_v36, %v9188_v12  ;;  %10375 = vmatpush1.bf16.msra.mxu1 %v12545_v20  ;;  %v9125_v56 = vadd.f32 %v9124_v21, %v9012_v27  ;;  %v9195_v33 = vmax.f32 %v9123_v28, 0.0  ;;  %v9020_v20 = vadd.f32 %v15316_v0, %v15271_v2  ;;  %v12554_v12 = vld [vmem:[#allocation8 + $0xfe8] ss:$16 sps:$4 sm:$0xff]  }
 0x5c8   :  { %v9126_v34 = vpop.f32.mrf.mxu1  ;;  %10376 = vmatprep.subr.bf16.mxu1 %v12550_v16  ;;  %v9026_v0 = vadd.f32 %v15341_v41, %v15278_v6  ;;  %v12562_v41 = vld [vmem:[#allocation8 + $0xfac] ss:$16 sps:$4 sm:$0xff]  }
 0x5c9   :  { %v9127_v14 = vadd.f32 %v9126_v34, %v9014_v23  ;;  %10200 = vmatprep.mubr.bf16.mxu1 %v15367_v40  ;;  %v9196_v50 = vmax.f32 %v9125_v56, 0.0  ;;  %v12557_v34 = vld [vmem:[#allocation8 + $0xfc8] ss:$16 sps:$4 sm:$0xff]  }
 0x5ca   :  { %v9128_v51 = vpop.f32.mrf.mxu1  ;;  %10201 = vmatmul.mubr.bf16.gmra.mxu1 %v15369_v22  ;;  %10314 = vmatmul.mubr.bf16.gmra.mxu0 %v15210_v10  ;;  %v9022_v10 = vadd.f32 %v15321_v37, %v15278_v6 }
 0x5cb   :  { %v9129_v45 = vadd.f32 %v9128_v51, %v9016_v26  ;;  %10323 = vmatprep.mubr.bf16.mxu0 %v15226_v3  ;;  %10377 = vmatpush1.bf16.msra.mxu1 %v12548_v24  ;;  %v9199_v15 = vmax.f32 %v9127_v14, 0.0  ;;  %v9024_v3 = vadd.f32 %v15336_v32, %v15271_v2  ;;  %v9039_v32 = vpop.f32.mrf.mxu0  ;;  %v9030_v51 = vadd.f32 %v15356_v57, %v15271_v2 }
 0x5cc   :  { %v9132_v9 = vpop.f32.mrf.mxu1  ;;  %10378 = vmatprep.subr.bf16.mxu1 %v12553_v8 }
 0x5cd   :  { %v9200_v49 = vmax.f32 %v9129_v45, 0.0  ;;  %v15385_v36 = vpack.c.bf16 %v9199_v15, %v9195_v33  ;;  %v9133_v37 = vadd.f32 %v9132_v9, %v9020_v20  ;;  %v9034_v15 = vadd.f32 %v9033_v25, %v15271_v2  ;;  %v12560_v9 = vld [vmem:[#allocation8 + $0xfa8] ss:$16 sps:$4 sm:$0xff]  }
 0x5ce   :  { %v9134_v4 = vpop.f32.mrf.mxu1  ;;  %v9036_v33 = vadd.f32 %v9035_v39, %v15278_v6  ;;  %v12568_v39 = vld [vmem:[#allocation8 + $0xf6c] ss:$16 sps:$4 sm:$0xff]  }
 0x5cf   :  { %v15383_v16 = vpack.c.bf16 %v9200_v49, %v9196_v50  ;;  %10379 = vmatpush1.bf16.msra.mxu1 %v12551_v7  ;;  %v9135_v21 = vadd.f32 %v9134_v4, %v9022_v10  ;;  %v9203_v28 = vmax.f32 %v9133_v37, 0.0  ;;  %v9041_v7 = vpop.f32.mrf.mxu0  ;;  %v12565_v49 = vld [vmem:[#allocation8 + $0xf8c] ss:$16 sps:$4 sm:$0xff]  }
 0x5d0   :  { %v9136_v54 = vpop.f32.mrf.mxu1  ;;  %10380 = vmatprep.subr.bf16.mxu1 %v12556_v55 }
 0x5d1   :  { %v9137_v27 = vadd.f32 %v9136_v54, %v9024_v3  ;;  %10210 = vmatprep.mubr.bf16.mxu1 %v15383_v16  ;;  %v9204_v56 = vmax.f32 %v9135_v21, 0.0  ;;  %v9043_v10 = vpop.f32.mrf.mxu0  ;;  %v12563_v3 = vld [vmem:[#allocation8 + $0xf88] ss:$16 sps:$4 sm:$0xff]  }
 0x5d2   :  { %v9138_v23 = vpop.f32.mrf.mxu1  ;;  %10211 = vmatmul.mubr.bf16.gmra.mxu1 %v15385_v36  ;;  %10324 = vmatmul.mubr.bf16.gmra.mxu0 %v15228_v52  ;;  %v9032_v52 = vadd.f32 %v15361_v42, %v15278_v6 }
 0x5d3   :  { %v9139_v24 = vadd.f32 %v9138_v23, %v9026_v0  ;;  %10333 = vmatprep.mubr.bf16.mxu0 %v15244_v47  ;;  %10381 = vmatpush2.bf16.msra.mxu1 %v12554_v12  ;;  %v9207_v8 = vmax.f32 %v9137_v27, 0.0  ;;  %v9040_v27 = vadd.f32 %v9039_v32, %v15271_v2  ;;  %v9045_v37 = vpop.f32.mrf.mxu0 }
 0x5d4   :  { %v9142_v26 = vpop.f32.mrf.mxu1  ;;  %10382 = vmatprep.subr.bf16.mxu1 %v12559_v44 }
 0x5d5   :  { %v9208_v14 = vmax.f32 %v9139_v24, 0.0  ;;  %v15400_v55 = vpack.c.bf16 %v9207_v8, %v9203_v28  ;;  %v9143_v4 = vadd.f32 %v9142_v26, %v9030_v51  ;;  %v9042_v24 = vadd.f32 %v9041_v7, %v15278_v6 }
 0x5d6   :  { %v9144_v45 = vpop.f32.mrf.mxu1 }
 0x5d7   :  { %v15398_v47 = vpack.c.bf16 %v9208_v14, %v9204_v56  ;;  %10383 = vmatpush2.bf16.msra.mxu1 %v12557_v34  ;;  %v9145_v20 = vadd.f32 %v9144_v45, %v9032_v52  ;;  %v9211_v21 = vmax.f32 %v9143_v4, 0.0  ;;  %v9046_v56 = vadd.f32 %v9045_v37, %v15278_v6  ;;  %v12574_v52 = vld [vmem:[#allocation8 + $0xf2c] ss:$16 sps:$4 sm:$0xff]  }
 0x5d8   :  { %v9146_v50 = vpop.f32.mrf.mxu1  ;;  %10384 = vmatprep.subr.bf16.mxu1 %v12562_v41  ;;  %v12571_v41 = vld [vmem:[#allocation8 + $0xf4c] ss:$16 sps:$4 sm:$0xff]  }
 0x5d9   :  { %v9147_v57 = vadd.f32 %v9146_v50, %v9034_v15  ;;  %10220 = vmatprep.mubr.bf16.mxu1 %v15398_v47  ;;  %v9212_v44 = vmax.f32 %v9145_v20, 0.0  ;;  %v12577_v20 = vld [vmem:[#allocation8 + $0xf0c] ss:$16 sps:$4 sm:$0xff]  }
 0x5da   :  { %v9148_v42 = vpop.f32.mrf.mxu1  ;;  %10221 = vmatmul.mubr.bf16.gmra.mxu1 %v15400_v55  ;;  %10334 = vmatmul.mubr.bf16.gmra.mxu0 %v15246_v63  ;;  %v9044_v63 = vadd.f32 %v9043_v10, %v15271_v2  ;;  %v12569_v2 = vld [vmem:[#allocation8 + $0xf48] ss:$16 sps:$4 sm:$0xff]  }
 0x5db   :  { %v9149_v25 = vadd.f32 %v9148_v42, %v9036_v33  ;;  %10343 = vmatprep.mubr.bf16.mxu0 %v15262_v48  ;;  %10385 = vmatpush2.bf16.msra.mxu1 %v12560_v9  ;;  %v9215_v12 = vmax.f32 %v9147_v57, 0.0  ;;  %v12566_v48 = vld [vmem:[#allocation8 + $0xf68] ss:$16 sps:$4 sm:$0xff]  }
 0x5dc   :  { %v9152_v54 = vpop.f32.mrf.mxu1  ;;  %10386 = vmatprep.subr.bf16.mxu1 %v12565_v49  ;;  %v12572_v49 = vld [vmem:[#allocation8 + $0xf28] ss:$16 sps:$4 sm:$0xff]  }
 0x5dd   :  { %v9216_v0 = vmax.f32 %v9149_v25, 0.0  ;;  %v9251_v8 = vpack.c.bf16 %v9215_v12, %v9211_v21  ;;  %v9153_v51 = vadd.f32 %v9152_v54, %v9040_v27 }
 0x5de   :  { %v9154_v23 = vpop.f32.mrf.mxu1 }
 0x5df   :  { %v9252_v34 = vpack.c.bf16 %v9216_v0, %v9212_v44  ;;  %10387 = vmatpush2.bf16.msra.mxu1 %v12563_v3  ;;  %v9155_v14 = vadd.f32 %v9154_v23, %v9042_v24  ;;  %v9219_v50 = vmax.f32 %v9153_v51, 0.0 }
 0x5e0   :  { %v9156_v26 = vpop.f32.mrf.mxu1  ;;  %10388 = vmatprep.subr.bf16.mxu1 %v12568_v39 }
 0x5e1   :  { %v9157_v28 = vadd.f32 %v9156_v26, %v9044_v63  ;;  %10230 = vmatprep.mubr.bf16.mxu1 %v9252_v34  ;;  %v9220_v15 = vmax.f32 %v9155_v14, 0.0 }
 0x5e2   :  { %v9158_v32 = vpop.f32.mrf.mxu1  ;;  %10231 = vmatmul.mubr.bf16.gmra.mxu1 %v9251_v8  ;;  %10344 = vmatmul.mubr.bf16.gmra.mxu0 %v15264_v59  ;;  %v12575_v59 = vld [vmem:[#allocation8 + $0xf08] ss:$16 sps:$4 sm:$0xff]  }
 0x5e3   :  { %v9159_v45 = vadd.f32 %v9158_v32, %v9046_v56  ;;  %10353 = vmatprep.mubr.bf16.mxu0 %v15288_v31  ;;  %10389 = vmatpush2.bf16.msra.mxu1 %v12566_v48  ;;  %v9223_v7 = vmax.f32 %v9157_v28, 0.0  ;;  %v15478_v48 = vld [vmem:[#allocation10] sm:$0xf] }
 0x5e4   :  { %10390 = vmatprep.subr.bf16.mxu1 %v12571_v41  ;;  %v15482_v41 = vrot.slane %v15478_v48, %v16364_v35  ;;  %v15489_v32 = vrot.slane %v15478_v48, %v16366_v38 }
 0x5e5   :  { %v9224_v9 = vmax.f32 %v9159_v45, 0.0  ;;  %v9255_v33 = vpack.c.bf16 %v9223_v7, %v9219_v50 }
 0x5e7   :  { %v9256_v6 = vpack.c.bf16 %v9224_v9, %v9220_v15  ;;  %10391 = vmatpush2.bf16.msra.mxu1 %v12569_v2 }
 0x5e8   :  { %10392 = vmatprep.subr.bf16.mxu1 %v12574_v52 }
 0x5e9   :  { %10240 = vmatprep.mubr.bf16.mxu1 %v9256_v6 }
 0x5ea   :  { %10241 = vmatmul.mubr.bf16.gmra.mxu1 %v9255_v33  ;;  %10354 = vmatmul.mubr.bf16.gmra.mxu0 %v15290_v58 }
 0x5eb   :  { %10393 = vmatpush2.bf16.msra.mxu1 %v12572_v49  ;;  %10396 = vmatprep.mubr.bf16.mxu1 %v15307_v19 }
 0x5ec   :  { %10394 = vmatprep.subr.bf16.mxu1 %v12577_v20 }
 0x5ef   :  { %10395 = vmatpush2.bf16.msra.mxu1 %v12575_v59 }
 0x5f2   :  { %10397 = vmatmul.mubr.bf16.vlgmr.msra.gmra.mxu1 %v15309_v30 }
 0x5f3   :  { %10406 = vmatprep.mubr.bf16.mxu1 %v15327_v62 }
 0x5fa   :  { %10407 = vmatmul.mubr.bf16.gmra.mxu1 %v15329_v17 }
 0x5fb   :  { %10416 = vmatprep.mubr.bf16.mxu1 %v15347_v61 }
 0x602   :  { %10417 = vmatmul.mubr.bf16.gmra.mxu1 %v15349_v29 }
 0x603   :  { %10426 = vmatprep.mubr.bf16.mxu1 %v15367_v40 }
 0x60a   :  { %10427 = vmatmul.mubr.bf16.gmra.mxu1 %v15369_v22 }
 0x60b   :  { %10436 = vmatprep.mubr.bf16.mxu1 %v15383_v16 }
 0x612   :  { %10437 = vmatmul.mubr.bf16.gmra.mxu1 %v15385_v36 }
 0x613   :  { %10446 = vmatprep.mubr.bf16.mxu1 %v15398_v47 }
 0x61a   :  { %10447 = vmatmul.mubr.bf16.gmra.mxu1 %v15400_v55 }
 0x61b   :  { %10456 = vmatprep.mubr.bf16.mxu1 %v9252_v34 }
 0x622   :  { %10457 = vmatmul.mubr.bf16.gmra.mxu1 %v9251_v8 }
 0x623   :  { %10466 = vmatprep.mubr.bf16.mxu1 %v9256_v6 }
 0x62a   :  { %10467 = vmatmul.mubr.bf16.gmra.mxu1 %v9255_v33 }
 0x632   :  { %v10059_v31 = vpop.f32.mrf.mxu0 }
 0x634   :  { %v10061_v58 = vpop.f32.mrf.mxu0 }
 0x636   :  { %v10063_v19 = vpop.f32.mrf.mxu0 }
 0x638   :  { %v10065_v30 = vpop.f32.mrf.mxu0 }
 0x63a   :  { %v10069_v62 = vpop.f32.mrf.mxu0 }
 0x63c   :  { %v10071_v17 = vpop.f32.mrf.mxu0 }
 0x63e   :  { %v15426_v61 = vpop.f32.mrf.mxu0 }
 0x640   :  { %v15428_v29 = vpop.f32.mrf.mxu0 }
 0x642   :  { %v15430_v40 = vpop.f32.mrf.mxu0 }
 0x644   :  { %v15432_v22 = vpop.f32.mrf.mxu0 }
 0x646   :  { %v15434_v16 = vpop.f32.mrf.mxu0 }
 0x648   :  { %v15436_v36 = vpop.f32.mrf.mxu0 }
 0x64a   :  { %v15438_v47 = vpop.f32.mrf.mxu0 }
 0x64c   :  { %v15440_v55 = vpop.f32.mrf.mxu0 }
 0x64e   :  { %v15442_v57 = vpop.f32.mrf.mxu0 }
 0x650   :  { %v15444_v4 = vpop.f32.mrf.mxu0 }
 0x652   :  { %v15446_v10 = vpop.f32.mrf.mxu0 }
 0x654   :  { %v15448_v42 = vpop.f32.mrf.mxu0 }
 0x656   :  { %v15450_v25 = vpop.f32.mrf.mxu0 }
 0x658   :  { %v15452_v3 = vpop.f32.mrf.mxu0 }
 0x65a   :  { %v15454_v12 = vpop.f32.mrf.mxu0 }
 0x65c   :  { %v15456_v54 = vpop.f32.mrf.mxu0 }
 0x65e   :  { %v15458_v39 = vpop.f32.mrf.mxu0 }
 0x660   :  { %v15460_v44 = vpop.f32.mrf.mxu0 }
 0x662   :  { %v15462_v0 = vpop.f32.mrf.mxu0 }
 0x664   :  { %v15464_v21 = vpop.f32.mrf.mxu0 }
 0x666   :  { %v15466_v27 = vpop.f32.mrf.mxu0 }
 0x668   :  { %v15468_v37 = vpop.f32.mrf.mxu0 }
 0x66a   :  { %v15470_v23 = vpop.f32.mrf.mxu0 }
 0x66c   :  { %v15472_v24 = vpop.f32.mrf.mxu0 }
 0x66e   :  { %v15474_v63 = vpop.f32.mrf.mxu0 }
 0x670   :  { %v15476_v34 = vpop.f32.mrf.mxu0 }
 0x672   :  { %v10172_v8 = vpop.f32.mrf.mxu1  ;;  %v15484_v56 = vpop.f32.mrf.mxu0 }
 0x673   :  { %v10173_v26 = vadd.f32 %v10172_v8, %v10059_v31 }
 0x674   :  { %v10174_v14 = vpop.f32.mrf.mxu1  ;;  %v15493_v15 = vpop.f32.mrf.mxu0 }
 0x675   :  { %v10477_v28 = vadd.f32 %v10173_v26, %v14755_v11  ;;  %v10175_v51 = vadd.f32 %v10174_v14, %v10061_v58 }
 0x676   :  { %v10176_v45 = vpop.f32.mrf.mxu1  ;;  %v15499_v31 = vpop.f32.mrf.mxu0 }
 0x677   :  { %v10563_v2 = vadd.f32 %v15482_v41, %v10477_v28  ;;  %v10478_v7 = vadd.f32 %v10175_v51, %v14761_v5  ;;  %v10177_v52 = vadd.f32 %v10176_v45, %v10063_v19 }
 0x678   :  { %v10178_v35 = vpop.f32.mrf.mxu1 }
 0x679   :  { %v10627_v9 = vmax.f32 %v10563_v2, 0.0  ;;  %v10564_v50 = vadd.f32 %v15489_v32, %v10478_v7  ;;  %v10481_v6 = vadd.f32 %v10177_v52, %v14767_v60  ;;  %v10179_v11 = vadd.f32 %v10178_v35, %v10065_v30 }
 0x67a   :  { %v10182_v49 = vpop.f32.mrf.mxu1 }
 0x67b   :  { %10691 = vst [vmem:[#allocation11] sm:$0xff] %v10627_v9  ;;  %v10628_v33 = vmax.f32 %v10564_v50, 0.0  ;;  %v10567_v38 = vadd.f32 %v15482_v41, %v10481_v6  ;;  %v10482_v20 = vadd.f32 %v10179_v11, %v14774_v53  ;;  %v10183_v59 = vadd.f32 %v10182_v49, %v10069_v62  ;;  %v15506_v62 = vpop.f32.mrf.mxu0  ;;  %v16371_v9 = vld [vmem:[#allocation28_spill] sm:$0xff] }
 0x67c   :  { %v10184_v5 = vpop.f32.mrf.mxu1 }
 0x67d   :  { %10692 = vst [vmem:[#allocation11 + $0x8] sm:$0xff] %v10628_v33  ;;  %v10631_v58 = vmax.f32 %v10567_v38, 0.0  ;;  %v10568_v19 = vadd.f32 %v15489_v32, %v10482_v20  ;;  %v10485_v8 = vadd.f32 %v10183_v59, %v14781_v43  ;;  %v10185_v26 = vadd.f32 %v10184_v5, %v10071_v17  ;;  %v15514_v50 = vpop.f32.mrf.mxu0  ;;  %v16372_v33 = vld [vmem:[#allocation30_spill] sm:$0xff]  ;;  %v16373_v5 = vld [vmem:[#allocation32_spill] sm:$0xff] }
 0x67e   :  { %v10186_v60 = vpop.f32.mrf.mxu1 }
 0x67f   :  { %10695 = vst [vmem:[#allocation11 + $0x20] sm:$0xff] %v10631_v58  ;;  %v10632_v30 = vmax.f32 %v10568_v19, 0.0  ;;  %v10571_v14 = vadd.f32 %v15482_v41, %v10485_v8  ;;  %v10486_v28 = vadd.f32 %v10185_v26, %v14787_v1  ;;  %v10187_v53 = vadd.f32 %v10186_v60, %v15426_v61  ;;  %v15522_v19 = vpop.f32.mrf.mxu0 }
 0x680   :  { %v10188_v51 = vpop.f32.mrf.mxu1 }
 0x681   :  { %10696 = vst [vmem:[#allocation11 + $0x28] sm:$0xff] %v10632_v30  ;;  %v10635_v45 = vmax.f32 %v10571_v14, 0.0  ;;  %v10572_v2 = vadd.f32 %v15489_v32, %v10486_v28  ;;  %v10489_v7 = vadd.f32 %v10187_v53, %v14793_v13  ;;  %v10189_v43 = vadd.f32 %v10188_v51, %v15428_v29  ;;  %v16374_v30 = vld [vmem:[#allocation36_spill] sm:$0xff] }
 0x682   :  { %v10192_v17 = vpop.f32.mrf.mxu1 }
 0x683   :  { %10699 = vst [vmem:[#allocation11 + $0x40] sm:$0xff] %v10635_v45  ;;  %v10636_v52 = vmax.f32 %v10572_v2, 0.0  ;;  %v10575_v35 = vadd.f32 %v15482_v41, %v10489_v7  ;;  %v10490_v1 = vadd.f32 %v10189_v43, %v16371_v9  ;;  %v10193_v61 = vadd.f32 %v10192_v17, %v15430_v40  ;;  %v16375_v45 = vld [vmem:[#allocation38_spill] sm:$0xff]  ;;  %v15530_v7 = vpop.f32.mrf.mxu0 }
 0x684   :  { %v10194_v6 = vpop.f32.mrf.mxu1 }
 0x685   :  { %10700 = vst [vmem:[#allocation11 + $0x48] sm:$0xff] %v10636_v52  ;;  %v10639_v11 = vmax.f32 %v10575_v35, 0.0  ;;  %v10576_v49 = vadd.f32 %v15489_v32, %v10490_v1  ;;  %v10493_v13 = vadd.f32 %v10193_v61, %v16372_v33  ;;  %v10195_v29 = vadd.f32 %v10194_v6, %v15432_v22  ;;  %v16376_v35 = vld [vmem:[#allocation40_spill] sm:$0xff]  ;;  %v15538_v33 = vpop.f32.mrf.mxu0 }
 0x686   :  { %v10196_v38 = vpop.f32.mrf.mxu1 }
 0x687   :  { %10703 = vst [vmem:[#allocation11 + $0x60] sm:$0xff] %v10639_v11  ;;  %v10640_v20 = vmax.f32 %v10576_v49, 0.0  ;;  %v10579_v59 = vadd.f32 %v15482_v41, %v10493_v13  ;;  %v10494_v58 = vadd.f32 %v10195_v29, %v16373_v5  ;;  %v10197_v40 = vadd.f32 %v10196_v38, %v15434_v16  ;;  %v16377_v11 = vld [vmem:[#allocation42_spill] sm:$0xff] }
 0x688   :  { %v10198_v8 = vpop.f32.mrf.mxu1 }
 0x689   :  { %10704 = vst [vmem:[#allocation11 + $0x68] sm:$0xff] %v10640_v20  ;;  %v10643_v26 = vmax.f32 %v10579_v59, 0.0  ;;  %v10580_v60 = vadd.f32 %v15489_v32, %v10494_v58  ;;  %v10497_v14 = vadd.f32 %v10197_v40, %v16374_v30  ;;  %v10199_v22 = vadd.f32 %v10198_v8, %v15436_v36  ;;  %v16378_v20 = vld [vmem:[#allocation29_spill] sm:$0xff]  ;;  %v16379_v8 = vld [vmem:[#allocation31_spill] sm:$0xff] }
 0x68a   :  { %v10202_v28 = vpop.f32.mrf.mxu1  ;;  %v16381_v30 = vld [vmem:[#allocation65_spill] sm:$0xff] }
 0x68b   :  { %10707 = vst [vmem:[#allocation11 + $0x80] sm:$0xff] %v10643_v26  ;;  %v10644_v53 = vmax.f32 %v10580_v60, 0.0  ;;  %v10583_v51 = vadd.f32 %v15482_v41, %v10497_v14  ;;  %v10498_v2 = vadd.f32 %v10199_v22, %v16375_v45  ;;  %v10203_v16 = vadd.f32 %v10202_v28, %v15438_v47  ;;  %v16380_v60 = vld [vmem:[#allocation74_spill] sm:$0xff]  ;;  %v16382_v22 = vld [vmem:[#allocation16_spill] sm:$0xff]  ;;  %v16383_v28 = vld [vmem:[#allocation37_spill] sm:$0xff] }
 0x68c   :  { %v10204_v43 = vpop.f32.mrf.mxu1  ;;  %v4926_v14 = vadd.f32 %v16381_v30, %v16380_v60  ;;  %v16391_v60 = vld [vmem:[#allocation47_spill] sm:$0xff] }
 0x68d   :  { %10708 = vst [vmem:[#allocation11 + $0x88] sm:$0xff] %v10644_v53  ;;  %v10647_v17 = vmax.f32 %v10583_v51, 0.0  ;;  %v10584_v52 = vadd.f32 %v15489_v32, %v10498_v2  ;;  %v10501_v9 = vadd.f32 %v10203_v16, %v16376_v35  ;;  %v10205_v36 = vadd.f32 %v10204_v43, %v15440_v55  ;;  %v15550_v51 = vpop.f32.mrf.mxu0  ;;  %v16384_v16 = vld [vmem:[#allocation33_spill] sm:$0xff] }
 0x68e   :  { %v10206_v1 = vpop.f32.mrf.mxu1  ;;  %v7597_v53 = vadd.f32 %v16383_v28, %v16382_v22 }
 0x68f   :  { %10711 = vst [vmem:[#allocation11 + $0xa0] sm:$0xff] %v10647_v17  ;;  %v10648_v61 = vmax.f32 %v10584_v52, 0.0  ;;  %v10587_v6 = vadd.f32 %v15482_v41, %v10501_v9  ;;  %v10502_v49 = vadd.f32 %v10205_v36, %v16377_v11  ;;  %v10207_v47 = vadd.f32 %v10206_v1, %v15442_v57  ;;  %v16385_v52 = vld [vmem:[#allocation25_spill] sm:$0xff]  ;;  %v16386_v1 = vld [vmem:[#allocation35_spill] sm:$0xff] }
 0x690   :  { %v10208_v13 = vpop.f32.mrf.mxu1  ;;  %v5039_v35 = vadd.f32 %v16385_v52, %v4926_v14  ;;  %v16394_v52 = vld [vmem:[#allocation45_spill] sm:$0xff] }
 0x691   :  { %10712 = vst [vmem:[#allocation11 + $0xa8] sm:$0xff] %v10648_v61  ;;  %v10651_v29 = vmax.f32 %v10587_v6, 0.0  ;;  %v10588_v38 = vadd.f32 %v15489_v32, %v10502_v49  ;;  %v10505_v59 = vadd.f32 %v10207_v47, %v16378_v20  ;;  %v10209_v55 = vadd.f32 %v10208_v13, %v15444_v4  ;;  %v15559_v49 = vpop.f32.mrf.mxu0 }
 0x692   :  { %v10212_v5 = vpop.f32.mrf.mxu1  ;;  %v7892_v11 = vadd.f32 %v7597_v53, %v5039_v35  ;;  %v16392_v53 = vld [vmem:[#allocation43_spill] sm:$0xff] }
 0x693   :  { %10715 = vst [vmem:[#allocation11 + $0xc0] sm:$0xff] %v10651_v29  ;;  %v10652_v58 = vmax.f32 %v10588_v38, 0.0  ;;  %v10591_v40 = vadd.f32 %v15482_v41, %v10505_v59  ;;  %v10506_v26 = vadd.f32 %v10209_v55, %v16379_v8  ;;  %v10213_v57 = vadd.f32 %v10212_v5, %v15446_v10  ;;  %v16389_v8 = vld [vmem:[#allocation69_spill] sm:$0xff]  ;;  %v15570_v14 = vpop.f32.mrf.mxu0 }
 0x694   :  { %v10214_v45 = vpop.f32.mrf.mxu1 }
 0x695   :  { %10716 = vst [vmem:[#allocation11 + $0xc8] sm:$0xff] %v10652_v58  ;;  %v10655_v4 = vmax.f32 %v10591_v40, 0.0  ;;  %v10592_v2 = vadd.f32 %v15489_v32, %v10506_v26  ;;  %v10509_v43 = vadd.f32 %v10213_v57, %v16384_v16  ;;  %v10215_v17 = vadd.f32 %v10214_v45, %v15448_v42  ;;  %v16387_v42 = vld [vmem:[#allocation41_spill] sm:$0xff]  ;;  %v16388_v40 = vld [vmem:[#allocation72_spill] sm:$0xff]  ;;  %v16390_v57 = vld [vmem:[#allocation18_spill] sm:$0xff] }
 0x696   :  { %v10216_v10 = vpop.f32.mrf.mxu1  ;;  %v4936_v26 = vadd.f32 %v16389_v8, %v16388_v40  ;;  %v7607_v30 = vadd.f32 %v16391_v60, %v16390_v57  ;;  %v16400_v57 = vld [vmem:[#allocation81_spill] sm:$0xff] }
 0x697   :  { %10719 = vst [vmem:[#allocation11 + $0xe0] sm:$0xff] %v10655_v4  ;;  %v10656_v9 = vmax.f32 %v10592_v2, 0.0  ;;  %v10595_v36 = vadd.f32 %v15482_v41, %v10509_v43  ;;  %v10510_v61 = vadd.f32 %v10215_v17, %v16386_v1  ;;  %v10217_v6 = vadd.f32 %v10216_v10, %v15450_v25  ;;  %v16393_v2 = vld [vmem:[#allocation66_spill] sm:$0xff] }
 0x698   :  { %v10218_v47 = vpop.f32.mrf.mxu1  ;;  %v5049_v16 = vadd.f32 %v16393_v2, %v4936_v26 }
 0x699   :  { %10720 = vst [vmem:[#allocation11 + $0xe8] sm:$0xff] %v10656_v9  ;;  %v10659_v13 = vmax.f32 %v10595_v36, 0.0  ;;  %v10596_v29 = vadd.f32 %v15489_v32, %v10510_v61  ;;  %v10513_v38 = vadd.f32 %v10217_v6, %v16387_v42  ;;  %v10219_v20 = vadd.f32 %v10218_v47, %v15452_v3  ;;  %v15579_v36 = vpop.f32.mrf.mxu0 }
 0x69a   :  { %v10222_v59 = vpop.f32.mrf.mxu1  ;;  %v7900_v9 = vadd.f32 %v7607_v30, %v5049_v16 }
 0x69b   :  { %10723 = vst [vmem:[#allocation11 + $0x100] sm:$0xff] %v10659_v13  ;;  %v10660_v55 = vmax.f32 %v10596_v29, 0.0  ;;  %v10599_v5 = vadd.f32 %v15482_v41, %v10513_v38  ;;  %v10514_v58 = vadd.f32 %v10219_v20, %v7892_v11  ;;  %v10223_v25 = vadd.f32 %v10222_v59, %v15454_v12  ;;  %v16396_v20 = vld [vmem:[#allocation82_spill] sm:$0xff]  ;;  %v16397_v59 = vld [vmem:[#allocation67_spill] sm:$0xff]  ;;  %v15590_v40 = vpop.f32.mrf.mxu0 }
 0x69c   :  { %v10224_v22 = vpop.f32.mrf.mxu1 }
 0x69d   :  { %10724 = vst [vmem:[#allocation11 + $0x108] sm:$0xff] %v10660_v55  ;;  %v10663_v28 = vmax.f32 %v10599_v5, 0.0  ;;  %v10600_v3 = vadd.f32 %v15489_v32, %v10514_v58  ;;  %v10517_v45 = vadd.f32 %v10223_v25, %v16392_v53  ;;  %v10225_v4 = vadd.f32 %v10224_v22, %v15456_v54  ;;  %v16395_v54 = vld [vmem:[#allocation44_spill] sm:$0xff]  ;;  %v16399_v58 = vld [vmem:[#allocation85_spill] sm:$0xff]  ;;  %v16401_v22 = vld [vmem:[#allocation70_spill] sm:$0xff] }
 0x69e   :  { %v10226_v12 = vpop.f32.mrf.mxu1  ;;  %v4946_v55 = vadd.f32 %v16397_v59, %v16396_v20  ;;  %v16398_v5 = vld [vmem:[#allocation20_spill] sm:$0xff]  ;;  %v16408_v59 = vld [vmem:[#allocation83_spill] sm:$0xff] }
 0x69f   :  { %10727 = vst [vmem:[#allocation11 + $0x120] sm:$0xff] %v10663_v28  ;;  %v10664_v43 = vmax.f32 %v10600_v3, 0.0  ;;  %v10603_v17 = vadd.f32 %v15482_v41, %v10517_v45  ;;  %v10518_v35 = vadd.f32 %v10225_v4, %v16394_v52  ;;  %v10227_v10 = vadd.f32 %v10226_v12, %v15458_v39  ;;  %v16402_v45 = vld [vmem:[#allocation76_spill] sm:$0xff]  ;;  %v15599_v12 = vpop.f32.mrf.mxu0 }
 0x6a0   :  { %v10228_v1 = vpop.f32.mrf.mxu1  ;;  %v7617_v25 = vadd.f32 %v16399_v58, %v16398_v5  ;;  %v5059_v28 = vadd.f32 %v16401_v22, %v4946_v55  ;;  %v16409_v58 = vld [vmem:[#allocation99_spill] sm:$0xff] }
 0x6a1   :  { %10728 = vst [vmem:[#allocation11 + $0x128] sm:$0xff] %v10664_v43  ;;  %v10667_v61 = vmax.f32 %v10603_v17, 0.0  ;;  %v10604_v6 = vadd.f32 %v15489_v32, %v10518_v35  ;;  %v10521_v11 = vadd.f32 %v10227_v10, %v16395_v54  ;;  %v10229_v47 = vadd.f32 %v10228_v1, %v15460_v44  ;;  %v16404_v54 = vld [vmem:[#allocation86_spill] sm:$0xff] }
 0x6a2   :  { %v10232_v13 = vpop.f32.mrf.mxu1  ;;  %v7908_v16 = vadd.f32 %v7617_v25, %v5059_v28 }
 0x6a3   :  { %10731 = vst [vmem:[#allocation11 + $0x140] sm:$0xff] %v10667_v61  ;;  %v10668_v29 = vmax.f32 %v10604_v6, 0.0  ;;  %v10607_v42 = vadd.f32 %v15482_v41, %v10521_v11  ;;  %v10522_v38 = vadd.f32 %v10229_v47, %v7900_v9  ;;  %v10233_v39 = vadd.f32 %v10232_v13, %v15462_v0  ;;  %v16405_v11 = vld [vmem:[#allocation78_spill] sm:$0xff] }
 0x6a4   :  { %v10234_v8 = vpop.f32.mrf.mxu1  ;;  %v4956_v47 = vadd.f32 %v16405_v11, %v16404_v54  ;;  %v16406_v13 = vld [vmem:[#allocation22_spill] sm:$0xff]  ;;  %v16417_v11 = vld [vmem:[#allocation104_spill] sm:$0xff] }
 0x6a5   :  { %10732 = vst [vmem:[#allocation11 + $0x148] sm:$0xff] %v10668_v29  ;;  %v10671_v26 = vmax.f32 %v10607_v42, 0.0  ;;  %v10608_v44 = vadd.f32 %v15489_v32, %v10522_v38  ;;  %v10525_v60 = vadd.f32 %v10233_v39, %v16400_v57  ;;  %v10235_v30 = vadd.f32 %v10234_v8, %v15464_v21  ;;  %v16403_v21 = vld [vmem:[#allocation79_spill] sm:$0xff]  ;;  %v16407_v29 = vld [vmem:[#allocation53_spill] sm:$0xff]  ;;  %v15610_v38 = vpop.f32.mrf.mxu0 }
 0x6a6   :  { %v10236_v0 = vpop.f32.mrf.mxu1  ;;  %v7627_v42 = vadd.f32 %v16407_v29, %v16406_v13  ;;  %v5069_v25 = vadd.f32 %v16409_v58, %v4956_v47 }
 0x6a7   :  { %10735 = vst [vmem:[#allocation11 + $0x160] sm:$0xff] %v10671_v26  ;;  %v10672_v3 = vmax.f32 %v10608_v44, 0.0  ;;  %v10611_v53 = vadd.f32 %v15482_v41, %v10525_v60  ;;  %v10526_v4 = vadd.f32 %v10235_v30, %v16402_v45  ;;  %v10237_v2 = vadd.f32 %v10236_v0, %v15466_v27  ;;  %v16410_v44 = vld [vmem:[#allocation57_spill] sm:$0xff]  ;;  %v15619_v22 = vpop.f32.mrf.mxu0 }
 0x6a8   :  { %v10238_v43 = vpop.f32.mrf.mxu1  ;;  %v7916_v30 = vadd.f32 %v7627_v42, %v5069_v25 }
 0x6a9   :  { %10736 = vst [vmem:[#allocation11 + $0x168] sm:$0xff] %v10672_v3  ;;  %v10675_v17 = vmax.f32 %v10611_v53, 0.0  ;;  %v10612_v52 = vadd.f32 %v15489_v32, %v10526_v4  ;;  %v10529_v35 = vadd.f32 %v10237_v2, %v16403_v21  ;;  %v10239_v10 = vadd.f32 %v10238_v43, %v15468_v37  ;;  %v16413_v21 = vld [vmem:[#allocation75_spill] sm:$0xff] }
 0x6aa   :  { %v10242_v9 = vpop.f32.mrf.mxu1  ;;  %v15626_v2 = vrot.slane %v15478_v48, %v16369_v46  ;;  %v15638_v46 = vrot.slane %v15478_v48, %v16370_v18 }
 0x6ab   :  { %10739 = vst [vmem:[#allocation11 + $0x180] sm:$0xff] %v10675_v17  ;;  %v10676_v1 = vmax.f32 %v10612_v52, 0.0  ;;  %v10615_v61 = vadd.f32 %v15482_v41, %v10529_v35  ;;  %v10530_v6 = vadd.f32 %v10239_v10, %v7908_v16  ;;  %v10243_v27 = vadd.f32 %v10242_v9, %v15470_v23  ;;  %v16412_v52 = vld [vmem:[#allocation54_spill] sm:$0xff]  ;;  %v16414_v10 = vld [vmem:[#allocation24_spill] sm:$0xff] }
 0x6ac   :  { %v10244_v39 = vpop.f32.mrf.mxu1  ;;  %v5112_v35 = vadd.f32 %v16413_v21, %v16412_v52  ;;  %v16415_v9 = vld [vmem:[#allocation56_spill] sm:$0xff]  ;;  %v16426_v21 = vld [vmem:[#allocation23_spill] sm:$0xff] }
 0x6ad   :  { %10740 = vst [vmem:[#allocation11 + $0x188] sm:$0xff] %v10676_v1  ;;  %v10679_v20 = vmax.f32 %v10615_v61, 0.0  ;;  %v10616_v37 = vadd.f32 %v15489_v32, %v10530_v6  ;;  %v10533_v55 = vadd.f32 %v10243_v27, %v16408_v59  ;;  %v10245_v5 = vadd.f32 %v10244_v39, %v15472_v24  ;;  %v16411_v24 = vld [vmem:[#allocation87_spill] sm:$0xff]  ;;  %v15634_v61 = vpop.f32.mrf.mxu0  ;;  %v16416_v27 = vld [vmem:[#allocation58_spill] sm:$0xff]  ;;  %v16418_v39 = vld [vmem:[#allocation21_spill] sm:$0xff] }
 0x6ae   :  { %v10246_v23 = vpop.f32.mrf.mxu1  ;;  %v7783_v1 = vadd.f32 %v16415_v9, %v16414_v10  ;;  %v5225_v47 = vadd.f32 %v16417_v11, %v5112_v35 }
 0x6af   :  { %10743 = vst [vmem:[#allocation11 + $0x1a0] sm:$0xff] %v10679_v20  ;;  %v10680_v8 = vmax.f32 %v10616_v37, 0.0  ;;  %v10619_v26 = vadd.f32 %v15482_v41, %v10533_v55  ;;  %v10534_v57 = vadd.f32 %v10245_v5, %v16410_v44  ;;  %v10247_v60 = vadd.f32 %v10246_v23, %v15474_v63  ;;  %v15647_v37 = vpop.f32.mrf.mxu0  ;;  %v16420_v44 = vld [vmem:[#allocation17_spill] sm:$0xff] }
 0x6b0   :  { %v10248_v28 = vpop.f32.mrf.mxu1  ;;  %v7862_v48 = vadd.f32 %v7783_v1, %v5225_v47 }
 0x6b1   :  { %10744 = vst [vmem:[#allocation11 + $0x1a8] sm:$0xff] %v10680_v8  ;;  %v10683_v0 = vmax.f32 %v10619_v26, 0.0  ;;  %v10620_v3 = vadd.f32 %v15489_v32, %v10534_v57  ;;  %v10537_v53 = vadd.f32 %v10247_v60, %v16411_v24  ;;  %v10249_v45 = vadd.f32 %v10248_v28, %v15476_v34  ;;  %v16421_v57 = vld [vmem:[#allocation84_spill] sm:$0xff]  ;;  %v16423_v28 = vld [vmem:[#allocation90_spill] sm:$0xff] }
 0x6b2   :  { %v10398_v4 = vpop.f32.mrf.mxu1  ;;  %v5122_v60 = vadd.f32 %v16421_v57, %v16420_v44 }
 0x6b3   :  { %10747 = vst [vmem:[#allocation11 + $0x1c0] sm:$0xff] %v10683_v0  ;;  %v10684_v16 = vmax.f32 %v10620_v3, 0.0  ;;  %v10623_v63 = vadd.f32 %v15482_v41, %v10537_v53  ;;  %v10538_v43 = vadd.f32 %v10249_v45, %v7916_v30  ;;  %v10399_v17 = vadd.f32 %v10398_v4, %v15484_v56  ;;  %v16422_v30 = vld [vmem:[#allocation26_spill] sm:$0xff]  ;;  %v15658_v3 = vpop.f32.mrf.mxu0  ;;  %v16424_v45 = vld [vmem:[#allocation89_spill] sm:$0xff] }
 0x6b4   :  { %v10400_v34 = vpop.f32.mrf.mxu1  ;;  %v7793_v0 = vadd.f32 %v16423_v28, %v16422_v30 }
 0x6b5   :  { %10748 = vst [vmem:[#allocation11 + $0x1c8] sm:$0xff] %v10684_v16  ;;  %v10687_v6 = vmax.f32 %v10623_v63, 0.0  ;;  %v10624_v41 = vadd.f32 %v15489_v32, %v10538_v43  ;;  %v10479_v54 = vadd.f32 %v10399_v17, %v16416_v27  ;;  %v10401_v56 = vadd.f32 %v10400_v34, %v15493_v15  ;;  %v16419_v15 = vld [vmem:[#allocation61_spill] sm:$0xff]  ;;  %v16425_v63 = vld [vmem:[#allocation108_spill] sm:$0xff]  ;;  %v15667_v1 = vpop.f32.mrf.mxu0 }
 0x6b6   :  { %v10402_v13 = vpop.f32.mrf.mxu1  ;;  %v5235_v43 = vadd.f32 %v16425_v63, %v5122_v60 }
 0x6b7   :  { %10751 = vst [vmem:[#allocation11 + $0x1e0] sm:$0xff] %v10687_v6  ;;  %v10688_v29 = vmax.f32 %v10624_v41, 0.0  ;;  %v10565_v42 = vadd.f32 %v15626_v2, %v10479_v54  ;;  %v10480_v20 = vadd.f32 %v10401_v56, %v16418_v39  ;;  %v10403_v18 = vadd.f32 %v10402_v13, %v15499_v31 }
 0x6b8   :  { %v10404_v59 = vpop.f32.mrf.mxu1  ;;  %v7870_v9 = vadd.f32 %v7793_v0, %v5235_v43  ;;  %v16436_v43 = vld [vmem:[#allocation62_spill] sm:$0xff] }
 0x6b9   :  { %10752 = vst [vmem:[#allocation11 + $0x1e8] sm:$0xff] %v10688_v29  ;;  %v10629_v32 = vmax.f32 %v10565_v42, 0.0  ;;  %v10566_v55 = vadd.f32 %v15638_v46, %v10480_v20  ;;  %v10483_v5 = vadd.f32 %v10403_v18, %v16419_v15  ;;  %v10405_v58 = vadd.f32 %v10404_v59, %v15506_v62  ;;  %v16428_v29 = vld [vmem:[#allocation51_spill] sm:$0xff]  ;;  %v16430_v20 = vld [vmem:[#allocation34_spill] sm:$0xff]  ;;  %v15678_v59 = vpop.f32.mrf.mxu0  ;;  %v16432_v15 = vld [vmem:[#allocation60_spill] sm:$0xff] }
 0x6ba   :  { %v10408_v25 = vpop.f32.mrf.mxu1  ;;  %v16429_v42 = vld [vmem:[#allocation19_spill] sm:$0xff] }
 0x6bb   :  { %10693 = vst [vmem:[#allocation11 + $0x10] sm:$0xff] %v10629_v32  ;;  %v10630_v23 = vmax.f32 %v10566_v55, 0.0  ;;  %v10569_v8 = vadd.f32 %v15626_v2, %v10483_v5  ;;  %v10484_v26 = vadd.f32 %v10405_v58, %v7862_v48  ;;  %v10409_v31 = vadd.f32 %v10408_v25, %v15514_v50  ;;  %v16431_v18 = vld [vmem:[#allocation95_spill] sm:$0xff]  ;;  %v16433_v25 = vld [vmem:[#allocation112_spill] sm:$0xff]  ;;  %v15687_v30 = vpop.f32.mrf.mxu0 }
 0x6bc   :  { %v10410_v24 = vpop.f32.mrf.mxu1  ;;  %v5132_v39 = vadd.f32 %v16429_v42, %v16428_v29  ;;  %v7803_v48 = vadd.f32 %v16431_v18, %v16430_v20 }
 0x6bd   :  { %10694 = vst [vmem:[#allocation11 + $0x18] sm:$0xff] %v10630_v23  ;;  %v10633_v53 = vmax.f32 %v10569_v8, 0.0  ;;  %v10570_v62 = vadd.f32 %v15638_v46, %v10484_v26  ;;  %v10487_v4 = vadd.f32 %v10409_v31, %v16424_v45  ;;  %v10411_v16 = vadd.f32 %v10410_v24, %v15522_v19  ;;  %v16427_v19 = vld [vmem:[#allocation92_spill] sm:$0xff]  ;;  %v16434_v31 = vld [vmem:[#allocation93_spill] sm:$0xff] }
 0x6be   :  { %v10412_v50 = vpop.f32.mrf.mxu1  ;;  %v5245_v23 = vadd.f32 %v16433_v25, %v5132_v39  ;;  %v16445_v25 = vld [vmem:[#allocation91_spill] sm:$0xff] }
 0x6bf   :  { %10697 = vst [vmem:[#allocation11 + $0x30] sm:$0xff] %v10633_v53  ;;  %v10634_v17 = vmax.f32 %v10570_v62, 0.0  ;;  %v10573_v52 = vadd.f32 %v15626_v2, %v10487_v4  ;;  %v10488_v35 = vadd.f32 %v10411_v16, %v16426_v21  ;;  %v10413_v10 = vadd.f32 %v10412_v50, %v15530_v7  ;;  %v16437_v50 = vld [vmem:[#allocation88_spill] sm:$0xff]  ;;  %v16439_v21 = vld [vmem:[#allocation97_spill] sm:$0xff] }
 0x6c0   :  { %v10414_v34 = vpop.f32.mrf.mxu1  ;;  %v7878_v60 = vadd.f32 %v7803_v48, %v5245_v23 }
 0x6c1   :  { %10698 = vst [vmem:[#allocation11 + $0x38] sm:$0xff] %v10634_v17  ;;  %v10637_v6 = vmax.f32 %v10573_v52, 0.0  ;;  %v10574_v41 = vadd.f32 %v15638_v46, %v10488_v35  ;;  %v10491_v27 = vadd.f32 %v10413_v10, %v16427_v19  ;;  %v10415_v54 = vadd.f32 %v10414_v34, %v15538_v33  ;;  %v16438_v52 = vld [vmem:[#allocation27_spill] sm:$0xff]  ;;  %v15698_v10 = vpop.f32.mrf.mxu0 }
 0x6c2   :  { %v10418_v56 = vpop.f32.mrf.mxu1  ;;  %v5142_v17 = vadd.f32 %v16437_v50, %v16436_v43  ;;  %v7813_v35 = vadd.f32 %v16439_v21, %v16438_v52  ;;  %v16451_v52 = vld [vmem:[#allocation105_spill] sm:$0xff] }
 0x6c3   :  { %10701 = vst [vmem:[#allocation11 + $0x50] sm:$0xff] %v10637_v6  ;;  %v10638_v11 = vmax.f32 %v10574_v41, 0.0  ;;  %v10577_v47 = vadd.f32 %v15626_v2, %v10491_v27  ;;  %v10492_v13 = vadd.f32 %v10415_v54, %v7870_v9  ;;  %v10419_v7 = vadd.f32 %v10418_v56, %v15550_v51  ;;  %v16440_v6 = vld [vmem:[#allocation63_spill] sm:$0xff]  ;;  %v16441_v27 = vld [vmem:[#allocation116_spill] sm:$0xff]  ;;  %v15707_v42 = vpop.f32.mrf.mxu0 }
 0x6c4   :  { %v10420_v32 = vpop.f32.mrf.mxu1  ;;  %v5255_v54 = vadd.f32 %v16441_v27, %v5142_v17  ;;  %v16454_v27 = vld [vmem:[#allocation71_spill] sm:$0xff] }
 0x6c5   :  { %10702 = vst [vmem:[#allocation11 + $0x58] sm:$0xff] %v10638_v11  ;;  %v10641_v55 = vmax.f32 %v10577_v47, 0.0  ;;  %v10578_v33 = vadd.f32 %v15638_v46, %v10492_v13  ;;  %v10495_v5 = vadd.f32 %v10419_v7, %v16432_v15  ;;  %v10421_v58 = vadd.f32 %v10420_v32, %v15559_v49  ;;  %v16435_v49 = vld [vmem:[#allocation64_spill] sm:$0xff] }
 0x6c6   :  { %v10422_v51 = vpop.f32.mrf.mxu1  ;;  %v16442_v47 = vld [vmem:[#allocation96_spill] sm:$0xff]  ;;  %v7886_v29 = vadd.f32 %v7813_v35, %v5255_v54  ;;  %v16455_v54 = vld [vmem:[#allocation109_spill] sm:$0xff] }
 0x6c7   :  { %10705 = vst [vmem:[#allocation11 + $0x70] sm:$0xff] %v10641_v55  ;;  %v10642_v8 = vmax.f32 %v10578_v33, 0.0  ;;  %v10581_v26 = vadd.f32 %v15626_v2, %v10495_v5  ;;  %v10496_v44 = vadd.f32 %v10421_v58, %v16434_v31  ;;  %v10423_v57 = vadd.f32 %v10422_v51, %v15570_v14  ;;  %v16444_v58 = vld [vmem:[#allocation55_spill] sm:$0xff]  ;;  %v10345_v31 = vpop.f32.mrf.mxu0 }
 0x6c8   :  { %v10424_v28 = vpop.f32.mrf.mxu1  ;;  %v5152_v23 = vadd.f32 %v16445_v25, %v16444_v58  ;;  %v16446_v51 = vld [vmem:[#allocation39_spill] sm:$0xff]  ;;  %v16459_v25 = vld [vmem:[#allocation110_spill] sm:$0xff] }
 0x6c9   :  { %10706 = vst [vmem:[#allocation11 + $0x78] sm:$0xff] %v10642_v8  ;;  %v10645_v0 = vmax.f32 %v10581_v26, 0.0  ;;  %v10582_v24 = vadd.f32 %v15638_v46, %v10496_v44  ;;  %v10499_v53 = vadd.f32 %v10423_v57, %v16435_v49  ;;  %v10425_v62 = vadd.f32 %v10424_v28, %v15579_v36  ;;  %v16447_v8 = vld [vmem:[#allocation103_spill] sm:$0xff] }
 0x6ca   :  { %v10428_v45 = vpop.f32.mrf.mxu1  ;;  %v7823_v26 = vadd.f32 %v16447_v8, %v16446_v51 }
 0x6cb   :  { %10709 = vst [vmem:[#allocation11 + $0x90] sm:$0xff] %v10645_v0  ;;  %v10646_v4 = vmax.f32 %v10582_v24, 0.0  ;;  %v10585_v16 = vadd.f32 %v15626_v2, %v10499_v53  ;;  %v10500_v63 = vadd.f32 %v10425_v62, %v7878_v60  ;;  %v10429_v14 = vadd.f32 %v10428_v45, %v15590_v40  ;;  %v16448_v60 = vld [vmem:[#allocation101_spill] sm:$0xff]  ;;  %v16449_v24 = vld [vmem:[#allocation120_spill] sm:$0xff]  ;;  %v16450_v45 = vld [vmem:[#allocation102_spill] sm:$0xff] }
 0x6cc   :  { %v10430_v9 = vpop.f32.mrf.mxu1  ;;  %v5265_v49 = vadd.f32 %v16449_v24, %v5152_v23 }
 0x6cd   :  { %10710 = vst [vmem:[#allocation11 + $0x98] sm:$0xff] %v10646_v4  ;;  %v10649_v34 = vmax.f32 %v10585_v16, 0.0  ;;  %v10586_v36 = vadd.f32 %v15638_v46, %v10500_v63  ;;  %v10503_v41 = vadd.f32 %v10429_v14, %v16440_v6  ;;  %v10431_v19 = vadd.f32 %v10430_v9, %v15599_v12  ;;  %v16443_v12 = vld [vmem:[#allocation98_spill] sm:$0xff]  ;;  %v10347_v14 = vpop.f32.mrf.mxu0 }
 0x6ce   :  { %v10432_v40 = vpop.f32.mrf.mxu1  ;;  %v7894_v63 = vadd.f32 %v7823_v26, %v5265_v49 }
 0x6cf   :  { %10713 = vst [vmem:[#allocation11 + $0xb0] sm:$0xff] %v10649_v34  ;;  %v10650_v56 = vmax.f32 %v10586_v36, 0.0  ;;  %v10589_v11 = vadd.f32 %v15626_v2, %v10503_v41  ;;  %v10504_v13 = vadd.f32 %v10431_v19, %v16442_v47  ;;  %v10433_v7 = vadd.f32 %v10432_v40, %v15610_v38  ;;  %v16453_v41 = vld [vmem:[#allocation94_spill] sm:$0xff] }
 0x6d0   :  { %v10434_v39 = vpop.f32.mrf.mxu1  ;;  %v7833_v40 = vadd.f32 %v16455_v54, %v16454_v27 }
 0x6d1   :  { %10714 = vst [vmem:[#allocation11 + $0xb8] sm:$0xff] %v10650_v56  ;;  %v10653_v20 = vmax.f32 %v10589_v11, 0.0  ;;  %v10590_v18 = vadd.f32 %v15638_v46, %v10504_v13  ;;  %v10507_v48 = vadd.f32 %v10433_v7, %v16443_v12  ;;  %v10435_v32 = vadd.f32 %v10434_v39, %v15619_v22  ;;  %v10349_v56 = vpop.f32.mrf.mxu0  ;;  %v16456_v13 = vld [vmem:[#allocation106_spill] sm:$0xff]  ;;  %v16457_v39 = vld [vmem:[#allocation124_spill] sm:$0xff] }
 0x6d2   :  { %v10438_v55 = vpop.f32.mrf.mxu1 }
 0x6d3   :  { %10717 = vst [vmem:[#allocation11 + $0xd0] sm:$0xff] %v10653_v20  ;;  %v10654_v33 = vmax.f32 %v10590_v18, 0.0  ;;  %v10593_v15 = vadd.f32 %v15626_v2, %v10507_v48  ;;  %v10508_v5 = vadd.f32 %v10435_v32, %v7886_v29  ;;  %v10439_v38 = vadd.f32 %v10438_v55, %v15634_v61  ;;  %v16458_v48 = vld [vmem:[#allocation107_spill] sm:$0xff] }
 0x6d4   :  { %v10440_v44 = vpop.f32.mrf.mxu1 }
 0x6d5   :  { %10718 = vst [vmem:[#allocation11 + $0xd8] sm:$0xff] %v10654_v33  ;;  %v10657_v57 = vmax.f32 %v10593_v15, 0.0  ;;  %v10594_v22 = vadd.f32 %v15638_v46, %v10508_v5  ;;  %v10511_v28 = vadd.f32 %v10439_v38, %v16448_v60  ;;  %v10441_v0 = vadd.f32 %v10440_v44, %v15647_v37  ;;  %v10351_v15 = vpop.f32.mrf.mxu0 }
 0x6d6   :  { %v10442_v53 = vpop.f32.mrf.mxu1 }
 0x6d7   :  { %10721 = vst [vmem:[#allocation11 + $0xf0] sm:$0xff] %v10657_v57  ;;  %v10658_v61 = vmax.f32 %v10594_v22, 0.0  ;;  %v10597_v62 = vadd.f32 %v15626_v2, %v10511_v28  ;;  %v10512_v4 = vadd.f32 %v10441_v0, %v16450_v45  ;;  %v10443_v16 = vadd.f32 %v10442_v53, %v15658_v3  ;;  %v16452_v3 = vld [vmem:[#allocation59_spill] sm:$0xff]  ;;  %v16460_v22 = vld [vmem:[#allocation68_spill] sm:$0xff]  ;;  %v16463_v0 = vld [vmem:[#allocation114_spill] sm:$0xff]  ;;  %v10355_v49 = vpop.f32.mrf.mxu0 }
 0x6d8   :  { %v10444_v43 = vpop.f32.mrf.mxu1  ;;  %v5162_v19 = vadd.f32 %v16453_v41, %v16452_v3  ;;  %v16462_v28 = vld [vmem:[#allocation80_spill] sm:$0xff] }
 0x6d9   :  { %10722 = vst [vmem:[#allocation11 + $0xf8] sm:$0xff] %v10658_v61  ;;  %v10661_v50 = vmax.f32 %v10597_v62, 0.0  ;;  %v10598_v17 = vadd.f32 %v15638_v46, %v10512_v4  ;;  %v10515_v37 = vadd.f32 %v10443_v16, %v16451_v52  ;;  %v10445_v21 = vadd.f32 %v10444_v43, %v15667_v1  ;;  %v16465_v16 = vld [vmem:[#allocation128_spill] sm:$0xff] }
 0x6da   :  { %v10448_v35 = vpop.f32.mrf.mxu1  ;;  %v5275_v20 = vadd.f32 %v16457_v39, %v5162_v19  ;;  %v7843_v24 = vadd.f32 %v16463_v0, %v16462_v28 }
 0x6db   :  { %10725 = vst [vmem:[#allocation11 + $0x110] sm:$0xff] %v10661_v50  ;;  %v10662_v9 = vmax.f32 %v10598_v17, 0.0  ;;  %v10601_v34 = vadd.f32 %v15626_v2, %v10515_v37  ;;  %v10516_v36 = vadd.f32 %v10445_v21, %v7894_v63  ;;  %v10449_v6 = vadd.f32 %v10448_v35, %v15678_v59  ;;  %v16466_v17 = vld [vmem:[#allocation113_spill] sm:$0xff]  ;;  %v10357_v35 = vpop.f32.mrf.mxu0 }
 0x6dc   :  { %v10450_v11 = vpop.f32.mrf.mxu1  ;;  %v7902_v33 = vadd.f32 %v7833_v40, %v5275_v20 }
 0x6dd   :  { %10726 = vst [vmem:[#allocation11 + $0x118] sm:$0xff] %v10662_v9  ;;  %v10665_v47 = vmax.f32 %v10601_v34, 0.0  ;;  %v10602_v1 = vadd.f32 %v15638_v46, %v10516_v36  ;;  %v10519_v7 = vadd.f32 %v10449_v6, %v16456_v13  ;;  %v10451_v29 = vadd.f32 %v10450_v11, %v15687_v30  ;;  %v16467_v6 = vld [vmem:[#allocation115_spill] sm:$0xff]  ;;  %v16468_v11 = vld [vmem:[#allocation77_spill] sm:$0xff] }
 0x6de   :  { %v10452_v18 = vpop.f32.mrf.mxu1  ;;  %v16471_v13 = vld [vmem:[#allocation119_spill] sm:$0xff] }
 0x6df   :  { %10729 = vst [vmem:[#allocation11 + $0x130] sm:$0xff] %v10665_v47  ;;  %v10666_v59 = vmax.f32 %v10602_v1, 0.0  ;;  %v10605_v12 = vadd.f32 %v15626_v2, %v10519_v7  ;;  %v10520_v32 = vadd.f32 %v10451_v29, %v16458_v48  ;;  %v10453_v55 = vadd.f32 %v10452_v18, %v15698_v10  ;;  %v16461_v10 = vld [vmem:[#allocation73_spill] sm:$0xff]  ;;  %v16469_v47 = vld [vmem:[#allocation100_spill] sm:$0xff]  ;;  %v16470_v1 = vld [vmem:[#allocation46_spill] sm:$0xff]  ;;  %v10359_v29 = vpop.f32.mrf.mxu0 }
 0x6e0   :  { %v10454_v5 = vpop.f32.mrf.mxu1  ;;  %v5172_v60 = vadd.f32 %v16461_v10, %v16460_v22  ;;  %v7853_v7 = vadd.f32 %v16471_v13, %v16470_v1 }
 0x6e1   :  { %10730 = vst [vmem:[#allocation11 + $0x138] sm:$0xff] %v10666_v59  ;;  %v10669_v38 = vmax.f32 %v10605_v12, 0.0  ;;  %v10606_v58 = vadd.f32 %v15638_v46, %v10520_v32  ;;  %v10523_v30 = vadd.f32 %v10453_v55, %v16459_v25  ;;  %v10455_v23 = vadd.f32 %v10454_v5, %v15707_v42  ;;  %v16464_v42 = vld [vmem:[#allocation111_spill] sm:$0xff]  ;;  %v16472_v59 = vld [vmem:[#allocation117_spill] sm:$0xff]  ;;  %v16473_v32 = vld [vmem:[#allocation132_spill] sm:$0xff] }
 0x6e2   :  { %v10458_v51 = vpop.f32.mrf.mxu1  ;;  %v5285_v63 = vadd.f32 %v16465_v16, %v5172_v60 }
 0x6e3   :  { %10733 = vst [vmem:[#allocation11 + $0x150] sm:$0xff] %v10669_v38  ;;  %v10670_v8 = vmax.f32 %v10606_v58, 0.0  ;;  %v10609_v26 = vadd.f32 %v15626_v2, %v10523_v30  ;;  %v10524_v44 = vadd.f32 %v10455_v23, %v7902_v33  ;;  %v10459_v57 = vadd.f32 %v10458_v51, %v10345_v31  ;;  %v16474_v38 = vld [vmem:[#allocation118_spill] sm:$0xff]  ;;  %v10361_v23 = vpop.f32.mrf.mxu0 }
 0x6e4   :  { %v10460_v53 = vpop.f32.mrf.mxu1  ;;  %v7910_v21 = vadd.f32 %v7843_v24, %v5285_v63 }
 0x6e5   :  { %10734 = vst [vmem:[#allocation11 + $0x158] sm:$0xff] %v10670_v8  ;;  %v10673_v61 = vmax.f32 %v10609_v26, 0.0  ;;  %v10610_v62 = vadd.f32 %v15638_v46, %v10524_v44  ;;  %v10527_v45 = vadd.f32 %v10459_v57, %v16464_v42  ;;  %v10461_v4 = vadd.f32 %v10460_v53, %v10347_v14  ;;  %v16475_v44 = vld [vmem:[#allocation121_spill] sm:$0xff] }
 0x6e6   :  { %v10462_v43 = vpop.f32.mrf.mxu1 }
 0x6e7   :  { %10737 = vst [vmem:[#allocation11 + $0x170] sm:$0xff] %v10673_v61  ;;  %v10674_v31 = vmax.f32 %v10610_v62, 0.0  ;;  %v10613_v50 = vadd.f32 %v15626_v2, %v10527_v45  ;;  %v10528_v52 = vadd.f32 %v10461_v4, %v16466_v17  ;;  %v10463_v37 = vadd.f32 %v10462_v43, %v10349_v56 }
 0x6e8   :  { %v10464_v9 = vpop.f32.mrf.mxu1  ;;  %v5182_v56 = vadd.f32 %v16469_v47, %v16468_v11 }
 0x6e9   :  { %10738 = vst [vmem:[#allocation11 + $0x178] sm:$0xff] %v10674_v31  ;;  %v10677_v34 = vmax.f32 %v10613_v50, 0.0  ;;  %v10614_v36 = vadd.f32 %v15638_v46, %v10528_v52  ;;  %v10531_v3 = vadd.f32 %v10463_v37, %v16467_v6  ;;  %v10465_v14 = vadd.f32 %v10464_v9, %v10351_v15 }
 0x6ea   :  { %v10468_v41 = vpop.f32.mrf.mxu1  ;;  %v5295_v55 = vadd.f32 %v16473_v32, %v5182_v56 }
 0x6eb   :  { %10741 = vst [vmem:[#allocation11 + $0x190] sm:$0xff] %v10677_v34  ;;  %v10678_v19 = vmax.f32 %v10614_v36, 0.0  ;;  %v10617_v27 = vadd.f32 %v15626_v2, %v10531_v3  ;;  %v10532_v54 = vadd.f32 %v10465_v14, %v7910_v21  ;;  %v10469_v40 = vadd.f32 %v10468_v41, %v10355_v49 }
 0x6ec   :  { %v10470_v39 = vpop.f32.mrf.mxu1  ;;  %v7918_v30 = vadd.f32 %v7853_v7, %v5295_v55 }
 0x6ed   :  { %10742 = vst [vmem:[#allocation11 + $0x198] sm:$0xff] %v10678_v19  ;;  %v10681_v20 = vmax.f32 %v10617_v27, 0.0  ;;  %v10618_v18 = vadd.f32 %v15638_v46, %v10532_v54  ;;  %v10535_v12 = vadd.f32 %v10469_v40, %v16472_v59  ;;  %v10471_v48 = vadd.f32 %v10470_v39, %v10357_v35 }
 0x6ee   :  { %v10472_v33 = vpop.f32.mrf.mxu1 }
 0x6ef   :  { %10745 = vst [vmem:[#allocation11 + $0x1b0] sm:$0xff] %v10681_v20  ;;  %v10682_v15 = vmax.f32 %v10618_v18, 0.0  ;;  %v10621_v5 = vadd.f32 %v15626_v2, %v10535_v12  ;;  %v10536_v58 = vadd.f32 %v10471_v48, %v16474_v38  ;;  %v10473_v25 = vadd.f32 %v10472_v33, %v10359_v29 }
 0x6f0   :  { %v10474_v51 = vpop.f32.mrf.mxu1 }
 0x6f1   :  { %10746 = vst [vmem:[#allocation11 + $0x1b8] sm:$0xff] %v10682_v15  ;;  %v10685_v8 = vmax.f32 %v10621_v5, 0.0  ;;  %v10622_v26 = vadd.f32 %v15638_v46, %v10536_v58  ;;  %v10539_v57 = vadd.f32 %v10473_v25, %v16475_v44  ;;  %v10475_v22 = vadd.f32 %v10474_v51, %v10361_v23 }
 0x6f3   :  { %10749 = vst [vmem:[#allocation11 + $0x1d0] sm:$0xff] %v10685_v8  ;;  %v10686_v10 = vmax.f32 %v10622_v26, 0.0  ;;  %v10625_v60 = vadd.f32 %v15626_v2, %v10539_v57  ;;  %v10540_v28 = vadd.f32 %v10475_v22, %v7918_v30 }
 0x6f5   :  { %10750 = vst [vmem:[#allocation11 + $0x1d8] sm:$0xff] %v10686_v10  ;;  %v10689_v0 = vmax.f32 %v10625_v60, 0.0  ;;  %v10626_v24 = vadd.f32 %v15638_v46, %v10540_v28 }
 0x6f7   :  { %10753 = vst [vmem:[#allocation11 + $0x1f0] sm:$0xff] %v10689_v0  ;;  %v10690_v49 = vmax.f32 %v10626_v24, 0.0 }
 0x6f9   :  { %10754 = vst [vmem:[#allocation11 + $0x1f8] sm:$0xff] %v10690_v49 }
 0x6fa   :  { %12689 = shalt.err (!%p12686_p1)
}
 0x6fb   :  { %10766 = dma.vmem_to_hbm [thread:$0]  %s10761_s4, 8192, %s15781_s5, [#allocation4], %s12713_s9, %s12713_s9, %s12714_s10  }
 0x6fc   :  { %12704 = dma.done.wait [#allocation4], 8192  }
 0x6fd   :  { %12705 = vsyncadd [#allocation4], 4294959104 }
 0x6fe   :  { %10770 = vsyncpa [#allocation3], 1 }
 0x6ff   :  { %10771 = vsyncpa [#allocation6], 1 }
 0x700   :  { %10772 = vsyncpa [#allocation9], 1 }
 0x701   :  { %10773 = vsyncpa [#allocation4], 1 }

</bundles_post_ra>
